<compile_context>
chip_gen: v7x
topology: tpu7x:2x2x1
jax: 0.10.0
libtpu: 0.0.40
codegen_flags: <defaults>
</compile_context>

<pallas_src>
import math
import functools

import jax
import jax.numpy as jnp
from jax.experimental import pallas as pl
from jax.experimental.pallas import tpu as pltpu


# ----------------------------------------------------------------------------
# Small helpers
# ----------------------------------------------------------------------------
def _layer_norm(x, gamma, beta, eps=1e-5):
    mean = jnp.mean(x, axis=-1, keepdims=True)
    var = jnp.mean((x - mean) ** 2, axis=-1, keepdims=True)
    return (x - mean) * jax.lax.rsqrt(var + eps) * gamma + beta


# ----------------------------------------------------------------------------
# Fused CVAE kernel (single invocation, no grid):
#   prologue (recog net + reparameterize + decoder_input_fc)
#   -> static loop over 6 transformer encoder layers (post-LN, ReLU FFN, eval)
#   -> fc_out vocab projection.
# All weights resident in VMEM (bf16 for the big matmul weights).
# ----------------------------------------------------------------------------
def cvae_fused_kernel(hs_ref, eps_ref,
                      rw1_ref, rb1_ref, rwmu_ref, rbmu_ref, rwlv_ref, rblv_ref,
                      dw_ref, db_ref,
                      hp_ref, hpt_ref,
                      wqkv_ref, bqkv_ref, wo_ref, bo_ref,
                      g1_ref, be1_ref, g2_ref, be2_ref,
                      f1w_ref, f1b_ref, f2w_ref, f2b_ref,
                      vw_ref, vb_ref,
                      mu_ref, logvar_ref, logits_ref,
                      *, num_heads, head_dim, num_layers):
    H = hp_ref.shape[0]
    NH = num_heads
    scale = 1.0 / math.sqrt(head_dim)

    # ---- prologue: mean-pool -> recognition net -> reparameterize -> dec_in --
    ve = jnp.mean(hs_ref[...], axis=1)                                      # (B, H)
    h = jnp.maximum(
        jnp.dot(ve, rw1_ref[...], preferred_element_type=jnp.float32)
        + rb1_ref[...], 0.0)
    mu = (jnp.dot(h, rwmu_ref[...], preferred_element_type=jnp.float32)
          + rbmu_ref[...])
    logvar = (jnp.dot(h, rwlv_ref[...], preferred_element_type=jnp.float32)
              + rblv_ref[...])
    z = mu + eps_ref[...] * jnp.exp(0.5 * logvar)
    x = (jnp.dot(z, dw_ref[...], preferred_element_type=jnp.float32)
         + db_ref[...])                                                     # (B, H)
    mu_ref[...] = mu
    logvar_ref[...] = logvar

    hp = hp_ref[...]     # (H, NH)  0/1 head indicator (pools lanes per head)
    hpt = hpt_ref[...]   # (NH, H)
    L = x.shape[0]       # attention length == original batch (batch_first=False)

    # ---- 6 x nn.TransformerEncoderLayer over the (L, H) slab ----------------
    for l in range(num_layers):                 # static unroll; static ref index
        xb = x.astype(jnp.bfloat16)             # hoisted activation cast

        # Fused QKV projection: one bf16 MXU push, 3H-lane output.
        qkv = (jnp.dot(xb, wqkv_ref[l], preferred_element_type=jnp.float32)
               + bqkv_ref[l])                                               # (L, 3H)
        q = qkv[:, 0:H]
        k = qkv[:, H:2 * H]
        v = qkv[:, 2 * H:3 * H]

        # Vectorized multi-head attention via the head-indicator matmul:
        #   s[i, j, n] = sum_{d in head n} q[i, d] * k[j, d]
        prod = q[:, None, :] * k[None, :, :]                               # (L, L, H)
        s2 = jnp.dot(prod.reshape(L * L, H), hp,
                     preferred_element_type=jnp.float32) * scale           # (L*L, NH)
        # Per-head column max is constant within each softmax group, so this
        # shift is exact (pure numerical stabilization).
        s2 = s2 - jnp.max(s2, axis=0, keepdims=True)
        p3 = jnp.exp(s2).reshape(L, L, NH)
        denom = jnp.sum(p3, axis=1, keepdims=True)                         # (L, 1, NH)
        attn = p3 / denom                                                  # exact softmax
        a_exp = jnp.dot(attn.reshape(L * L, NH), hpt,
                        preferred_element_type=jnp.float32).reshape(L, L, H)
        ctx = jnp.sum(a_exp * v[None, :, :], axis=1)                       # (L, H)

        attn_out = (jnp.dot(ctx.astype(jnp.bfloat16), wo_ref[l],
                            preferred_element_type=jnp.float32) + bo_ref[l])
        x1 = _layer_norm(x + attn_out, g1_ref[l], be1_ref[l])

        ff = jnp.maximum(
            jnp.dot(x1.astype(jnp.bfloat16), f1w_ref[l],
                    preferred_element_type=jnp.float32) + f1b_ref[l], 0.0)  # (L, DFF)
        ff = (jnp.dot(ff.astype(jnp.bfloat16), f2w_ref[l],
                      preferred_element_type=jnp.float32) + f2b_ref[l])
        x = _layer_norm(x1 + ff, g2_ref[l], be2_ref[l])

    # ---- epilogue: fc_out vocab projection (lane-dense, V multiple of 128) --
    logits_ref[...] = (jnp.dot(x.astype(jnp.bfloat16), vw_ref[...],
                               preferred_element_type=jnp.float32) + vb_ref[...])


# ----------------------------------------------------------------------------
# Jitted forward wrapper
# ----------------------------------------------------------------------------
@functools.partial(jax.jit,
                   static_argnames=("sequence_length", "num_heads", "num_layers"))
def cvae_forward(encoder_hidden_states, eps, params, *,
                 sequence_length, num_heads, num_layers):
    """
    encoder_hidden_states: (B, S_in, H) — stands in for BertModel last_hidden_state.
    eps:                   (B, latent)  — reparameterization noise (torch.randn_like).
    Returns (mu, logvar, generative_logits) with generative_logits (B, S, V).
    """
    B, _, H = encoder_hidden_states.shape
    LAT = eps.shape[1]
    V = params["fc_out_w"].shape[1]
    head_dim = H // num_heads
    lw = params["layers"]

    args = (encoder_hidden_states, eps,
            params["recog_fc1_w"], params["recog_fc1_b"],
            params["recog_mu_w"], params["recog_mu_b"],
            params["recog_lv_w"], params["recog_lv_b"],
            params["dec_in_w"], params["dec_in_b"],
            params["head_pool"], params["head_pool_t"],
            lw["wqkv"], lw["bqkv"], lw["wo"], lw["bo"],
            lw["ln1_g"], lw["ln1_b"], lw["ln2_g"], lw["ln2_b"],
            lw["ff1_w"], lw["ff1_b"], lw["ff2_w"], lw["ff2_b"],
            params["fc_out_w"], params["fc_out_b"])

    out_shape = (jax.ShapeDtypeStruct((B, LAT), jnp.float32),
                 jax.ShapeDtypeStruct((B, LAT), jnp.float32),
                 jax.ShapeDtypeStruct((B, V), jnp.float32))

    # No grid: every operand is a single whole-array VMEM block (total ~4 MiB),
    # so there is no per-step grid overhead and no per-layer DMA descriptors.
    mu, logvar, logits = pl.pallas_call(
        functools.partial(cvae_fused_kernel, num_heads=num_heads,
                          head_dim=head_dim, num_layers=num_layers),
        out_shape=out_shape,
        compiler_params=pltpu.CompilerParams(vmem_limit_bytes=32 * 1024 * 1024),
    )(*args)

    # h_dec is repeated across sequence_length with no positional encoding, so
    # every position of the transformer produces identical outputs; the stack
    # ran once on the (B, H) slab and the logits are broadcast to (B, S, V)
    # here (matches the reference up to bf16 matmul rounding).
    generative_logits = jnp.broadcast_to(logits[:, None, :],
                                         (B, sequence_length, V))
    return mu, logvar, generative_logits


# ----------------------------------------------------------------------------
# Parameter init (deterministic, synthetic).  Big matmul weights are stored as
# bf16 (MXU-native); per-layer tensors are pre-stacked on a leading layer axis
# and QKV is pre-fused into a single (num_layers, H, 3H) weight.
# ----------------------------------------------------------------------------
def init_params(key, H, LAT, V, dff, num_layers, num_heads):
    def dense(k, shape, scale=0.02, dtype=jnp.float32):
        return (jax.random.normal(k, shape, jnp.float32) * scale).astype(dtype)

    ks = jax.random.split(key, 6)
    p = {
        "recog_fc1_w": dense(ks[0], (H, H)),
        "recog_fc1_b": jnp.zeros((1, H), jnp.float32),
        "recog_mu_w": dense(ks[1], (H, LAT)),
        "recog_mu_b": jnp.zeros((1, LAT), jnp.float32),
        "recog_lv_w": dense(ks[2], (H, LAT)),
        "recog_lv_b": jnp.zeros((1, LAT), jnp.float32),
        "dec_in_w": dense(ks[3], (LAT, H)),
        "dec_in_b": jnp.zeros((1, H), jnp.float32),
        "fc_out_w": dense(ks[4], (H, V), dtype=jnp.bfloat16),
        "fc_out_b": jnp.zeros((1, V), jnp.float32),
    }
    # 0/1 head indicator: hp[d, h] = 1 iff feature lane d belongs to head h.
    head_dim = H // num_heads
    hp = (jnp.arange(H)[:, None] // head_dim
          == jnp.arange(num_heads)[None, :]).astype(jnp.float32)           # (H, NH)
    p["head_pool"] = hp
    p["head_pool_t"] = jnp.transpose(hp)                                   # (NH, H)

    names = ("wqkv", "bqkv", "wo", "bo", "ln1_g", "ln1_b", "ln2_g", "ln2_b",
             "ff1_w", "ff1_b", "ff2_w", "ff2_b")
    stacked = {n: [] for n in names}
    lkeys = jax.random.split(ks[5], num_layers)
    for l in range(num_layers):
        sub = jax.random.split(lkeys[l], 6)
        wq = dense(sub[0], (H, H))
        wk = dense(sub[1], (H, H))
        wv = dense(sub[2], (H, H))
        stacked["wqkv"].append(
            jnp.concatenate([wq, wk, wv], axis=1).astype(jnp.bfloat16))    # (H, 3H)
        stacked["bqkv"].append(jnp.zeros((1, 3 * H), jnp.float32))
        stacked["wo"].append(dense(sub[3], (H, H), dtype=jnp.bfloat16))
        stacked["bo"].append(jnp.zeros((1, H), jnp.float32))
        stacked["ln1_g"].append(jnp.ones((1, H), jnp.float32))
        stacked["ln1_b"].append(jnp.zeros((1, H), jnp.float32))
        stacked["ln2_g"].append(jnp.ones((1, H), jnp.float32))
        stacked["ln2_b"].append(jnp.zeros((1, H), jnp.float32))
        stacked["ff1_w"].append(dense(sub[4], (H, dff), dtype=jnp.bfloat16))
        stacked["ff1_b"].append(jnp.zeros((1, dff), jnp.float32))
        stacked["ff2_w"].append(dense(sub[5], (dff, H), dtype=jnp.bfloat16))
        stacked["ff2_b"].append(jnp.zeros((1, H), jnp.float32))
    p["layers"] = {n: jnp.stack(v, axis=0) for n, v in stacked.items()}
    return p


# ----------------------------------------------------------------------------
# Main
# ----------------------------------------------------------------------------
if __name__ == "__main__":
    B = 2            # batch
    S_IN = 8         # encoder (BERT) sequence length
    H = 64           # hidden_dim
    LAT = 32         # latent_dim
    V = 512          # vocab_size (synthetic small, multiple of 128)
    SEQ = 8          # generation sequence_length
    NUM_HEADS = 8    # nhead=8
    DFF = 2048       # nn.TransformerEncoderLayer default dim_feedforward
    NUM_LAYERS = 6   # num_layers=6

    key = jax.random.PRNGKey(0)
    k_hs, k_eps, k_par = jax.random.split(key, 3)
    encoder_hidden_states = jax.random.normal(k_hs, (B, S_IN, H), jnp.float32)
    eps = jax.random.normal(k_eps, (B, LAT), jnp.float32)
    params = init_params(k_par, H, LAT, V, DFF, NUM_LAYERS, NUM_HEADS)

    mu, logvar, logits = cvae_forward(encoder_hidden_states, eps, params,
                                      sequence_length=SEQ,
                                      num_heads=NUM_HEADS,
                                      num_layers=NUM_LAYERS)
    jax.block_until_ready((mu, logvar, logits))

    assert mu.shape == (B, LAT) and logvar.shape == (B, LAT)
    assert logits.shape == (B, SEQ, V)

    # argmax ids (pre-tokenizer step) computed in glue.
    # TODO(synk): tokenizer.decode / re-tokenize and the pretrained BERT
    # classifier branches (P_classified, P_gold, P_pred) are host/string ops
    # plus a pretrained model with no Pallas equivalent.
    ids = jnp.argmax(logits, axis=-1)
    jax.block_until_ready(ids)
    print("KERNEL_OK")
</pallas_src>

<mosaic_0001>
module attributes {stable_mosaic.version = 11 : i64} {
  func.func @cvae_fused_kernel(%arg0: memref<2x8x64xf32, #tpu.memory_space<vmem>>, %arg1: memref<2x32xf32, #tpu.memory_space<vmem>>, %arg2: memref<64x64xf32, #tpu.memory_space<vmem>>, %arg3: memref<1x64xf32, #tpu.memory_space<vmem>>, %arg4: memref<64x32xf32, #tpu.memory_space<vmem>>, %arg5: memref<1x32xf32, #tpu.memory_space<vmem>>, %arg6: memref<64x32xf32, #tpu.memory_space<vmem>>, %arg7: memref<1x32xf32, #tpu.memory_space<vmem>>, %arg8: memref<32x64xf32, #tpu.memory_space<vmem>>, %arg9: memref<1x64xf32, #tpu.memory_space<vmem>>, %arg10: memref<64x8xf32, #tpu.memory_space<vmem>>, %arg11: memref<8x64xf32, #tpu.memory_space<vmem>>, %arg12: memref<6x64x192xbf16, #tpu.memory_space<vmem>>, %arg13: memref<6x1x192xf32, #tpu.memory_space<vmem>>, %arg14: memref<6x64x64xbf16, #tpu.memory_space<vmem>>, %arg15: memref<6x1x64xf32, #tpu.memory_space<vmem>>, %arg16: memref<6x1x64xf32, #tpu.memory_space<vmem>>, %arg17: memref<6x1x64xf32, #tpu.memory_space<vmem>>, %arg18: memref<6x1x64xf32, #tpu.memory_space<vmem>>, %arg19: memref<6x1x64xf32, #tpu.memory_space<vmem>>, %arg20: memref<6x64x2048xbf16, #tpu.memory_space<vmem>>, %arg21: memref<6x1x2048xf32, #tpu.memory_space<vmem>>, %arg22: memref<6x2048x64xbf16, #tpu.memory_space<vmem>>, %arg23: memref<6x1x64xf32, #tpu.memory_space<vmem>>, %arg24: memref<64x512xbf16, #tpu.memory_space<vmem>>, %arg25: memref<1x512xf32, #tpu.memory_space<vmem>>, %arg26: memref<2x32xf32, #tpu.memory_space<vmem>>, %arg27: memref<2x32xf32, #tpu.memory_space<vmem>>, %arg28: memref<2x512xf32, #tpu.memory_space<vmem>>) attributes {dimension_semantics = [], scalar_prefetch = 0 : i64, scratch_operands = 0 : i64, tpu.core_type = #tpu.core_type<tc>} {
    %c0 = arith.constant 0 : index
    %c0_0 = arith.constant 0 : index
    %c0_1 = arith.constant 0 : index
    %0 = vector.load %arg0[%c0, %c0_0, %c0_1] : memref<2x8x64xf32, #tpu.memory_space<vmem>>, vector<2x8x64xf32>
    %cst = arith.constant dense<0.000000e+00> : vector<2x64xf32>
    %1 = vector.multi_reduction <add>, %0, %cst [1] : vector<2x8x64xf32> to vector<2x64xf32>
    %cst_2 = arith.constant 8.000000e+00 : f32
    %2 = vector.broadcast %cst_2 : f32 to vector<2x64xf32>
    %3 = arith.divf %1, %2 : vector<2x64xf32>
    %c0_3 = arith.constant 0 : index
    %c0_4 = arith.constant 0 : index
    %4 = vector.load %arg2[%c0_3, %c0_4] : memref<64x64xf32, #tpu.memory_space<vmem>>, vector<64x64xf32>
    %cst_5 = arith.constant dense<0.000000e+00> : vector<2x64xf32>
    %5 = tpu.matmul %3, %4, %cst_5 {dimension_numbers = #tpu.dot_dimension_numbers<[1], [0], [0], [1], [0, 0, 1, 1], [], []>} : vector<2x64xf32>, vector<64x64xf32>, vector<2x64xf32> -> vector<2x64xf32>
    %c0_6 = arith.constant 0 : index
    %c0_7 = arith.constant 0 : index
    %6 = vector.load %arg3[%c0_6, %c0_7] : memref<1x64xf32, #tpu.memory_space<vmem>>, vector<1x64xf32>
    %7 = vector.broadcast %6 : vector<1x64xf32> to vector<2x64xf32>
    %8 = arith.addf %5, %7 : vector<2x64xf32>
    %cst_8 = arith.constant 0.000000e+00 : f32
    %9 = vector.broadcast %cst_8 : f32 to vector<2x64xf32>
    %10 = arith.maximumf %8, %9 : vector<2x64xf32>
    %c0_9 = arith.constant 0 : index
    %c0_10 = arith.constant 0 : index
    %11 = vector.load %arg4[%c0_9, %c0_10] : memref<64x32xf32, #tpu.memory_space<vmem>>, vector<64x32xf32>
    %cst_11 = arith.constant dense<0.000000e+00> : vector<2x32xf32>
    %12 = tpu.matmul %10, %11, %cst_11 {dimension_numbers = #tpu.dot_dimension_numbers<[1], [0], [0], [1], [0, 0, 1, 1], [], []>} : vector<2x64xf32>, vector<64x32xf32>, vector<2x32xf32> -> vector<2x32xf32>
    %c0_12 = arith.constant 0 : index
    %c0_13 = arith.constant 0 : index
    %13 = vector.load %arg5[%c0_12, %c0_13] : memref<1x32xf32, #tpu.memory_space<vmem>>, vector<1x32xf32>
    %14 = vector.broadcast %13 : vector<1x32xf32> to vector<2x32xf32>
    %15 = arith.addf %12, %14 : vector<2x32xf32>
    %c0_14 = arith.constant 0 : index
    %c0_15 = arith.constant 0 : index
    %16 = vector.load %arg6[%c0_14, %c0_15] : memref<64x32xf32, #tpu.memory_space<vmem>>, vector<64x32xf32>
    %cst_16 = arith.constant dense<0.000000e+00> : vector<2x32xf32>
    %17 = tpu.matmul %10, %16, %cst_16 {dimension_numbers = #tpu.dot_dimension_numbers<[1], [0], [0], [1], [0, 0, 1, 1], [], []>} : vector<2x64xf32>, vector<64x32xf32>, vector<2x32xf32> -> vector<2x32xf32>
    %c0_17 = arith.constant 0 : index
    %c0_18 = arith.constant 0 : index
    %18 = vector.load %arg7[%c0_17, %c0_18] : memref<1x32xf32, #tpu.memory_space<vmem>>, vector<1x32xf32>
    %19 = vector.broadcast %18 : vector<1x32xf32> to vector<2x32xf32>
    %20 = arith.addf %17, %19 : vector<2x32xf32>
    %c0_19 = arith.constant 0 : index
    %c0_20 = arith.constant 0 : index
    %21 = vector.load %arg1[%c0_19, %c0_20] : memref<2x32xf32, #tpu.memory_space<vmem>>, vector<2x32xf32>
    %cst_21 = arith.constant 5.000000e-01 : f32
    %22 = vector.broadcast %cst_21 : f32 to vector<2x32xf32>
    %23 = arith.mulf %22, %20 : vector<2x32xf32>
    %24 = math.exp %23 : vector<2x32xf32>
    %25 = arith.mulf %21, %24 : vector<2x32xf32>
    %26 = arith.addf %15, %25 : vector<2x32xf32>
    %c0_22 = arith.constant 0 : index
    %c0_23 = arith.constant 0 : index
    %27 = vector.load %arg8[%c0_22, %c0_23] : memref<32x64xf32, #tpu.memory_space<vmem>>, vector<32x64xf32>
    %cst_24 = arith.constant dense<0.000000e+00> : vector<2x64xf32>
    %28 = tpu.matmul %26, %27, %cst_24 {dimension_numbers = #tpu.dot_dimension_numbers<[1], [0], [0], [1], [0, 0, 1, 1], [], []>} : vector<2x32xf32>, vector<32x64xf32>, vector<2x64xf32> -> vector<2x64xf32>
    %c0_25 = arith.constant 0 : index
    %c0_26 = arith.constant 0 : index
    %29 = vector.load %arg9[%c0_25, %c0_26] : memref<1x64xf32, #tpu.memory_space<vmem>>, vector<1x64xf32>
    %30 = vector.broadcast %29 : vector<1x64xf32> to vector<2x64xf32>
    %31 = arith.addf %28, %30 : vector<2x64xf32>
    %c0_27 = arith.constant 0 : index
    %c0_28 = arith.constant 0 : index
    %32 = vector.load %arg26[%c0_27, %c0_28] : memref<2x32xf32, #tpu.memory_space<vmem>>, vector<2x32xf32>
    tpu.vector_store %arg26[%c0_27, %c0_28], %15 {strides = array<i32>} : memref<2x32xf32, #tpu.memory_space<vmem>>, vector<2x32xf32>,
    %c0_29 = arith.constant 0 : index
    %c0_30 = arith.constant 0 : index
    %33 = vector.load %arg27[%c0_29, %c0_30] : memref<2x32xf32, #tpu.memory_space<vmem>>, vector<2x32xf32>
    tpu.vector_store %arg27[%c0_29, %c0_30], %20 {strides = array<i32>} : memref<2x32xf32, #tpu.memory_space<vmem>>, vector<2x32xf32>,
    %c0_31 = arith.constant 0 : index
    %c0_32 = arith.constant 0 : index
    %34 = vector.load %arg10[%c0_31, %c0_32] : memref<64x8xf32, #tpu.memory_space<vmem>>, vector<64x8xf32>
    %c0_33 = arith.constant 0 : index
    %c0_34 = arith.constant 0 : index
    %35 = vector.load %arg11[%c0_33, %c0_34] : memref<8x64xf32, #tpu.memory_space<vmem>>, vector<8x64xf32>
    %36 = arith.truncf %31 : vector<2x64xf32> to vector<2x64xbf16>
    %c0_35 = arith.constant 0 : index
    %c0_36 = arith.constant 0 : index
    %c0_37 = arith.constant 0 : index
    %37 = vector.load %arg12[%c0_35, %c0_36, %c0_37] : memref<6x64x192xbf16, #tpu.memory_space<vmem>>, vector<1x64x192xbf16>
    %38 = vector.shape_cast %37 : vector<1x64x192xbf16> to vector<64x192xbf16>
    %cst_38 = arith.constant dense<0.000000e+00> : vector<2x192xf32>
    %39 = tpu.matmul %36, %38, %cst_38 {dimension_numbers = #tpu.dot_dimension_numbers<[1], [0], [0], [1], [0, 0, 1, 1], [], []>} : vector<2x64xbf16>, vector<64x192xbf16>, vector<2x192xf32> -> vector<2x192xf32>
    %c0_39 = arith.constant 0 : index
    %c0_40 = arith.constant 0 : index
    %c0_41 = arith.constant 0 : index
    %40 = vector.load %arg13[%c0_39, %c0_40, %c0_41] : memref<6x1x192xf32, #tpu.memory_space<vmem>>, vector<1x1x192xf32>
    %41 = vector.shape_cast %40 : vector<1x1x192xf32> to vector<1x192xf32>
    %42 = vector.broadcast %41 : vector<1x192xf32> to vector<2x192xf32>
    %43 = arith.addf %39, %42 : vector<2x192xf32>
    %44 = vector.extract_strided_slice %43 {offsets = [0, 0], sizes = [2, 64], strides = [1, 1]} : vector<2x192xf32> to vector<2x64xf32>
    %45 = vector.extract_strided_slice %43 {offsets = [0, 64], sizes = [2, 64], strides = [1, 1]} : vector<2x192xf32> to vector<2x64xf32>
    %46 = vector.extract_strided_slice %43 {offsets = [0, 128], sizes = [2, 64], strides = [1, 1]} : vector<2x192xf32> to vector<2x64xf32>
    %47 = vector.shape_cast %44 : vector<2x64xf32> to vector<2x1x64xf32>
    %48 = vector.shape_cast %45 : vector<2x64xf32> to vector<1x2x64xf32>
    %49 = vector.broadcast %47 : vector<2x1x64xf32> to vector<2x2x64xf32>
    %50 = vector.broadcast %48 : vector<1x2x64xf32> to vector<2x2x64xf32>
    %51 = arith.mulf %49, %50 : vector<2x2x64xf32>
    %52 = vector.shape_cast %51 : vector<2x2x64xf32> to vector<4x64xf32>
    %cst_42 = arith.constant dense<0.000000e+00> : vector<4x8xf32>
    %53 = tpu.matmul %52, %34, %cst_42 {dimension_numbers = #tpu.dot_dimension_numbers<[1], [0], [0], [1], [0, 0, 1, 1], [], []>} : vector<4x64xf32>, vector<64x8xf32>, vector<4x8xf32> -> vector<4x8xf32>
    %cst_43 = arith.constant 0.353553385 : f32
    %54 = vector.broadcast %cst_43 : f32 to vector<4x8xf32>
    %55 = arith.mulf %53, %54 : vector<4x8xf32>
    %cst_44 = arith.constant dense<0xFF800000> : vector<8xf32>
    %56 = vector.multi_reduction <maximumf>, %55, %cst_44 [0] : vector<4x8xf32> to vector<8xf32>
    %57 = vector.shape_cast %56 : vector<8xf32> to vector<1x8xf32>
    %58 = vector.broadcast %57 : vector<1x8xf32> to vector<4x8xf32>
    %59 = arith.subf %55, %58 : vector<4x8xf32>
    %60 = math.exp %59 : vector<4x8xf32>
    %61 = vector.shape_cast %60 : vector<4x8xf32> to vector<2x2x8xf32>
    %cst_45 = arith.constant dense<0.000000e+00> : vector<2x8xf32>
    %62 = vector.multi_reduction <add>, %61, %cst_45 [1] : vector<2x2x8xf32> to vector<2x8xf32>
    %63 = vector.shape_cast %62 : vector<2x8xf32> to vector<2x1x8xf32>
    %64 = vector.broadcast %63 : vector<2x1x8xf32> to vector<2x2x8xf32>
    %65 = arith.divf %61, %64 : vector<2x2x8xf32>
    %66 = vector.shape_cast %65 : vector<2x2x8xf32> to vector<4x8xf32>
    %cst_46 = arith.constant dense<0.000000e+00> : vector<4x64xf32>
    %67 = tpu.matmul %66, %35, %cst_46 {dimension_numbers = #tpu.dot_dimension_numbers<[1], [0], [0], [1], [0, 0, 1, 1], [], []>} : vector<4x8xf32>, vector<8x64xf32>, vector<4x64xf32> -> vector<4x64xf32>
    %68 = vector.shape_cast %67 : vector<4x64xf32> to vector<2x2x64xf32>
    %69 = vector.shape_cast %46 : vector<2x64xf32> to vector<1x2x64xf32>
    %70 = vector.broadcast %69 : vector<1x2x64xf32> to vector<2x2x64xf32>
    %71 = arith.mulf %68, %70 : vector<2x2x64xf32>
    %cst_47 = arith.constant dense<0.000000e+00> : vector<2x64xf32>
    %72 = vector.multi_reduction <add>, %71, %cst_47 [1] : vector<2x2x64xf32> to vector<2x64xf32>
    %73 = arith.truncf %72 : vector<2x64xf32> to vector<2x64xbf16>
    %c0_48 = arith.constant 0 : index
    %c0_49 = arith.constant 0 : index
    %c0_50 = arith.constant 0 : index
    %74 = vector.load %arg14[%c0_48, %c0_49, %c0_50] : memref<6x64x64xbf16, #tpu.memory_space<vmem>>, vector<1x64x64xbf16>
    %75 = vector.shape_cast %74 : vector<1x64x64xbf16> to vector<64x64xbf16>
    %cst_51 = arith.constant dense<0.000000e+00> : vector<2x64xf32>
    %76 = tpu.matmul %73, %75, %cst_51 {dimension_numbers = #tpu.dot_dimension_numbers<[1], [0], [0], [1], [0, 0, 1, 1], [], []>} : vector<2x64xbf16>, vector<64x64xbf16>, vector<2x64xf32> -> vector<2x64xf32>
    %c0_52 = arith.constant 0 : index
    %c0_53 = arith.constant 0 : index
    %c0_54 = arith.constant 0 : index
    %77 = vector.load %arg15[%c0_52, %c0_53, %c0_54] : memref<6x1x64xf32, #tpu.memory_space<vmem>>, vector<1x1x64xf32>
    %78 = vector.shape_cast %77 : vector<1x1x64xf32> to vector<1x64xf32>
    %79 = vector.broadcast %78 : vector<1x64xf32> to vector<2x64xf32>
    %80 = arith.addf %76, %79 : vector<2x64xf32>
    %81 = arith.addf %31, %80 : vector<2x64xf32>
    %c0_55 = arith.constant 0 : index
    %c0_56 = arith.constant 0 : index
    %c0_57 = arith.constant 0 : index
    %82 = vector.load %arg16[%c0_55, %c0_56, %c0_57] : memref<6x1x64xf32, #tpu.memory_space<vmem>>, vector<1x1x64xf32>
    %83 = vector.shape_cast %82 : vector<1x1x64xf32> to vector<1x64xf32>
    %c0_58 = arith.constant 0 : index
    %c0_59 = arith.constant 0 : index
    %c0_60 = arith.constant 0 : index
    %84 = vector.load %arg17[%c0_58, %c0_59, %c0_60] : memref<6x1x64xf32, #tpu.memory_space<vmem>>, vector<1x1x64xf32>
    %85 = vector.shape_cast %84 : vector<1x1x64xf32> to vector<1x64xf32>
    %cst_61 = arith.constant dense<0.000000e+00> : vector<2xf32>
    %86 = vector.multi_reduction <add>, %81, %cst_61 [1] : vector<2x64xf32> to vector<2xf32>
    %87 = vector.shape_cast %86 : vector<2xf32> to vector<2x1xf32>
    %cst_62 = arith.constant 6.400000e+01 : f32
    %88 = vector.broadcast %cst_62 : f32 to vector<2x1xf32>
    %89 = arith.divf %87, %88 : vector<2x1xf32>
    %90 = vector.broadcast %89 : vector<2x1xf32> to vector<2x64xf32>
    %91 = arith.subf %81, %90 : vector<2x64xf32>
    %92 = arith.mulf %91, %91 : vector<2x64xf32>
    %cst_63 = arith.constant dense<0.000000e+00> : vector<2xf32>
    %93 = vector.multi_reduction <add>, %92, %cst_63 [1] : vector<2x64xf32> to vector<2xf32>
    %94 = vector.shape_cast %93 : vector<2xf32> to vector<2x1xf32>
    %cst_64 = arith.constant 6.400000e+01 : f32
    %95 = vector.broadcast %cst_64 : f32 to vector<2x1xf32>
    %96 = arith.divf %94, %95 : vector<2x1xf32>
    %97 = vector.broadcast %89 : vector<2x1xf32> to vector<2x64xf32>
    %98 = arith.subf %81, %97 : vector<2x64xf32>
    %cst_65 = arith.constant 9.99999974E-6 : f32
    %99 = vector.broadcast %cst_65 : f32 to vector<2x1xf32>
    %100 = arith.addf %96, %99 : vector<2x1xf32>
    %101 = math.rsqrt %100 : vector<2x1xf32>
    %102 = vector.broadcast %101 : vector<2x1xf32> to vector<2x64xf32>
    %103 = arith.mulf %98, %102 : vector<2x64xf32>
    %104 = vector.broadcast %83 : vector<1x64xf32> to vector<2x64xf32>
    %105 = arith.mulf %103, %104 : vector<2x64xf32>
    %106 = vector.broadcast %85 : vector<1x64xf32> to vector<2x64xf32>
    %107 = arith.addf %105, %106 : vector<2x64xf32>
    %108 = arith.truncf %107 : vector<2x64xf32> to vector<2x64xbf16>
    %c0_66 = arith.constant 0 : index
    %c0_67 = arith.constant 0 : index
    %c0_68 = arith.constant 0 : index
    %109 = vector.load %arg20[%c0_66, %c0_67, %c0_68] : memref<6x64x2048xbf16, #tpu.memory_space<vmem>>, vector<1x64x2048xbf16>
    %110 = vector.shape_cast %109 : vector<1x64x2048xbf16> to vector<64x2048xbf16>
    %cst_69 = arith.constant dense<0.000000e+00> : vector<2x2048xf32>
    %111 = tpu.matmul %108, %110, %cst_69 {dimension_numbers = #tpu.dot_dimension_numbers<[1], [0], [0], [1], [0, 0, 1, 1], [], []>} : vector<2x64xbf16>, vector<64x2048xbf16>, vector<2x2048xf32> -> vector<2x2048xf32>
    %c0_70 = arith.constant 0 : index
    %c0_71 = arith.constant 0 : index
    %c0_72 = arith.constant 0 : index
    %112 = vector.load %arg21[%c0_70, %c0_71, %c0_72] : memref<6x1x2048xf32, #tpu.memory_space<vmem>>, vector<1x1x2048xf32>
    %113 = vector.shape_cast %112 : vector<1x1x2048xf32> to vector<1x2048xf32>
    %114 = vector.broadcast %113 : vector<1x2048xf32> to vector<2x2048xf32>
    %115 = arith.addf %111, %114 : vector<2x2048xf32>
    %cst_73 = arith.constant 0.000000e+00 : f32
    %116 = vector.broadcast %cst_73 : f32 to vector<2x2048xf32>
    %117 = arith.maximumf %115, %116 : vector<2x2048xf32>
    %118 = arith.truncf %117 : vector<2x2048xf32> to vector<2x2048xbf16>
    %c0_74 = arith.constant 0 : index
    %c0_75 = arith.constant 0 : index
    %c0_76 = arith.constant 0 : index
    %119 = vector.load %arg22[%c0_74, %c0_75, %c0_76] : memref<6x2048x64xbf16, #tpu.memory_space<vmem>>, vector<1x2048x64xbf16>
    %120 = vector.shape_cast %119 : vector<1x2048x64xbf16> to vector<2048x64xbf16>
    %cst_77 = arith.constant dense<0.000000e+00> : vector<2x64xf32>
    %121 = tpu.matmul %118, %120, %cst_77 {dimension_numbers = #tpu.dot_dimension_numbers<[1], [0], [0], [1], [0, 0, 1, 1], [], []>} : vector<2x2048xbf16>, vector<2048x64xbf16>, vector<2x64xf32> -> vector<2x64xf32>
    %c0_78 = arith.constant 0 : index
    %c0_79 = arith.constant 0 : index
    %c0_80 = arith.constant 0 : index
    %122 = vector.load %arg23[%c0_78, %c0_79, %c0_80] : memref<6x1x64xf32, #tpu.memory_space<vmem>>, vector<1x1x64xf32>
    %123 = vector.shape_cast %122 : vector<1x1x64xf32> to vector<1x64xf32>
    %124 = vector.broadcast %123 : vector<1x64xf32> to vector<2x64xf32>
    %125 = arith.addf %121, %124 : vector<2x64xf32>
    %126 = arith.addf %107, %125 : vector<2x64xf32>
    %c0_81 = arith.constant 0 : index
    %c0_82 = arith.constant 0 : index
    %c0_83 = arith.constant 0 : index
    %127 = vector.load %arg18[%c0_81, %c0_82, %c0_83] : memref<6x1x64xf32, #tpu.memory_space<vmem>>, vector<1x1x64xf32>
    %128 = vector.shape_cast %127 : vector<1x1x64xf32> to vector<1x64xf32>
    %c0_84 = arith.constant 0 : index
    %c0_85 = arith.constant 0 : index
    %c0_86 = arith.constant 0 : index
    %129 = vector.load %arg19[%c0_84, %c0_85, %c0_86] : memref<6x1x64xf32, #tpu.memory_space<vmem>>, vector<1x1x64xf32>
    %130 = vector.shape_cast %129 : vector<1x1x64xf32> to vector<1x64xf32>
    %cst_87 = arith.constant dense<0.000000e+00> : vector<2xf32>
    %131 = vector.multi_reduction <add>, %126, %cst_87 [1] : vector<2x64xf32> to vector<2xf32>
    %132 = vector.shape_cast %131 : vector<2xf32> to vector<2x1xf32>
    %cst_88 = arith.constant 6.400000e+01 : f32
    %133 = vector.broadcast %cst_88 : f32 to vector<2x1xf32>
    %134 = arith.divf %132, %133 : vector<2x1xf32>
    %135 = vector.broadcast %134 : vector<2x1xf32> to vector<2x64xf32>
    %136 = arith.subf %126, %135 : vector<2x64xf32>
    %137 = arith.mulf %136, %136 : vector<2x64xf32>
    %cst_89 = arith.constant dense<0.000000e+00> : vector<2xf32>
    %138 = vector.multi_reduction <add>, %137, %cst_89 [1] : vector<2x64xf32> to vector<2xf32>
    %139 = vector.shape_cast %138 : vector<2xf32> to vector<2x1xf32>
    %cst_90 = arith.constant 6.400000e+01 : f32
    %140 = vector.broadcast %cst_90 : f32 to vector<2x1xf32>
    %141 = arith.divf %139, %140 : vector<2x1xf32>
    %142 = vector.broadcast %134 : vector<2x1xf32> to vector<2x64xf32>
    %143 = arith.subf %126, %142 : vector<2x64xf32>
    %cst_91 = arith.constant 9.99999974E-6 : f32
    %144 = vector.broadcast %cst_91 : f32 to vector<2x1xf32>
    %145 = arith.addf %141, %144 : vector<2x1xf32>
    %146 = math.rsqrt %145 : vector<2x1xf32>
    %147 = vector.broadcast %146 : vector<2x1xf32> to vector<2x64xf32>
    %148 = arith.mulf %143, %147 : vector<2x64xf32>
    %149 = vector.broadcast %128 : vector<1x64xf32> to vector<2x64xf32>
    %150 = arith.mulf %148, %149 : vector<2x64xf32>
    %151 = vector.broadcast %130 : vector<1x64xf32> to vector<2x64xf32>
    %152 = arith.addf %150, %151 : vector<2x64xf32>
    %153 = arith.truncf %152 : vector<2x64xf32> to vector<2x64xbf16>
    %c1 = arith.constant 1 : index
    %c0_92 = arith.constant 0 : index
    %c0_93 = arith.constant 0 : index
    %154 = vector.load %arg12[%c1, %c0_92, %c0_93] : memref<6x64x192xbf16, #tpu.memory_space<vmem>>, vector<1x64x192xbf16>
    %155 = vector.shape_cast %154 : vector<1x64x192xbf16> to vector<64x192xbf16>
    %cst_94 = arith.constant dense<0.000000e+00> : vector<2x192xf32>
    %156 = tpu.matmul %153, %155, %cst_94 {dimension_numbers = #tpu.dot_dimension_numbers<[1], [0], [0], [1], [0, 0, 1, 1], [], []>} : vector<2x64xbf16>, vector<64x192xbf16>, vector<2x192xf32> -> vector<2x192xf32>
    %c1_95 = arith.constant 1 : index
    %c0_96 = arith.constant 0 : index
    %c0_97 = arith.constant 0 : index
    %157 = vector.load %arg13[%c1_95, %c0_96, %c0_97] : memref<6x1x192xf32, #tpu.memory_space<vmem>>, vector<1x1x192xf32>
    %158 = vector.shape_cast %157 : vector<1x1x192xf32> to vector<1x192xf32>
    %159 = vector.broadcast %158 : vector<1x192xf32> to vector<2x192xf32>
    %160 = arith.addf %156, %159 : vector<2x192xf32>
    %161 = vector.extract_strided_slice %160 {offsets = [0, 0], sizes = [2, 64], strides = [1, 1]} : vector<2x192xf32> to vector<2x64xf32>
    %162 = vector.extract_strided_slice %160 {offsets = [0, 64], sizes = [2, 64], strides = [1, 1]} : vector<2x192xf32> to vector<2x64xf32>
    %163 = vector.extract_strided_slice %160 {offsets = [0, 128], sizes = [2, 64], strides = [1, 1]} : vector<2x192xf32> to vector<2x64xf32>
    %164 = vector.shape_cast %161 : vector<2x64xf32> to vector<2x1x64xf32>
    %165 = vector.shape_cast %162 : vector<2x64xf32> to vector<1x2x64xf32>
    %166 = vector.broadcast %164 : vector<2x1x64xf32> to vector<2x2x64xf32>
    %167 = vector.broadcast %165 : vector<1x2x64xf32> to vector<2x2x64xf32>
    %168 = arith.mulf %166, %167 : vector<2x2x64xf32>
    %169 = vector.shape_cast %168 : vector<2x2x64xf32> to vector<4x64xf32>
    %cst_98 = arith.constant dense<0.000000e+00> : vector<4x8xf32>
    %170 = tpu.matmul %169, %34, %cst_98 {dimension_numbers = #tpu.dot_dimension_numbers<[1], [0], [0], [1], [0, 0, 1, 1], [], []>} : vector<4x64xf32>, vector<64x8xf32>, vector<4x8xf32> -> vector<4x8xf32>
    %cst_99 = arith.constant 0.353553385 : f32
    %171 = vector.broadcast %cst_99 : f32 to vector<4x8xf32>
    %172 = arith.mulf %170, %171 : vector<4x8xf32>
    %cst_100 = arith.constant dense<0xFF800000> : vector<8xf32>
    %173 = vector.multi_reduction <maximumf>, %172, %cst_100 [0] : vector<4x8xf32> to vector<8xf32>
    %174 = vector.shape_cast %173 : vector<8xf32> to vector<1x8xf32>
    %175 = vector.broadcast %174 : vector<1x8xf32> to vector<4x8xf32>
    %176 = arith.subf %172, %175 : vector<4x8xf32>
    %177 = math.exp %176 : vector<4x8xf32>
    %178 = vector.shape_cast %177 : vector<4x8xf32> to vector<2x2x8xf32>
    %cst_101 = arith.constant dense<0.000000e+00> : vector<2x8xf32>
    %179 = vector.multi_reduction <add>, %178, %cst_101 [1] : vector<2x2x8xf32> to vector<2x8xf32>
    %180 = vector.shape_cast %179 : vector<2x8xf32> to vector<2x1x8xf32>
    %181 = vector.broadcast %180 : vector<2x1x8xf32> to vector<2x2x8xf32>
    %182 = arith.divf %178, %181 : vector<2x2x8xf32>
    %183 = vector.shape_cast %182 : vector<2x2x8xf32> to vector<4x8xf32>
    %cst_102 = arith.constant dense<0.000000e+00> : vector<4x64xf32>
    %184 = tpu.matmul %183, %35, %cst_102 {dimension_numbers = #tpu.dot_dimension_numbers<[1], [0], [0], [1], [0, 0, 1, 1], [], []>} : vector<4x8xf32>, vector<8x64xf32>, vector<4x64xf32> -> vector<4x64xf32>
    %185 = vector.shape_cast %184 : vector<4x64xf32> to vector<2x2x64xf32>
    %186 = vector.shape_cast %163 : vector<2x64xf32> to vector<1x2x64xf32>
    %187 = vector.broadcast %186 : vector<1x2x64xf32> to vector<2x2x64xf32>
    %188 = arith.mulf %185, %187 : vector<2x2x64xf32>
    %cst_103 = arith.constant dense<0.000000e+00> : vector<2x64xf32>
    %189 = vector.multi_reduction <add>, %188, %cst_103 [1] : vector<2x2x64xf32> to vector<2x64xf32>
    %190 = arith.truncf %189 : vector<2x64xf32> to vector<2x64xbf16>
    %c1_104 = arith.constant 1 : index
    %c0_105 = arith.constant 0 : index
    %c0_106 = arith.constant 0 : index
    %191 = vector.load %arg14[%c1_104, %c0_105, %c0_106] : memref<6x64x64xbf16, #tpu.memory_space<vmem>>, vector<1x64x64xbf16>
    %192 = vector.shape_cast %191 : vector<1x64x64xbf16> to vector<64x64xbf16>
    %cst_107 = arith.constant dense<0.000000e+00> : vector<2x64xf32>
    %193 = tpu.matmul %190, %192, %cst_107 {dimension_numbers = #tpu.dot_dimension_numbers<[1], [0], [0], [1], [0, 0, 1, 1], [], []>} : vector<2x64xbf16>, vector<64x64xbf16>, vector<2x64xf32> -> vector<2x64xf32>
    %c1_108 = arith.constant 1 : index
    %c0_109 = arith.constant 0 : index
    %c0_110 = arith.constant 0 : index
    %194 = vector.load %arg15[%c1_108, %c0_109, %c0_110] : memref<6x1x64xf32, #tpu.memory_space<vmem>>, vector<1x1x64xf32>
    %195 = vector.shape_cast %194 : vector<1x1x64xf32> to vector<1x64xf32>
    %196 = vector.broadcast %195 : vector<1x64xf32> to vector<2x64xf32>
    %197 = arith.addf %193, %196 : vector<2x64xf32>
    %198 = arith.addf %152, %197 : vector<2x64xf32>
    %c1_111 = arith.constant 1 : index
    %c0_112 = arith.constant 0 : index
    %c0_113 = arith.constant 0 : index
    %199 = vector.load %arg16[%c1_111, %c0_112, %c0_113] : memref<6x1x64xf32, #tpu.memory_space<vmem>>, vector<1x1x64xf32>
    %200 = vector.shape_cast %199 : vector<1x1x64xf32> to vector<1x64xf32>
    %c1_114 = arith.constant 1 : index
    %c0_115 = arith.constant 0 : index
    %c0_116 = arith.constant 0 : index
    %201 = vector.load %arg17[%c1_114, %c0_115, %c0_116] : memref<6x1x64xf32, #tpu.memory_space<vmem>>, vector<1x1x64xf32>
    %202 = vector.shape_cast %201 : vector<1x1x64xf32> to vector<1x64xf32>
    %cst_117 = arith.constant dense<0.000000e+00> : vector<2xf32>
    %203 = vector.multi_reduction <add>, %198, %cst_117 [1] : vector<2x64xf32> to vector<2xf32>
    %204 = vector.shape_cast %203 : vector<2xf32> to vector<2x1xf32>
    %cst_118 = arith.constant 6.400000e+01 : f32
    %205 = vector.broadcast %cst_118 : f32 to vector<2x1xf32>
    %206 = arith.divf %204, %205 : vector<2x1xf32>
    %207 = vector.broadcast %206 : vector<2x1xf32> to vector<2x64xf32>
    %208 = arith.subf %198, %207 : vector<2x64xf32>
    %209 = arith.mulf %208, %208 : vector<2x64xf32>
    %cst_119 = arith.constant dense<0.000000e+00> : vector<2xf32>
    %210 = vector.multi_reduction <add>, %209, %cst_119 [1] : vector<2x64xf32> to vector<2xf32>
    %211 = vector.shape_cast %210 : vector<2xf32> to vector<2x1xf32>
    %cst_120 = arith.constant 6.400000e+01 : f32
    %212 = vector.broadcast %cst_120 : f32 to vector<2x1xf32>
    %213 = arith.divf %211, %212 : vector<2x1xf32>
    %214 = vector.broadcast %206 : vector<2x1xf32> to vector<2x64xf32>
    %215 = arith.subf %198, %214 : vector<2x64xf32>
    %cst_121 = arith.constant 9.99999974E-6 : f32
    %216 = vector.broadcast %cst_121 : f32 to vector<2x1xf32>
    %217 = arith.addf %213, %216 : vector<2x1xf32>
    %218 = math.rsqrt %217 : vector<2x1xf32>
    %219 = vector.broadcast %218 : vector<2x1xf32> to vector<2x64xf32>
    %220 = arith.mulf %215, %219 : vector<2x64xf32>
    %221 = vector.broadcast %200 : vector<1x64xf32> to vector<2x64xf32>
    %222 = arith.mulf %220, %221 : vector<2x64xf32>
    %223 = vector.broadcast %202 : vector<1x64xf32> to vector<2x64xf32>
    %224 = arith.addf %222, %223 : vector<2x64xf32>
    %225 = arith.truncf %224 : vector<2x64xf32> to vector<2x64xbf16>
    %c1_122 = arith.constant 1 : index
    %c0_123 = arith.constant 0 : index
    %c0_124 = arith.constant 0 : index
    %226 = vector.load %arg20[%c1_122, %c0_123, %c0_124] : memref<6x64x2048xbf16, #tpu.memory_space<vmem>>, vector<1x64x2048xbf16>
    %227 = vector.shape_cast %226 : vector<1x64x2048xbf16> to vector<64x2048xbf16>
    %cst_125 = arith.constant dense<0.000000e+00> : vector<2x2048xf32>
    %228 = tpu.matmul %225, %227, %cst_125 {dimension_numbers = #tpu.dot_dimension_numbers<[1], [0], [0], [1], [0, 0, 1, 1], [], []>} : vector<2x64xbf16>, vector<64x2048xbf16>, vector<2x2048xf32> -> vector<2x2048xf32>
    %c1_126 = arith.constant 1 : index
    %c0_127 = arith.constant 0 : index
    %c0_128 = arith.constant 0 : index
    %229 = vector.load %arg21[%c1_126, %c0_127, %c0_128] : memref<6x1x2048xf32, #tpu.memory_space<vmem>>, vector<1x1x2048xf32>
    %230 = vector.shape_cast %229 : vector<1x1x2048xf32> to vector<1x2048xf32>
    %231 = vector.broadcast %230 : vector<1x2048xf32> to vector<2x2048xf32>
    %232 = arith.addf %228, %231 : vector<2x2048xf32>
    %cst_129 = arith.constant 0.000000e+00 : f32
    %233 = vector.broadcast %cst_129 : f32 to vector<2x2048xf32>
    %234 = arith.maximumf %232, %233 : vector<2x2048xf32>
    %235 = arith.truncf %234 : vector<2x2048xf32> to vector<2x2048xbf16>
    %c1_130 = arith.constant 1 : index
    %c0_131 = arith.constant 0 : index
    %c0_132 = arith.constant 0 : index
    %236 = vector.load %arg22[%c1_130, %c0_131, %c0_132] : memref<6x2048x64xbf16, #tpu.memory_space<vmem>>, vector<1x2048x64xbf16>
    %237 = vector.shape_cast %236 : vector<1x2048x64xbf16> to vector<2048x64xbf16>
    %cst_133 = arith.constant dense<0.000000e+00> : vector<2x64xf32>
    %238 = tpu.matmul %235, %237, %cst_133 {dimension_numbers = #tpu.dot_dimension_numbers<[1], [0], [0], [1], [0, 0, 1, 1], [], []>} : vector<2x2048xbf16>, vector<2048x64xbf16>, vector<2x64xf32> -> vector<2x64xf32>
    %c1_134 = arith.constant 1 : index
    %c0_135 = arith.constant 0 : index
    %c0_136 = arith.constant 0 : index
    %239 = vector.load %arg23[%c1_134, %c0_135, %c0_136] : memref<6x1x64xf32, #tpu.memory_space<vmem>>, vector<1x1x64xf32>
    %240 = vector.shape_cast %239 : vector<1x1x64xf32> to vector<1x64xf32>
    %241 = vector.broadcast %240 : vector<1x64xf32> to vector<2x64xf32>
    %242 = arith.addf %238, %241 : vector<2x64xf32>
    %243 = arith.addf %224, %242 : vector<2x64xf32>
    %c1_137 = arith.constant 1 : index
    %c0_138 = arith.constant 0 : index
    %c0_139 = arith.constant 0 : index
    %244 = vector.load %arg18[%c1_137, %c0_138, %c0_139] : memref<6x1x64xf32, #tpu.memory_space<vmem>>, vector<1x1x64xf32>
    %245 = vector.shape_cast %244 : vector<1x1x64xf32> to vector<1x64xf32>
    %c1_140 = arith.constant 1 : index
    %c0_141 = arith.constant 0 : index
    %c0_142 = arith.constant 0 : index
    %246 = vector.load %arg19[%c1_140, %c0_141, %c0_142] : memref<6x1x64xf32, #tpu.memory_space<vmem>>, vector<1x1x64xf32>
    %247 = vector.shape_cast %246 : vector<1x1x64xf32> to vector<1x64xf32>
    %cst_143 = arith.constant dense<0.000000e+00> : vector<2xf32>
    %248 = vector.multi_reduction <add>, %243, %cst_143 [1] : vector<2x64xf32> to vector<2xf32>
    %249 = vector.shape_cast %248 : vector<2xf32> to vector<2x1xf32>
    %cst_144 = arith.constant 6.400000e+01 : f32
    %250 = vector.broadcast %cst_144 : f32 to vector<2x1xf32>
    %251 = arith.divf %249, %250 : vector<2x1xf32>
    %252 = vector.broadcast %251 : vector<2x1xf32> to vector<2x64xf32>
    %253 = arith.subf %243, %252 : vector<2x64xf32>
    %254 = arith.mulf %253, %253 : vector<2x64xf32>
    %cst_145 = arith.constant dense<0.000000e+00> : vector<2xf32>
    %255 = vector.multi_reduction <add>, %254, %cst_145 [1] : vector<2x64xf32> to vector<2xf32>
    %256 = vector.shape_cast %255 : vector<2xf32> to vector<2x1xf32>
    %cst_146 = arith.constant 6.400000e+01 : f32
    %257 = vector.broadcast %cst_146 : f32 to vector<2x1xf32>
    %258 = arith.divf %256, %257 : vector<2x1xf32>
    %259 = vector.broadcast %251 : vector<2x1xf32> to vector<2x64xf32>
    %260 = arith.subf %243, %259 : vector<2x64xf32>
    %cst_147 = arith.constant 9.99999974E-6 : f32
    %261 = vector.broadcast %cst_147 : f32 to vector<2x1xf32>
    %262 = arith.addf %258, %261 : vector<2x1xf32>
    %263 = math.rsqrt %262 : vector<2x1xf32>
    %264 = vector.broadcast %263 : vector<2x1xf32> to vector<2x64xf32>
    %265 = arith.mulf %260, %264 : vector<2x64xf32>
    %266 = vector.broadcast %245 : vector<1x64xf32> to vector<2x64xf32>
    %267 = arith.mulf %265, %266 : vector<2x64xf32>
    %268 = vector.broadcast %247 : vector<1x64xf32> to vector<2x64xf32>
    %269 = arith.addf %267, %268 : vector<2x64xf32>
    %270 = arith.truncf %269 : vector<2x64xf32> to vector<2x64xbf16>
    %c2 = arith.constant 2 : index
    %c0_148 = arith.constant 0 : index
    %c0_149 = arith.constant 0 : index
    %271 = vector.load %arg12[%c2, %c0_148, %c0_149] : memref<6x64x192xbf16, #tpu.memory_space<vmem>>, vector<1x64x192xbf16>
    %272 = vector.shape_cast %271 : vector<1x64x192xbf16> to vector<64x192xbf16>
    %cst_150 = arith.constant dense<0.000000e+00> : vector<2x192xf32>
    %273 = tpu.matmul %270, %272, %cst_150 {dimension_numbers = #tpu.dot_dimension_numbers<[1], [0], [0], [1], [0, 0, 1, 1], [], []>} : vector<2x64xbf16>, vector<64x192xbf16>, vector<2x192xf32> -> vector<2x192xf32>
    %c2_151 = arith.constant 2 : index
    %c0_152 = arith.constant 0 : index
    %c0_153 = arith.constant 0 : index
    %274 = vector.load %arg13[%c2_151, %c0_152, %c0_153] : memref<6x1x192xf32, #tpu.memory_space<vmem>>, vector<1x1x192xf32>
    %275 = vector.shape_cast %274 : vector<1x1x192xf32> to vector<1x192xf32>
    %276 = vector.broadcast %275 : vector<1x192xf32> to vector<2x192xf32>
    %277 = arith.addf %273, %276 : vector<2x192xf32>
    %278 = vector.extract_strided_slice %277 {offsets = [0, 0], sizes = [2, 64], strides = [1, 1]} : vector<2x192xf32> to vector<2x64xf32>
    %279 = vector.extract_strided_slice %277 {offsets = [0, 64], sizes = [2, 64], strides = [1, 1]} : vector<2x192xf32> to vector<2x64xf32>
    %280 = vector.extract_strided_slice %277 {offsets = [0, 128], sizes = [2, 64], strides = [1, 1]} : vector<2x192xf32> to vector<2x64xf32>
    %281 = vector.shape_cast %278 : vector<2x64xf32> to vector<2x1x64xf32>
    %282 = vector.shape_cast %279 : vector<2x64xf32> to vector<1x2x64xf32>
    %283 = vector.broadcast %281 : vector<2x1x64xf32> to vector<2x2x64xf32>
    %284 = vector.broadcast %282 : vector<1x2x64xf32> to vector<2x2x64xf32>
    %285 = arith.mulf %283, %284 : vector<2x2x64xf32>
    %286 = vector.shape_cast %285 : vector<2x2x64xf32> to vector<4x64xf32>
    %cst_154 = arith.constant dense<0.000000e+00> : vector<4x8xf32>
    %287 = tpu.matmul %286, %34, %cst_154 {dimension_numbers = #tpu.dot_dimension_numbers<[1], [0], [0], [1], [0, 0, 1, 1], [], []>} : vector<4x64xf32>, vector<64x8xf32>, vector<4x8xf32> -> vector<4x8xf32>
    %cst_155 = arith.constant 0.353553385 : f32
    %288 = vector.broadcast %cst_155 : f32 to vector<4x8xf32>
    %289 = arith.mulf %287, %288 : vector<4x8xf32>
    %cst_156 = arith.constant dense<0xFF800000> : vector<8xf32>
    %290 = vector.multi_reduction <maximumf>, %289, %cst_156 [0] : vector<4x8xf32> to vector<8xf32>
    %291 = vector.shape_cast %290 : vector<8xf32> to vector<1x8xf32>
    %292 = vector.broadcast %291 : vector<1x8xf32> to vector<4x8xf32>
    %293 = arith.subf %289, %292 : vector<4x8xf32>
    %294 = math.exp %293 : vector<4x8xf32>
    %295 = vector.shape_cast %294 : vector<4x8xf32> to vector<2x2x8xf32>
    %cst_157 = arith.constant dense<0.000000e+00> : vector<2x8xf32>
    %296 = vector.multi_reduction <add>, %295, %cst_157 [1] : vector<2x2x8xf32> to vector<2x8xf32>
    %297 = vector.shape_cast %296 : vector<2x8xf32> to vector<2x1x8xf32>
    %298 = vector.broadcast %297 : vector<2x1x8xf32> to vector<2x2x8xf32>
    %299 = arith.divf %295, %298 : vector<2x2x8xf32>
    %300 = vector.shape_cast %299 : vector<2x2x8xf32> to vector<4x8xf32>
    %cst_158 = arith.constant dense<0.000000e+00> : vector<4x64xf32>
    %301 = tpu.matmul %300, %35, %cst_158 {dimension_numbers = #tpu.dot_dimension_numbers<[1], [0], [0], [1], [0, 0, 1, 1], [], []>} : vector<4x8xf32>, vector<8x64xf32>, vector<4x64xf32> -> vector<4x64xf32>
    %302 = vector.shape_cast %301 : vector<4x64xf32> to vector<2x2x64xf32>
    %303 = vector.shape_cast %280 : vector<2x64xf32> to vector<1x2x64xf32>
    %304 = vector.broadcast %303 : vector<1x2x64xf32> to vector<2x2x64xf32>
    %305 = arith.mulf %302, %304 : vector<2x2x64xf32>
    %cst_159 = arith.constant dense<0.000000e+00> : vector<2x64xf32>
    %306 = vector.multi_reduction <add>, %305, %cst_159 [1] : vector<2x2x64xf32> to vector<2x64xf32>
    %307 = arith.truncf %306 : vector<2x64xf32> to vector<2x64xbf16>
    %c2_160 = arith.constant 2 : index
    %c0_161 = arith.constant 0 : index
    %c0_162 = arith.constant 0 : index
    %308 = vector.load %arg14[%c2_160, %c0_161, %c0_162] : memref<6x64x64xbf16, #tpu.memory_space<vmem>>, vector<1x64x64xbf16>
    %309 = vector.shape_cast %308 : vector<1x64x64xbf16> to vector<64x64xbf16>
    %cst_163 = arith.constant dense<0.000000e+00> : vector<2x64xf32>
    %310 = tpu.matmul %307, %309, %cst_163 {dimension_numbers = #tpu.dot_dimension_numbers<[1], [0], [0], [1], [0, 0, 1, 1], [], []>} : vector<2x64xbf16>, vector<64x64xbf16>, vector<2x64xf32> -> vector<2x64xf32>
    %c2_164 = arith.constant 2 : index
    %c0_165 = arith.constant 0 : index
    %c0_166 = arith.constant 0 : index
    %311 = vector.load %arg15[%c2_164, %c0_165, %c0_166] : memref<6x1x64xf32, #tpu.memory_space<vmem>>, vector<1x1x64xf32>
    %312 = vector.shape_cast %311 : vector<1x1x64xf32> to vector<1x64xf32>
    %313 = vector.broadcast %312 : vector<1x64xf32> to vector<2x64xf32>
    %314 = arith.addf %310, %313 : vector<2x64xf32>
    %315 = arith.addf %269, %314 : vector<2x64xf32>
    %c2_167 = arith.constant 2 : index
    %c0_168 = arith.constant 0 : index
    %c0_169 = arith.constant 0 : index
    %316 = vector.load %arg16[%c2_167, %c0_168, %c0_169] : memref<6x1x64xf32, #tpu.memory_space<vmem>>, vector<1x1x64xf32>
    %317 = vector.shape_cast %316 : vector<1x1x64xf32> to vector<1x64xf32>
    %c2_170 = arith.constant 2 : index
    %c0_171 = arith.constant 0 : index
    %c0_172 = arith.constant 0 : index
    %318 = vector.load %arg17[%c2_170, %c0_171, %c0_172] : memref<6x1x64xf32, #tpu.memory_space<vmem>>, vector<1x1x64xf32>
    %319 = vector.shape_cast %318 : vector<1x1x64xf32> to vector<1x64xf32>
    %cst_173 = arith.constant dense<0.000000e+00> : vector<2xf32>
    %320 = vector.multi_reduction <add>, %315, %cst_173 [1] : vector<2x64xf32> to vector<2xf32>
    %321 = vector.shape_cast %320 : vector<2xf32> to vector<2x1xf32>
    %cst_174 = arith.constant 6.400000e+01 : f32
    %322 = vector.broadcast %cst_174 : f32 to vector<2x1xf32>
    %323 = arith.divf %321, %322 : vector<2x1xf32>
    %324 = vector.broadcast %323 : vector<2x1xf32> to vector<2x64xf32>
    %325 = arith.subf %315, %324 : vector<2x64xf32>
    %326 = arith.mulf %325, %325 : vector<2x64xf32>
    %cst_175 = arith.constant dense<0.000000e+00> : vector<2xf32>
    %327 = vector.multi_reduction <add>, %326, %cst_175 [1] : vector<2x64xf32> to vector<2xf32>
    %328 = vector.shape_cast %327 : vector<2xf32> to vector<2x1xf32>
    %cst_176 = arith.constant 6.400000e+01 : f32
    %329 = vector.broadcast %cst_176 : f32 to vector<2x1xf32>
    %330 = arith.divf %328, %329 : vector<2x1xf32>
    %331 = vector.broadcast %323 : vector<2x1xf32> to vector<2x64xf32>
    %332 = arith.subf %315, %331 : vector<2x64xf32>
    %cst_177 = arith.constant 9.99999974E-6 : f32
    %333 = vector.broadcast %cst_177 : f32 to vector<2x1xf32>
    %334 = arith.addf %330, %333 : vector<2x1xf32>
    %335 = math.rsqrt %334 : vector<2x1xf32>
    %336 = vector.broadcast %335 : vector<2x1xf32> to vector<2x64xf32>
    %337 = arith.mulf %332, %336 : vector<2x64xf32>
    %338 = vector.broadcast %317 : vector<1x64xf32> to vector<2x64xf32>
    %339 = arith.mulf %337, %338 : vector<2x64xf32>
    %340 = vector.broadcast %319 : vector<1x64xf32> to vector<2x64xf32>
    %341 = arith.addf %339, %340 : vector<2x64xf32>
    %342 = arith.truncf %341 : vector<2x64xf32> to vector<2x64xbf16>
    %c2_178 = arith.constant 2 : index
    %c0_179 = arith.constant 0 : index
    %c0_180 = arith.constant 0 : index
    %343 = vector.load %arg20[%c2_178, %c0_179, %c0_180] : memref<6x64x2048xbf16, #tpu.memory_space<vmem>>, vector<1x64x2048xbf16>
    %344 = vector.shape_cast %343 : vector<1x64x2048xbf16> to vector<64x2048xbf16>
    %cst_181 = arith.constant dense<0.000000e+00> : vector<2x2048xf32>
    %345 = tpu.matmul %342, %344, %cst_181 {dimension_numbers = #tpu.dot_dimension_numbers<[1], [0], [0], [1], [0, 0, 1, 1], [], []>} : vector<2x64xbf16>, vector<64x2048xbf16>, vector<2x2048xf32> -> vector<2x2048xf32>
    %c2_182 = arith.constant 2 : index
    %c0_183 = arith.constant 0 : index
    %c0_184 = arith.constant 0 : index
    %346 = vector.load %arg21[%c2_182, %c0_183, %c0_184] : memref<6x1x2048xf32, #tpu.memory_space<vmem>>, vector<1x1x2048xf32>
    %347 = vector.shape_cast %346 : vector<1x1x2048xf32> to vector<1x2048xf32>
    %348 = vector.broadcast %347 : vector<1x2048xf32> to vector<2x2048xf32>
    %349 = arith.addf %345, %348 : vector<2x2048xf32>
    %cst_185 = arith.constant 0.000000e+00 : f32
    %350 = vector.broadcast %cst_185 : f32 to vector<2x2048xf32>
    %351 = arith.maximumf %349, %350 : vector<2x2048xf32>
    %352 = arith.truncf %351 : vector<2x2048xf32> to vector<2x2048xbf16>
    %c2_186 = arith.constant 2 : index
    %c0_187 = arith.constant 0 : index
    %c0_188 = arith.constant 0 : index
    %353 = vector.load %arg22[%c2_186, %c0_187, %c0_188] : memref<6x2048x64xbf16, #tpu.memory_space<vmem>>, vector<1x2048x64xbf16>
    %354 = vector.shape_cast %353 : vector<1x2048x64xbf16> to vector<2048x64xbf16>
    %cst_189 = arith.constant dense<0.000000e+00> : vector<2x64xf32>
    %355 = tpu.matmul %352, %354, %cst_189 {dimension_numbers = #tpu.dot_dimension_numbers<[1], [0], [0], [1], [0, 0, 1, 1], [], []>} : vector<2x2048xbf16>, vector<2048x64xbf16>, vector<2x64xf32> -> vector<2x64xf32>
    %c2_190 = arith.constant 2 : index
    %c0_191 = arith.constant 0 : index
    %c0_192 = arith.constant 0 : index
    %356 = vector.load %arg23[%c2_190, %c0_191, %c0_192] : memref<6x1x64xf32, #tpu.memory_space<vmem>>, vector<1x1x64xf32>
    %357 = vector.shape_cast %356 : vector<1x1x64xf32> to vector<1x64xf32>
    %358 = vector.broadcast %357 : vector<1x64xf32> to vector<2x64xf32>
    %359 = arith.addf %355, %358 : vector<2x64xf32>
    %360 = arith.addf %341, %359 : vector<2x64xf32>
    %c2_193 = arith.constant 2 : index
    %c0_194 = arith.constant 0 : index
    %c0_195 = arith.constant 0 : index
    %361 = vector.load %arg18[%c2_193, %c0_194, %c0_195] : memref<6x1x64xf32, #tpu.memory_space<vmem>>, vector<1x1x64xf32>
    %362 = vector.shape_cast %361 : vector<1x1x64xf32> to vector<1x64xf32>
    %c2_196 = arith.constant 2 : index
    %c0_197 = arith.constant 0 : index
    %c0_198 = arith.constant 0 : index
    %363 = vector.load %arg19[%c2_196, %c0_197, %c0_198] : memref<6x1x64xf32, #tpu.memory_space<vmem>>, vector<1x1x64xf32>
    %364 = vector.shape_cast %363 : vector<1x1x64xf32> to vector<1x64xf32>
    %cst_199 = arith.constant dense<0.000000e+00> : vector<2xf32>
    %365 = vector.multi_reduction <add>, %360, %cst_199 [1] : vector<2x64xf32> to vector<2xf32>
    %366 = vector.shape_cast %365 : vector<2xf32> to vector<2x1xf32>
    %cst_200 = arith.constant 6.400000e+01 : f32
    %367 = vector.broadcast %cst_200 : f32 to vector<2x1xf32>
    %368 = arith.divf %366, %367 : vector<2x1xf32>
    %369 = vector.broadcast %368 : vector<2x1xf32> to vector<2x64xf32>
    %370 = arith.subf %360, %369 : vector<2x64xf32>
    %371 = arith.mulf %370, %370 : vector<2x64xf32>
    %cst_201 = arith.constant dense<0.000000e+00> : vector<2xf32>
    %372 = vector.multi_reduction <add>, %371, %cst_201 [1] : vector<2x64xf32> to vector<2xf32>
    %373 = vector.shape_cast %372 : vector<2xf32> to vector<2x1xf32>
    %cst_202 = arith.constant 6.400000e+01 : f32
    %374 = vector.broadcast %cst_202 : f32 to vector<2x1xf32>
    %375 = arith.divf %373, %374 : vector<2x1xf32>
    %376 = vector.broadcast %368 : vector<2x1xf32> to vector<2x64xf32>
    %377 = arith.subf %360, %376 : vector<2x64xf32>
    %cst_203 = arith.constant 9.99999974E-6 : f32
    %378 = vector.broadcast %cst_203 : f32 to vector<2x1xf32>
    %379 = arith.addf %375, %378 : vector<2x1xf32>
    %380 = math.rsqrt %379 : vector<2x1xf32>
    %381 = vector.broadcast %380 : vector<2x1xf32> to vector<2x64xf32>
    %382 = arith.mulf %377, %381 : vector<2x64xf32>
    %383 = vector.broadcast %362 : vector<1x64xf32> to vector<2x64xf32>
    %384 = arith.mulf %382, %383 : vector<2x64xf32>
    %385 = vector.broadcast %364 : vector<1x64xf32> to vector<2x64xf32>
    %386 = arith.addf %384, %385 : vector<2x64xf32>
    %387 = arith.truncf %386 : vector<2x64xf32> to vector<2x64xbf16>
    %c3 = arith.constant 3 : index
    %c0_204 = arith.constant 0 : index
    %c0_205 = arith.constant 0 : index
    %388 = vector.load %arg12[%c3, %c0_204, %c0_205] : memref<6x64x192xbf16, #tpu.memory_space<vmem>>, vector<1x64x192xbf16>
    %389 = vector.shape_cast %388 : vector<1x64x192xbf16> to vector<64x192xbf16>
    %cst_206 = arith.constant dense<0.000000e+00> : vector<2x192xf32>
    %390 = tpu.matmul %387, %389, %cst_206 {dimension_numbers = #tpu.dot_dimension_numbers<[1], [0], [0], [1], [0, 0, 1, 1], [], []>} : vector<2x64xbf16>, vector<64x192xbf16>, vector<2x192xf32> -> vector<2x192xf32>
    %c3_207 = arith.constant 3 : index
    %c0_208 = arith.constant 0 : index
    %c0_209 = arith.constant 0 : index
    %391 = vector.load %arg13[%c3_207, %c0_208, %c0_209] : memref<6x1x192xf32, #tpu.memory_space<vmem>>, vector<1x1x192xf32>
    %392 = vector.shape_cast %391 : vector<1x1x192xf32> to vector<1x192xf32>
    %393 = vector.broadcast %392 : vector<1x192xf32> to vector<2x192xf32>
    %394 = arith.addf %390, %393 : vector<2x192xf32>
    %395 = vector.extract_strided_slice %394 {offsets = [0, 0], sizes = [2, 64], strides = [1, 1]} : vector<2x192xf32> to vector<2x64xf32>
    %396 = vector.extract_strided_slice %394 {offsets = [0, 64], sizes = [2, 64], strides = [1, 1]} : vector<2x192xf32> to vector<2x64xf32>
    %397 = vector.extract_strided_slice %394 {offsets = [0, 128], sizes = [2, 64], strides = [1, 1]} : vector<2x192xf32> to vector<2x64xf32>
    %398 = vector.shape_cast %395 : vector<2x64xf32> to vector<2x1x64xf32>
    %399 = vector.shape_cast %396 : vector<2x64xf32> to vector<1x2x64xf32>
    %400 = vector.broadcast %398 : vector<2x1x64xf32> to vector<2x2x64xf32>
    %401 = vector.broadcast %399 : vector<1x2x64xf32> to vector<2x2x64xf32>
    %402 = arith.mulf %400, %401 : vector<2x2x64xf32>
    %403 = vector.shape_cast %402 : vector<2x2x64xf32> to vector<4x64xf32>
    %cst_210 = arith.constant dense<0.000000e+00> : vector<4x8xf32>
    %404 = tpu.matmul %403, %34, %cst_210 {dimension_numbers = #tpu.dot_dimension_numbers<[1], [0], [0], [1], [0, 0, 1, 1], [], []>} : vector<4x64xf32>, vector<64x8xf32>, vector<4x8xf32> -> vector<4x8xf32>
    %cst_211 = arith.constant 0.353553385 : f32
    %405 = vector.broadcast %cst_211 : f32 to vector<4x8xf32>
    %406 = arith.mulf %404, %405 : vector<4x8xf32>
    %cst_212 = arith.constant dense<0xFF800000> : vector<8xf32>
    %407 = vector.multi_reduction <maximumf>, %406, %cst_212 [0] : vector<4x8xf32> to vector<8xf32>
    %408 = vector.shape_cast %407 : vector<8xf32> to vector<1x8xf32>
    %409 = vector.broadcast %408 : vector<1x8xf32> to vector<4x8xf32>
    %410 = arith.subf %406, %409 : vector<4x8xf32>
    %411 = math.exp %410 : vector<4x8xf32>
    %412 = vector.shape_cast %411 : vector<4x8xf32> to vector<2x2x8xf32>
    %cst_213 = arith.constant dense<0.000000e+00> : vector<2x8xf32>
    %413 = vector.multi_reduction <add>, %412, %cst_213 [1] : vector<2x2x8xf32> to vector<2x8xf32>
    %414 = vector.shape_cast %413 : vector<2x8xf32> to vector<2x1x8xf32>
    %415 = vector.broadcast %414 : vector<2x1x8xf32> to vector<2x2x8xf32>
    %416 = arith.divf %412, %415 : vector<2x2x8xf32>
    %417 = vector.shape_cast %416 : vector<2x2x8xf32> to vector<4x8xf32>
    %cst_214 = arith.constant dense<0.000000e+00> : vector<4x64xf32>
    %418 = tpu.matmul %417, %35, %cst_214 {dimension_numbers = #tpu.dot_dimension_numbers<[1], [0], [0], [1], [0, 0, 1, 1], [], []>} : vector<4x8xf32>, vector<8x64xf32>, vector<4x64xf32> -> vector<4x64xf32>
    %419 = vector.shape_cast %418 : vector<4x64xf32> to vector<2x2x64xf32>
    %420 = vector.shape_cast %397 : vector<2x64xf32> to vector<1x2x64xf32>
    %421 = vector.broadcast %420 : vector<1x2x64xf32> to vector<2x2x64xf32>
    %422 = arith.mulf %419, %421 : vector<2x2x64xf32>
    %cst_215 = arith.constant dense<0.000000e+00> : vector<2x64xf32>
    %423 = vector.multi_reduction <add>, %422, %cst_215 [1] : vector<2x2x64xf32> to vector<2x64xf32>
    %424 = arith.truncf %423 : vector<2x64xf32> to vector<2x64xbf16>
    %c3_216 = arith.constant 3 : index
    %c0_217 = arith.constant 0 : index
    %c0_218 = arith.constant 0 : index
    %425 = vector.load %arg14[%c3_216, %c0_217, %c0_218] : memref<6x64x64xbf16, #tpu.memory_space<vmem>>, vector<1x64x64xbf16>
    %426 = vector.shape_cast %425 : vector<1x64x64xbf16> to vector<64x64xbf16>
    %cst_219 = arith.constant dense<0.000000e+00> : vector<2x64xf32>
    %427 = tpu.matmul %424, %426, %cst_219 {dimension_numbers = #tpu.dot_dimension_numbers<[1], [0], [0], [1], [0, 0, 1, 1], [], []>} : vector<2x64xbf16>, vector<64x64xbf16>, vector<2x64xf32> -> vector<2x64xf32>
    %c3_220 = arith.constant 3 : index
    %c0_221 = arith.constant 0 : index
    %c0_222 = arith.constant 0 : index
    %428 = vector.load %arg15[%c3_220, %c0_221, %c0_222] : memref<6x1x64xf32, #tpu.memory_space<vmem>>, vector<1x1x64xf32>
    %429 = vector.shape_cast %428 : vector<1x1x64xf32> to vector<1x64xf32>
    %430 = vector.broadcast %429 : vector<1x64xf32> to vector<2x64xf32>
    %431 = arith.addf %427, %430 : vector<2x64xf32>
    %432 = arith.addf %386, %431 : vector<2x64xf32>
    %c3_223 = arith.constant 3 : index
    %c0_224 = arith.constant 0 : index
    %c0_225 = arith.constant 0 : index
    %433 = vector.load %arg16[%c3_223, %c0_224, %c0_225] : memref<6x1x64xf32, #tpu.memory_space<vmem>>, vector<1x1x64xf32>
    %434 = vector.shape_cast %433 : vector<1x1x64xf32> to vector<1x64xf32>
    %c3_226 = arith.constant 3 : index
    %c0_227 = arith.constant 0 : index
    %c0_228 = arith.constant 0 : index
    %435 = vector.load %arg17[%c3_226, %c0_227, %c0_228] : memref<6x1x64xf32, #tpu.memory_space<vmem>>, vector<1x1x64xf32>
    %436 = vector.shape_cast %435 : vector<1x1x64xf32> to vector<1x64xf32>
    %cst_229 = arith.constant dense<0.000000e+00> : vector<2xf32>
    %437 = vector.multi_reduction <add>, %432, %cst_229 [1] : vector<2x64xf32> to vector<2xf32>
    %438 = vector.shape_cast %437 : vector<2xf32> to vector<2x1xf32>
    %cst_230 = arith.constant 6.400000e+01 : f32
    %439 = vector.broadcast %cst_230 : f32 to vector<2x1xf32>
    %440 = arith.divf %438, %439 : vector<2x1xf32>
    %441 = vector.broadcast %440 : vector<2x1xf32> to vector<2x64xf32>
    %442 = arith.subf %432, %441 : vector<2x64xf32>
    %443 = arith.mulf %442, %442 : vector<2x64xf32>
    %cst_231 = arith.constant dense<0.000000e+00> : vector<2xf32>
    %444 = vector.multi_reduction <add>, %443, %cst_231 [1] : vector<2x64xf32> to vector<2xf32>
    %445 = vector.shape_cast %444 : vector<2xf32> to vector<2x1xf32>
    %cst_232 = arith.constant 6.400000e+01 : f32
    %446 = vector.broadcast %cst_232 : f32 to vector<2x1xf32>
    %447 = arith.divf %445, %446 : vector<2x1xf32>
    %448 = vector.broadcast %440 : vector<2x1xf32> to vector<2x64xf32>
    %449 = arith.subf %432, %448 : vector<2x64xf32>
    %cst_233 = arith.constant 9.99999974E-6 : f32
    %450 = vector.broadcast %cst_233 : f32 to vector<2x1xf32>
    %451 = arith.addf %447, %450 : vector<2x1xf32>
    %452 = math.rsqrt %451 : vector<2x1xf32>
    %453 = vector.broadcast %452 : vector<2x1xf32> to vector<2x64xf32>
    %454 = arith.mulf %449, %453 : vector<2x64xf32>
    %455 = vector.broadcast %434 : vector<1x64xf32> to vector<2x64xf32>
    %456 = arith.mulf %454, %455 : vector<2x64xf32>
    %457 = vector.broadcast %436 : vector<1x64xf32> to vector<2x64xf32>
    %458 = arith.addf %456, %457 : vector<2x64xf32>
    %459 = arith.truncf %458 : vector<2x64xf32> to vector<2x64xbf16>
    %c3_234 = arith.constant 3 : index
    %c0_235 = arith.constant 0 : index
    %c0_236 = arith.constant 0 : index
    %460 = vector.load %arg20[%c3_234, %c0_235, %c0_236] : memref<6x64x2048xbf16, #tpu.memory_space<vmem>>, vector<1x64x2048xbf16>
    %461 = vector.shape_cast %460 : vector<1x64x2048xbf16> to vector<64x2048xbf16>
    %cst_237 = arith.constant dense<0.000000e+00> : vector<2x2048xf32>
    %462 = tpu.matmul %459, %461, %cst_237 {dimension_numbers = #tpu.dot_dimension_numbers<[1], [0], [0], [1], [0, 0, 1, 1], [], []>} : vector<2x64xbf16>, vector<64x2048xbf16>, vector<2x2048xf32> -> vector<2x2048xf32>
    %c3_238 = arith.constant 3 : index
    %c0_239 = arith.constant 0 : index
    %c0_240 = arith.constant 0 : index
    %463 = vector.load %arg21[%c3_238, %c0_239, %c0_240] : memref<6x1x2048xf32, #tpu.memory_space<vmem>>, vector<1x1x2048xf32>
    %464 = vector.shape_cast %463 : vector<1x1x2048xf32> to vector<1x2048xf32>
    %465 = vector.broadcast %464 : vector<1x2048xf32> to vector<2x2048xf32>
    %466 = arith.addf %462, %465 : vector<2x2048xf32>
    %cst_241 = arith.constant 0.000000e+00 : f32
    %467 = vector.broadcast %cst_241 : f32 to vector<2x2048xf32>
    %468 = arith.maximumf %466, %467 : vector<2x2048xf32>
    %469 = arith.truncf %468 : vector<2x2048xf32> to vector<2x2048xbf16>
    %c3_242 = arith.constant 3 : index
    %c0_243 = arith.constant 0 : index
    %c0_244 = arith.constant 0 : index
    %470 = vector.load %arg22[%c3_242, %c0_243, %c0_244] : memref<6x2048x64xbf16, #tpu.memory_space<vmem>>, vector<1x2048x64xbf16>
    %471 = vector.shape_cast %470 : vector<1x2048x64xbf16> to vector<2048x64xbf16>
    %cst_245 = arith.constant dense<0.000000e+00> : vector<2x64xf32>
    %472 = tpu.matmul %469, %471, %cst_245 {dimension_numbers = #tpu.dot_dimension_numbers<[1], [0], [0], [1], [0, 0, 1, 1], [], []>} : vector<2x2048xbf16>, vector<2048x64xbf16>, vector<2x64xf32> -> vector<2x64xf32>
    %c3_246 = arith.constant 3 : index
    %c0_247 = arith.constant 0 : index
    %c0_248 = arith.constant 0 : index
    %473 = vector.load %arg23[%c3_246, %c0_247, %c0_248] : memref<6x1x64xf32, #tpu.memory_space<vmem>>, vector<1x1x64xf32>
    %474 = vector.shape_cast %473 : vector<1x1x64xf32> to vector<1x64xf32>
    %475 = vector.broadcast %474 : vector<1x64xf32> to vector<2x64xf32>
    %476 = arith.addf %472, %475 : vector<2x64xf32>
    %477 = arith.addf %458, %476 : vector<2x64xf32>
    %c3_249 = arith.constant 3 : index
    %c0_250 = arith.constant 0 : index
    %c0_251 = arith.constant 0 : index
    %478 = vector.load %arg18[%c3_249, %c0_250, %c0_251] : memref<6x1x64xf32, #tpu.memory_space<vmem>>, vector<1x1x64xf32>
    %479 = vector.shape_cast %478 : vector<1x1x64xf32> to vector<1x64xf32>
    %c3_252 = arith.constant 3 : index
    %c0_253 = arith.constant 0 : index
    %c0_254 = arith.constant 0 : index
    %480 = vector.load %arg19[%c3_252, %c0_253, %c0_254] : memref<6x1x64xf32, #tpu.memory_space<vmem>>, vector<1x1x64xf32>
    %481 = vector.shape_cast %480 : vector<1x1x64xf32> to vector<1x64xf32>
    %cst_255 = arith.constant dense<0.000000e+00> : vector<2xf32>
    %482 = vector.multi_reduction <add>, %477, %cst_255 [1] : vector<2x64xf32> to vector<2xf32>
    %483 = vector.shape_cast %482 : vector<2xf32> to vector<2x1xf32>
    %cst_256 = arith.constant 6.400000e+01 : f32
    %484 = vector.broadcast %cst_256 : f32 to vector<2x1xf32>
    %485 = arith.divf %483, %484 : vector<2x1xf32>
    %486 = vector.broadcast %485 : vector<2x1xf32> to vector<2x64xf32>
    %487 = arith.subf %477, %486 : vector<2x64xf32>
    %488 = arith.mulf %487, %487 : vector<2x64xf32>
    %cst_257 = arith.constant dense<0.000000e+00> : vector<2xf32>
    %489 = vector.multi_reduction <add>, %488, %cst_257 [1] : vector<2x64xf32> to vector<2xf32>
    %490 = vector.shape_cast %489 : vector<2xf32> to vector<2x1xf32>
    %cst_258 = arith.constant 6.400000e+01 : f32
    %491 = vector.broadcast %cst_258 : f32 to vector<2x1xf32>
    %492 = arith.divf %490, %491 : vector<2x1xf32>
    %493 = vector.broadcast %485 : vector<2x1xf32> to vector<2x64xf32>
    %494 = arith.subf %477, %493 : vector<2x64xf32>
    %cst_259 = arith.constant 9.99999974E-6 : f32
    %495 = vector.broadcast %cst_259 : f32 to vector<2x1xf32>
    %496 = arith.addf %492, %495 : vector<2x1xf32>
    %497 = math.rsqrt %496 : vector<2x1xf32>
    %498 = vector.broadcast %497 : vector<2x1xf32> to vector<2x64xf32>
    %499 = arith.mulf %494, %498 : vector<2x64xf32>
    %500 = vector.broadcast %479 : vector<1x64xf32> to vector<2x64xf32>
    %501 = arith.mulf %499, %500 : vector<2x64xf32>
    %502 = vector.broadcast %481 : vector<1x64xf32> to vector<2x64xf32>
    %503 = arith.addf %501, %502 : vector<2x64xf32>
    %504 = arith.truncf %503 : vector<2x64xf32> to vector<2x64xbf16>
    %c4 = arith.constant 4 : index
    %c0_260 = arith.constant 0 : index
    %c0_261 = arith.constant 0 : index
    %505 = vector.load %arg12[%c4, %c0_260, %c0_261] : memref<6x64x192xbf16, #tpu.memory_space<vmem>>, vector<1x64x192xbf16>
    %506 = vector.shape_cast %505 : vector<1x64x192xbf16> to vector<64x192xbf16>
    %cst_262 = arith.constant dense<0.000000e+00> : vector<2x192xf32>
    %507 = tpu.matmul %504, %506, %cst_262 {dimension_numbers = #tpu.dot_dimension_numbers<[1], [0], [0], [1], [0, 0, 1, 1], [], []>} : vector<2x64xbf16>, vector<64x192xbf16>, vector<2x192xf32> -> vector<2x192xf32>
    %c4_263 = arith.constant 4 : index
    %c0_264 = arith.constant 0 : index
    %c0_265 = arith.constant 0 : index
    %508 = vector.load %arg13[%c4_263, %c0_264, %c0_265] : memref<6x1x192xf32, #tpu.memory_space<vmem>>, vector<1x1x192xf32>
    %509 = vector.shape_cast %508 : vector<1x1x192xf32> to vector<1x192xf32>
    %510 = vector.broadcast %509 : vector<1x192xf32> to vector<2x192xf32>
    %511 = arith.addf %507, %510 : vector<2x192xf32>
    %512 = vector.extract_strided_slice %511 {offsets = [0, 0], sizes = [2, 64], strides = [1, 1]} : vector<2x192xf32> to vector<2x64xf32>
    %513 = vector.extract_strided_slice %511 {offsets = [0, 64], sizes = [2, 64], strides = [1, 1]} : vector<2x192xf32> to vector<2x64xf32>
    %514 = vector.extract_strided_slice %511 {offsets = [0, 128], sizes = [2, 64], strides = [1, 1]} : vector<2x192xf32> to vector<2x64xf32>
    %515 = vector.shape_cast %512 : vector<2x64xf32> to vector<2x1x64xf32>
    %516 = vector.shape_cast %513 : vector<2x64xf32> to vector<1x2x64xf32>
    %517 = vector.broadcast %515 : vector<2x1x64xf32> to vector<2x2x64xf32>
    %518 = vector.broadcast %516 : vector<1x2x64xf32> to vector<2x2x64xf32>
    %519 = arith.mulf %517, %518 : vector<2x2x64xf32>
    %520 = vector.shape_cast %519 : vector<2x2x64xf32> to vector<4x64xf32>
    %cst_266 = arith.constant dense<0.000000e+00> : vector<4x8xf32>
    %521 = tpu.matmul %520, %34, %cst_266 {dimension_numbers = #tpu.dot_dimension_numbers<[1], [0], [0], [1], [0, 0, 1, 1], [], []>} : vector<4x64xf32>, vector<64x8xf32>, vector<4x8xf32> -> vector<4x8xf32>
    %cst_267 = arith.constant 0.353553385 : f32
    %522 = vector.broadcast %cst_267 : f32 to vector<4x8xf32>
    %523 = arith.mulf %521, %522 : vector<4x8xf32>
    %cst_268 = arith.constant dense<0xFF800000> : vector<8xf32>
    %524 = vector.multi_reduction <maximumf>, %523, %cst_268 [0] : vector<4x8xf32> to vector<8xf32>
    %525 = vector.shape_cast %524 : vector<8xf32> to vector<1x8xf32>
    %526 = vector.broadcast %525 : vector<1x8xf32> to vector<4x8xf32>
    %527 = arith.subf %523, %526 : vector<4x8xf32>
    %528 = math.exp %527 : vector<4x8xf32>
    %529 = vector.shape_cast %528 : vector<4x8xf32> to vector<2x2x8xf32>
    %cst_269 = arith.constant dense<0.000000e+00> : vector<2x8xf32>
    %530 = vector.multi_reduction <add>, %529, %cst_269 [1] : vector<2x2x8xf32> to vector<2x8xf32>
    %531 = vector.shape_cast %530 : vector<2x8xf32> to vector<2x1x8xf32>
    %532 = vector.broadcast %531 : vector<2x1x8xf32> to vector<2x2x8xf32>
    %533 = arith.divf %529, %532 : vector<2x2x8xf32>
    %534 = vector.shape_cast %533 : vector<2x2x8xf32> to vector<4x8xf32>
    %cst_270 = arith.constant dense<0.000000e+00> : vector<4x64xf32>
    %535 = tpu.matmul %534, %35, %cst_270 {dimension_numbers = #tpu.dot_dimension_numbers<[1], [0], [0], [1], [0, 0, 1, 1], [], []>} : vector<4x8xf32>, vector<8x64xf32>, vector<4x64xf32> -> vector<4x64xf32>
    %536 = vector.shape_cast %535 : vector<4x64xf32> to vector<2x2x64xf32>
    %537 = vector.shape_cast %514 : vector<2x64xf32> to vector<1x2x64xf32>
    %538 = vector.broadcast %537 : vector<1x2x64xf32> to vector<2x2x64xf32>
    %539 = arith.mulf %536, %538 : vector<2x2x64xf32>
    %cst_271 = arith.constant dense<0.000000e+00> : vector<2x64xf32>
    %540 = vector.multi_reduction <add>, %539, %cst_271 [1] : vector<2x2x64xf32> to vector<2x64xf32>
    %541 = arith.truncf %540 : vector<2x64xf32> to vector<2x64xbf16>
    %c4_272 = arith.constant 4 : index
    %c0_273 = arith.constant 0 : index
    %c0_274 = arith.constant 0 : index
    %542 = vector.load %arg14[%c4_272, %c0_273, %c0_274] : memref<6x64x64xbf16, #tpu.memory_space<vmem>>, vector<1x64x64xbf16>
    %543 = vector.shape_cast %542 : vector<1x64x64xbf16> to vector<64x64xbf16>
    %cst_275 = arith.constant dense<0.000000e+00> : vector<2x64xf32>
    %544 = tpu.matmul %541, %543, %cst_275 {dimension_numbers = #tpu.dot_dimension_numbers<[1], [0], [0], [1], [0, 0, 1, 1], [], []>} : vector<2x64xbf16>, vector<64x64xbf16>, vector<2x64xf32> -> vector<2x64xf32>
    %c4_276 = arith.constant 4 : index
    %c0_277 = arith.constant 0 : index
    %c0_278 = arith.constant 0 : index
    %545 = vector.load %arg15[%c4_276, %c0_277, %c0_278] : memref<6x1x64xf32, #tpu.memory_space<vmem>>, vector<1x1x64xf32>
    %546 = vector.shape_cast %545 : vector<1x1x64xf32> to vector<1x64xf32>
    %547 = vector.broadcast %546 : vector<1x64xf32> to vector<2x64xf32>
    %548 = arith.addf %544, %547 : vector<2x64xf32>
    %549 = arith.addf %503, %548 : vector<2x64xf32>
    %c4_279 = arith.constant 4 : index
    %c0_280 = arith.constant 0 : index
    %c0_281 = arith.constant 0 : index
    %550 = vector.load %arg16[%c4_279, %c0_280, %c0_281] : memref<6x1x64xf32, #tpu.memory_space<vmem>>, vector<1x1x64xf32>
    %551 = vector.shape_cast %550 : vector<1x1x64xf32> to vector<1x64xf32>
    %c4_282 = arith.constant 4 : index
    %c0_283 = arith.constant 0 : index
    %c0_284 = arith.constant 0 : index
    %552 = vector.load %arg17[%c4_282, %c0_283, %c0_284] : memref<6x1x64xf32, #tpu.memory_space<vmem>>, vector<1x1x64xf32>
    %553 = vector.shape_cast %552 : vector<1x1x64xf32> to vector<1x64xf32>
    %cst_285 = arith.constant dense<0.000000e+00> : vector<2xf32>
    %554 = vector.multi_reduction <add>, %549, %cst_285 [1] : vector<2x64xf32> to vector<2xf32>
    %555 = vector.shape_cast %554 : vector<2xf32> to vector<2x1xf32>
    %cst_286 = arith.constant 6.400000e+01 : f32
    %556 = vector.broadcast %cst_286 : f32 to vector<2x1xf32>
    %557 = arith.divf %555, %556 : vector<2x1xf32>
    %558 = vector.broadcast %557 : vector<2x1xf32> to vector<2x64xf32>
    %559 = arith.subf %549, %558 : vector<2x64xf32>
    %560 = arith.mulf %559, %559 : vector<2x64xf32>
    %cst_287 = arith.constant dense<0.000000e+00> : vector<2xf32>
    %561 = vector.multi_reduction <add>, %560, %cst_287 [1] : vector<2x64xf32> to vector<2xf32>
    %562 = vector.shape_cast %561 : vector<2xf32> to vector<2x1xf32>
    %cst_288 = arith.constant 6.400000e+01 : f32
    %563 = vector.broadcast %cst_288 : f32 to vector<2x1xf32>
    %564 = arith.divf %562, %563 : vector<2x1xf32>
    %565 = vector.broadcast %557 : vector<2x1xf32> to vector<2x64xf32>
    %566 = arith.subf %549, %565 : vector<2x64xf32>
    %cst_289 = arith.constant 9.99999974E-6 : f32
    %567 = vector.broadcast %cst_289 : f32 to vector<2x1xf32>
    %568 = arith.addf %564, %567 : vector<2x1xf32>
    %569 = math.rsqrt %568 : vector<2x1xf32>
    %570 = vector.broadcast %569 : vector<2x1xf32> to vector<2x64xf32>
    %571 = arith.mulf %566, %570 : vector<2x64xf32>
    %572 = vector.broadcast %551 : vector<1x64xf32> to vector<2x64xf32>
    %573 = arith.mulf %571, %572 : vector<2x64xf32>
    %574 = vector.broadcast %553 : vector<1x64xf32> to vector<2x64xf32>
    %575 = arith.addf %573, %574 : vector<2x64xf32>
    %576 = arith.truncf %575 : vector<2x64xf32> to vector<2x64xbf16>
    %c4_290 = arith.constant 4 : index
    %c0_291 = arith.constant 0 : index
    %c0_292 = arith.constant 0 : index
    %577 = vector.load %arg20[%c4_290, %c0_291, %c0_292] : memref<6x64x2048xbf16, #tpu.memory_space<vmem>>, vector<1x64x2048xbf16>
    %578 = vector.shape_cast %577 : vector<1x64x2048xbf16> to vector<64x2048xbf16>
    %cst_293 = arith.constant dense<0.000000e+00> : vector<2x2048xf32>
    %579 = tpu.matmul %576, %578, %cst_293 {dimension_numbers = #tpu.dot_dimension_numbers<[1], [0], [0], [1], [0, 0, 1, 1], [], []>} : vector<2x64xbf16>, vector<64x2048xbf16>, vector<2x2048xf32> -> vector<2x2048xf32>
    %c4_294 = arith.constant 4 : index
    %c0_295 = arith.constant 0 : index
    %c0_296 = arith.constant 0 : index
    %580 = vector.load %arg21[%c4_294, %c0_295, %c0_296] : memref<6x1x2048xf32, #tpu.memory_space<vmem>>, vector<1x1x2048xf32>
    %581 = vector.shape_cast %580 : vector<1x1x2048xf32> to vector<1x2048xf32>
    %582 = vector.broadcast %581 : vector<1x2048xf32> to vector<2x2048xf32>
    %583 = arith.addf %579, %582 : vector<2x2048xf32>
    %cst_297 = arith.constant 0.000000e+00 : f32
    %584 = vector.broadcast %cst_297 : f32 to vector<2x2048xf32>
    %585 = arith.maximumf %583, %584 : vector<2x2048xf32>
    %586 = arith.truncf %585 : vector<2x2048xf32> to vector<2x2048xbf16>
    %c4_298 = arith.constant 4 : index
    %c0_299 = arith.constant 0 : index
    %c0_300 = arith.constant 0 : index
    %587 = vector.load %arg22[%c4_298, %c0_299, %c0_300] : memref<6x2048x64xbf16, #tpu.memory_space<vmem>>, vector<1x2048x64xbf16>
    %588 = vector.shape_cast %587 : vector<1x2048x64xbf16> to vector<2048x64xbf16>
    %cst_301 = arith.constant dense<0.000000e+00> : vector<2x64xf32>
    %589 = tpu.matmul %586, %588, %cst_301 {dimension_numbers = #tpu.dot_dimension_numbers<[1], [0], [0], [1], [0, 0, 1, 1], [], []>} : vector<2x2048xbf16>, vector<2048x64xbf16>, vector<2x64xf32> -> vector<2x64xf32>
    %c4_302 = arith.constant 4 : index
    %c0_303 = arith.constant 0 : index
    %c0_304 = arith.constant 0 : index
    %590 = vector.load %arg23[%c4_302, %c0_303, %c0_304] : memref<6x1x64xf32, #tpu.memory_space<vmem>>, vector<1x1x64xf32>
    %591 = vector.shape_cast %590 : vector<1x1x64xf32> to vector<1x64xf32>
    %592 = vector.broadcast %591 : vector<1x64xf32> to vector<2x64xf32>
    %593 = arith.addf %589, %592 : vector<2x64xf32>
    %594 = arith.addf %575, %593 : vector<2x64xf32>
    %c4_305 = arith.constant 4 : index
    %c0_306 = arith.constant 0 : index
    %c0_307 = arith.constant 0 : index
    %595 = vector.load %arg18[%c4_305, %c0_306, %c0_307] : memref<6x1x64xf32, #tpu.memory_space<vmem>>, vector<1x1x64xf32>
    %596 = vector.shape_cast %595 : vector<1x1x64xf32> to vector<1x64xf32>
    %c4_308 = arith.constant 4 : index
    %c0_309 = arith.constant 0 : index
    %c0_310 = arith.constant 0 : index
    %597 = vector.load %arg19[%c4_308, %c0_309, %c0_310] : memref<6x1x64xf32, #tpu.memory_space<vmem>>, vector<1x1x64xf32>
    %598 = vector.shape_cast %597 : vector<1x1x64xf32> to vector<1x64xf32>
    %cst_311 = arith.constant dense<0.000000e+00> : vector<2xf32>
    %599 = vector.multi_reduction <add>, %594, %cst_311 [1] : vector<2x64xf32> to vector<2xf32>
    %600 = vector.shape_cast %599 : vector<2xf32> to vector<2x1xf32>
    %cst_312 = arith.constant 6.400000e+01 : f32
    %601 = vector.broadcast %cst_312 : f32 to vector<2x1xf32>
    %602 = arith.divf %600, %601 : vector<2x1xf32>
    %603 = vector.broadcast %602 : vector<2x1xf32> to vector<2x64xf32>
    %604 = arith.subf %594, %603 : vector<2x64xf32>
    %605 = arith.mulf %604, %604 : vector<2x64xf32>
    %cst_313 = arith.constant dense<0.000000e+00> : vector<2xf32>
    %606 = vector.multi_reduction <add>, %605, %cst_313 [1] : vector<2x64xf32> to vector<2xf32>
    %607 = vector.shape_cast %606 : vector<2xf32> to vector<2x1xf32>
    %cst_314 = arith.constant 6.400000e+01 : f32
    %608 = vector.broadcast %cst_314 : f32 to vector<2x1xf32>
    %609 = arith.divf %607, %608 : vector<2x1xf32>
    %610 = vector.broadcast %602 : vector<2x1xf32> to vector<2x64xf32>
    %611 = arith.subf %594, %610 : vector<2x64xf32>
    %cst_315 = arith.constant 9.99999974E-6 : f32
    %612 = vector.broadcast %cst_315 : f32 to vector<2x1xf32>
    %613 = arith.addf %609, %612 : vector<2x1xf32>
    %614 = math.rsqrt %613 : vector<2x1xf32>
    %615 = vector.broadcast %614 : vector<2x1xf32> to vector<2x64xf32>
    %616 = arith.mulf %611, %615 : vector<2x64xf32>
    %617 = vector.broadcast %596 : vector<1x64xf32> to vector<2x64xf32>
    %618 = arith.mulf %616, %617 : vector<2x64xf32>
    %619 = vector.broadcast %598 : vector<1x64xf32> to vector<2x64xf32>
    %620 = arith.addf %618, %619 : vector<2x64xf32>
    %621 = arith.truncf %620 : vector<2x64xf32> to vector<2x64xbf16>
    %c5 = arith.constant 5 : index
    %c0_316 = arith.constant 0 : index
    %c0_317 = arith.constant 0 : index
    %622 = vector.load %arg12[%c5, %c0_316, %c0_317] : memref<6x64x192xbf16, #tpu.memory_space<vmem>>, vector<1x64x192xbf16>
    %623 = vector.shape_cast %622 : vector<1x64x192xbf16> to vector<64x192xbf16>
    %cst_318 = arith.constant dense<0.000000e+00> : vector<2x192xf32>
    %624 = tpu.matmul %621, %623, %cst_318 {dimension_numbers = #tpu.dot_dimension_numbers<[1], [0], [0], [1], [0, 0, 1, 1], [], []>} : vector<2x64xbf16>, vector<64x192xbf16>, vector<2x192xf32> -> vector<2x192xf32>
    %c5_319 = arith.constant 5 : index
    %c0_320 = arith.constant 0 : index
    %c0_321 = arith.constant 0 : index
    %625 = vector.load %arg13[%c5_319, %c0_320, %c0_321] : memref<6x1x192xf32, #tpu.memory_space<vmem>>, vector<1x1x192xf32>
    %626 = vector.shape_cast %625 : vector<1x1x192xf32> to vector<1x192xf32>
    %627 = vector.broadcast %626 : vector<1x192xf32> to vector<2x192xf32>
    %628 = arith.addf %624, %627 : vector<2x192xf32>
    %629 = vector.extract_strided_slice %628 {offsets = [0, 0], sizes = [2, 64], strides = [1, 1]} : vector<2x192xf32> to vector<2x64xf32>
    %630 = vector.extract_strided_slice %628 {offsets = [0, 64], sizes = [2, 64], strides = [1, 1]} : vector<2x192xf32> to vector<2x64xf32>
    %631 = vector.extract_strided_slice %628 {offsets = [0, 128], sizes = [2, 64], strides = [1, 1]} : vector<2x192xf32> to vector<2x64xf32>
    %632 = vector.shape_cast %629 : vector<2x64xf32> to vector<2x1x64xf32>
    %633 = vector.shape_cast %630 : vector<2x64xf32> to vector<1x2x64xf32>
    %634 = vector.broadcast %632 : vector<2x1x64xf32> to vector<2x2x64xf32>
    %635 = vector.broadcast %633 : vector<1x2x64xf32> to vector<2x2x64xf32>
    %636 = arith.mulf %634, %635 : vector<2x2x64xf32>
    %637 = vector.shape_cast %636 : vector<2x2x64xf32> to vector<4x64xf32>
    %cst_322 = arith.constant dense<0.000000e+00> : vector<4x8xf32>
    %638 = tpu.matmul %637, %34, %cst_322 {dimension_numbers = #tpu.dot_dimension_numbers<[1], [0], [0], [1], [0, 0, 1, 1], [], []>} : vector<4x64xf32>, vector<64x8xf32>, vector<4x8xf32> -> vector<4x8xf32>
    %cst_323 = arith.constant 0.353553385 : f32
    %639 = vector.broadcast %cst_323 : f32 to vector<4x8xf32>
    %640 = arith.mulf %638, %639 : vector<4x8xf32>
    %cst_324 = arith.constant dense<0xFF800000> : vector<8xf32>
    %641 = vector.multi_reduction <maximumf>, %640, %cst_324 [0] : vector<4x8xf32> to vector<8xf32>
    %642 = vector.shape_cast %641 : vector<8xf32> to vector<1x8xf32>
    %643 = vector.broadcast %642 : vector<1x8xf32> to vector<4x8xf32>
    %644 = arith.subf %640, %643 : vector<4x8xf32>
    %645 = math.exp %644 : vector<4x8xf32>
    %646 = vector.shape_cast %645 : vector<4x8xf32> to vector<2x2x8xf32>
    %cst_325 = arith.constant dense<0.000000e+00> : vector<2x8xf32>
    %647 = vector.multi_reduction <add>, %646, %cst_325 [1] : vector<2x2x8xf32> to vector<2x8xf32>
    %648 = vector.shape_cast %647 : vector<2x8xf32> to vector<2x1x8xf32>
    %649 = vector.broadcast %648 : vector<2x1x8xf32> to vector<2x2x8xf32>
    %650 = arith.divf %646, %649 : vector<2x2x8xf32>
    %651 = vector.shape_cast %650 : vector<2x2x8xf32> to vector<4x8xf32>
    %cst_326 = arith.constant dense<0.000000e+00> : vector<4x64xf32>
    %652 = tpu.matmul %651, %35, %cst_326 {dimension_numbers = #tpu.dot_dimension_numbers<[1], [0], [0], [1], [0, 0, 1, 1], [], []>} : vector<4x8xf32>, vector<8x64xf32>, vector<4x64xf32> -> vector<4x64xf32>
    %653 = vector.shape_cast %652 : vector<4x64xf32> to vector<2x2x64xf32>
    %654 = vector.shape_cast %631 : vector<2x64xf32> to vector<1x2x64xf32>
    %655 = vector.broadcast %654 : vector<1x2x64xf32> to vector<2x2x64xf32>
    %656 = arith.mulf %653, %655 : vector<2x2x64xf32>
    %cst_327 = arith.constant dense<0.000000e+00> : vector<2x64xf32>
    %657 = vector.multi_reduction <add>, %656, %cst_327 [1] : vector<2x2x64xf32> to vector<2x64xf32>
    %658 = arith.truncf %657 : vector<2x64xf32> to vector<2x64xbf16>
    %c5_328 = arith.constant 5 : index
    %c0_329 = arith.constant 0 : index
    %c0_330 = arith.constant 0 : index
    %659 = vector.load %arg14[%c5_328, %c0_329, %c0_330] : memref<6x64x64xbf16, #tpu.memory_space<vmem>>, vector<1x64x64xbf16>
    %660 = vector.shape_cast %659 : vector<1x64x64xbf16> to vector<64x64xbf16>
    %cst_331 = arith.constant dense<0.000000e+00> : vector<2x64xf32>
    %661 = tpu.matmul %658, %660, %cst_331 {dimension_numbers = #tpu.dot_dimension_numbers<[1], [0], [0], [1], [0, 0, 1, 1], [], []>} : vector<2x64xbf16>, vector<64x64xbf16>, vector<2x64xf32> -> vector<2x64xf32>
    %c5_332 = arith.constant 5 : index
    %c0_333 = arith.constant 0 : index
    %c0_334 = arith.constant 0 : index
    %662 = vector.load %arg15[%c5_332, %c0_333, %c0_334] : memref<6x1x64xf32, #tpu.memory_space<vmem>>, vector<1x1x64xf32>
    %663 = vector.shape_cast %662 : vector<1x1x64xf32> to vector<1x64xf32>
    %664 = vector.broadcast %663 : vector<1x64xf32> to vector<2x64xf32>
    %665 = arith.addf %661, %664 : vector<2x64xf32>
    %666 = arith.addf %620, %665 : vector<2x64xf32>
    %c5_335 = arith.constant 5 : index
    %c0_336 = arith.constant 0 : index
    %c0_337 = arith.constant 0 : index
    %667 = vector.load %arg16[%c5_335, %c0_336, %c0_337] : memref<6x1x64xf32, #tpu.memory_space<vmem>>, vector<1x1x64xf32>
    %668 = vector.shape_cast %667 : vector<1x1x64xf32> to vector<1x64xf32>
    %c5_338 = arith.constant 5 : index
    %c0_339 = arith.constant 0 : index
    %c0_340 = arith.constant 0 : index
    %669 = vector.load %arg17[%c5_338, %c0_339, %c0_340] : memref<6x1x64xf32, #tpu.memory_space<vmem>>, vector<1x1x64xf32>
    %670 = vector.shape_cast %669 : vector<1x1x64xf32> to vector<1x64xf32>
    %cst_341 = arith.constant dense<0.000000e+00> : vector<2xf32>
    %671 = vector.multi_reduction <add>, %666, %cst_341 [1] : vector<2x64xf32> to vector<2xf32>
    %672 = vector.shape_cast %671 : vector<2xf32> to vector<2x1xf32>
    %cst_342 = arith.constant 6.400000e+01 : f32
    %673 = vector.broadcast %cst_342 : f32 to vector<2x1xf32>
    %674 = arith.divf %672, %673 : vector<2x1xf32>
    %675 = vector.broadcast %674 : vector<2x1xf32> to vector<2x64xf32>
    %676 = arith.subf %666, %675 : vector<2x64xf32>
    %677 = arith.mulf %676, %676 : vector<2x64xf32>
    %cst_343 = arith.constant dense<0.000000e+00> : vector<2xf32>
    %678 = vector.multi_reduction <add>, %677, %cst_343 [1] : vector<2x64xf32> to vector<2xf32>
    %679 = vector.shape_cast %678 : vector<2xf32> to vector<2x1xf32>
    %cst_344 = arith.constant 6.400000e+01 : f32
    %680 = vector.broadcast %cst_344 : f32 to vector<2x1xf32>
    %681 = arith.divf %679, %680 : vector<2x1xf32>
    %682 = vector.broadcast %674 : vector<2x1xf32> to vector<2x64xf32>
    %683 = arith.subf %666, %682 : vector<2x64xf32>
    %cst_345 = arith.constant 9.99999974E-6 : f32
    %684 = vector.broadcast %cst_345 : f32 to vector<2x1xf32>
    %685 = arith.addf %681, %684 : vector<2x1xf32>
    %686 = math.rsqrt %685 : vector<2x1xf32>
    %687 = vector.broadcast %686 : vector<2x1xf32> to vector<2x64xf32>
    %688 = arith.mulf %683, %687 : vector<2x64xf32>
    %689 = vector.broadcast %668 : vector<1x64xf32> to vector<2x64xf32>
    %690 = arith.mulf %688, %689 : vector<2x64xf32>
    %691 = vector.broadcast %670 : vector<1x64xf32> to vector<2x64xf32>
    %692 = arith.addf %690, %691 : vector<2x64xf32>
    %693 = arith.truncf %692 : vector<2x64xf32> to vector<2x64xbf16>
    %c5_346 = arith.constant 5 : index
    %c0_347 = arith.constant 0 : index
    %c0_348 = arith.constant 0 : index
    %694 = vector.load %arg20[%c5_346, %c0_347, %c0_348] : memref<6x64x2048xbf16, #tpu.memory_space<vmem>>, vector<1x64x2048xbf16>
    %695 = vector.shape_cast %694 : vector<1x64x2048xbf16> to vector<64x2048xbf16>
    %cst_349 = arith.constant dense<0.000000e+00> : vector<2x2048xf32>
    %696 = tpu.matmul %693, %695, %cst_349 {dimension_numbers = #tpu.dot_dimension_numbers<[1], [0], [0], [1], [0, 0, 1, 1], [], []>} : vector<2x64xbf16>, vector<64x2048xbf16>, vector<2x2048xf32> -> vector<2x2048xf32>
    %c5_350 = arith.constant 5 : index
    %c0_351 = arith.constant 0 : index
    %c0_352 = arith.constant 0 : index
    %697 = vector.load %arg21[%c5_350, %c0_351, %c0_352] : memref<6x1x2048xf32, #tpu.memory_space<vmem>>, vector<1x1x2048xf32>
    %698 = vector.shape_cast %697 : vector<1x1x2048xf32> to vector<1x2048xf32>
    %699 = vector.broadcast %698 : vector<1x2048xf32> to vector<2x2048xf32>
    %700 = arith.addf %696, %699 : vector<2x2048xf32>
    %cst_353 = arith.constant 0.000000e+00 : f32
    %701 = vector.broadcast %cst_353 : f32 to vector<2x2048xf32>
    %702 = arith.maximumf %700, %701 : vector<2x2048xf32>
    %703 = arith.truncf %702 : vector<2x2048xf32> to vector<2x2048xbf16>
    %c5_354 = arith.constant 5 : index
    %c0_355 = arith.constant 0 : index
    %c0_356 = arith.constant 0 : index
    %704 = vector.load %arg22[%c5_354, %c0_355, %c0_356] : memref<6x2048x64xbf16, #tpu.memory_space<vmem>>, vector<1x2048x64xbf16>
    %705 = vector.shape_cast %704 : vector<1x2048x64xbf16> to vector<2048x64xbf16>
    %cst_357 = arith.constant dense<0.000000e+00> : vector<2x64xf32>
    %706 = tpu.matmul %703, %705, %cst_357 {dimension_numbers = #tpu.dot_dimension_numbers<[1], [0], [0], [1], [0, 0, 1, 1], [], []>} : vector<2x2048xbf16>, vector<2048x64xbf16>, vector<2x64xf32> -> vector<2x64xf32>
    %c5_358 = arith.constant 5 : index
    %c0_359 = arith.constant 0 : index
    %c0_360 = arith.constant 0 : index
    %707 = vector.load %arg23[%c5_358, %c0_359, %c0_360] : memref<6x1x64xf32, #tpu.memory_space<vmem>>, vector<1x1x64xf32>
    %708 = vector.shape_cast %707 : vector<1x1x64xf32> to vector<1x64xf32>
    %709 = vector.broadcast %708 : vector<1x64xf32> to vector<2x64xf32>
    %710 = arith.addf %706, %709 : vector<2x64xf32>
    %711 = arith.addf %692, %710 : vector<2x64xf32>
    %c5_361 = arith.constant 5 : index
    %c0_362 = arith.constant 0 : index
    %c0_363 = arith.constant 0 : index
    %712 = vector.load %arg18[%c5_361, %c0_362, %c0_363] : memref<6x1x64xf32, #tpu.memory_space<vmem>>, vector<1x1x64xf32>
    %713 = vector.shape_cast %712 : vector<1x1x64xf32> to vector<1x64xf32>
    %c5_364 = arith.constant 5 : index
    %c0_365 = arith.constant 0 : index
    %c0_366 = arith.constant 0 : index
    %714 = vector.load %arg19[%c5_364, %c0_365, %c0_366] : memref<6x1x64xf32, #tpu.memory_space<vmem>>, vector<1x1x64xf32>
    %715 = vector.shape_cast %714 : vector<1x1x64xf32> to vector<1x64xf32>
    %cst_367 = arith.constant dense<0.000000e+00> : vector<2xf32>
    %716 = vector.multi_reduction <add>, %711, %cst_367 [1] : vector<2x64xf32> to vector<2xf32>
    %717 = vector.shape_cast %716 : vector<2xf32> to vector<2x1xf32>
    %cst_368 = arith.constant 6.400000e+01 : f32
    %718 = vector.broadcast %cst_368 : f32 to vector<2x1xf32>
    %719 = arith.divf %717, %718 : vector<2x1xf32>
    %720 = vector.broadcast %719 : vector<2x1xf32> to vector<2x64xf32>
    %721 = arith.subf %711, %720 : vector<2x64xf32>
    %722 = arith.mulf %721, %721 : vector<2x64xf32>
    %cst_369 = arith.constant dense<0.000000e+00> : vector<2xf32>
    %723 = vector.multi_reduction <add>, %722, %cst_369 [1] : vector<2x64xf32> to vector<2xf32>
    %724 = vector.shape_cast %723 : vector<2xf32> to vector<2x1xf32>
    %cst_370 = arith.constant 6.400000e+01 : f32
    %725 = vector.broadcast %cst_370 : f32 to vector<2x1xf32>
    %726 = arith.divf %724, %725 : vector<2x1xf32>
    %727 = vector.broadcast %719 : vector<2x1xf32> to vector<2x64xf32>
    %728 = arith.subf %711, %727 : vector<2x64xf32>
    %cst_371 = arith.constant 9.99999974E-6 : f32
    %729 = vector.broadcast %cst_371 : f32 to vector<2x1xf32>
    %730 = arith.addf %726, %729 : vector<2x1xf32>
    %731 = math.rsqrt %730 : vector<2x1xf32>
    %732 = vector.broadcast %731 : vector<2x1xf32> to vector<2x64xf32>
    %733 = arith.mulf %728, %732 : vector<2x64xf32>
    %734 = vector.broadcast %713 : vector<1x64xf32> to vector<2x64xf32>
    %735 = arith.mulf %733, %734 : vector<2x64xf32>
    %736 = vector.broadcast %715 : vector<1x64xf32> to vector<2x64xf32>
    %737 = arith.addf %735, %736 : vector<2x64xf32>
    %738 = arith.truncf %737 : vector<2x64xf32> to vector<2x64xbf16>
    %c0_372 = arith.constant 0 : index
    %c0_373 = arith.constant 0 : index
    %739 = vector.load %arg24[%c0_372, %c0_373] : memref<64x512xbf16, #tpu.memory_space<vmem>>, vector<64x512xbf16>
    %cst_374 = arith.constant dense<0.000000e+00> : vector<2x512xf32>
    %740 = tpu.matmul %738, %739, %cst_374 {dimension_numbers = #tpu.dot_dimension_numbers<[1], [0], [0], [1], [0, 0, 1, 1], [], []>} : vector<2x64xbf16>, vector<64x512xbf16>, vector<2x512xf32> -> vector<2x512xf32>
    %c0_375 = arith.constant 0 : index
    %c0_376 = arith.constant 0 : index
    %741 = vector.load %arg25[%c0_375, %c0_376] : memref<1x512xf32, #tpu.memory_space<vmem>>, vector<1x512xf32>
    %742 = vector.broadcast %741 : vector<1x512xf32> to vector<2x512xf32>
    %743 = arith.addf %740, %742 : vector<2x512xf32>
    %c0_377 = arith.constant 0 : index
    %c0_378 = arith.constant 0 : index
    %744 = vector.load %arg28[%c0_377, %c0_378] : memref<2x512xf32, #tpu.memory_space<vmem>>, vector<2x512xf32>
    tpu.vector_store %arg28[%c0_377, %c0_378], %743 {strides = array<i32>} : memref<2x512xf32, #tpu.memory_space<vmem>>, vector<2x512xf32>,
    return
  }
}

</mosaic_0001>

<bundles_post_ra>
// kernel: cvae_forward.1
= control target key start
LH: loop header
LB: loop body
LE: loop exit
PB: predicated region body
PF: predicated region fallthrough
CT: control target
= control target key end

     0   :  { %s27863_s0 = inlined_call_operand.vmem [shape: f32[2,8,64], index: 0, kind: input, shape index: {}]   ;;  %s27864_s1 = inlined_call_operand.vmem [shape: f32[2,32], index: 1, kind: input, shape index: {}]   ;;  %s27865_s2 = inlined_call_operand.vmem [shape: f32[64,64], index: 2, kind: input, shape index: {}]   ;;  %s27866_s3 = inlined_call_operand.vmem [shape: f32[1,64], index: 3, kind: input, shape index: {}]   ;;  %s27867_s4 = inlined_call_operand.vmem [shape: f32[64,32], index: 4, kind: input, shape index: {}]   ;;  %s27868_s5 = inlined_call_operand.vmem [shape: f32[1,32], index: 5, kind: input, shape index: {}]   ;;  %s27869_s6 = inlined_call_operand.vmem [shape: f32[64,32], index: 6, kind: input, shape index: {}]   ;;  %s27870_s7 = inlined_call_operand.vmem [shape: f32[1,32], index: 7, kind: input, shape index: {}]   ;;  %s27871_s8 = inlined_call_operand.vmem [shape: f32[32,64], index: 8, kind: input, shape index: {}]   ;;  %s27872_s9 = inlined_call_operand.vmem [shape: f32[1,64], index: 9, kind: input, shape index: {}]   ;;  %s27873_s10 = inlined_call_operand.vmem [shape: f32[64,8], index: 10, kind: input, shape index: {}]   ;;  %s27874_s11 = inlined_call_operand.vmem [shape: f32[8,64], index: 11, kind: input, shape index: {}]   ;;  %s27875_s12 = inlined_call_operand.vmem [shape: bf16[6,64,192], index: 12, kind: input, shape index: {}]   ;;  %s27876_s13 = inlined_call_operand.vmem [shape: f32[6,1,192], index: 13, kind: input, shape index: {}]   ;;  %s27877_s14 = inlined_call_operand.vmem [shape: bf16[6,64,64], index: 14, kind: input, shape index: {}]   ;;  %s27878_s15 = inlined_call_operand.vmem [shape: f32[6,1,64], index: 15, kind: input, shape index: {}]   ;;  %s27879_s16 = inlined_call_operand.vmem [shape: f32[6,1,64], index: 16, kind: input, shape index: {}]   ;;  %s27880_s17 = inlined_call_operand.vmem [shape: f32[6,1,64], index: 17, kind: input, shape index: {}]   ;;  %s27881_s18 = inlined_call_operand.vmem [shape: f32[6,1,64], index: 18, kind: input, shape index: {}]   ;;  %s27882_s19 = inlined_call_operand.vmem [shape: f32[6,1,64], index: 19, kind: input, shape index: {}]   ;;  %s27883_s20 = inlined_call_operand.vmem [shape: bf16[6,64,2048], index: 20, kind: input, shape index: {}]   ;;  %s27884_s21 = inlined_call_operand.vmem [shape: f32[6,1,2048], index: 21, kind: input, shape index: {}]   ;;  %s27885_s22 = inlined_call_operand.vmem [shape: bf16[6,2048,64], index: 22, kind: input, shape index: {}]   ;;  %s27886_s23 = inlined_call_operand.vmem [shape: f32[6,1,64], index: 23, kind: input, shape index: {}]   ;;  %s27887_s24 = inlined_call_operand.vmem [shape: bf16[64,512], index: 24, kind: input, shape index: {}]   ;;  %s27888_s25 = inlined_call_operand.vmem [shape: f32[1,512], index: 25, kind: input, shape index: {}]   ;;  %s27889_s26 = inlined_call_operand.hbm [shape: f32[2,32], index: 26, kind: output, shape index: {0}]   ;;  %s27890_s27 = inlined_call_operand.hbm [shape: f32[2,32], index: 27, kind: output, shape index: {1}]   ;;  %s27891_s28 = inlined_call_operand.vmem [shape: f32[2,512], index: 28, kind: output, shape index: {2}]  }
   0x1   :  { %27900 = sst [smem:[#allocation8_spill]] %s27863_s0 }
   0x2   :  { %27901 = sst [smem:[#allocation9_spill]] %s27864_s1 }
   0x3   :  { %27902 = sst [smem:[#allocation10_spill]] %s27865_s2 }
   0x4   :  { %27903 = sst [smem:[#allocation11_spill]] %s27866_s3 }
   0x5   :  { %27904 = sst [smem:[#allocation12_spill]] %s27867_s4 }
   0x6   :  { %27905 = sst [smem:[#allocation13_spill]] %s27868_s5 }
   0x7   :  { %27906 = sst [smem:[#allocation14_spill]] %s27869_s6 }
   0x8   :  { %27907 = sst [smem:[#allocation15_spill]] %s27870_s7 }
   0x9   :  { %27908 = sst [smem:[#allocation16_spill]] %s27871_s8 }
   0xa   :  { %27909 = sst [smem:[#allocation17_spill]] %s27872_s9 }
   0xb   :  { %27910 = sst [smem:[#allocation18_spill]] %s27873_s10 }
   0xc   :  { %27911 = sst [smem:[#allocation19_spill]] %s27874_s11 }
   0xd   :  { %27912 = sst [smem:[#allocation20_spill]] %s27875_s12 }
   0xe   :  { %34 = vsyncpa [#allocation3], 0  ;;  %s27913_s9 = sld [smem:[#allocation10_spill]]  ;;  %v22720_v3 = vmov 0.0|0.0   ;;  %vm22721_vm0 = vmmov 0   ;;  %v22722_v6 = vmov 0.0  }
   0xf   :  { %21594 = vmatprep.subr.bf16.mxu0 %v22720_v3  ;;  %21326 = vmatprep.mubr.msk.f32.mxu0 %vm22721_vm0, %v22722_v6  ;;  %vm91_vm1 = vcmask 523264   ;;  %s27914_s7 = sld [smem:[#allocation8_spill]]  ;;  %s27915_s5 = sld [smem:[#allocation12_spill]]  ;;  %vm126_vm2 = vcmask 1041409   ;;  %vm465_vm3 = vcmask 254976   ;;  %vm391_vm4 = vcmask 261120  }
  0x10   :  { %21606 = vmatprep.subr.bf16.mxu1 %v22720_v3  ;;  %21345 = vmatprep.mubr.msk.f32.mxu1 %vm22721_vm0, %v22722_v6  ;;  %s27916_s29 = sld [smem:[#allocation14_spill]]  ;;  %s27917_s3 = sld [smem:[#allocation11_spill]] }
  0x11   :  { %s27918_s6 = sld [smem:[#allocation16_spill]]  ;;  %s27919_s4 = sld [smem:[#allocation20_spill]] }
  0x12   :  { %s27921_s10 = sld [smem:[#allocation15_spill]] }
  0x14   :  { %v109_v0 = vld [vmem:[%s27913_s9] sm:$0xff]  ;;  %v110_v1 = vld [vmem:[%s27913_s9 + $0x8] sm:$0xff]  ;;  %v111_v2 = vld [vmem:[%s27913_s9 + $0x10] sm:$0xff] }
  0x15   :  { %v21595_v4 = vpack.c.bf16 %v110_v1, %v109_v0  ;;  %v112_v5 = vld [vmem:[%s27913_s9 + $0x18] sm:$0xff]  ;;  %v89_v7 = vld [vmem:[%s27914_s7] sm:$0xff]  ;;  %v90_v9 = vld [vmem:[%s27914_s7 + $0x8] sm:$0xff] }
  0x16   :  { %v21598_v8 = vpack.c.bf16 %v112_v5, %v111_v2  ;;  %v92_v10 = vsel %vm91_vm1, %v89_v7, 0.0  ;;  %v201_v11 = vld [vmem:[%s27915_s5] sm:$0xff]  ;;  %v202_v12 = vld [vmem:[%s27915_s5 + $0x8] sm:$0xff]  ;;  %v99_v16 = vsel %vm91_vm1, %v90_v9, 0.0  ;;  %v203_v18 = vld [vmem:[%s27915_s5 + $0x10] sm:$0xff] }
  0x17   :  { %21596 = vmatpush3.bf16.msra.mxu0 %v21595_v4  ;;  %v113_v13 = vld [vmem:[%s27913_s9 + $0x20] sm:$0xff]  ;;  %v114_v14 = vld [vmem:[%s27913_s9 + $0x28] sm:$0xff]  ;;  %v93_v15 = vrot.slane %v92_v10, 4  ;;  %v21607_v17 = vpack.c.bf16 %v202_v12, %v201_v11  ;;  %v100_v19 = vrot.slane %v99_v16, 4  ;;  %v204_v20 = vld [vmem:[%s27915_s5 + $0x18] sm:$0xff] }
  0x18   :  { %21597 = vmatprep.subr.bf16.mxu0 %v22720_v3  ;;  %v115_v21 = vld [vmem:[%s27913_s9 + $0x30] sm:$0xff]  ;;  %v116_v22 = vld [vmem:[%s27913_s9 + $0x38] sm:$0xff]  ;;  %v21610_v24 = vpack.c.bf16 %v204_v20, %v203_v18  ;;  %v21601_v25 = vpack.c.bf16 %v114_v14, %v113_v13  ;;  %v205_v27 = vld [vmem:[%s27915_s5 + $0x20] sm:$0xff]  ;;  %s27922_s9 = sld [smem:[#allocation9_spill]] }
  0x19   :  { %v94_v23 = vadd.f32 %v93_v15, %v92_v10  ;;  %21608 = vmatpush3.bf16.msra.mxu1 %v21607_v17  ;;  %v101_v26 = vadd.f32 %v100_v19, %v99_v16  ;;  %v206_v28 = vld [vmem:[%s27915_s5 + $0x28] sm:$0xff]  ;;  %v21604_v33 = vpack.c.bf16 %v116_v22, %v115_v21  ;;  %v289_v36 = vld [vmem:[%s27916_s29] sm:$0xff]  ;;  %v291_v42 = vld [vmem:[%s27916_s29 + $0x10] sm:$0xff] }
  0x1a   :  { %21609 = vmatprep.subr.bf16.mxu1 %v22720_v3  ;;  %v21613_v32 = vpack.c.bf16 %v206_v28, %v205_v27  ;;  %v290_v37 = vld [vmem:[%s27916_s29 + $0x8] sm:$0xff]  ;;  %v292_v43 = vld [vmem:[%s27916_s29 + $0x18] sm:$0xff]  ;;  %v293_v47 = vld [vmem:[%s27916_s29 + $0x20] sm:$0xff]  ;;  %v22723_v28 = vmov 0  }
  0x1b   :  { %21599 = vmatpush3.bf16.msra.mxu0 %v21598_v8  ;;  %v95_v29 = vrot.slane %v94_v23, 2  ;;  %v102_v30 = vrot.slane %v101_v26, 2  ;;  %v21619_v45 = vpack.c.bf16 %v290_v37, %v289_v36  ;;  %v294_v48 = vld [vmem:[%s27916_s29 + $0x28] sm:$0xff]  ;;  %v21622_v49 = vpack.c.bf16 %v292_v43, %v291_v42  ;;  %v207_v51 = vld [vmem:[%s27915_s5 + $0x30] sm:$0xff]  ;;  %v208_v52 = vld [vmem:[%s27915_s5 + $0x38] sm:$0xff] }
  0x1c   :  { %21600 = vmatprep.subr.bf16.mxu0 %v22720_v3  ;;  %v21625_v50 = vpack.c.bf16 %v294_v48, %v293_v47  ;;  %v295_v53 = vld [vmem:[%s27916_s29 + $0x30] sm:$0xff]  ;;  %v21616_v54 = vpack.c.bf16 %v208_v52, %v207_v51  ;;  %v296_v55 = vld [vmem:[%s27916_s29 + $0x38] sm:$0xff]  ;;  %v17043_v57 = vld [vmem:[%s27917_s3] ss:$0 sm:$0xff]  ;;  %s27920_s3 = sld [smem:[#allocation13_spill]] }
  0x1d   :  { %v96_v31 = vadd.f32 %v95_v29, %v94_v23  ;;  %21611 = vmatpush3.bf16.msra.mxu1 %v21610_v24  ;;  %v103_v34 = vadd.f32 %v102_v30, %v101_v26  ;;  %v21628_v56 = vpack.c.bf16 %v296_v55, %v295_v53  ;;  %v380_v62 = vld [vmem:[%s27918_s6] sm:$0xff]  ;;  %v381_v63 = vld [vmem:[%s27918_s6 + $0x8] sm:$0xff]  ;;  %v382_v0 = vld [vmem:[%s27918_s6 + $0x10] sm:$0xff] }
  0x1e   :  { %21612 = vmatprep.subr.bf16.mxu1 %v22720_v3  ;;  %v21631_v1 = vpack.c.bf16 %v381_v63, %v380_v62  ;;  %v383_v2 = vld [vmem:[%s27918_s6 + $0x18] sm:$0xff]  ;;  %v21719_v5 = vld [vmem:[%s27919_s4 + $0x4] ss:$8 sps:$4 sm:$0xff]   ;;  %v17047_v8 = vld [vmem:[%s27921_s10] ss:$0 sm:$0xff] }
  0x1f   :  { %21602 = vmatpush3.bf16.msra.mxu0 %v21601_v25  ;;  %v97_v35 = vrot.slane %v96_v31, 1  ;;  %v104_v38 = vrot.slane %v103_v34, 1  ;;  %v21634_v4 = vpack.c.bf16 %v383_v2, %v382_v0  ;;  %v374_v17 = vld [vmem:[%s27922_s9] sm:$0x3]  ;;  %v21722_v21 = vld [vmem:[%s27919_s4 + $0x14] ss:$8 sps:$4 sm:$0xff]  }
  0x20   :  { %21603 = vmatprep.subr.bf16.mxu0 %v22720_v3  ;;  %v21717_v19 = vld [vmem:[%s27919_s4] ss:$8 sps:$4 sm:$0xff]   ;;  %v21720_v23 = vld [vmem:[%s27919_s4 + $0x10] ss:$8 sps:$4 sm:$0xff]   ;;  %v21725_v24 = vld [vmem:[%s27919_s4 + $0x24] ss:$8 sps:$4 sm:$0xff]  }
  0x21   :  { %v98_v39 = vadd.f32 %v97_v35, %v96_v31  ;;  %21614 = vmatpush3.bf16.msra.mxu1 %v21613_v32  ;;  %v105_v40 = vadd.f32 %v104_v38, %v103_v34  ;;  %v21723_v25 = vld [vmem:[%s27919_s4 + $0x20] ss:$8 sps:$4 sm:$0xff]   ;;  %v21728_v26 = vld [vmem:[%s27919_s4 + $0x34] ss:$8 sps:$4 sm:$0xff]   ;;  %v21726_v27 = vld [vmem:[%s27919_s4 + $0x30] ss:$8 sps:$4 sm:$0xff]  }
  0x22   :  { %21615 = vmatprep.subr.bf16.mxu1 %v22720_v3  ;;  %v17045_v7 = vld [vmem:[%s27920_s3] ss:$0 sm:$0xff] }
  0x23   :  { %21605 = vmatpush3.bf16.msra.mxu0 %v21604_v33  ;;  %v107_v41 = vmul.f32 0.125, %v98_v39  ;;  %v108_v44 = vmul.f32 0.125, %v105_v40 }
  0x24   :  { %21618 = vmatprep.subr.bf16.mxu0 %v22720_v3 }
  0x25   :  { %v127_v46 = vsel %vm126_vm2, %v108_v44, %v107_v41  ;;  %21617 = vmatpush3.bf16.msra.mxu1 %v21616_v54 }
  0x26   :  { %21327 = vmatmul.mubr.msk.f32.vlgmr.msra.gmra.mrb[0].mxu0 %vm91_vm1, %v127_v46  ;;  %21630 = vmatprep.subr.bf16.mxu1 %v22720_v3 }
  0x27   :  { %21620 = vmatpush3.bf16.msra.mxu0 %v21619_v45  ;;  %21364 = vmatprep.mubr.msk.f32.mxu0 %vm22721_vm0, %v22722_v6 }
  0x28   :  { %21621 = vmatprep.subr.bf16.mxu0 %v22720_v3 }
  0x2b   :  { %21623 = vmatpush3.bf16.msra.mxu0 %v21622_v49 }
  0x2c   :  { %21624 = vmatprep.subr.bf16.mxu0 %v22720_v3 }
  0x2f   :  { %21626 = vmatpush3.bf16.msra.mxu0 %v21625_v50 }
  0x30   :  { %21627 = vmatprep.subr.bf16.mxu0 %v22720_v3 }
  0x33   :  { %21629 = vmatpush3.bf16.msra.mxu0 %v21628_v56 }
  0x34   :  { %21636 = vmatprep.subr.bf16.mxu0 %v22720_v3 }
  0xf9   :  { %v196_v58 = vpop.f32.mrb[0].mxu0 }
  0xfa   :  { %v197_v59 = vadd.f32 %v17043_v57, %v196_v58  ;;  %v21328_v60 = vpop.f32.mrb[1].mxu0 }
  0xfc   :  { %v200_v61 = vmax.f32 %v197_v59, 0.0 }
  0xfe   :  { %21346 = vmatmul.mubr.msk.f32.vlgmr.msra.gmra.mrb[0].mxu1 %vm91_vm1, %v200_v61  ;;  %21365 = vmatmul.mubr.msk.f32.vlgmr.msra.gmra.mrb[2].mxu0 %vm91_vm1, %v200_v61 }
  0xff   :  { %21375 = vmatprep.mubr.msk.f32.mxu1 %vm22721_vm0, %v22722_v6  ;;  %21394 = vmatprep.mubr.msk.f32.mxu0 %vm22721_vm0, %v22722_v6 }
 0x100   :  { %21632 = vmatpush3.bf16.msra.mxu1 %v21631_v1 }
 0x101   :  { %21633 = vmatprep.subr.bf16.mxu1 %v22720_v3 }
 0x104   :  { %21635 = vmatpush3.bf16.msra.mxu1 %v21634_v4 }
 0x105   :  { %541 = vmatprep.subr.bf16.mxu1 %v21719_v5 }
 0x1d1   :  { %v285_v9 = vpop.f32.mrb[0].mxu1  ;;  %v370_v10 = vpop.f32.mrb[2].mxu0 }
 0x1d2   :  { %v286_v11 = vadd.f32 %v17045_v7, %v285_v9  ;;  %v371_v12 = vadd.f32 %v17047_v8, %v370_v10  ;;  %v21347_v13 = vpop.f32.mrb[1].mxu1  ;;  %v21366_v14 = vpop.f32.mrb[3].mxu0 }
 0x1d4   :  { %v375_v15 = vmul.f32 0.5, %v371_v12  ;;  %466 = vst.msk [vmem:[#allocation2] sm:$0x3] %vm465_vm3, %v286_v11  ;;  %467 = vst.msk [vmem:[#allocation4] sm:$0x3] %vm465_vm3, %v371_v12 }
 0x1d6   :  { %v376_v16 = vmul.f32 1.442695, %v375_v15 }
 0x1d8   :  { %22605 = vpow2.f32 %v376_v16 }
 0x1e2   :  { %v22606_v18 = vpop.eup %22605 }
 0x1e3   :  { %v378_v20 = vmul.f32 %v22606_v18, %v374_v17 }
 0x1e5   :  { %v379_v22 = vadd.f32 %v378_v20, %v286_v11 }
 0x1e7   :  { %21376 = vmatmul.mubr.msk.f32.vlgmr.msra.gmra.mrb[2].mxu1 %vm391_vm4, %v379_v22 }
 0x1e8   :  { %542 = vmatpush1.bf16.msra.mxu1 %v21717_v19  ;;  %573 = vmatprep.mubr.bf16.mxu1 %v22723_v28 }
 0x1e9   :  { %543 = vmatprep.subr.bf16.mxu1 %v21722_v21 }
 0x1ec   :  { %544 = vmatpush1.bf16.msra.mxu1 %v21720_v23 }
 0x1ed   :  { %545 = vmatprep.subr.bf16.mxu1 %v21725_v24 }
 0x1f0   :  { %546 = vmatpush1.bf16.msra.mxu1 %v21723_v25 }
 0x1f1   :  { %547 = vmatprep.subr.bf16.mxu1 %v21728_v26 }
 0x1f4   :  { %548 = vmatpush1.bf16.msra.mxu1 %v21726_v27 }
 0x1f5   :  { %35 = vsyncpa [#allocation5], 0  ;;  %s27923_s7 = sld [smem:[#allocation17_spill]]  ;;  %s27924_s8 = sld [smem:[#allocation18_spill]]  ;;  %v488_v43 = vlaneseq  ;;  %v23088_v49 = vld [vmem:[%s27876_s13] sm:$0x3] }
 0x1f6   :  { %v22725_v56 = vmov 1966171168   ;;  %v22726_v62 = vmov 1983009808   ;;  %s27925_s6 = sld [smem:[#allocation19_spill]]  ;;  %vm703_vm5 = vcmask 60416  }
 0x1f7   :  { %v23071_v44 = vshrl.u32 %v488_v43, 7  ;;  %v584_v57 = vunpack.c.l.s4 %v22725_v56  ;;  %v624_v63 = vunpack.c.l.s4 %v22726_v62  ;;  %vm725_vm6 = vcmask 58368   ;;  %v21731_v62 = vld [vmem:[%s27877_s14 + $0x10] sm:$0xff]  }
 0x1f8   :  { %vm754_vm7 = vcmask 64512   ;;  %vm840_vm8 = vcmask 517120  }
 0x1f9   :  { %v23082_v48 = vsub.s32 0, %v23071_v44  ;;  %v585_v58 = vunpack.c.0.s8 %v584_v57  ;;  %v625_v2 = vunpack.c.0.s8 %v624_v63  ;;  %v21732_v63 = vld [vmem:[%s27877_s14 + $0x18] sm:$0xff]  }
 0x1fb   :  { %v17049_v29 = vld [vmem:[%s27923_s7] ss:$0 sm:$0xff]  ;;  %v469_v35 = vld [vmem:[%s27924_s8 + $0x8] sm:$0xff]  ;;  %v470_v36 = vld [vmem:[%s27924_s8 + $0x10] sm:$0xff]  ;;  %v491_v50 = vrot.slane %v23088_v49, %v23082_v48  ;;  %v23097_v59 = vsub.s32 %v585_v58, %v23071_v44  ;;  %v23105_v8 = vsub.s32 %v625_v2, %v23071_v44 }
 0x1fc   :  { %v468_v34 = vld [vmem:[%s27924_s8] sm:$0xff]  ;;  %v471_v38 = vld [vmem:[%s27924_s8 + $0x18] sm:$0xff]  ;;  %v473_v41 = vld [vmem:[%s27924_s8 + $0x28] sm:$0xff] }
 0x1fd   :  { %v23050_v37 = vpack.c.bf16 %v469_v35, %v468_v34  ;;  %v23056_v39 = vpack.c.bf16 %v471_v38, %v470_v36  ;;  %v472_v40 = vld [vmem:[%s27924_s8 + $0x20] sm:$0xff]  ;;  %v474_v45 = vld [vmem:[%s27924_s8 + $0x30] sm:$0xff]  ;;  %v475_v46 = vld [vmem:[%s27924_s8 + $0x38] sm:$0xff]  ;;  %s22724_s8 = smov 64  }
 0x1fe   :  { %v23066_v42 = vpack.c.bf16 %v473_v41, %v472_v40  ;;  %v23079_v47 = vpack.c.bf16 %v475_v46, %v474_v45  ;;  %v476_v13 = vld [vmem:[%s27925_s6] sm:$0xff] }
 0x1ff   :  { %21638 = vmatpush3.bf16.msra.mxu0 %v23050_v37 }
 0x200   :  { %21639 = vmatprep.subr.bf16.mxu0 %v22720_v3 }
 0x203   :  { %21641 = vmatpush3.bf16.msra.mxu0 %v23056_v39 }
 0x204   :  { %21642 = vmatprep.subr.bf16.mxu0 %v22720_v3 }
 0x207   :  { %21644 = vmatpush3.bf16.msra.mxu0 %v23066_v42 }
 0x208   :  { %21645 = vmatprep.subr.bf16.mxu0 %v22720_v3 }
 0x20b   :  { %21647 = vmatpush3.bf16.msra.mxu0 %v23079_v47 }
 0x20c   :  { %21397 = vmatprep.subr.mxu0 %v22722_v6 }
 0x2ba   :  { %v461_v30 = vpop.f32.mrb[2].mxu1 }
 0x2bb   :  { %v23035_v31 = vadd.f32 %v17049_v29, %v461_v30  ;;  %v21377_v32 = vpop.f32.mrb[3].mxu1 }
 0x2bd   :  { %v477_v33 = vpack.c.bf16 %v23035_v31, %v23035_v31 }
 0x2bf   :  { %17059 = vmatmul.mubr.msk.bf16.vlgmr.msra.gmra.mrb[4].mxu1 %vm91_vm1, %v477_v33 }
 0x2c0   :  { %1480 = vmatprep.mubr.bf16.mxu1 %v22723_v28 }
 0x392   :  { %v575_v51 = vpop.f32.mrb[4].mxu1 }
 0x393   :  { %v576_v52 = vadd.f32 %v575_v51, %v491_v50  ;;  %v23093_v53 = vpop.f32.mrb[5].mxu1 }
 0x394   :  { %v579_v54 = vpop.f32.mrb[6].mxu1 }
 0x395   :  { %v580_v55 = vpop.f32.mrb[7].mxu1  ;;  %615 = vrot.lane.b32.xlu0 %v576_v52, %s22724_s8  ;;  %v589_v60 = vrot.slane %v576_v52, %v23097_v59 }
 0x397   :  { %v590_v61 = vcombine.high %v589_v60, %v589_v60  ;;  %v597_v0 = vrot.slane %v589_v60, %v23097_v59  ;;  %v21729_v60 = vld [vmem:[%s27877_s14] sm:$0xff]  }
 0x399   :  { %v604_v1 = vrot.slane %v590_v61, %v23097_v59  ;;  %v608_v4 = vrot.slane %v597_v0, %v23082_v48  ;;  %v21730_v61 = vld [vmem:[%s27877_s14 + $0x8] sm:$0xff]   ;;  %v23139_v0 = vsub.s32 1, %v23071_v44 }
 0x39b   :  { %v612_v5 = vrot.slane %v604_v1, %v23082_v48  ;;  %v495_v1 = vrot.slane %v23088_v49, %v23139_v0 }
 0x407   :  { %v616_v7 = vpop.permute.xlu0 %615 }
 0x408   :  { %v618_v9 = vmul.f32 %v616_v7, %v608_v4  ;;  %v619_v10 = vmul.f32 %v616_v7, %v612_v5  ;;  %v578_v4 = vadd.f32 %v23093_v53, %v495_v1 }
 0x40a   :  { %v622_v11 = vcombine.low %v618_v9, %v619_v10 }
 0x40c   :  { %v629_v12 = vrot.slane %v622_v11, %v23105_v8 }
 0x40e   :  { %21395 = vmatmul.mubr.msk.f32.vlgmr.msra.gmra.mrb[4].mxu0 %vm91_vm1, %v629_v12 }
 0x40f   :  { %21399 = vmatprep.mubr.msk.f32.mxu0 %vm22721_vm0, %v22722_v6  ;;  %21398 = vmatpush3.msra.mxu0 %v476_v13 }
 0x410   :  { %21402 = vmatprep.subr.bf16.mxu0 %v22722_v6 }
 0x4e1   :  { %v698_v14 = vpop.f32.mrb[4].mxu0 }
 0x4e2   :  { %v702_v15 = vmul.f32 0.35355338, %v698_v14  ;;  %v21396_v16 = vpop.f32.mrb[5].mxu0 }
 0x4e4   :  { %v704_v17 = vsel %vm703_vm5, %v702_v15, -inf }
 0x4e5   :  { %v705_v18 = vrot.slane %v704_v17, 4 }
 0x4e7   :  { %v706_v19 = vmax.f32 %v704_v17, %v705_v18 }
 0x4e9   :  { %v707_v20 = vrot.slane %v706_v19, 2 }
 0x4eb   :  { %v708_v21 = vmax.f32 %v706_v19, %v707_v20 }
 0x4ed   :  { %v709_v22 = vrot.slane %v708_v21, 1 }
 0x4ef   :  { %v710_v23 = vmax.f32 %v708_v21, %v709_v22 }
 0x4f1   :  { %v711_v24 = vsub.f32 %v702_v15, %v710_v23 }
 0x4f3   :  { %v712_v25 = vmul.f32 1.442695, %v711_v24 }
 0x4f5   :  { %22607 = vpow2.f32 %v712_v25 }
 0x4ff   :  { %v22608_v26 = vpop.eup %22607 }
 0x500   :  { %v721_v27 = vrot.slane %v22608_v26, %v23105_v8 }
 0x502   :  { %v726_v29 = vsel %vm725_vm6, %v721_v27, 0.0  ;;  %v722_v30 = vcombine.high %v721_v27, %v721_v27 }
 0x503   :  { %v727_v32 = vrot.slane %v726_v29, 4 }
 0x504   :  { %v733_v33 = vsel %vm725_vm6, %v722_v30, 0.0 }
 0x505   :  { %v728_v34 = vadd.f32 %v727_v32, %v726_v29  ;;  %v734_v35 = vrot.slane %v733_v33, 4  ;;  %v17062_v32 = vld [vmem:[%s27878_s15] ss:$0 sm:$0xff] }
 0x507   :  { %v729_v36 = vrot.slane %v728_v34, 2  ;;  %v735_v38 = vadd.f32 %v734_v35, %v733_v33 }
 0x509   :  { %v730_v40 = vadd.f32 %v729_v36, %v728_v34  ;;  %v736_v41 = vrot.slane %v735_v38, 2 }
 0x50b   :  { %v731_v43 = vrot.slane %v730_v40, 1  ;;  %v737_v45 = vadd.f32 %v736_v41, %v735_v38 }
 0x50d   :  { %v732_v46 = vadd.f32 %v731_v43, %v730_v40  ;;  %v738_v50 = vrot.slane %v737_v45, 1 }
 0x50f   :  { %22609 = vrcp.f32 %v732_v46  ;;  %v739_v51 = vadd.f32 %v738_v50, %v737_v45 }
 0x511   :  { %22611 = vrcp.f32 %v739_v51 }
 0x519   :  { %v22610_v52 = vpop.eup %22609 }
 0x51a   :  { %v741_v55 = vmul.f32 %v22610_v52, %v721_v27  ;;  %v977_v52 = vld [vmem:[%s27883_s20] sm:$0xff] }
 0x51b   :  { %v22612_v54 = vpop.eup %22611 }
 0x51c   :  { %v743_v56 = vmul.f32 %v22612_v54, %v722_v30  ;;  %v978_v54 = vld [vmem:[%s27883_s20 + $0x8] sm:$0xff] }
 0x51e   :  { %v746_v57 = vcombine.low %v741_v55, %v743_v56  ;;  %v986_v56 = vld [vmem:[%s27883_s20 + $0x48] sm:$0xff] }
 0x520   :  { %v753_v58 = vrot.slane %v746_v57, %v23105_v8 }
 0x522   :  { %21400 = vmatmul.mubr.msk.f32.vlgmr.msra.gmra.mrb[6].mxu0 %vm754_vm7, %v753_v58  ;;  %v17072_v58 = vcombine.low %v978_v54, %v986_v56 }
 0x523   :  { %21410 = vmatprep.mubr.msk.bf16.mxu0 %vm22721_vm0, %v22722_v6  ;;  %21403 = vmatpush3.bf16.msra.mxu0 %v21729_v60  ;;  %v17073_v60 = vcombine.high %v978_v54, %v986_v56  ;;  %v1011_v56 = vld [vmem:[%s27883_s20 + $0x110] sm:$0xff] }
 0x524   :  { %21404 = vmatprep.subr.bf16.mxu0 %v22722_v6 }
 0x527   :  { %21405 = vmatpush3.bf16.msra.mxu0 %v21730_v61  ;;  %v993_v61 = vld [vmem:[%s27883_s20 + $0x80] sm:$0xff] }
 0x528   :  { %21406 = vmatprep.subr.bf16.mxu0 %v22722_v6 }
 0x52b   :  { %21407 = vmatpush3.bf16.msra.mxu0 %v21731_v62  ;;  %v1001_v62 = vld [vmem:[%s27883_s20 + $0xc0] sm:$0xff] }
 0x52c   :  { %21408 = vmatprep.subr.bf16.mxu0 %v22722_v6  ;;  %v17087_v1 = vcombine.high %v993_v61, %v1001_v62 }
 0x52f   :  { %21409 = vmatpush3.bf16.msra.mxu0 %v21732_v63  ;;  %v994_v63 = vld [vmem:[%s27883_s20 + $0x88] sm:$0xff] }
 0x530   :  { %1489 = vmatprep.subr.bf16.mxu0 %v17073_v60  ;;  %v1020_v60 = vld [vmem:[%s27883_s20 + $0x158] sm:$0xff] }
 0x5f5   :  { %v823_v2 = vpop.f32.mrb[6].mxu0 }
 0x5f6   :  { %v834_v5 = vrot.slane %v823_v2, %v23105_v8  ;;  %v21401_v7 = vpop.f32.mrb[7].mxu0  ;;  %v1002_v2 = vld [vmem:[%s27883_s20 + $0xc8] sm:$0xff] }
 0x5f7   :  { %v17089_v7 = vcombine.high %v994_v63, %v1002_v2 }
 0x5f8   :  { %v835_v9 = vcombine.high %v834_v5, %v834_v5  ;;  %v838_v10 = vmul.f32 %v834_v5, %v578_v4  ;;  %v17088_v5 = vcombine.low %v994_v63, %v1002_v2  ;;  %v1027_v2 = vld [vmem:[%s27883_s20 + $0x190] sm:$0xff] }
 0x5fa   :  { %v839_v11 = vmul.f32 %v835_v9, %v578_v4  ;;  %v841_v12 = vsel %vm840_vm8, %v838_v10, 0.0  ;;  %v17086_v4 = vcombine.low %v993_v61, %v1001_v62  ;;  %v1009_v9 = vld [vmem:[%s27883_s20 + $0x100] sm:$0xff] }
 0x5fb   :  { %v842_v13 = vrot.slane %v841_v12, 4  ;;  %v1017_v10 = vld [vmem:[%s27883_s20 + $0x140] sm:$0xff] }
 0x5fc   :  { %v848_v14 = vsel %vm840_vm8, %v839_v11, 0.0  ;;  %v1010_v11 = vld [vmem:[%s27883_s20 + $0x108] sm:$0xff] }
 0x5fd   :  { %v843_v15 = vadd.f32 %v842_v13, %v841_v12  ;;  %v849_v16 = vrot.slane %v848_v14, 4  ;;  %v17103_v12 = vcombine.high %v1009_v9, %v1017_v10  ;;  %v1018_v13 = vld [vmem:[%s27883_s20 + $0x148] sm:$0xff] }
 0x5ff   :  { %v844_v17 = vrot.slane %v843_v15, 2  ;;  %v850_v18 = vadd.f32 %v849_v16, %v848_v14  ;;  %v17102_v14 = vcombine.low %v1009_v9, %v1017_v10  ;;  %v17105_v16 = vcombine.high %v1010_v11, %v1018_v13 }
 0x601   :  { %v845_v49 = vadd.f32 %v844_v17, %v843_v15  ;;  %v851_v19 = vrot.slane %v850_v18, 2  ;;  %v17104_v15 = vcombine.low %v1010_v11, %v1018_v13  ;;  %v1025_v17 = vld [vmem:[%s27883_s20 + $0x180] sm:$0xff] }
 0x602   :  { %v981_v13 = vld [vmem:[%s27883_s20 + $0x20] sm:$0xff] }
 0x603   :  { %v846_v20 = vrot.slane %v845_v49, 1  ;;  %v852_v53 = vadd.f32 %v851_v19, %v850_v18  ;;  %v1033_v18 = vld [vmem:[%s27883_s20 + $0x1c0] sm:$0xff] }
 0x604   :  { %v17119_v19 = vcombine.high %v1025_v17, %v1033_v18 }
 0x605   :  { %v847_v21 = vadd.f32 %v846_v20, %v845_v49  ;;  %v853_v22 = vrot.slane %v852_v53, 1  ;;  %v1026_v49 = vld [vmem:[%s27883_s20 + $0x188] sm:$0xff] }
 0x606   :  { %v1034_v20 = vld [vmem:[%s27883_s20 + $0x1c8] sm:$0xff] }
 0x607   :  { %v854_v23 = vadd.f32 %v853_v22, %v852_v53  ;;  %v855_v24 = vpack.c.bf16 %v847_v21, %v847_v21  ;;  %v17118_v53 = vcombine.low %v1025_v17, %v1033_v18  ;;  %v17120_v21 = vcombine.low %v1026_v49, %v1034_v20 }
 0x608   :  { %v17121_v22 = vcombine.high %v1026_v49, %v1034_v20  ;;  %v997_v20 = vld [vmem:[%s27883_s20 + $0xa0] sm:$0xff] }
 0x609   :  { %v856_v25 = vpack.c.bf16 %v854_v23, %v854_v23  ;;  %v874_v26 = vunpack.c.l.b16 %v855_v24  ;;  %v979_v23 = vld [vmem:[%s27883_s20 + $0x10] sm:$0xff] }
 0x60a   :  { %v987_v24 = vld [vmem:[%s27883_s20 + $0x50] sm:$0xff] }
 0x60b   :  { %v875_v27 = vunpack.c.l.b16 %v856_v25  ;;  %v980_v25 = vld [vmem:[%s27883_s20 + $0x18] sm:$0xff] }
 0x60d   :  { %v876_v29 = vsel %vm126_vm2, %v875_v27, %v874_v26  ;;  %v17075_v26 = vcombine.high %v979_v23, %v987_v24  ;;  %v988_v27 = vld [vmem:[%s27883_s20 + $0x58] sm:$0xff] }
 0x60e   :  { %v877_v30 = vpack.c.b16 %v876_v29, %v876_v29  ;;  %v17074_v29 = vcombine.low %v979_v23, %v987_v24 }
 0x610   :  { %21411 = vmatmul.mubr.msk.bf16.vlgmr.msra.gmra.mrb[8].mxu0 %vm91_vm1, %v877_v30  ;;  %v17076_v30 = vcombine.low %v980_v25, %v988_v27 }
 0x611   :  { %1521 = vmatprep.mubr.bf16.mxu0 %v22723_v28  ;;  %1490 = vmatpush1.bf16.msra.mxu0 %v17072_v58  ;;  %v1012_v58 = vld [vmem:[%s27883_s20 + $0x118] sm:$0xff] }
 0x612   :  { %1491 = vmatprep.subr.bf16.mxu0 %v17089_v7  ;;  %v1036_v7 = vld [vmem:[%s27883_s20 + $0x1d8] sm:$0xff]  ;;  %v17108_v10 = vcombine.low %v1012_v58, %v1020_v60 }
 0x615   :  { %1492 = vmatpush1.bf16.msra.mxu0 %v17088_v5  ;;  %v1028_v5 = vld [vmem:[%s27883_s20 + $0x198] sm:$0xff] }
 0x616   :  { %1493 = vmatprep.subr.bf16.mxu0 %v17105_v16  ;;  %v990_v16 = vld [vmem:[%s27883_s20 + $0x68] sm:$0xff]  ;;  %v17124_v18 = vcombine.low %v1028_v5, %v1036_v7 }
 0x619   :  { %1494 = vmatpush1.bf16.msra.mxu0 %v17104_v15  ;;  %v982_v15 = vld [vmem:[%s27883_s20 + $0x28] sm:$0xff] }
 0x61a   :  { %1495 = vmatprep.subr.bf16.mxu0 %v17121_v22  ;;  %v1006_v22 = vld [vmem:[%s27883_s20 + $0xe8] sm:$0xff]  ;;  %v17080_v24 = vcombine.low %v982_v15, %v990_v16 }
 0x61d   :  { %1496 = vmatpush1.bf16.msra.mxu0 %v17120_v21  ;;  %v998_v21 = vld [vmem:[%s27883_s20 + $0xa8] sm:$0xff] }
 0x6e3   :  { %v939_v33 = vpop.f32.mrb[8].mxu0 }
 0x6e4   :  { %v940_v34 = vadd.f32 %v17062_v32, %v939_v33  ;;  %v21412_v35 = vpop.f32.mrb[9].mxu0  ;;  %v17077_v32 = vcombine.high %v980_v25, %v988_v27  ;;  %v1013_v27 = vld [vmem:[%s27883_s20 + $0x120] sm:$0xff] }
 0x6e5   :  { %v942_v36 = vpop.f32.mrb[10].mxu0 }
 0x6e6   :  { %v21413_v38 = vpop.f32.mrb[11].mxu0  ;;  %v945_v40 = vadd.f32 %v940_v34, %v23035_v31  ;;  %v985_v31 = vld [vmem:[%s27883_s20 + $0x40] sm:$0xff]  ;;  %1571 = vmatprep.subr.bf16.mxu0 %v17077_v32  ;;  %v1022_v32 = vld [vmem:[%s27883_s20 + $0x168] sm:$0xff] }
 0x6e7   :  { %v17071_v55 = vcombine.high %v977_v52, %v985_v31  ;;  %v17070_v57 = vcombine.low %v977_v52, %v985_v31  ;;  %v17068_v38 = vld [vmem:[%s27879_s16] ss:$0 sm:$0xff] }
 0x6e8   :  { %v948_v41 = vsel %vm840_vm8, %v945_v40, 0.0 }
 0x6e9   :  { %949 = vadd.xlane.f32.xlu0 %v948_v41  ;;  %1448 = vmatprep.subr.bf16.mxu1 %v17071_v55  ;;  %v17069_v41 = vld [vmem:[%s27880_s17] ss:$0 sm:$0xff] }
 0x6ea   :  { %1449 = vmatpush1.bf16.msra.mxu1 %v17070_v57  ;;  %v1019_v57 = vld [vmem:[%s27883_s20 + $0x150] sm:$0xff] }
 0x6eb   :  { %1450 = vmatprep.subr.bf16.mxu1 %v17087_v1  ;;  %v17107_v63 = vcombine.high %v1011_v56, %v1019_v57  ;;  %v17109_v1 = vcombine.high %v1012_v58, %v1020_v60  ;;  %v17106_v9 = vcombine.low %v1011_v56, %v1019_v57  ;;  %v984_v56 = vld [vmem:[%s27883_s20 + $0x38] sm:$0xff] }
 0x6ec   :  { %v992_v57 = vld [vmem:[%s27883_s20 + $0x78] sm:$0xff] }
 0x6ee   :  { %1451 = vmatpush1.bf16.msra.mxu1 %v17086_v4  ;;  %v1035_v4 = vld [vmem:[%s27883_s20 + $0x1d0] sm:$0xff] }
 0x6ef   :  { %1452 = vmatprep.subr.bf16.mxu1 %v17103_v12  ;;  %v17123_v11 = vcombine.high %v1027_v2, %v1035_v4  ;;  %v17125_v12 = vcombine.high %v1028_v5, %v1036_v7  ;;  %v17122_v17 = vcombine.low %v1027_v2, %v1035_v4  ;;  %v1000_v2 = vld [vmem:[%s27883_s20 + $0xb8] sm:$0xff]  ;;  %v17084_v7 = vcombine.low %v984_v56, %v992_v57 }
 0x6f0   :  { %v1008_v4 = vld [vmem:[%s27883_s20 + $0xf8] sm:$0xff] }
 0x6f2   :  { %1453 = vmatpush1.bf16.msra.mxu1 %v17102_v14  ;;  %v989_v14 = vld [vmem:[%s27883_s20 + $0x60] sm:$0xff] }
 0x6f3   :  { %1454 = vmatprep.subr.bf16.mxu1 %v17119_v19  ;;  %v17079_v49 = vcombine.high %v981_v13, %v989_v14  ;;  %v17081_v19 = vcombine.high %v982_v15, %v990_v16  ;;  %v17078_v23 = vcombine.low %v981_v13, %v989_v14  ;;  %v1016_v13 = vld [vmem:[%s27883_s20 + $0x138] sm:$0xff]  ;;  %v17100_v16 = vcombine.low %v1000_v2, %v1008_v4 }
 0x6f4   :  { %v1024_v14 = vld [vmem:[%s27883_s20 + $0x178] sm:$0xff] }
 0x6f6   :  { %1455 = vmatpush1.bf16.msra.mxu1 %v17118_v53  ;;  %v1005_v53 = vld [vmem:[%s27883_s20 + $0xe0] sm:$0xff] }
 0x6f7   :  { %1530 = vmatprep.subr.bf16.mxu1 %v17075_v26  ;;  %v17095_v25 = vcombine.high %v997_v20, %v1005_v53  ;;  %v17097_v26 = vcombine.high %v998_v21, %v1006_v22 }
 0x776   :  { %v950_v43 = vpop.xlane.xlu0 %949 }
 0x777   :  { %v952_v45 = vmul.f32 0.015625, %v950_v43 }
 0x779   :  { %v23155_v46 = vsub.f32 %v945_v40, %v952_v45  ;;  %v995_v45 = vld [vmem:[%s27883_s20 + $0x90] sm:$0xff] }
 0x77b   :  { %v954_v50 = vmul.f32 %v23155_v46, %v23155_v46 }
 0x77d   :  { %v955_v51 = vsel %vm840_vm8, %v954_v50, 0.0  ;;  %v1003_v50 = vld [vmem:[%s27883_s20 + $0xd0] sm:$0xff] }
 0x77e   :  { %956 = vadd.xlane.f32.xlu1 %v955_v51  ;;  %v996_v51 = vld [vmem:[%s27883_s20 + $0x98] sm:$0xff]  ;;  %v17091_v54 = vcombine.high %v995_v45, %v1003_v50  ;;  %v17090_v61 = vcombine.low %v995_v45, %v1003_v50 }
 0x80b   :  { %v957_v33 = vpop.xlane.xlu1 %956 }
 0x80c   :  { %v958_v34 = vmul.f32 0.015625, %v957_v33  ;;  %v17094_v33 = vcombine.low %v997_v20, %v1005_v53  ;;  %v1032_v20 = vld [vmem:[%s27883_s20 + $0x1b8] sm:$0xff] }
 0x80d   :  { %v1040_v53 = vld [vmem:[%s27883_s20 + $0x1f8] sm:$0xff] }
 0x80e   :  { %v959_v35 = vadd.f32 1e-05, %v958_v34  ;;  %v17096_v34 = vcombine.low %v998_v21, %v1006_v22  ;;  %v17116_v22 = vcombine.low %v1016_v13, %v1024_v14 }
 0x810   :  { %22613 = vrsqrt.f32 %v959_v35 }
 0x81a   :  { %v22614_v36 = vpop.eup %22613 }
 0x81b   :  { %v961_v40 = vmul.f32 %v22614_v36, %v23155_v46  ;;  %v1004_v46 = vld [vmem:[%s27883_s20 + $0xd8] sm:$0xff] }
 0x81c   :  { %v17093_v55 = vcombine.high %v996_v51, %v1004_v46  ;;  %v17092_v62 = vcombine.low %v996_v51, %v1004_v46 }
 0x81d   :  { %v968_v43 = vmul.f32 %v17068_v38, %v961_v40  ;;  %v1029_v38 = vld [vmem:[%s27883_s20 + $0x1a0] sm:$0xff] }
 0x81e   :  { %v1037_v40 = vld [vmem:[%s27883_s20 + $0x1e0] sm:$0xff] }
 0x81f   :  { %v23239_v52 = vadd.f32 %v17069_v41, %v968_v43  ;;  %v1030_v41 = vld [vmem:[%s27883_s20 + $0x1a8] sm:$0xff]  ;;  %v17127_v51 = vcombine.high %v1029_v38, %v1037_v40  ;;  %v17126_v58 = vcombine.low %v1029_v38, %v1037_v40  ;;  %v21741_v38 = vld [vmem:[%s27885_s22 + $0x50] sm:$0xff]  }
 0x820   :  { %v1038_v43 = vld [vmem:[%s27883_s20 + $0x1e8] sm:$0xff]  ;;  %v21743_v40 = vld [vmem:[%s27885_s22 + $0x10] sm:$0xff]  }
 0x821   :  { %v23243_v31 = vpack.c.bf16 %v23239_v52, %v23239_v52  ;;  %v17129_v46 = vcombine.high %v1030_v41, %v1038_v43  ;;  %v17128_v60 = vcombine.low %v1030_v41, %v1038_v43  ;;  %v21744_v41 = vld [vmem:[%s27885_s22 + $0x90] sm:$0xff]   ;;  %v21745_v43 = vld [vmem:[%s27885_s22 + $0x58] sm:$0xff]  }
 0x823   :  { %17134 = vmatmul.mubr.msk.bf16.vlgmr.msra.gmra.mrb[8].mxu1 %vm91_vm1, %v23243_v31  ;;  %17135 = vmatmul.mubr.msk.bf16.vlgmr.msra.gmra.mrb[12].mxu0 %vm91_vm1, %v23243_v31 }
 0x824   :  { %1531 = vmatpush1.bf16.msra.mxu1 %v17074_v29  ;;  %1572 = vmatpush1.bf16.msra.mxu0 %v17076_v30  ;;  %v1021_v29 = vld [vmem:[%s27883_s20 + $0x160] sm:$0xff]  ;;  %v1014_v30 = vld [vmem:[%s27883_s20 + $0x128] sm:$0xff] }
 0x825   :  { %1532 = vmatprep.subr.bf16.mxu1 %v17091_v54  ;;  %1573 = vmatprep.subr.bf16.mxu0 %v17093_v55  ;;  %v17111_v35 = vcombine.high %v1013_v27, %v1021_v29  ;;  %v17113_v36 = vcombine.high %v1014_v30, %v1022_v32  ;;  %v17110_v45 = vcombine.low %v1013_v27, %v1021_v29  ;;  %v983_v54 = vld [vmem:[%s27883_s20 + $0x30] sm:$0xff]  ;;  %v21733_v27 = vld [vmem:[%s27885_s22 + $0x40] sm:$0xff]  }
 0x826   :  { %1562 = vmatprep.mubr.bf16.mxu1 %v22723_v28  ;;  %1603 = vmatprep.mubr.bf16.mxu0 %v22723_v28  ;;  %v17112_v50 = vcombine.low %v1014_v30, %v1022_v32  ;;  %v991_v55 = vld [vmem:[%s27883_s20 + $0x70] sm:$0xff]  ;;  %v21734_v29 = vld [vmem:[%s27885_s22 + $0xc0] sm:$0xff]  }
 0x827   :  { %v17082_v5 = vcombine.low %v983_v54, %v991_v55  ;;  %v21735_v30 = vld [vmem:[%s27885_s22] sm:$0xff]  }
 0x828   :  { %1533 = vmatpush1.bf16.msra.mxu1 %v17090_v61  ;;  %1574 = vmatpush1.bf16.msra.mxu0 %v17092_v62  ;;  %v17083_v61 = vcombine.high %v983_v54, %v991_v55  ;;  %v17085_v62 = vcombine.high %v984_v56, %v992_v57  ;;  %v21736_v32 = vld [vmem:[%s27885_s22 + $0x80] sm:$0xff]   ;;  %v21753_v57 = vld [vmem:[%s27885_s22 + $0x68] sm:$0xff]  }
 0x829   :  { %1534 = vmatprep.subr.bf16.mxu1 %v17107_v63  ;;  %1575 = vmatprep.subr.bf16.mxu0 %v17109_v1  ;;  %v999_v63 = vld [vmem:[%s27883_s20 + $0xb0] sm:$0xff]  ;;  %v21750_v54 = vld [vmem:[%s27885_s22 + $0xe0] sm:$0xff]  }
 0x82a   :  { %v1007_v1 = vld [vmem:[%s27883_s20 + $0xf0] sm:$0xff]  ;;  %v21751_v55 = vld [vmem:[%s27885_s22 + $0x20] sm:$0xff]  }
 0x82b   :  { %v17098_v15 = vcombine.low %v999_v63, %v1007_v1  ;;  %v21752_v56 = vld [vmem:[%s27885_s22 + $0xa0] sm:$0xff]  }
 0x82c   :  { %1535 = vmatpush1.bf16.msra.mxu1 %v17106_v9  ;;  %1576 = vmatpush1.bf16.msra.mxu0 %v17108_v10  ;;  %v17099_v9 = vcombine.high %v999_v63, %v1007_v1  ;;  %v17101_v10 = vcombine.high %v1000_v2, %v1008_v4  ;;  %v21758_v63 = vld [vmem:[%s27885_s22 + $0xf0] sm:$0xff]   ;;  %v21761_v4 = vld [vmem:[%s27885_s22 + $0x78] sm:$0xff]  }
 0x82d   :  { %1536 = vmatprep.subr.bf16.mxu1 %v17123_v11  ;;  %1577 = vmatprep.subr.bf16.mxu0 %v17125_v12  ;;  %v1015_v11 = vld [vmem:[%s27883_s20 + $0x130] sm:$0xff] }
 0x82e   :  { %v1023_v12 = vld [vmem:[%s27883_s20 + $0x170] sm:$0xff] }
 0x82f   :  { %v17114_v21 = vcombine.low %v1015_v11, %v1023_v12  ;;  %v21759_v1 = vld [vmem:[%s27885_s22 + $0x30] sm:$0xff]  }
 0x830   :  { %1537 = vmatpush1.bf16.msra.mxu1 %v17122_v17  ;;  %1578 = vmatpush1.bf16.msra.mxu0 %v17124_v18  ;;  %v17115_v17 = vcombine.high %v1015_v11, %v1023_v12  ;;  %v17117_v18 = vcombine.high %v1016_v13, %v1024_v14  ;;  %v21760_v2 = vld [vmem:[%s27885_s22 + $0xb0] sm:$0xff]   ;;  %v21766_v11 = vld [vmem:[%s27885_s22 + $0x1c0] sm:$0xff]   ;;  %v23490_v12 = vsub.s32 2, %v23071_v44  ;;  %v23498_v14 = vsub.s32 3, %v23071_v44 }
 0x831   :  { %1612 = vmatprep.subr.bf16.mxu1 %v17079_v49  ;;  %1653 = vmatprep.subr.bf16.mxu0 %v17081_v19  ;;  %v1031_v49 = vld [vmem:[%s27883_s20 + $0x1b0] sm:$0xff]  ;;  %v23495_v13 = vld [vmem:[%s27884_s21] sm:$0xff] }
 0x832   :  { %v1039_v19 = vld [vmem:[%s27883_s20 + $0x1f0] sm:$0xff] }
 0x833   :  { %17136 = vmatmul.mubr.msk.bf16.vlgmr.msra.gmra.mrb[12].mxu1 %vm91_vm1, %v23243_v31  ;;  %17137 = vmatmul.mubr.msk.bf16.vlgmr.msra.gmra.mrb[16].mxu0 %vm91_vm1, %v23243_v31 }
 0x834   :  { %1613 = vmatpush1.bf16.msra.mxu1 %v17078_v23  ;;  %1654 = vmatpush1.bf16.msra.mxu0 %v17080_v24  ;;  %v17131_v23 = vcombine.high %v1031_v49, %v1039_v19  ;;  %v17133_v24 = vcombine.high %v1032_v20, %v1040_v53 }
 0x835   :  { %1614 = vmatprep.subr.bf16.mxu1 %v17095_v25  ;;  %1655 = vmatprep.subr.bf16.mxu0 %v17097_v26  ;;  %v17130_v25 = vcombine.low %v1031_v49, %v1039_v19  ;;  %v17132_v26 = vcombine.low %v1032_v20, %v1040_v53 }
 0x836   :  { %1644 = vmatprep.mubr.bf16.mxu1 %v22723_v28  ;;  %1685 = vmatprep.mubr.bf16.mxu0 %v22723_v28 }
 0x838   :  { %1615 = vmatpush1.bf16.msra.mxu1 %v17094_v33  ;;  %1656 = vmatpush1.bf16.msra.mxu0 %v17096_v34  ;;  %v21737_v33 = vld [vmem:[%s27885_s22 + $0x48] sm:$0xff]  }
 0x839   :  { %1616 = vmatprep.subr.bf16.mxu1 %v17111_v35  ;;  %1657 = vmatprep.subr.bf16.mxu0 %v17113_v36  ;;  %v21738_v34 = vld [vmem:[%s27885_s22 + $0xc8] sm:$0xff]  }
 0x83a   :  { %v21739_v35 = vld [vmem:[%s27885_s22 + $0x8] sm:$0xff]  }
 0x83b   :  { %v21740_v36 = vld [vmem:[%s27885_s22 + $0x88] sm:$0xff]  }
 0x83c   :  { %1617 = vmatpush1.bf16.msra.mxu1 %v17110_v45  ;;  %1658 = vmatpush1.bf16.msra.mxu0 %v17112_v50  ;;  %v21746_v45 = vld [vmem:[%s27885_s22 + $0xd8] sm:$0xff]  }
 0x83d   :  { %1618 = vmatprep.subr.bf16.mxu1 %v17127_v51  ;;  %1659 = vmatprep.subr.bf16.mxu0 %v17129_v46  ;;  %v21747_v50 = vld [vmem:[%s27885_s22 + $0x18] sm:$0xff]   ;;  %v21749_v46 = vld [vmem:[%s27885_s22 + $0x60] sm:$0xff]  }
 0x83e   :  { %v21748_v51 = vld [vmem:[%s27885_s22 + $0x98] sm:$0xff]  }
 0x840   :  { %1619 = vmatpush1.bf16.msra.mxu1 %v17126_v58  ;;  %1660 = vmatpush1.bf16.msra.mxu0 %v17128_v60  ;;  %v21754_v58 = vld [vmem:[%s27885_s22 + $0xe8] sm:$0xff]  }
 0x841   :  { %1694 = vmatprep.subr.bf16.mxu1 %v17083_v61  ;;  %1735 = vmatprep.subr.bf16.mxu0 %v17085_v62  ;;  %v21755_v60 = vld [vmem:[%s27885_s22 + $0x28] sm:$0xff]   ;;  %v21757_v62 = vld [vmem:[%s27885_s22 + $0x70] sm:$0xff]  }
 0x842   :  { %v21756_v61 = vld [vmem:[%s27885_s22 + $0xa8] sm:$0xff]  }
 0x843   :  { %17138 = vmatmul.mubr.msk.bf16.vlgmr.msra.gmra.mrb[16].mxu1 %vm91_vm1, %v23243_v31  ;;  %17139 = vmatmul.mubr.msk.bf16.vlgmr.msra.gmra.mrb[20].mxu0 %vm91_vm1, %v23243_v31 }
 0x844   :  { %1695 = vmatpush1.bf16.msra.mxu1 %v17082_v5  ;;  %1736 = vmatpush1.bf16.msra.mxu0 %v17084_v7  ;;  %v21762_v5 = vld [vmem:[%s27885_s22 + $0xf8] sm:$0xff]  }
 0x845   :  { %1696 = vmatprep.subr.bf16.mxu1 %v17099_v9  ;;  %1737 = vmatprep.subr.bf16.mxu0 %v17101_v10  ;;  %v21763_v7 = vld [vmem:[%s27885_s22 + $0x38] sm:$0xff]   ;;  %v21765_v10 = vld [vmem:[%s27885_s22 + $0x140] sm:$0xff]  }
 0x846   :  { %1726 = vmatprep.mubr.bf16.mxu1 %v22723_v28  ;;  %1767 = vmatprep.mubr.bf16.mxu0 %v22723_v28  ;;  %v21764_v9 = vld [vmem:[%s27885_s22 + $0xb8] sm:$0xff]  }
 0x848   :  { %1697 = vmatpush1.bf16.msra.mxu1 %v17098_v15  ;;  %1738 = vmatpush1.bf16.msra.mxu0 %v17100_v16  ;;  %v1048_v15 = vrot.slane %v23495_v13, %v23082_v48  ;;  %v1056_v16 = vrot.slane %v23495_v13, %v23490_v12 }
 0x849   :  { %1698 = vmatprep.subr.bf16.mxu1 %v17115_v17  ;;  %1739 = vmatprep.subr.bf16.mxu0 %v17117_v18  ;;  %v1052_v17 = vrot.slane %v23495_v13, %v23139_v0  ;;  %v1060_v18 = vrot.slane %v23495_v13, %v23498_v14 }
 0x84c   :  { %1699 = vmatpush1.bf16.msra.mxu1 %v17114_v21  ;;  %1740 = vmatpush1.bf16.msra.mxu0 %v17116_v22 }
 0x84d   :  { %1700 = vmatprep.subr.bf16.mxu1 %v17131_v23  ;;  %1741 = vmatprep.subr.bf16.mxu0 %v17133_v24 }
 0x850   :  { %1701 = vmatpush1.bf16.msra.mxu1 %v17130_v25  ;;  %1742 = vmatpush1.bf16.msra.mxu0 %v17132_v26 }
 0x851   :  { %20174 = vmatprep.subr.bf16.mxu1 %v21733_v27  ;;  %20196 = vmatprep.subr.bf16.mxu0 %v21734_v29 }
 0x853   :  { %17140 = vmatmul.mubr.msk.bf16.vlgmr.msra.gmra.mrb[20].mxu1 %vm91_vm1, %v23243_v31  ;;  %17141 = vmatmul.mubr.msk.bf16.vlgmr.msra.gmra.mrb[24].mxu0 %vm91_vm1, %v23243_v31  ;;  %v21742_v31 = vld [vmem:[%s27885_s22 + $0xd0] sm:$0xff]  }
 0x854   :  { %20175 = vmatpush3.bf16.msra.mxu1 %v21735_v30  ;;  %20197 = vmatpush3.bf16.msra.mxu0 %v21736_v32 }
 0x855   :  { %20176 = vmatprep.subr.bf16.mxu1 %v21737_v33  ;;  %20198 = vmatprep.subr.bf16.mxu0 %v21738_v34 }
 0x858   :  { %20177 = vmatpush3.bf16.msra.mxu1 %v21739_v35  ;;  %20199 = vmatpush3.bf16.msra.mxu0 %v21740_v36 }
 0x859   :  { %20178 = vmatprep.subr.bf16.mxu1 %v21741_v38  ;;  %20200 = vmatprep.subr.bf16.mxu0 %v21742_v31  ;;  %v21767_v38 = vld [vmem:[%s27885_s22 + $0x100] sm:$0xff]  }
 0x85a   :  { %v21768_v31 = vld [vmem:[%s27885_s22 + $0x180] sm:$0xff]  }
 0x85c   :  { %20179 = vmatpush3.bf16.msra.mxu1 %v21743_v40  ;;  %20201 = vmatpush3.bf16.msra.mxu0 %v21744_v41 }
 0x85d   :  { %20180 = vmatprep.subr.bf16.mxu1 %v21745_v43  ;;  %20202 = vmatprep.subr.bf16.mxu0 %v21746_v45  ;;  %v21769_v43 = vld [vmem:[%s27885_s22 + $0x148] sm:$0xff]  }
 0x85e   :  { %v21770_v45 = vld [vmem:[%s27885_s22 + $0x1c8] sm:$0xff]  }
 0x860   :  { %20181 = vmatpush3.bf16.msra.mxu1 %v21747_v50  ;;  %20203 = vmatpush3.bf16.msra.mxu0 %v21748_v51  ;;  %v21771_v50 = vld [vmem:[%s27885_s22 + $0x108] sm:$0xff]  }
 0x861   :  { %20182 = vmatprep.subr.bf16.mxu1 %v21749_v46  ;;  %20204 = vmatprep.subr.bf16.mxu0 %v21750_v54  ;;  %v21772_v51 = vld [vmem:[%s27885_s22 + $0x188] sm:$0xff]   ;;  %v23527_v46 = vsub.s32 5, %v23071_v44  ;;  %v23530_v54 = vsub.s32 7, %v23071_v44 }
 0x864   :  { %20183 = vmatpush3.bf16.msra.mxu1 %v21751_v55  ;;  %20205 = vmatpush3.bf16.msra.mxu0 %v21752_v56  ;;  %v21773_v55 = vld [vmem:[%s27885_s22 + $0x150] sm:$0xff]  }
 0x865   :  { %20184 = vmatprep.subr.bf16.mxu1 %v21753_v57  ;;  %20206 = vmatprep.subr.bf16.mxu0 %v21754_v58  ;;  %v21774_v56 = vld [vmem:[%s27885_s22 + $0x1d0] sm:$0xff]   ;;  %v1068_v57 = vrot.slane %v23495_v13, %v23527_v46  ;;  %v1076_v58 = vrot.slane %v23495_v13, %v23530_v54 }
 0x868   :  { %20185 = vmatpush3.bf16.msra.mxu1 %v21755_v60  ;;  %20207 = vmatpush3.bf16.msra.mxu0 %v21756_v61  ;;  %v21775_v60 = vld [vmem:[%s27885_s22 + $0x110] sm:$0xff]  }
 0x869   :  { %20186 = vmatprep.subr.bf16.mxu1 %v21757_v62  ;;  %20208 = vmatprep.subr.bf16.mxu0 %v21758_v63  ;;  %v21776_v61 = vld [vmem:[%s27885_s22 + $0x190] sm:$0xff]   ;;  %v21777_v62 = vld [vmem:[%s27885_s22 + $0x158] sm:$0xff]  }
 0x86a   :  { %v21778_v63 = vld [vmem:[%s27885_s22 + $0x1d8] sm:$0xff]  }
 0x86c   :  { %20187 = vmatpush3.bf16.msra.mxu1 %v21759_v1  ;;  %20209 = vmatpush3.bf16.msra.mxu0 %v21760_v2 }
 0x86d   :  { %20188 = vmatprep.subr.bf16.mxu1 %v21761_v4  ;;  %20210 = vmatprep.subr.bf16.mxu0 %v21762_v5 }
 0x870   :  { %20189 = vmatpush3.bf16.msra.mxu1 %v21763_v7  ;;  %20211 = vmatpush3.bf16.msra.mxu0 %v21764_v9 }
 0x871   :  { %20218 = vmatprep.subr.bf16.mxu1 %v21765_v10  ;;  %20240 = vmatprep.subr.bf16.mxu0 %v21766_v11 }
 0x8f6   :  { %v1482_v49 = vpop.f32.mrb[8].mxu1  ;;  %v1523_v19 = vpop.f32.mrb[12].mxu0 }
 0x8f7   :  { %v1483_v20 = vadd.f32 %v1482_v49, %v1048_v15  ;;  %v1524_v53 = vadd.f32 %v1523_v19, %v1056_v16  ;;  %v1484_v21 = vpop.f32.mrb[9].mxu1  ;;  %v1525_v22 = vpop.f32.mrb[13].mxu0  ;;  %v21779_v15 = vld [vmem:[%s27885_s22 + $0x118] sm:$0xff]   ;;  %v21781_v49 = vld [vmem:[%s27885_s22 + $0x160] sm:$0xff]  }
 0x8f8   :  { %v1485_v23 = vadd.f32 %v1484_v21, %v1052_v17  ;;  %v1526_v24 = vadd.f32 %v1525_v22, %v1060_v18  ;;  %v1486_v25 = vpop.f32.mrb[10].mxu1  ;;  %v1527_v26 = vpop.f32.mrb[14].mxu0  ;;  %v21780_v16 = vld [vmem:[%s27885_s22 + $0x198] sm:$0xff]   ;;  %v21782_v19 = vld [vmem:[%s27885_s22 + $0x1e0] sm:$0xff]  }
 0x8f9   :  { %v1776_v27 = vmax.f32 %v1483_v20, 0.0  ;;  %v1778_v29 = vmax.f32 %v1524_v53, 0.0  ;;  %v1487_v30 = vpop.f32.mrb[11].mxu1  ;;  %v1528_v32 = vpop.f32.mrb[15].mxu0  ;;  %v23573_v25 = vsub.s32 4, %v23071_v44  ;;  %v23576_v26 = vsub.s32 6, %v23071_v44 }
 0x8fa   :  { %v1777_v33 = vmax.f32 %v1485_v23, 0.0  ;;  %v1779_v34 = vmax.f32 %v1526_v24, 0.0  ;;  %v21783_v23 = vld [vmem:[%s27885_s22 + $0x120] sm:$0xff]   ;;  %v21787_v30 = vld [vmem:[%s27885_s22 + $0x128] sm:$0xff]  }
 0x8fb   :  { %v1792_v40 = vpack.c.bf16 %v1776_v27, %v1776_v27  ;;  %v1794_v41 = vpack.c.bf16 %v1778_v29, %v1778_v29  ;;  %v21784_v24 = vld [vmem:[%s27885_s22 + $0x1a0] sm:$0xff]   ;;  %v21785_v27 = vld [vmem:[%s27885_s22 + $0x168] sm:$0xff]   ;;  %v1064_v32 = vrot.slane %v23495_v13, %v23573_v25 }
 0x8fc   :  { %v1793_v35 = vpack.c.bf16 %v1777_v33, %v1777_v33  ;;  %v1795_v36 = vpack.c.bf16 %v1779_v34, %v1779_v34  ;;  %v21786_v29 = vld [vmem:[%s27885_s22 + $0x1e8] sm:$0xff]   ;;  %v1072_v33 = vrot.slane %v23495_v13, %v23576_v26 }
 0x8fd   :  { %v21788_v44 = vld [vmem:[%s27885_s22 + $0x1a8] sm:$0xff]  }
 0x8fe   :  { %2871 = vmatprep.mubr.bf16.mxu1 %v1793_v35  ;;  %2911 = vmatprep.mubr.bf16.mxu0 %v1795_v36  ;;  %v23597_v34 = vld [vmem:[%s27884_s21 + $0x8] sm:$0xff]  ;;  %v21789_v35 = vld [vmem:[%s27885_s22 + $0x170] sm:$0xff]  }
 0x8ff   :  { %2872 = vmatmul.mubr.bf16.vlgmr.msra.gmra.mrb[24].mxu1 %v1792_v40  ;;  %2912 = vmatmul.mubr.bf16.vlgmr.msra.gmra.mrb[28].mxu0 %v1794_v41  ;;  %v21790_v36 = vld [vmem:[%s27885_s22 + $0x1f0] sm:$0xff]   ;;  %v1084_v13 = vrot.slane %v23597_v34, %v23139_v0 }
 0x900   :  { %20219 = vmatpush3.bf16.msra.mxu1 %v21767_v38  ;;  %20241 = vmatpush3.bf16.msra.mxu0 %v21768_v31  ;;  %v1092_v38 = vrot.slane %v23597_v34, %v23498_v14  ;;  %v21791_v31 = vld [vmem:[%s27885_s22 + $0x130] sm:$0xff]  }
 0x901   :  { %20220 = vmatprep.subr.bf16.mxu1 %v21769_v43  ;;  %20242 = vmatprep.subr.bf16.mxu0 %v21770_v45  ;;  %v21792_v40 = vld [vmem:[%s27885_s22 + $0x1b0] sm:$0xff]   ;;  %v21793_v45 = vld [vmem:[%s27885_s22 + $0x178] sm:$0xff]  }
 0x904   :  { %20221 = vmatpush3.bf16.msra.mxu1 %v21771_v50  ;;  %20243 = vmatpush3.bf16.msra.mxu0 %v21772_v51  ;;  %v21794_v50 = vld [vmem:[%s27885_s22 + $0x1f8] sm:$0xff]  }
 0x905   :  { %20222 = vmatprep.subr.bf16.mxu1 %v21773_v55  ;;  %20244 = vmatprep.subr.bf16.mxu0 %v21774_v56 }
 0x906   :  { %v1564_v1 = vpop.f32.mrb[12].mxu1  ;;  %v1605_v2 = vpop.f32.mrb[16].mxu0 }
 0x907   :  { %v1566_v4 = vpop.f32.mrb[13].mxu1  ;;  %v1607_v5 = vpop.f32.mrb[17].mxu0  ;;  %v1565_v41 = vadd.f32 %v1564_v1, %v1064_v32  ;;  %v1606_v43 = vadd.f32 %v1605_v2, %v1072_v33  ;;  %v21796_v1 = vld [vmem:[%s27885_s22 + $0x1b8] sm:$0xff]  }
 0x908   :  { %v1567_v7 = vadd.f32 %v1566_v4, %v1068_v57  ;;  %v1608_v9 = vadd.f32 %v1607_v5, %v1076_v58  ;;  %v1568_v10 = vpop.f32.mrb[14].mxu1  ;;  %v1609_v11 = vpop.f32.mrb[18].mxu0  ;;  %20223 = vmatpush3.bf16.msra.mxu1 %v21775_v60  ;;  %20245 = vmatpush3.bf16.msra.mxu0 %v21776_v61  ;;  %v21809_v32 = vld [vmem:[%s27885_s22 + $0x258] sm:$0xff]  }
 0x909   :  { %v1569_v17 = vpop.f32.mrb[15].mxu1  ;;  %v1610_v18 = vpop.f32.mrb[19].mxu0  ;;  %20224 = vmatprep.subr.bf16.mxu1 %v21777_v62  ;;  %20246 = vmatprep.subr.bf16.mxu0 %v21778_v63  ;;  %v21795_v63 = vld [vmem:[%s27885_s22 + $0x138] sm:$0xff]   ;;  %v1780_v2 = vmax.f32 %v1565_v41, 0.0  ;;  %v1782_v4 = vmax.f32 %v1606_v43, 0.0  ;;  %v21798_v10 = vld [vmem:[%s27885_s22 + $0x2c0] sm:$0xff]  }
 0x90a   :  { %v1781_v20 = vmax.f32 %v1567_v7, 0.0  ;;  %v1783_v53 = vmax.f32 %v1608_v9, 0.0  ;;  %v21797_v9 = vld [vmem:[%s27885_s22 + $0x240] sm:$0xff]   ;;  %v21811_v43 = vld [vmem:[%s27885_s22 + $0x218] sm:$0xff]  }
 0x90b   :  { %v1796_v17 = vpack.c.bf16 %v1780_v2, %v1780_v2  ;;  %v1798_v18 = vpack.c.bf16 %v1782_v4, %v1782_v4  ;;  %v1080_v2 = vrot.slane %v23597_v34, %v23082_v48  ;;  %v21820_v4 = vld [vmem:[%s27885_s22 + $0x2a8] sm:$0xff]  }
 0x90c   :  { %v1797_v21 = vpack.c.bf16 %v1781_v20, %v1781_v20  ;;  %v1799_v22 = vpack.c.bf16 %v1783_v53, %v1783_v53  ;;  %20225 = vmatpush3.bf16.msra.mxu1 %v21779_v15  ;;  %20247 = vmatpush3.bf16.msra.mxu0 %v21780_v16  ;;  %v21799_v16 = vld [vmem:[%s27885_s22 + $0x200] sm:$0xff]   ;;  %v21801_v20 = vld [vmem:[%s27885_s22 + $0x248] sm:$0xff]  }
 0x90d   :  { %20226 = vmatprep.subr.bf16.mxu1 %v21781_v49  ;;  %20248 = vmatprep.subr.bf16.mxu0 %v21782_v19  ;;  %v21800_v49 = vld [vmem:[%s27885_s22 + $0x280] sm:$0xff]   ;;  %v21802_v53 = vld [vmem:[%s27885_s22 + $0x2c8] sm:$0xff]  }
 0x90e   :  { %2951 = vmatprep.mubr.bf16.mxu1 %v1797_v21  ;;  %2991 = vmatprep.mubr.bf16.mxu0 %v1799_v22  ;;  %v21803_v22 = vld [vmem:[%s27885_s22 + $0x208] sm:$0xff]  }
 0x910   :  { %20227 = vmatpush3.bf16.msra.mxu1 %v21783_v23  ;;  %20249 = vmatpush3.bf16.msra.mxu0 %v21784_v24  ;;  %v21804_v23 = vld [vmem:[%s27885_s22 + $0x288] sm:$0xff]   ;;  %v21805_v24 = vld [vmem:[%s27885_s22 + $0x250] sm:$0xff]  }
 0x911   :  { %20228 = vmatprep.subr.bf16.mxu1 %v21785_v27  ;;  %20250 = vmatprep.subr.bf16.mxu0 %v21786_v29  ;;  %v21806_v27 = vld [vmem:[%s27885_s22 + $0x2d0] sm:$0xff]   ;;  %v1104_v29 = vrot.slane %v23597_v34, %v23576_v26 }
 0x914   :  { %20229 = vmatpush3.bf16.msra.mxu1 %v21787_v30  ;;  %20251 = vmatpush3.bf16.msra.mxu0 %v21788_v44  ;;  %v21807_v30 = vld [vmem:[%s27885_s22 + $0x210] sm:$0xff]  }
 0x915   :  { %20230 = vmatprep.subr.bf16.mxu1 %v21789_v35  ;;  %20252 = vmatprep.subr.bf16.mxu0 %v21790_v36  ;;  %v21808_v44 = vld [vmem:[%s27885_s22 + $0x290] sm:$0xff]   ;;  %v21810_v36 = vld [vmem:[%s27885_s22 + $0x2d8] sm:$0xff]  }
 0x916   :  { %v23621_v51 = vpop.f32.mrb[16].mxu1  ;;  %v23623_v55 = vpop.f32.mrb[20].mxu0 }
 0x917   :  { %v1648_v56 = vpop.f32.mrb[17].mxu1  ;;  %v1689_v57 = vpop.f32.mrb[21].mxu0 }
 0x918   :  { %v1649_v58 = vadd.f32 %v1648_v56, %v1084_v13  ;;  %v1690_v60 = vadd.f32 %v1689_v57, %v1092_v38  ;;  %v1650_v61 = vpop.f32.mrb[18].mxu1  ;;  %v1691_v62 = vpop.f32.mrb[22].mxu0  ;;  %20231 = vmatpush3.bf16.msra.mxu1 %v21791_v31  ;;  %20253 = vmatpush3.bf16.msra.mxu0 %v21792_v40  ;;  %v21812_v56 = vld [vmem:[%s27885_s22 + $0x298] sm:$0xff]   ;;  %v21813_v57 = vld [vmem:[%s27885_s22 + $0x260] sm:$0xff]  }
 0x919   :  { %v1651_v5 = vpop.f32.mrb[19].mxu1  ;;  %v1692_v7 = vpop.f32.mrb[23].mxu0  ;;  %20232 = vmatprep.subr.bf16.mxu1 %v21793_v45  ;;  %20254 = vmatprep.subr.bf16.mxu0 %v21794_v50  ;;  %v21816_v61 = vld [vmem:[%s27885_s22 + $0x2a0] sm:$0xff]   ;;  %v21817_v62 = vld [vmem:[%s27885_s22 + $0x268] sm:$0xff]  }
 0x91a   :  { %v1785_v11 = vmax.f32 %v1649_v58, 0.0  ;;  %v1787_v15 = vmax.f32 %v1690_v60, 0.0  ;;  %v21814_v58 = vld [vmem:[%s27885_s22 + $0x2e0] sm:$0xff]   ;;  %v21821_v5 = vld [vmem:[%s27885_s22 + $0x270] sm:$0xff]   ;;  %v1088_v7 = vrot.slane %v23597_v34, %v23490_v12 }
 0x91b   :  { %v21815_v60 = vld [vmem:[%s27885_s22 + $0x220] sm:$0xff]  }
 0x91c   :  { %20233 = vmatpush3.bf16.msra.mxu1 %v21795_v63  ;;  %20255 = vmatpush3.bf16.msra.mxu0 %v21796_v1  ;;  %v1801_v19 = vpack.c.bf16 %v1785_v11, %v1785_v11  ;;  %v1803_v21 = vpack.c.bf16 %v1787_v15, %v1787_v15  ;;  %v21818_v63 = vld [vmem:[%s27885_s22 + $0x2e8] sm:$0xff]   ;;  %v1108_v11 = vrot.slane %v23597_v34, %v23530_v54  ;;  %v21823_v15 = vld [vmem:[%s27885_s22 + $0x230] sm:$0xff]  }
 0x91d   :  { %20262 = vmatprep.subr.bf16.mxu1 %v21797_v9  ;;  %20284 = vmatprep.subr.bf16.mxu0 %v21798_v10  ;;  %v21819_v1 = vld [vmem:[%s27885_s22 + $0x228] sm:$0xff]   ;;  %v21822_v9 = vld [vmem:[%s27885_s22 + $0x2f0] sm:$0xff]   ;;  %v1100_v10 = vrot.slane %v23597_v34, %v23527_v46 }
 0x91f   :  { %2952 = vmatmul.mubr.bf16.vlgmr.msra.gmra.mrb[28].mxu1 %v1796_v17  ;;  %2992 = vmatmul.mubr.bf16.vlgmr.msra.gmra.mrb[32].mxu0 %v1798_v18  ;;  %v21824_v17 = vld [vmem:[%s27885_s22 + $0x2b0] sm:$0xff]   ;;  %v21825_v18 = vld [vmem:[%s27885_s22 + $0x278] sm:$0xff]  }
 0x920   :  { %20263 = vmatpush3.bf16.msra.mxu1 %v21799_v16  ;;  %3031 = vmatprep.mubr.bf16.mxu1 %v1801_v19  ;;  %v1647_v16 = vadd.f32 %v23621_v51, %v1080_v2  ;;  %v21826_v19 = vld [vmem:[%s27885_s22 + $0x2f8] sm:$0xff]   ;;  %v21847_v2 = vld [vmem:[%s27885_s22 + $0x320] sm:$0xff]  }
 0x921   :  { %20285 = vmatpush3.bf16.msra.mxu0 %v21800_v49  ;;  %3071 = vmatprep.mubr.bf16.mxu0 %v1803_v21  ;;  %v1688_v49 = vadd.f32 %v23623_v55, %v1088_v7  ;;  %v21827_v51 = vld [vmem:[%s27885_s22 + $0x238] sm:$0xff]   ;;  %v21829_v55 = vld [vmem:[%s27885_s22 + $0x340] sm:$0xff]   ;;  %v21850_v7 = vld [vmem:[%s27885_s22 + $0x3e8] sm:$0xff]  }
 0x922   :  { %20264 = vmatprep.subr.bf16.mxu1 %v21801_v20  ;;  %20286 = vmatprep.subr.bf16.mxu0 %v21802_v53  ;;  %v1784_v21 = vmax.f32 %v1647_v16, 0.0  ;;  %v21854_v16 = vld [vmem:[%s27885_s22 + $0x3f0] sm:$0xff]  }
 0x924   :  { %20265 = vmatpush3.bf16.msra.mxu1 %v21803_v22  ;;  %v21828_v22 = vld [vmem:[%s27885_s22 + $0x2b8] sm:$0xff]  }
 0x925   :  { %20287 = vmatpush3.bf16.msra.mxu0 %v21804_v23  ;;  %20266 = vmatprep.subr.bf16.mxu1 %v21805_v24  ;;  %v1786_v23 = vmax.f32 %v1688_v49, 0.0  ;;  %v21830_v24 = vld [vmem:[%s27885_s22 + $0x3c0] sm:$0xff]   ;;  %v21857_v49 = vld [vmem:[%s27885_s22 + $0x378] sm:$0xff]  }
 0x926   :  { %v23672_v33 = vpop.f32.mrb[20].mxu1  ;;  %v1769_v35 = vpop.f32.mrb[24].mxu0  ;;  %20288 = vmatprep.subr.bf16.mxu0 %v21806_v27 }
 0x927   :  { %v23677_v13 = vadd.f32 %v1769_v35, %v1104_v29  ;;  %v1730_v38 = vpop.f32.mrb[21].mxu1  ;;  %v1771_v31 = vpop.f32.mrb[25].mxu0  ;;  %v1802_v35 = vpack.c.bf16 %v1786_v23, %v1786_v23  ;;  %v17142_v23 = vld [vmem:[%s27886_s23] ss:$0 sm:$0xff] }
 0x928   :  { %v1732_v40 = vpop.f32.mrb[22].mxu1  ;;  %v1773_v41 = vpop.f32.mrb[26].mxu0  ;;  %20267 = vmatpush3.bf16.msra.mxu1 %v21807_v30  ;;  %v1731_v20 = vadd.f32 %v1730_v38, %v1100_v10  ;;  %v1772_v53 = vadd.f32 %v1771_v31, %v1108_v11  ;;  %v21831_v30 = vld [vmem:[%s27885_s22 + $0x300] sm:$0xff]   ;;  %v21834_v31 = vld [vmem:[%s27885_s22 + $0x3c8] sm:$0xff]   ;;  %v1096_v10 = vrot.slane %v23597_v34, %v23573_v25  ;;  %v21855_v34 = vld [vmem:[%s27885_s22 + $0x330] sm:$0xff]  }
 0x929   :  { %20289 = vmatpush3.bf16.msra.mxu0 %v21808_v44  ;;  %v1733_v45 = vpop.f32.mrb[23].mxu1  ;;  %v1774_v50 = vpop.f32.mrb[27].mxu0  ;;  %20268 = vmatprep.subr.bf16.mxu1 %v21809_v32  ;;  %v1800_v44 = vpack.c.bf16 %v1784_v21, %v1784_v21  ;;  %v21832_v32 = vld [vmem:[%s27885_s22 + $0x380] sm:$0xff]   ;;  %v21835_v41 = vld [vmem:[%s27885_s22 + $0x308] sm:$0xff]  }
 0x92a   :  { %20290 = vmatprep.subr.bf16.mxu0 %v21810_v36  ;;  %v1789_v27 = vmax.f32 %v1731_v20, 0.0  ;;  %v1791_v29 = vmax.f32 %v1772_v53, 0.0  ;;  %v21833_v36 = vld [vmem:[%s27885_s22 + $0x348] sm:$0xff]   ;;  %v21837_v45 = vld [vmem:[%s27885_s22 + $0x350] sm:$0xff]   ;;  %v21860_v53 = vld [vmem:[%s27885_s22 + $0x3b8] sm:$0xff]  }
 0x92b   :  { %v21838_v50 = vld [vmem:[%s27885_s22 + $0x3d0] sm:$0xff]   ;;  %v21852_v11 = vld [vmem:[%s27885_s22 + $0x3a8] sm:$0xff]  }
 0x92c   :  { %20269 = vmatpush3.bf16.msra.mxu1 %v21811_v43  ;;  %v1805_v38 = vpack.c.bf16 %v1789_v27, %v1789_v27  ;;  %v1807_v40 = vpack.c.bf16 %v1791_v29, %v1791_v29  ;;  %v21836_v43 = vld [vmem:[%s27885_s22 + $0x388] sm:$0xff]  }
 0x92d   :  { %20291 = vmatpush3.bf16.msra.mxu0 %v21812_v56  ;;  %20270 = vmatprep.subr.bf16.mxu1 %v21813_v57  ;;  %v21839_v56 = vld [vmem:[%s27885_s22 + $0x310] sm:$0xff]  }
 0x92e   :  { %20292 = vmatprep.subr.bf16.mxu0 %v21814_v58  ;;  %v21840_v57 = vld [vmem:[%s27885_s22 + $0x390] sm:$0xff]   ;;  %v21841_v58 = vld [vmem:[%s27885_s22 + $0x358] sm:$0xff]  }
 0x930   :  { %20271 = vmatpush3.bf16.msra.mxu1 %v21815_v60  ;;  %v21842_v60 = vld [vmem:[%s27885_s22 + $0x3d8] sm:$0xff]  }
 0x931   :  { %20293 = vmatpush3.bf16.msra.mxu0 %v21816_v61  ;;  %20272 = vmatprep.subr.bf16.mxu1 %v21817_v62  ;;  %v21843_v61 = vld [vmem:[%s27885_s22 + $0x318] sm:$0xff]  }
 0x932   :  { %20294 = vmatprep.subr.bf16.mxu0 %v21818_v63  ;;  %v21844_v62 = vld [vmem:[%s27885_s22 + $0x398] sm:$0xff]   ;;  %v21845_v63 = vld [vmem:[%s27885_s22 + $0x360] sm:$0xff]  }
 0x934   :  { %20273 = vmatpush3.bf16.msra.mxu1 %v21819_v1  ;;  %v21846_v1 = vld [vmem:[%s27885_s22 + $0x3e0] sm:$0xff]  }
 0x935   :  { %20295 = vmatpush3.bf16.msra.mxu0 %v21820_v4  ;;  %20274 = vmatprep.subr.bf16.mxu1 %v21821_v5  ;;  %v21848_v4 = vld [vmem:[%s27885_s22 + $0x3a0] sm:$0xff]   ;;  %v21849_v5 = vld [vmem:[%s27885_s22 + $0x368] sm:$0xff]  }
 0x936   :  { %20296 = vmatprep.subr.bf16.mxu0 %v21822_v9  ;;  %v21851_v9 = vld [vmem:[%s27885_s22 + $0x328] sm:$0xff]  }
 0x938   :  { %20275 = vmatpush3.bf16.msra.mxu1 %v21823_v15  ;;  %v21853_v15 = vld [vmem:[%s27885_s22 + $0x370] sm:$0xff]  }
 0x939   :  { %20297 = vmatpush3.bf16.msra.mxu0 %v21824_v17  ;;  %20276 = vmatprep.subr.bf16.mxu1 %v21825_v18  ;;  %v1729_v17 = vadd.f32 %v23672_v33, %v1096_v10  ;;  %v21856_v18 = vld [vmem:[%s27885_s22 + $0x3b0] sm:$0xff]   ;;  %v21859_v33 = vld [vmem:[%s27885_s22 + $0x338] sm:$0xff]  }
 0x93a   :  { %20298 = vmatprep.subr.bf16.mxu0 %v21826_v19  ;;  %v21858_v19 = vld [vmem:[%s27885_s22 + $0x3f8] sm:$0xff]  }
 0x93b   :  { %v1788_v20 = vmax.f32 %v1729_v17, 0.0 }
 0x93c   :  { %20277 = vmatpush3.bf16.msra.mxu1 %v21827_v51  ;;  %v1790_v51 = vmax.f32 %v23677_v13, 0.0 }
 0x93d   :  { %20299 = vmatpush3.bf16.msra.mxu0 %v21828_v22  ;;  %20306 = vmatprep.subr.bf16.mxu1 %v21829_v55  ;;  %v1804_v21 = vpack.c.bf16 %v1788_v20, %v1788_v20 }
 0x93e   :  { %20328 = vmatprep.subr.bf16.mxu0 %v21830_v24  ;;  %v1806_v22 = vpack.c.bf16 %v1790_v51, %v1790_v51 }
 0x93f   :  { %3032 = vmatmul.mubr.bf16.vlgmr.msra.gmra.mrb[32].mxu1 %v1800_v44 }
 0x940   :  { %3072 = vmatmul.mubr.bf16.vlgmr.msra.gmra.mrb[36].mxu0 %v1802_v35  ;;  %20307 = vmatpush3.bf16.msra.mxu1 %v21831_v30 }
 0x941   :  { %3111 = vmatprep.mubr.bf16.mxu1 %v1805_v38  ;;  %20329 = vmatpush3.bf16.msra.mxu0 %v21832_v32 }
 0x942   :  { %3151 = vmatprep.mubr.bf16.mxu0 %v1807_v40  ;;  %20308 = vmatprep.subr.bf16.mxu1 %v21833_v36 }
 0x943   :  { %20330 = vmatprep.subr.bf16.mxu0 %v21834_v31 }
 0x944   :  { %20309 = vmatpush3.bf16.msra.mxu1 %v21835_v41 }
 0x945   :  { %20331 = vmatpush3.bf16.msra.mxu0 %v21836_v43  ;;  %20310 = vmatprep.subr.bf16.mxu1 %v21837_v45 }
 0x946   :  { %20332 = vmatprep.subr.bf16.mxu0 %v21838_v50 }
 0x948   :  { %20311 = vmatpush3.bf16.msra.mxu1 %v21839_v56 }
 0x949   :  { %20333 = vmatpush3.bf16.msra.mxu0 %v21840_v57  ;;  %20312 = vmatprep.subr.bf16.mxu1 %v21841_v58 }
 0x94a   :  { %20334 = vmatprep.subr.bf16.mxu0 %v21842_v60 }
 0x94c   :  { %20313 = vmatpush3.bf16.msra.mxu1 %v21843_v61 }
 0x94d   :  { %20335 = vmatpush3.bf16.msra.mxu0 %v21844_v62  ;;  %20314 = vmatprep.subr.bf16.mxu1 %v21845_v63 }
 0x94e   :  { %20336 = vmatprep.subr.bf16.mxu0 %v21846_v1 }
 0x950   :  { %20315 = vmatpush3.bf16.msra.mxu1 %v21847_v2 }
 0x951   :  { %20337 = vmatpush3.bf16.msra.mxu0 %v21848_v4  ;;  %20316 = vmatprep.subr.bf16.mxu1 %v21849_v5 }
 0x952   :  { %20338 = vmatprep.subr.bf16.mxu0 %v21850_v7 }
 0x954   :  { %20317 = vmatpush3.bf16.msra.mxu1 %v21851_v9 }
 0x955   :  { %20339 = vmatpush3.bf16.msra.mxu0 %v21852_v11  ;;  %20318 = vmatprep.subr.bf16.mxu1 %v21853_v15 }
 0x956   :  { %20340 = vmatprep.subr.bf16.mxu0 %v21854_v16 }
 0x958   :  { %20319 = vmatpush3.bf16.msra.mxu1 %v21855_v34 }
 0x959   :  { %20341 = vmatpush3.bf16.msra.mxu0 %v21856_v18  ;;  %20320 = vmatprep.subr.bf16.mxu1 %v21857_v49 }
 0x95a   :  { %20342 = vmatprep.subr.bf16.mxu0 %v21858_v19 }
 0x95c   :  { %20321 = vmatpush3.bf16.msra.mxu1 %v21859_v33 }
 0x95d   :  { %20343 = vmatpush3.bf16.msra.mxu0 %v21860_v53 }
 0x95e   :  { %21648 = vmatprep.subr.bf16.mxu0 %v22720_v3 }
 0x95f   :  { %3112 = vmatmul.mubr.bf16.vlgmr.msra.gmra.mrb[36].mxu1 %v1804_v21 }
 0x960   :  { %3152 = vmatmul.mubr.bf16.vlgmr.msra.gmra.mrb[40].mxu0 %v1806_v22  ;;  %3287 = vmatprep.mubr.bf16.mxu1 %v22723_v28 }
 0x961   :  { %21650 = vmatpush3.bf16.msra.mxu0 %v23050_v37  ;;  %21430 = vmatprep.mubr.msk.f32.mxu0 %vm22721_vm0, %v22722_v6 }
 0x962   :  { %21651 = vmatprep.subr.bf16.mxu0 %v22720_v3 }
 0x965   :  { %21653 = vmatpush3.bf16.msra.mxu0 %v23056_v39 }
 0x966   :  { %21654 = vmatprep.subr.bf16.mxu0 %v22720_v3 }
 0x969   :  { %21656 = vmatpush3.bf16.msra.mxu0 %v23066_v42 }
 0x96a   :  { %21657 = vmatprep.subr.bf16.mxu0 %v22720_v3 }
 0x96d   :  { %21659 = vmatpush3.bf16.msra.mxu0 %v23079_v47 }
 0x9d2   :  { %v20190_v13 = vpop.f32.mrb[24].mxu1  ;;  %v20212_v55 = vpop.f32.mrb[28].mxu0 }
 0x9d3   :  { %v20191_v24 = vpop.f32.mrb[25].mxu1  ;;  %v20213_v27 = vpop.f32.mrb[29].mxu0 }
 0x9d4   :  { %v20192_v29 = vadd.f32 %v20191_v24, %v20190_v13  ;;  %v20214_v30 = vadd.f32 %v20213_v27, %v20212_v55  ;;  %v20193_v44 = vpop.f32.mrb[26].mxu1  ;;  %v20215_v32 = vpop.f32.mrb[30].mxu0 }
 0x9d5   :  { %v20194_v35 = vpop.f32.mrb[27].mxu1  ;;  %v20216_v36 = vpop.f32.mrb[31].mxu0 }
 0x9d6   :  { %v2874_v38 = vadd.f32 %v20192_v29, %v17142_v23  ;;  %v21863_v36 = vld [vmem:[%s27919_s4 + $0x44] ss:$8 sps:$4 sm:$0xff]  }
 0x9d7   :  { %3255 = vmatprep.subr.bf16.mxu1 %v21863_v36 }
 0x9d8   :  { %v2914_v31 = vadd.f32 %v20214_v30, %v2874_v38  ;;  %v21861_v38 = vld [vmem:[%s27919_s4 + $0x40] ss:$8 sps:$4 sm:$0xff]  }
 0x9d9   :  { %3256 = vmatpush1.bf16.msra.mxu1 %v21861_v38 }
 0x9f2   :  { %v20234_v40 = vpop.f32.mrb[28].mxu1  ;;  %v20256_v41 = vpop.f32.mrb[32].mxu0 }
 0x9f3   :  { %v20235_v43 = vpop.f32.mrb[29].mxu1  ;;  %v20257_v45 = vpop.f32.mrb[33].mxu0 }
 0x9f4   :  { %v20236_v50 = vadd.f32 %v20235_v43, %v20234_v40  ;;  %v20258_v56 = vadd.f32 %v20257_v45, %v20256_v41  ;;  %v20237_v57 = vpop.f32.mrb[30].mxu1  ;;  %v20259_v58 = vpop.f32.mrb[34].mxu0  ;;  %v21869_v40 = vld [vmem:[%s27919_s4 + $0x64] ss:$8 sps:$4 sm:$0xff]   ;;  %v21867_v41 = vld [vmem:[%s27919_s4 + $0x60] ss:$8 sps:$4 sm:$0xff]  }
 0x9f5   :  { %v20238_v60 = vpop.f32.mrb[31].mxu1  ;;  %v20260_v61 = vpop.f32.mrb[35].mxu0  ;;  %v21872_v43 = vld [vmem:[%s27919_s4 + $0x74] ss:$8 sps:$4 sm:$0xff]   ;;  %v21870_v45 = vld [vmem:[%s27919_s4 + $0x70] ss:$8 sps:$4 sm:$0xff]  }
 0x9f6   :  { %v2954_v62 = vadd.f32 %v20236_v50, %v2914_v31  ;;  %v21864_v31 = vld [vmem:[%s27919_s4 + $0x50] ss:$8 sps:$4 sm:$0xff]   ;;  %v17271_v60 = vld [vmem:[%s27881_s18] ss:$0 sm:$0xff] }
 0x9f8   :  { %v2994_v63 = vadd.f32 %v20258_v56, %v2954_v62  ;;  %v17272_v62 = vld [vmem:[%s27882_s19] ss:$0 sm:$0xff] }
 0xa12   :  { %v20278_v1 = vpop.f32.mrb[32].mxu1 }
 0xa13   :  { %v20300_v2 = vpop.f32.mrb[36].mxu0  ;;  %v20279_v4 = vpop.f32.mrb[33].mxu1 }
 0xa14   :  { %v20280_v5 = vadd.f32 %v20279_v4, %v20278_v1  ;;  %v20301_v7 = vpop.f32.mrb[37].mxu0  ;;  %v20281_v9 = vpop.f32.mrb[34].mxu1  ;;  %v22667_v4 = vld [vmem:[%s27925_s6] sm:$0xff] }
 0xa15   :  { %v20302_v10 = vadd.f32 %v20301_v7, %v20300_v2  ;;  %v20303_v11 = vpop.f32.mrb[38].mxu0  ;;  %v20282_v15 = vpop.f32.mrb[35].mxu1 }
 0xa16   :  { %v3034_v16 = vadd.f32 %v20280_v5, %v2994_v63  ;;  %v20304_v34 = vpop.f32.mrb[39].mxu0  ;;  %v23905_v5 = vld [vmem:[%s27876_s13 + $0x2] sm:$0x3] }
 0xa17   :  { %v3205_v7 = vrot.slane %v23905_v5, %v23082_v48 }
 0xa18   :  { %v3074_v17 = vadd.f32 %v20302_v10, %v3034_v16 }
 0xa32   :  { %v20322_v18 = vpop.f32.mrb[36].mxu1 }
 0xa33   :  { %v20344_v49 = vpop.f32.mrb[40].mxu0  ;;  %v20323_v19 = vpop.f32.mrb[37].mxu1 }
 0xa34   :  { %v20324_v33 = vadd.f32 %v20323_v19, %v20322_v18  ;;  %v20345_v20 = vpop.f32.mrb[41].mxu0  ;;  %v20325_v53 = vpop.f32.mrb[38].mxu1 }
 0xa35   :  { %v20346_v51 = vadd.f32 %v20345_v20, %v20344_v49  ;;  %v20347_v21 = vpop.f32.mrb[42].mxu0  ;;  %v20326_v22 = vpop.f32.mrb[39].mxu1 }
 0xa36   :  { %v3114_v13 = vadd.f32 %v20324_v33, %v3074_v17  ;;  %v20348_v55 = vpop.f32.mrb[43].mxu0 }
 0xa38   :  { %v3154_v23 = vadd.f32 %v20346_v51, %v3114_v13 }
 0xa3a   :  { %v3159_v24 = vadd.f32 %v3154_v23, %v23239_v52  ;;  %v21866_v52 = vld [vmem:[%s27919_s4 + $0x54] ss:$8 sps:$4 sm:$0xff]  }
 0xa3b   :  { %3257 = vmatprep.subr.bf16.mxu1 %v21866_v52 }
 0xa3c   :  { %v3162_v27 = vsel %vm840_vm8, %v3159_v24, 0.0  ;;  %3258 = vmatpush1.bf16.msra.mxu1 %v21864_v31 }
 0xa3d   :  { %3163 = vadd.xlane.f32.xlu1 %v3162_v27  ;;  %3259 = vmatprep.subr.bf16.mxu1 %v21869_v40 }
 0xa40   :  { %3260 = vmatpush1.bf16.msra.mxu1 %v21867_v41 }
 0xa41   :  { %3261 = vmatprep.subr.bf16.mxu1 %v21872_v43 }
 0xa44   :  { %3262 = vmatpush1.bf16.msra.mxu1 %v21870_v45 }
 0xa45   :  { %21433 = vmatprep.subr.mxu1 %v22722_v6 }
 0xaca   :  { %v3164_v29 = vpop.xlane.xlu1 %3163 }
 0xacb   :  { %v3165_v30 = vmul.f32 0.015625, %v3164_v29 }
 0xacd   :  { %v3166_v44 = vsub.f32 %v3159_v24, %v3165_v30 }
 0xacf   :  { %v3167_v32 = vmul.f32 %v3166_v44, %v3166_v44 }
 0xad1   :  { %v3168_v35 = vsel %vm840_vm8, %v3167_v32, 0.0 }
 0xad2   :  { %3169 = vadd.xlane.f32.xlu1 %v3168_v35 }
 0xb5f   :  { %v3170_v50 = vpop.xlane.xlu1 %3169 }
 0xb60   :  { %v3171_v56 = vmul.f32 0.015625, %v3170_v50 }
 0xb62   :  { %v3172_v57 = vadd.f32 1e-05, %v3171_v56 }
 0xb64   :  { %22615 = vrsqrt.f32 %v3172_v57 }
 0xb6e   :  { %v22616_v58 = vpop.eup %22615 }
 0xb6f   :  { %v3174_v61 = vmul.f32 %v22616_v58, %v3166_v44 }
 0xb71   :  { %v3181_v63 = vmul.f32 %v17271_v60, %v3174_v61 }
 0xb73   :  { %v23891_v1 = vadd.f32 %v17272_v62, %v3181_v63 }
 0xb75   :  { %v3189_v2 = vpack.c.bf16 %v23891_v1, %v23891_v1 }
 0xb77   :  { %17290 = vmatmul.mubr.msk.bf16.vlgmr.msra.gmra.mrb[40].mxu1 %vm91_vm1, %v3189_v2 }
 0xb78   :  { %21434 = vmatpush3.msra.mxu1 %v22667_v4  ;;  %21435 = vmatprep.mubr.msk.f32.mxu1 %vm22721_vm0, %v22722_v6 }
 0xb79   :  { %21438 = vmatprep.subr.bf16.mxu1 %v22722_v6 }
 0xc4a   :  { %v3289_v9 = vpop.f32.mrb[40].mxu1 }
 0xc4b   :  { %v3290_v10 = vadd.f32 %v3289_v9, %v3205_v7  ;;  %v23909_v11 = vpop.f32.mrb[41].mxu1 }
 0xc4c   :  { %v3293_v15 = vpop.f32.mrb[42].mxu1 }
 0xc4d   :  { %v3294_v16 = vpop.f32.mrb[43].mxu1  ;;  %3329 = vrot.lane.b32.xlu1 %v3290_v10, %s22724_s8  ;;  %v3303_v34 = vrot.slane %v3290_v10, %v23097_v59 }
 0xc4f   :  { %v3304_v17 = vcombine.high %v3303_v34, %v3303_v34  ;;  %v3311_v18 = vrot.slane %v3303_v34, %v23097_v59 }
 0xc51   :  { %v3318_v49 = vrot.slane %v3304_v17, %v23097_v59  ;;  %v3322_v19 = vrot.slane %v3311_v18, %v23082_v48  ;;  %v21873_v18 = vld [vmem:[%s27877_s14 + $0x20] sm:$0xff]  }
 0xc53   :  { %v3326_v33 = vrot.slane %v3318_v49, %v23082_v48  ;;  %v21874_v49 = vld [vmem:[%s27877_s14 + $0x28] sm:$0xff]  }
 0xcbf   :  { %v3330_v20 = vpop.permute.xlu1 %3329 }
 0xcc0   :  { %v3332_v53 = vmul.f32 %v3330_v20, %v3322_v19  ;;  %v3333_v51 = vmul.f32 %v3330_v20, %v3326_v33  ;;  %v21875_v19 = vld [vmem:[%s27877_s14 + $0x30] sm:$0xff]   ;;  %v21876_v33 = vld [vmem:[%s27877_s14 + $0x38] sm:$0xff]   ;;  %v3209_v20 = vrot.slane %v23905_v5, %v23139_v0 }
 0xcc2   :  { %v3336_v21 = vcombine.low %v3332_v53, %v3333_v51  ;;  %v3292_v51 = vadd.f32 %v23909_v11, %v3209_v20 }
 0xcc4   :  { %v3343_v22 = vrot.slane %v3336_v21, %v23105_v8 }
 0xcc6   :  { %21431 = vmatmul.mubr.msk.f32.vlgmr.msra.gmra.mrb[44].mxu0 %vm91_vm1, %v3343_v22 }
 0xcc7   :  { %4195 = vmatprep.mubr.bf16.mxu0 %v22723_v28 }
 0xd99   :  { %v3412_v13 = vpop.f32.mrb[44].mxu0 }
 0xd9a   :  { %v3416_v55 = vmul.f32 0.35355338, %v3412_v13  ;;  %v21432_v23 = vpop.f32.mrb[45].mxu0 }
 0xd9c   :  { %v3417_v24 = vsel %vm703_vm5, %v3416_v55, -inf }
 0xd9d   :  { %v3418_v27 = vrot.slane %v3417_v24, 4 }
 0xd9f   :  { %v3419_v29 = vmax.f32 %v3417_v24, %v3418_v27 }
 0xda1   :  { %v3420_v30 = vrot.slane %v3419_v29, 2 }
 0xda3   :  { %v3421_v44 = vmax.f32 %v3419_v29, %v3420_v30 }
 0xda5   :  { %v3422_v32 = vrot.slane %v3421_v44, 1 }
 0xda7   :  { %v3423_v35 = vmax.f32 %v3421_v44, %v3422_v32 }
 0xda9   :  { %v3424_v36 = vsub.f32 %v3416_v55, %v3423_v35 }
 0xdab   :  { %v3425_v38 = vmul.f32 1.442695, %v3424_v36 }
 0xdad   :  { %22617 = vpow2.f32 %v3425_v38 }
 0xdb7   :  { %v22618_v52 = vpop.eup %22617 }
 0xdb8   :  { %v3434_v31 = vrot.slane %v22618_v52, %v23105_v8 }
 0xdba   :  { %v3438_v40 = vsel %vm725_vm6, %v3434_v31, 0.0  ;;  %v3435_v41 = vcombine.high %v3434_v31, %v3434_v31 }
 0xdbb   :  { %v3439_v43 = vrot.slane %v3438_v40, 4 }
 0xdbc   :  { %v3445_v45 = vsel %vm725_vm6, %v3435_v41, 0.0 }
 0xdbd   :  { %v3440_v50 = vadd.f32 %v3439_v43, %v3438_v40  ;;  %v3446_v56 = vrot.slane %v3445_v45, 4 }
 0xdbf   :  { %v3441_v57 = vrot.slane %v3440_v50, 2  ;;  %v3447_v58 = vadd.f32 %v3446_v56, %v3445_v45 }
 0xdc1   :  { %v3442_v60 = vadd.f32 %v3441_v57, %v3440_v50  ;;  %v3448_v61 = vrot.slane %v3447_v58, 2 }
 0xdc3   :  { %v3443_v62 = vrot.slane %v3442_v60, 1  ;;  %v3449_v63 = vadd.f32 %v3448_v61, %v3447_v58  ;;  %v17302_v58 = vld [vmem:[%s27878_s15 + $0x1] ss:$0 sm:$0xff] }
 0xdc5   :  { %v3444_v2 = vadd.f32 %v3443_v62, %v3442_v60  ;;  %v3450_v4 = vrot.slane %v3449_v63, 1 }
 0xdc7   :  { %22619 = vrcp.f32 %v3444_v2  ;;  %v3451_v7 = vadd.f32 %v3450_v4, %v3449_v63 }
 0xdc9   :  { %22621 = vrcp.f32 %v3451_v7 }
 0xdd1   :  { %v22620_v9 = vpop.eup %22619 }
 0xdd2   :  { %v3453_v15 = vmul.f32 %v22620_v9, %v3434_v31 }
 0xdd3   :  { %v22622_v10 = vpop.eup %22621 }
 0xdd4   :  { %v3455_v16 = vmul.f32 %v22622_v10, %v3435_v41 }
 0xdd6   :  { %v3458_v34 = vcombine.low %v3453_v15, %v3455_v16 }
 0xdd8   :  { %v3465_v17 = vrot.slane %v3458_v34, %v23105_v8 }
 0xdda   :  { %21436 = vmatmul.mubr.msk.f32.vlgmr.msra.gmra.mrb[44].mxu1 %vm754_vm7, %v3465_v17  ;;  %v17312_v17 = vld [vmem:[%s27883_s20 + $0x200] sm:$0xff] }
 0xddb   :  { %21446 = vmatprep.mubr.msk.bf16.mxu1 %vm22721_vm0, %v22722_v6  ;;  %21439 = vmatpush3.bf16.msra.mxu1 %v21873_v18  ;;  %v17313_v18 = vld [vmem:[%s27883_s20 + $0x208] sm:$0xff] }
 0xddc   :  { %21440 = vmatprep.subr.bf16.mxu1 %v22722_v6 }
 0xddf   :  { %21441 = vmatpush3.bf16.msra.mxu1 %v21874_v49 }
 0xde0   :  { %21442 = vmatprep.subr.bf16.mxu1 %v22722_v6 }
 0xde3   :  { %21443 = vmatpush3.bf16.msra.mxu1 %v21875_v19  ;;  %v17321_v19 = vld [vmem:[%s27883_s20 + $0x248] sm:$0xff] }
 0xde4   :  { %21444 = vmatprep.subr.bf16.mxu1 %v22722_v6  ;;  %v17380_v20 = vcombine.low %v17313_v18, %v17321_v19 }
 0xde7   :  { %21445 = vmatpush3.bf16.msra.mxu1 %v21876_v33 }
 0xead   :  { %v3534_v53 = vpop.f32.mrb[44].mxu1 }
 0xeae   :  { %v3545_v21 = vrot.slane %v3534_v53, %v23105_v8  ;;  %v21437_v22 = vpop.f32.mrb[45].mxu1  ;;  %v17381_v53 = vcombine.high %v17313_v18, %v17321_v19  ;;  %v17330_v18 = vld [vmem:[%s27883_s20 + $0x290] sm:$0xff]  ;;  %v17331_v19 = vld [vmem:[%s27883_s20 + $0x298] sm:$0xff] }
 0xeaf   :  { %v17329_v22 = vld [vmem:[%s27883_s20 + $0x288] sm:$0xff] }
 0xeb0   :  { %v3546_v13 = vcombine.high %v3545_v21, %v3545_v21  ;;  %v3549_v55 = vmul.f32 %v3545_v21, %v3292_v51  ;;  %4204 = vmatprep.subr.bf16.mxu1 %v17381_v53  ;;  %v17336_v21 = vld [vmem:[%s27883_s20 + $0x2c0] sm:$0xff] }
 0xeb2   :  { %v3550_v23 = vmul.f32 %v3546_v13, %v3292_v51  ;;  %v3551_v24 = vsel %vm840_vm8, %v3549_v55, 0.0  ;;  %v17328_v51 = vld [vmem:[%s27883_s20 + $0x280] sm:$0xff]  ;;  %v17337_v55 = vld [vmem:[%s27883_s20 + $0x2c8] sm:$0xff] }
 0xeb3   :  { %v3552_v27 = vrot.slane %v3551_v24, 4  ;;  %v17395_v13 = vcombine.high %v17328_v51, %v17336_v21 }
 0xeb4   :  { %v3558_v29 = vsel %vm840_vm8, %v3550_v23, 0.0  ;;  %v17394_v23 = vcombine.low %v17328_v51, %v17336_v21  ;;  %v17346_v21 = vld [vmem:[%s27883_s20 + $0x310] sm:$0xff] }
 0xeb5   :  { %v3553_v30 = vadd.f32 %v3552_v27, %v3551_v24  ;;  %v3559_v44 = vrot.slane %v3558_v29, 4  ;;  %v17396_v24 = vcombine.low %v17329_v22, %v17337_v55  ;;  %v17397_v27 = vcombine.high %v17329_v22, %v17337_v55  ;;  %v17354_v22 = vld [vmem:[%s27883_s20 + $0x350] sm:$0xff]  ;;  %v17355_v55 = vld [vmem:[%s27883_s20 + $0x358] sm:$0xff] }
 0xeb7   :  { %v3554_v32 = vrot.slane %v3553_v30, 2  ;;  %v3560_v35 = vadd.f32 %v3559_v44, %v3558_v29  ;;  %v17344_v29 = vld [vmem:[%s27883_s20 + $0x300] sm:$0xff]  ;;  %v17345_v44 = vld [vmem:[%s27883_s20 + $0x308] sm:$0xff] }
 0xeb9   :  { %v3555_v36 = vadd.f32 %v3554_v32, %v3553_v30  ;;  %v3561_v5 = vrot.slane %v3560_v35, 2  ;;  %v17352_v30 = vld [vmem:[%s27883_s20 + $0x340] sm:$0xff] }
 0xeba   :  { %v17411_v32 = vcombine.high %v17344_v29, %v17352_v30 }
 0xebb   :  { %v3556_v38 = vrot.slane %v3555_v36, 1  ;;  %v3562_v52 = vadd.f32 %v3561_v5, %v3560_v35  ;;  %v17353_v35 = vld [vmem:[%s27883_s20 + $0x348] sm:$0xff] }
 0xebc   :  { %v17412_v5 = vcombine.low %v17345_v44, %v17353_v35 }
 0xebd   :  { %v3557_v11 = vadd.f32 %v3556_v38, %v3555_v36  ;;  %v3563_v31 = vrot.slane %v3562_v52, 1  ;;  %v17410_v36 = vcombine.low %v17344_v29, %v17352_v30  ;;  %v17413_v38 = vcombine.high %v17345_v44, %v17353_v35  ;;  %v17362_v30 = vld [vmem:[%s27883_s20 + $0x390] sm:$0xff]  ;;  %v17371_v35 = vld [vmem:[%s27883_s20 + $0x3d8] sm:$0xff] }
 0xebe   :  { %v17370_v44 = vld [vmem:[%s27883_s20 + $0x3d0] sm:$0xff] }
 0xebf   :  { %v3564_v40 = vadd.f32 %v3563_v31, %v3562_v52  ;;  %v3565_v41 = vpack.c.bf16 %v3557_v11, %v3557_v11  ;;  %v17360_v52 = vld [vmem:[%s27883_s20 + $0x380] sm:$0xff]  ;;  %v17361_v31 = vld [vmem:[%s27883_s20 + $0x388] sm:$0xff] }
 0xec0   :  { %v17368_v11 = vld [vmem:[%s27883_s20 + $0x3c0] sm:$0xff] }
 0xec1   :  { %v3566_v43 = vpack.c.bf16 %v3564_v40, %v3564_v40  ;;  %v3586_v45 = vunpack.c.l.b16 %v3565_v41  ;;  %v17427_v40 = vcombine.high %v17360_v52, %v17368_v11  ;;  %v17369_v41 = vld [vmem:[%s27883_s20 + $0x3c8] sm:$0xff] }
 0xec3   :  { %v3587_v50 = vunpack.c.l.b16 %v3566_v43  ;;  %v17426_v43 = vcombine.low %v17360_v52, %v17368_v11  ;;  %v17316_v11 = vld [vmem:[%s27883_s20 + $0x220] sm:$0xff] }
 0xec5   :  { %v3588_v56 = vsel %vm126_vm2, %v3587_v50, %v3586_v45  ;;  %v17428_v45 = vcombine.low %v17361_v31, %v17369_v41  ;;  %v17429_v50 = vcombine.high %v17361_v31, %v17369_v41  ;;  %v17324_v31 = vld [vmem:[%s27883_s20 + $0x260] sm:$0xff]  ;;  %v17325_v41 = vld [vmem:[%s27883_s20 + $0x268] sm:$0xff] }
 0xec6   :  { %v3589_v57 = vpack.c.b16 %v3588_v56, %v3588_v56  ;;  %v17314_v56 = vld [vmem:[%s27883_s20 + $0x210] sm:$0xff] }
 0xec8   :  { %21447 = vmatmul.mubr.msk.bf16.vlgmr.msra.gmra.mrb[48].mxu1 %vm91_vm1, %v3589_v57  ;;  %v17322_v57 = vld [vmem:[%s27883_s20 + $0x250] sm:$0xff] }
 0xec9   :  { %4236 = vmatprep.mubr.bf16.mxu1 %v22723_v28  ;;  %4205 = vmatpush1.bf16.msra.mxu1 %v17380_v20 }
 0xeca   :  { %4206 = vmatprep.subr.bf16.mxu1 %v17397_v27  ;;  %v17415_v27 = vcombine.high %v17346_v21, %v17354_v22 }
 0xecd   :  { %4207 = vmatpush1.bf16.msra.mxu1 %v17396_v24 }
 0xece   :  { %4208 = vmatprep.subr.bf16.mxu1 %v17413_v38  ;;  %v17431_v38 = vcombine.high %v17362_v30, %v17370_v44 }
 0xed1   :  { %4209 = vmatpush1.bf16.msra.mxu1 %v17412_v5 }
 0xed2   :  { %4210 = vmatprep.subr.bf16.mxu1 %v17429_v50  ;;  %v17387_v50 = vcombine.high %v17316_v11, %v17324_v31 }
 0xed5   :  { %4211 = vmatpush1.bf16.msra.mxu1 %v17428_v45 }
 0xf9b   :  { %v3651_v60 = vpop.f32.mrb[48].mxu1 }
 0xf9c   :  { %v3652_v61 = vadd.f32 %v17302_v58, %v3651_v60  ;;  %v21448_v62 = vpop.f32.mrb[49].mxu1  ;;  %v17315_v58 = vld [vmem:[%s27883_s20 + $0x218] sm:$0xff]  ;;  %v17382_v60 = vcombine.low %v17314_v56, %v17322_v57 }
 0xf9d   :  { %v3654_v63 = vpop.f32.mrb[50].mxu1  ;;  %v17323_v62 = vld [vmem:[%s27883_s20 + $0x258] sm:$0xff] }
 0xf9e   :  { %v21449_v2 = vpop.f32.mrb[51].mxu1  ;;  %v3657_v4 = vadd.f32 %v3652_v61, %v23891_v1  ;;  %v17320_v1 = vld [vmem:[%s27883_s20 + $0x240] sm:$0xff]  ;;  %v17383_v61 = vcombine.high %v17314_v56, %v17322_v57  ;;  %v17384_v63 = vcombine.low %v17315_v58, %v17323_v62 }
 0xf9f   :  { %v17379_v49 = vcombine.high %v17312_v17, %v17320_v1  ;;  %v17378_v33 = vcombine.low %v17312_v17, %v17320_v1  ;;  %v17385_v2 = vcombine.high %v17315_v58, %v17323_v62  ;;  %v17311_v17 = vld [vmem:[%s27880_s17 + $0x1] ss:$0 sm:$0xff]  ;;  %v17386_v62 = vcombine.low %v17316_v11, %v17324_v31 }
 0xfa0   :  { %v3662_v7 = vsel %vm840_vm8, %v3657_v4, 0.0  ;;  %v17332_v57 = vld [vmem:[%s27883_s20 + $0x2a0] sm:$0xff] }
 0xfa1   :  { %3663 = vadd.xlane.f32.xlu1 %v3662_v7  ;;  %4163 = vmatprep.subr.bf16.mxu0 %v17379_v49  ;;  %v17338_v49 = vld [vmem:[%s27883_s20 + $0x2d0] sm:$0xff]  ;;  %v17340_v58 = vld [vmem:[%s27883_s20 + $0x2e0] sm:$0xff] }
 0xfa2   :  { %4164 = vmatpush1.bf16.msra.mxu0 %v17378_v33  ;;  %4286 = vmatprep.subr.bf16.mxu1 %v17385_v2  ;;  %v17399_v53 = vcombine.high %v17330_v18, %v17338_v49  ;;  %v17403_v2 = vcombine.high %v17332_v57, %v17340_v58 }
 0xfa3   :  { %4165 = vmatprep.subr.bf16.mxu0 %v17395_v13  ;;  %v17347_v13 = vld [vmem:[%s27883_s20 + $0x318] sm:$0xff] }
 0xfa4   :  { %v17417_v29 = vcombine.high %v17347_v13, %v17355_v55  ;;  %v17416_v5 = vcombine.low %v17347_v13, %v17355_v55  ;;  %v17318_v55 = vld [vmem:[%s27883_s20 + $0x230] sm:$0xff] }
 0xfa6   :  { %4166 = vmatpush1.bf16.msra.mxu0 %v17394_v23  ;;  %v17398_v23 = vcombine.low %v17330_v18, %v17338_v49  ;;  %v17364_v49 = vld [vmem:[%s27883_s20 + $0x3a0] sm:$0xff] }
 0xfa7   :  { %4167 = vmatprep.subr.bf16.mxu0 %v17411_v32  ;;  %v17363_v32 = vld [vmem:[%s27883_s20 + $0x398] sm:$0xff] }
 0xfa8   :  { %v17433_v52 = vcombine.high %v17363_v32, %v17371_v35  ;;  %v17432_v45 = vcombine.low %v17363_v32, %v17371_v35  ;;  %v17334_v35 = vld [vmem:[%s27883_s20 + $0x2b0] sm:$0xff] }
 0xfaa   :  { %4168 = vmatpush1.bf16.msra.mxu0 %v17410_v36  ;;  %v17414_v36 = vcombine.low %v17346_v21, %v17354_v22 }
 0xfab   :  { %4169 = vmatprep.subr.bf16.mxu0 %v17427_v40  ;;  %v17317_v40 = vld [vmem:[%s27883_s20 + $0x228] sm:$0xff] }
 0xfac   :  { %v17389_v56 = vcombine.high %v17317_v40, %v17325_v41 }
 0xfae   :  { %4170 = vmatpush1.bf16.msra.mxu0 %v17426_v43  ;;  %v17430_v43 = vcombine.low %v17362_v30, %v17370_v44 }
 0xfaf   :  { %4245 = vmatprep.subr.bf16.mxu0 %v17383_v61  ;;  %v17341_v61 = vld [vmem:[%s27883_s20 + $0x2e8] sm:$0xff] }
0x102e   :  { %v3664_v9 = vpop.xlane.xlu1 %3663 }
0x102f   :  { %v3665_v10 = vmul.f32 0.015625, %v3664_v9 }
0x1031   :  { %v23957_v15 = vsub.f32 %v3657_v4, %v3665_v10 }
0x1033   :  { %v3667_v16 = vmul.f32 %v23957_v15, %v23957_v15 }
0x1035   :  { %v3668_v34 = vsel %vm840_vm8, %v3667_v16, 0.0  ;;  %v17310_v16 = vld [vmem:[%s27879_s16 + $0x1] ss:$0 sm:$0xff] }
0x1036   :  { %3669 = vadd.xlane.f32.xlu0 %v3668_v34 }
0x10c3   :  { %v3670_v4 = vpop.xlane.xlu0 %3669 }
0x10c4   :  { %v3671_v7 = vmul.f32 0.015625, %v3670_v4 }
0x10c6   :  { %v3672_v9 = vadd.f32 1e-05, %v3671_v7  ;;  %v17348_v7 = vld [vmem:[%s27883_s20 + $0x320] sm:$0xff] }
0x10c8   :  { %22623 = vrsqrt.f32 %v3672_v9  ;;  %v17356_v9 = vld [vmem:[%s27883_s20 + $0x360] sm:$0xff] }
0x10d2   :  { %v22624_v10 = vpop.eup %22623 }
0x10d3   :  { %v3674_v34 = vmul.f32 %v22624_v10, %v23957_v15  ;;  %v17339_v15 = vld [vmem:[%s27883_s20 + $0x2d8] sm:$0xff]  ;;  %v17349_v10 = vld [vmem:[%s27883_s20 + $0x328] sm:$0xff] }
0x10d4   :  { %v17401_v51 = vcombine.high %v17331_v19, %v17339_v15  ;;  %v17400_v24 = vcombine.low %v17331_v19, %v17339_v15  ;;  %v17372_v19 = vld [vmem:[%s27883_s20 + $0x3e0] sm:$0xff]  ;;  %v17365_v15 = vld [vmem:[%s27883_s20 + $0x3a8] sm:$0xff] }
0x10d5   :  { %v3681_v1 = vmul.f32 %v17310_v16, %v3674_v34  ;;  %v17357_v16 = vld [vmem:[%s27883_s20 + $0x368] sm:$0xff]  ;;  %v17402_v34 = vcombine.low %v17332_v57, %v17340_v58  ;;  %v17435_v22 = vcombine.high %v17364_v49, %v17372_v19 }
0x10d6   :  { %v17421_v18 = vcombine.high %v17349_v10, %v17357_v16  ;;  %v17420_v21 = vcombine.low %v17349_v10, %v17357_v16 }
0x10d7   :  { %v24041_v33 = vadd.f32 %v17311_v17, %v3681_v1  ;;  %v17419_v1 = vcombine.high %v17348_v7, %v17356_v9 }
0x10d9   :  { %v24045_v20 = vpack.c.bf16 %v24041_v33, %v24041_v33 }
0x10db   :  { %17442 = vmatmul.mubr.msk.bf16.vlgmr.msra.gmra.mrb[48].mxu0 %vm91_vm1, %v24045_v20  ;;  %17443 = vmatmul.mubr.msk.bf16.vlgmr.msra.gmra.mrb[52].mxu1 %vm91_vm1, %v24045_v20 }
0x10dc   :  { %4246 = vmatpush1.bf16.msra.mxu0 %v17382_v60  ;;  %4287 = vmatpush1.bf16.msra.mxu1 %v17384_v63  ;;  %v17333_v60 = vld [vmem:[%s27883_s20 + $0x2a8] sm:$0xff]  ;;  %v17388_v63 = vcombine.low %v17317_v40, %v17325_v41  ;;  %v17350_v41 = vld [vmem:[%s27883_s20 + $0x330] sm:$0xff] }
0x10dd   :  { %4247 = vmatprep.subr.bf16.mxu0 %v17399_v53  ;;  %4288 = vmatprep.subr.bf16.mxu1 %v17401_v51  ;;  %v17405_v4 = vcombine.high %v17333_v60, %v17341_v61  ;;  %v17404_v17 = vcombine.low %v17333_v60, %v17341_v61  ;;  %v17373_v53 = vld [vmem:[%s27883_s20 + $0x3e8] sm:$0xff]  ;;  %v17418_v51 = vcombine.low %v17348_v7, %v17356_v9  ;;  %v17366_v61 = vld [vmem:[%s27883_s20 + $0x3b0] sm:$0xff] }
0x10de   :  { %4277 = vmatprep.mubr.bf16.mxu0 %v22723_v28  ;;  %4318 = vmatprep.mubr.bf16.mxu1 %v22723_v28  ;;  %v17437_v13 = vcombine.high %v17365_v15, %v17373_v53  ;;  %v17436_v30 = vcombine.low %v17365_v15, %v17373_v53  ;;  %v21882_v15 = vld [vmem:[%s27885_s22 + $0x4c8] sm:$0xff]  }
0x10df   :  { %v21883_v53 = vld [vmem:[%s27885_s22 + $0x408] sm:$0xff]  }
0x10e0   :  { %4248 = vmatpush1.bf16.msra.mxu0 %v17398_v23  ;;  %4289 = vmatpush1.bf16.msra.mxu1 %v17400_v24  ;;  %v17326_v23 = vld [vmem:[%s27883_s20 + $0x270] sm:$0xff]  ;;  %v17319_v24 = vld [vmem:[%s27883_s20 + $0x238] sm:$0xff] }
0x10e1   :  { %4249 = vmatprep.subr.bf16.mxu0 %v17415_v27  ;;  %4290 = vmatprep.subr.bf16.mxu1 %v17417_v29  ;;  %v17327_v27 = vld [vmem:[%s27883_s20 + $0x278] sm:$0xff]  ;;  %v17434_v29 = vcombine.low %v17364_v49, %v17372_v19  ;;  %v17391_v44 = vcombine.high %v17318_v55, %v17326_v23  ;;  %v21880_v49 = vld [vmem:[%s27885_s22 + $0x480] sm:$0xff]   ;;  %v21881_v19 = vld [vmem:[%s27885_s22 + $0x448] sm:$0xff]  }
0x10e2   :  { %v17393_v32 = vcombine.high %v17319_v24, %v17327_v27  ;;  %v17392_v11 = vcombine.low %v17319_v24, %v17327_v27  ;;  %v21891_v24 = vld [vmem:[%s27885_s22 + $0x418] sm:$0xff]  }
0x10e3   :  { %v21892_v27 = vld [vmem:[%s27885_s22 + $0x498] sm:$0xff]  }
0x10e4   :  { %4250 = vmatpush1.bf16.msra.mxu0 %v17414_v36  ;;  %4291 = vmatpush1.bf16.msra.mxu1 %v17416_v5  ;;  %v17342_v36 = vld [vmem:[%s27883_s20 + $0x2f0] sm:$0xff]  ;;  %v17335_v5 = vld [vmem:[%s27883_s20 + $0x2b8] sm:$0xff] }
0x10e5   :  { %4251 = vmatprep.subr.bf16.mxu0 %v17431_v38  ;;  %4292 = vmatprep.subr.bf16.mxu1 %v17433_v52  ;;  %v17343_v38 = vld [vmem:[%s27883_s20 + $0x2f8] sm:$0xff]  ;;  %v17390_v52 = vcombine.low %v17318_v55, %v17326_v23  ;;  %v17407_v31 = vcombine.high %v17334_v35, %v17342_v36 }
0x10e6   :  { %v17409_v40 = vcombine.high %v17335_v5, %v17343_v38  ;;  %v17408_v57 = vcombine.low %v17335_v5, %v17343_v38  ;;  %v21889_v55 = vld [vmem:[%s27885_s22 + $0x458] sm:$0xff]   ;;  %v21899_v5 = vld [vmem:[%s27885_s22 + $0x428] sm:$0xff]  }
0x10e7   :  { %v21890_v23 = vld [vmem:[%s27885_s22 + $0x4d8] sm:$0xff]   ;;  %v21900_v38 = vld [vmem:[%s27885_s22 + $0x4a8] sm:$0xff]  }
0x10e8   :  { %4252 = vmatpush1.bf16.msra.mxu0 %v17430_v43  ;;  %4293 = vmatpush1.bf16.msra.mxu1 %v17432_v45  ;;  %v17358_v43 = vld [vmem:[%s27883_s20 + $0x370] sm:$0xff]  ;;  %v17351_v45 = vld [vmem:[%s27883_s20 + $0x338] sm:$0xff] }
0x10e9   :  { %4327 = vmatprep.subr.bf16.mxu0 %v17387_v50  ;;  %4368 = vmatprep.subr.bf16.mxu1 %v17389_v56  ;;  %v17359_v50 = vld [vmem:[%s27883_s20 + $0x378] sm:$0xff]  ;;  %v17406_v56 = vcombine.low %v17334_v35, %v17342_v36  ;;  %v17423_v58 = vcombine.high %v17350_v41, %v17358_v43  ;;  %v21897_v35 = vld [vmem:[%s27885_s22 + $0x468] sm:$0xff]  }
0x10ea   :  { %v17425_v60 = vcombine.high %v17351_v45, %v17359_v50  ;;  %v17424_v7 = vcombine.low %v17351_v45, %v17359_v50  ;;  %v21898_v36 = vld [vmem:[%s27885_s22 + $0x4e8] sm:$0xff]   ;;  %v21907_v45 = vld [vmem:[%s27885_s22 + $0x438] sm:$0xff]  }
0x10eb   :  { %17444 = vmatmul.mubr.msk.bf16.vlgmr.msra.gmra.mrb[52].mxu0 %vm91_vm1, %v24045_v20  ;;  %17445 = vmatmul.mubr.msk.bf16.vlgmr.msra.gmra.mrb[56].mxu1 %vm91_vm1, %v24045_v20  ;;  %v21908_v50 = vld [vmem:[%s27885_s22 + $0x4b8] sm:$0xff]  }
0x10ec   :  { %4328 = vmatpush1.bf16.msra.mxu0 %v17386_v62  ;;  %4369 = vmatpush1.bf16.msra.mxu1 %v17388_v63  ;;  %v17374_v62 = vld [vmem:[%s27883_s20 + $0x3f0] sm:$0xff]  ;;  %v17367_v63 = vld [vmem:[%s27883_s20 + $0x3b8] sm:$0xff] }
0x10ed   :  { %4329 = vmatprep.subr.bf16.mxu0 %v17403_v2  ;;  %4370 = vmatprep.subr.bf16.mxu1 %v17405_v4  ;;  %v17375_v2 = vld [vmem:[%s27883_s20 + $0x3f8] sm:$0xff]  ;;  %v17422_v4 = vcombine.low %v17350_v41, %v17358_v43  ;;  %v17439_v9 = vcombine.high %v17366_v61, %v17374_v62  ;;  %v17438_v16 = vcombine.low %v17366_v61, %v17374_v62 }
0x10ee   :  { %4359 = vmatprep.mubr.bf16.mxu0 %v22723_v28  ;;  %4400 = vmatprep.mubr.bf16.mxu1 %v22723_v28  ;;  %v17441_v10 = vcombine.high %v17367_v63, %v17375_v2  ;;  %v21905_v41 = vld [vmem:[%s27885_s22 + $0x478] sm:$0xff]  }
0x10ef   :  { %v21906_v43 = vld [vmem:[%s27885_s22 + $0x4f8] sm:$0xff]  }
0x10f0   :  { %4330 = vmatpush1.bf16.msra.mxu0 %v17402_v34  ;;  %4371 = vmatpush1.bf16.msra.mxu1 %v17404_v17  ;;  %v17440_v34 = vcombine.low %v17367_v63, %v17375_v2  ;;  %v21877_v17 = vld [vmem:[%s27885_s22 + $0x440] sm:$0xff]  }
0x10f1   :  { %4331 = vmatprep.subr.bf16.mxu0 %v17419_v1  ;;  %4372 = vmatprep.subr.bf16.mxu1 %v17421_v18  ;;  %v21878_v1 = vld [vmem:[%s27885_s22 + $0x4c0] sm:$0xff]  }
0x10f2   :  { %v21879_v18 = vld [vmem:[%s27885_s22 + $0x400] sm:$0xff]  }
0x10f4   :  { %4332 = vmatpush1.bf16.msra.mxu0 %v17418_v51  ;;  %4373 = vmatpush1.bf16.msra.mxu1 %v17420_v21  ;;  %v21884_v51 = vld [vmem:[%s27885_s22 + $0x488] sm:$0xff]   ;;  %v21885_v21 = vld [vmem:[%s27885_s22 + $0x450] sm:$0xff]  }
0x10f5   :  { %4333 = vmatprep.subr.bf16.mxu0 %v17435_v22  ;;  %4374 = vmatprep.subr.bf16.mxu1 %v17437_v13  ;;  %v21887_v22 = vld [vmem:[%s27885_s22 + $0x410] sm:$0xff]  }
0x10f6   :  { %v21888_v13 = vld [vmem:[%s27885_s22 + $0x490] sm:$0xff]  }
0x10f8   :  { %4334 = vmatpush1.bf16.msra.mxu0 %v17434_v29  ;;  %4375 = vmatpush1.bf16.msra.mxu1 %v17436_v30  ;;  %v21893_v29 = vld [vmem:[%s27885_s22 + $0x460] sm:$0xff]  }
0x10f9   :  { %4409 = vmatprep.subr.bf16.mxu0 %v17391_v44  ;;  %4450 = vmatprep.subr.bf16.mxu1 %v17393_v32  ;;  %v21894_v30 = vld [vmem:[%s27885_s22 + $0x4e0] sm:$0xff]  }
0x10fa   :  { %v21895_v44 = vld [vmem:[%s27885_s22 + $0x420] sm:$0xff]  }
0x10fb   :  { %17446 = vmatmul.mubr.msk.bf16.vlgmr.msra.gmra.mrb[56].mxu0 %vm91_vm1, %v24045_v20  ;;  %17447 = vmatmul.mubr.msk.bf16.vlgmr.msra.gmra.mrb[60].mxu1 %vm91_vm1, %v24045_v20  ;;  %v21896_v32 = vld [vmem:[%s27885_s22 + $0x4a0] sm:$0xff]  }
0x10fc   :  { %4410 = vmatpush1.bf16.msra.mxu0 %v17390_v52  ;;  %4451 = vmatpush1.bf16.msra.mxu1 %v17392_v11  ;;  %v21901_v52 = vld [vmem:[%s27885_s22 + $0x470] sm:$0xff]  }
0x10fd   :  { %4411 = vmatprep.subr.bf16.mxu0 %v17407_v31  ;;  %4452 = vmatprep.subr.bf16.mxu1 %v17409_v40  ;;  %v21902_v11 = vld [vmem:[%s27885_s22 + $0x4f0] sm:$0xff]  }
0x10fe   :  { %4441 = vmatprep.mubr.bf16.mxu0 %v22723_v28  ;;  %4482 = vmatprep.mubr.bf16.mxu1 %v22723_v28  ;;  %v21903_v31 = vld [vmem:[%s27885_s22 + $0x430] sm:$0xff]  }
0x10ff   :  { %v21904_v40 = vld [vmem:[%s27885_s22 + $0x4b0] sm:$0xff]  }
0x1100   :  { %4412 = vmatpush1.bf16.msra.mxu0 %v17406_v56  ;;  %4453 = vmatpush1.bf16.msra.mxu1 %v17408_v57  ;;  %v21909_v56 = vld [vmem:[%s27885_s22 + $0x540] sm:$0xff]  }
0x1101   :  { %4413 = vmatprep.subr.bf16.mxu0 %v17423_v58  ;;  %4454 = vmatprep.subr.bf16.mxu1 %v17425_v60  ;;  %v21910_v57 = vld [vmem:[%s27885_s22 + $0x5c0] sm:$0xff]   ;;  %v24294_v58 = vld [vmem:[%s27884_s21 + $0x10] sm:$0xff] }
0x1102   :  { %v3763_v60 = vrot.slane %v24294_v58, %v23082_v48  ;;  %v3771_v61 = vrot.slane %v24294_v58, %v23490_v12  ;;  %v3767_v62 = vrot.slane %v24294_v58, %v23139_v0  ;;  %v3775_v63 = vrot.slane %v24294_v58, %v23498_v14 }
0x1104   :  { %4414 = vmatpush1.bf16.msra.mxu0 %v17422_v4  ;;  %4455 = vmatpush1.bf16.msra.mxu1 %v17424_v7 }
0x1105   :  { %4415 = vmatprep.subr.bf16.mxu0 %v17439_v9  ;;  %4456 = vmatprep.subr.bf16.mxu1 %v17441_v10 }
0x1108   :  { %4416 = vmatpush1.bf16.msra.mxu0 %v17438_v16  ;;  %4457 = vmatpush1.bf16.msra.mxu1 %v17440_v34 }
0x1109   :  { %20366 = vmatprep.subr.bf16.mxu0 %v21877_v17  ;;  %20388 = vmatprep.subr.bf16.mxu1 %v21878_v1 }
0x110b   :  { %17448 = vmatmul.mubr.msk.bf16.vlgmr.msra.gmra.mrb[60].mxu0 %vm91_vm1, %v24045_v20  ;;  %17449 = vmatmul.mubr.msk.bf16.vlgmr.msra.gmra.mrb[64].mxu1 %vm91_vm1, %v24045_v20  ;;  %v21886_v20 = vld [vmem:[%s27885_s22 + $0x4d0] sm:$0xff]  }
0x110c   :  { %20367 = vmatpush3.bf16.msra.mxu0 %v21879_v18  ;;  %20389 = vmatpush3.bf16.msra.mxu1 %v21880_v49 }
0x110d   :  { %20368 = vmatprep.subr.bf16.mxu0 %v21881_v19  ;;  %20390 = vmatprep.subr.bf16.mxu1 %v21882_v15 }
0x1110   :  { %20369 = vmatpush3.bf16.msra.mxu0 %v21883_v53  ;;  %20391 = vmatpush3.bf16.msra.mxu1 %v21884_v51 }
0x1111   :  { %20370 = vmatprep.subr.bf16.mxu0 %v21885_v21  ;;  %20392 = vmatprep.subr.bf16.mxu1 %v21886_v20 }
0x1114   :  { %20371 = vmatpush3.bf16.msra.mxu0 %v21887_v22  ;;  %20393 = vmatpush3.bf16.msra.mxu1 %v21888_v13  ;;  %v21911_v13 = vld [vmem:[%s27885_s22 + $0x500] sm:$0xff]  }
0x1115   :  { %20372 = vmatprep.subr.bf16.mxu0 %v21889_v55  ;;  %20394 = vmatprep.subr.bf16.mxu1 %v21890_v23  ;;  %v21912_v55 = vld [vmem:[%s27885_s22 + $0x580] sm:$0xff]  }
0x1118   :  { %20373 = vmatpush3.bf16.msra.mxu0 %v21891_v24  ;;  %20395 = vmatpush3.bf16.msra.mxu1 %v21892_v27  ;;  %v21913_v27 = vld [vmem:[%s27885_s22 + $0x548] sm:$0xff]  }
0x1119   :  { %20374 = vmatprep.subr.bf16.mxu0 %v21893_v29  ;;  %20396 = vmatprep.subr.bf16.mxu1 %v21894_v30  ;;  %v21914_v29 = vld [vmem:[%s27885_s22 + $0x5c8] sm:$0xff]  }
0x111a   :  { %v21915_v30 = vld [vmem:[%s27885_s22 + $0x508] sm:$0xff]  }
0x111c   :  { %20375 = vmatpush3.bf16.msra.mxu0 %v21895_v44  ;;  %20397 = vmatpush3.bf16.msra.mxu1 %v21896_v32  ;;  %v21916_v44 = vld [vmem:[%s27885_s22 + $0x588] sm:$0xff]   ;;  %v21917_v32 = vld [vmem:[%s27885_s22 + $0x550] sm:$0xff]  }
0x111d   :  { %20376 = vmatprep.subr.bf16.mxu0 %v21897_v35  ;;  %20398 = vmatprep.subr.bf16.mxu1 %v21898_v36  ;;  %v21918_v35 = vld [vmem:[%s27885_s22 + $0x5d0] sm:$0xff]   ;;  %v3783_v36 = vrot.slane %v24294_v58, %v23527_v46 }
0x1120   :  { %20377 = vmatpush3.bf16.msra.mxu0 %v21899_v5  ;;  %20399 = vmatpush3.bf16.msra.mxu1 %v21900_v38  ;;  %v3791_v5 = vrot.slane %v24294_v58, %v23530_v54  ;;  %v21919_v38 = vld [vmem:[%s27885_s22 + $0x510] sm:$0xff]  }
0x1121   :  { %20378 = vmatprep.subr.bf16.mxu0 %v21901_v52  ;;  %20400 = vmatprep.subr.bf16.mxu1 %v21902_v11  ;;  %v21920_v52 = vld [vmem:[%s27885_s22 + $0x590] sm:$0xff]   ;;  %v21921_v11 = vld [vmem:[%s27885_s22 + $0x558] sm:$0xff]  }
0x1124   :  { %20379 = vmatpush3.bf16.msra.mxu0 %v21903_v31  ;;  %20401 = vmatpush3.bf16.msra.mxu1 %v21904_v40  ;;  %v21922_v31 = vld [vmem:[%s27885_s22 + $0x5d8] sm:$0xff]  }
0x1125   :  { %20380 = vmatprep.subr.bf16.mxu0 %v21905_v41  ;;  %20402 = vmatprep.subr.bf16.mxu1 %v21906_v43 }
0x1128   :  { %20381 = vmatpush3.bf16.msra.mxu0 %v21907_v45  ;;  %20403 = vmatpush3.bf16.msra.mxu1 %v21908_v50 }
0x1129   :  { %20410 = vmatprep.subr.bf16.mxu0 %v21909_v56  ;;  %20432 = vmatprep.subr.bf16.mxu1 %v21910_v57 }
0x11ae   :  { %v4197_v2 = vpop.f32.mrb[48].mxu0  ;;  %v4238_v4 = vpop.f32.mrb[52].mxu1 }
0x11af   :  { %v4198_v7 = vadd.f32 %v4197_v2, %v3763_v60  ;;  %v4239_v9 = vadd.f32 %v4238_v4, %v3771_v61  ;;  %v4199_v10 = vpop.f32.mrb[49].mxu0  ;;  %v4240_v16 = vpop.f32.mrb[53].mxu1  ;;  %v21923_v61 = vld [vmem:[%s27885_s22 + $0x518] sm:$0xff]   ;;  %v21925_v4 = vld [vmem:[%s27885_s22 + $0x560] sm:$0xff]  }
0x11b0   :  { %v4200_v34 = vadd.f32 %v4199_v10, %v3767_v62  ;;  %v4241_v17 = vadd.f32 %v4240_v16, %v3775_v63  ;;  %v4201_v1 = vpop.f32.mrb[50].mxu0  ;;  %v4242_v18 = vpop.f32.mrb[54].mxu1  ;;  %v21924_v62 = vld [vmem:[%s27885_s22 + $0x598] sm:$0xff]  }
0x11b1   :  { %v4491_v49 = vmax.f32 %v4198_v7, 0.0  ;;  %v4493_v19 = vmax.f32 %v4239_v9, 0.0  ;;  %v4202_v15 = vpop.f32.mrb[51].mxu0  ;;  %v4243_v53 = vpop.f32.mrb[55].mxu1  ;;  %v21926_v7 = vld [vmem:[%s27885_s22 + $0x5e0] sm:$0xff]   ;;  %v21929_v18 = vld [vmem:[%s27885_s22 + $0x568] sm:$0xff]  }
0x11b2   :  { %v4492_v51 = vmax.f32 %v4200_v34, 0.0  ;;  %v4494_v21 = vmax.f32 %v4241_v17, 0.0  ;;  %v21927_v17 = vld [vmem:[%s27885_s22 + $0x520] sm:$0xff]   ;;  %v21932_v15 = vld [vmem:[%s27885_s22 + $0x5a8] sm:$0xff]   ;;  %v3779_v53 = vrot.slane %v24294_v58, %v23573_v25 }
0x11b3   :  { %v4507_v23 = vpack.c.bf16 %v4491_v49, %v4491_v49  ;;  %v4509_v24 = vpack.c.bf16 %v4493_v19, %v4493_v19  ;;  %v21928_v1 = vld [vmem:[%s27885_s22 + $0x5a0] sm:$0xff]   ;;  %v21930_v49 = vld [vmem:[%s27885_s22 + $0x5e8] sm:$0xff]  }
0x11b4   :  { %v4508_v20 = vpack.c.bf16 %v4492_v51, %v4492_v51  ;;  %v4510_v22 = vpack.c.bf16 %v4494_v21, %v4494_v21  ;;  %v21931_v19 = vld [vmem:[%s27885_s22 + $0x528] sm:$0xff]   ;;  %v3787_v51 = vrot.slane %v24294_v58, %v23576_v26  ;;  %v24381_v21 = vld [vmem:[%s27884_s21 + $0x18] sm:$0xff] }
0x11b5   :  { %v3799_v58 = vrot.slane %v24381_v21, %v23139_v0 }
0x11b6   :  { %5588 = vmatprep.mubr.bf16.mxu0 %v4508_v20  ;;  %5628 = vmatprep.mubr.bf16.mxu1 %v4510_v22  ;;  %v21933_v20 = vld [vmem:[%s27885_s22 + $0x570] sm:$0xff]  }
0x11b7   :  { %5589 = vmatmul.mubr.bf16.vlgmr.msra.gmra.mrb[64].mxu0 %v4507_v23  ;;  %5629 = vmatmul.mubr.bf16.vlgmr.msra.gmra.mrb[68].mxu1 %v4509_v24  ;;  %v21934_v22 = vld [vmem:[%s27885_s22 + $0x5f0] sm:$0xff]  }
0x11b8   :  { %20411 = vmatpush3.bf16.msra.mxu0 %v21911_v13  ;;  %20433 = vmatpush3.bf16.msra.mxu1 %v21912_v55  ;;  %v3807_v13 = vrot.slane %v24381_v21, %v23498_v14  ;;  %v21935_v55 = vld [vmem:[%s27885_s22 + $0x530] sm:$0xff]  }
0x11b9   :  { %20412 = vmatprep.subr.bf16.mxu0 %v21913_v27  ;;  %20434 = vmatprep.subr.bf16.mxu1 %v21914_v29  ;;  %v21936_v23 = vld [vmem:[%s27885_s22 + $0x5b0] sm:$0xff]   ;;  %v21937_v29 = vld [vmem:[%s27885_s22 + $0x578] sm:$0xff]  }
0x11bc   :  { %20413 = vmatpush3.bf16.msra.mxu0 %v21915_v30  ;;  %20435 = vmatpush3.bf16.msra.mxu1 %v21916_v44  ;;  %v21938_v30 = vld [vmem:[%s27885_s22 + $0x5f8] sm:$0xff]  }
0x11bd   :  { %20414 = vmatprep.subr.bf16.mxu0 %v21917_v32  ;;  %20436 = vmatprep.subr.bf16.mxu1 %v21918_v35 }
0x11be   :  { %v4279_v40 = vpop.f32.mrb[52].mxu0  ;;  %v4320_v41 = vpop.f32.mrb[56].mxu1 }
0x11bf   :  { %v4281_v43 = vpop.f32.mrb[53].mxu0  ;;  %v4322_v45 = vpop.f32.mrb[57].mxu1  ;;  %v4280_v24 = vadd.f32 %v4279_v40, %v3779_v53  ;;  %v4321_v27 = vadd.f32 %v4320_v41, %v3787_v51  ;;  %v21940_v40 = vld [vmem:[%s27885_s22 + $0x5b8] sm:$0xff]  }
0x11c0   :  { %v4282_v50 = vadd.f32 %v4281_v43, %v3783_v36  ;;  %v4323_v56 = vadd.f32 %v4322_v45, %v3791_v5  ;;  %v4283_v57 = vpop.f32.mrb[54].mxu0  ;;  %v4324_v60 = vpop.f32.mrb[58].mxu1  ;;  %20415 = vmatpush3.bf16.msra.mxu0 %v21919_v38  ;;  %20437 = vmatpush3.bf16.msra.mxu1 %v21920_v52  ;;  %v21953_v53 = vld [vmem:[%s27885_s22 + $0x658] sm:$0xff]  }
0x11c1   :  { %v4284_v63 = vpop.f32.mrb[55].mxu0  ;;  %v4325_v2 = vpop.f32.mrb[59].mxu1  ;;  %20416 = vmatprep.subr.bf16.mxu0 %v21921_v11  ;;  %20438 = vmatprep.subr.bf16.mxu1 %v21922_v31  ;;  %v21939_v31 = vld [vmem:[%s27885_s22 + $0x538] sm:$0xff]   ;;  %v4495_v41 = vmax.f32 %v4280_v24, 0.0  ;;  %v4497_v43 = vmax.f32 %v4321_v27, 0.0  ;;  %v21942_v57 = vld [vmem:[%s27885_s22 + $0x6c0] sm:$0xff]  }
0x11c2   :  { %v4496_v9 = vmax.f32 %v4282_v50, 0.0  ;;  %v4498_v10 = vmax.f32 %v4323_v56, 0.0  ;;  %v21941_v56 = vld [vmem:[%s27885_s22 + $0x640] sm:$0xff]   ;;  %v21955_v27 = vld [vmem:[%s27885_s22 + $0x618] sm:$0xff]  }
0x11c3   :  { %v4511_v63 = vpack.c.bf16 %v4495_v41, %v4495_v41  ;;  %v4513_v2 = vpack.c.bf16 %v4497_v43, %v4497_v43  ;;  %v3795_v41 = vrot.slane %v24381_v21, %v23082_v48  ;;  %v21964_v43 = vld [vmem:[%s27885_s22 + $0x6a8] sm:$0xff]  }
0x11c4   :  { %v4512_v16 = vpack.c.bf16 %v4496_v9, %v4496_v9  ;;  %v4514_v34 = vpack.c.bf16 %v4498_v10, %v4498_v10  ;;  %20417 = vmatpush3.bf16.msra.mxu0 %v21923_v61  ;;  %20439 = vmatpush3.bf16.msra.mxu1 %v21924_v62  ;;  %v21943_v62 = vld [vmem:[%s27885_s22 + $0x600] sm:$0xff]   ;;  %v21945_v9 = vld [vmem:[%s27885_s22 + $0x648] sm:$0xff]  }
0x11c5   :  { %20418 = vmatprep.subr.bf16.mxu0 %v21925_v4  ;;  %20440 = vmatprep.subr.bf16.mxu1 %v21926_v7  ;;  %v21944_v4 = vld [vmem:[%s27885_s22 + $0x680] sm:$0xff]   ;;  %v21946_v10 = vld [vmem:[%s27885_s22 + $0x6c8] sm:$0xff]  }
0x11c6   :  { %5668 = vmatprep.mubr.bf16.mxu0 %v4512_v16  ;;  %5708 = vmatprep.mubr.bf16.mxu1 %v4514_v34  ;;  %v21947_v34 = vld [vmem:[%s27885_s22 + $0x608] sm:$0xff]  }
0x11c8   :  { %20419 = vmatpush3.bf16.msra.mxu0 %v21927_v17  ;;  %20441 = vmatpush3.bf16.msra.mxu1 %v21928_v1  ;;  %v21948_v17 = vld [vmem:[%s27885_s22 + $0x688] sm:$0xff]   ;;  %v21949_v1 = vld [vmem:[%s27885_s22 + $0x650] sm:$0xff]  }
0x11c9   :  { %20420 = vmatprep.subr.bf16.mxu0 %v21929_v18  ;;  %20442 = vmatprep.subr.bf16.mxu1 %v21930_v49  ;;  %v21950_v18 = vld [vmem:[%s27885_s22 + $0x6d0] sm:$0xff]   ;;  %v3819_v49 = vrot.slane %v24381_v21, %v23576_v26 }
0x11cc   :  { %20421 = vmatpush3.bf16.msra.mxu0 %v21931_v19  ;;  %20443 = vmatpush3.bf16.msra.mxu1 %v21932_v15  ;;  %v21951_v19 = vld [vmem:[%s27885_s22 + $0x610] sm:$0xff]  }
0x11cd   :  { %20422 = vmatprep.subr.bf16.mxu0 %v21933_v20  ;;  %20444 = vmatprep.subr.bf16.mxu1 %v21934_v22  ;;  %v21952_v15 = vld [vmem:[%s27885_s22 + $0x690] sm:$0xff]   ;;  %v21954_v22 = vld [vmem:[%s27885_s22 + $0x6d8] sm:$0xff]  }
0x11ce   :  { %v24405_v44 = vpop.f32.mrb[56].mxu0  ;;  %v24407_v32 = vpop.f32.mrb[60].mxu1 }
0x11cf   :  { %v4363_v35 = vpop.f32.mrb[57].mxu0  ;;  %v4404_v36 = vpop.f32.mrb[61].mxu1 }
0x11d0   :  { %v4364_v5 = vadd.f32 %v4363_v35, %v3799_v58  ;;  %v4405_v38 = vadd.f32 %v4404_v36, %v3807_v13  ;;  %v4365_v52 = vpop.f32.mrb[58].mxu0  ;;  %v4406_v11 = vpop.f32.mrb[62].mxu1  ;;  %20423 = vmatpush3.bf16.msra.mxu0 %v21935_v55  ;;  %20445 = vmatpush3.bf16.msra.mxu1 %v21936_v23  ;;  %v21956_v35 = vld [vmem:[%s27885_s22 + $0x698] sm:$0xff]   ;;  %v21957_v36 = vld [vmem:[%s27885_s22 + $0x660] sm:$0xff]  }
0x11d1   :  { %v4366_v45 = vpop.f32.mrb[59].mxu0  ;;  %v4407_v50 = vpop.f32.mrb[63].mxu1  ;;  %20424 = vmatprep.subr.bf16.mxu0 %v21937_v29  ;;  %20446 = vmatprep.subr.bf16.mxu1 %v21938_v30  ;;  %v21960_v52 = vld [vmem:[%s27885_s22 + $0x6a0] sm:$0xff]   ;;  %v21961_v11 = vld [vmem:[%s27885_s22 + $0x668] sm:$0xff]  }
0x11d2   :  { %v4500_v60 = vmax.f32 %v4364_v5, 0.0  ;;  %v4502_v61 = vmax.f32 %v4405_v38, 0.0  ;;  %v21958_v5 = vld [vmem:[%s27885_s22 + $0x6e0] sm:$0xff]   ;;  %v21965_v45 = vld [vmem:[%s27885_s22 + $0x670] sm:$0xff]   ;;  %v3803_v50 = vrot.slane %v24381_v21, %v23490_v12 }
0x11d3   :  { %v21959_v38 = vld [vmem:[%s27885_s22 + $0x620] sm:$0xff]  }
0x11d4   :  { %20425 = vmatpush3.bf16.msra.mxu0 %v21939_v31  ;;  %20447 = vmatpush3.bf16.msra.mxu1 %v21940_v40  ;;  %v4516_v7 = vpack.c.bf16 %v4500_v60, %v4500_v60  ;;  %v4518_v16 = vpack.c.bf16 %v4502_v61, %v4502_v61  ;;  %v21962_v31 = vld [vmem:[%s27885_s22 + $0x6e8] sm:$0xff]   ;;  %v3823_v60 = vrot.slane %v24381_v21, %v23530_v54  ;;  %v21967_v61 = vld [vmem:[%s27885_s22 + $0x630] sm:$0xff]  }
0x11d5   :  { %20454 = vmatprep.subr.bf16.mxu0 %v21941_v56  ;;  %20476 = vmatprep.subr.bf16.mxu1 %v21942_v57  ;;  %v21963_v40 = vld [vmem:[%s27885_s22 + $0x628] sm:$0xff]   ;;  %v21966_v56 = vld [vmem:[%s27885_s22 + $0x6f0] sm:$0xff]   ;;  %v3815_v57 = vrot.slane %v24381_v21, %v23527_v46 }
0x11d7   :  { %5669 = vmatmul.mubr.bf16.vlgmr.msra.gmra.mrb[68].mxu0 %v4511_v63  ;;  %5709 = vmatmul.mubr.bf16.vlgmr.msra.gmra.mrb[72].mxu1 %v4513_v2  ;;  %v21968_v63 = vld [vmem:[%s27885_s22 + $0x6b0] sm:$0xff]   ;;  %v21969_v2 = vld [vmem:[%s27885_s22 + $0x678] sm:$0xff]  }
0x11d8   :  { %20455 = vmatpush3.bf16.msra.mxu0 %v21943_v62  ;;  %5748 = vmatprep.mubr.bf16.mxu0 %v4516_v7  ;;  %v4362_v62 = vadd.f32 %v24405_v44, %v3795_v41  ;;  %v21970_v7 = vld [vmem:[%s27885_s22 + $0x6f8] sm:$0xff]   ;;  %v21991_v41 = vld [vmem:[%s27885_s22 + $0x720] sm:$0xff]  }
0x11d9   :  { %20477 = vmatpush3.bf16.msra.mxu1 %v21944_v4  ;;  %5788 = vmatprep.mubr.bf16.mxu1 %v4518_v16  ;;  %v4403_v4 = vadd.f32 %v24407_v32, %v3803_v50  ;;  %v21971_v44 = vld [vmem:[%s27885_s22 + $0x638] sm:$0xff]   ;;  %v21973_v32 = vld [vmem:[%s27885_s22 + $0x740] sm:$0xff]   ;;  %v21994_v50 = vld [vmem:[%s27885_s22 + $0x7e8] sm:$0xff]  }
0x11da   :  { %20456 = vmatprep.subr.bf16.mxu0 %v21945_v9  ;;  %20478 = vmatprep.subr.bf16.mxu1 %v21946_v10  ;;  %v4499_v16 = vmax.f32 %v4362_v62, 0.0  ;;  %v21998_v62 = vld [vmem:[%s27885_s22 + $0x7f0] sm:$0xff]  }
0x11dc   :  { %20457 = vmatpush3.bf16.msra.mxu0 %v21947_v34  ;;  %v21972_v34 = vld [vmem:[%s27885_s22 + $0x6b8] sm:$0xff]  }
0x11dd   :  { %20479 = vmatpush3.bf16.msra.mxu1 %v21948_v17  ;;  %20458 = vmatprep.subr.bf16.mxu0 %v21949_v1  ;;  %v4501_v17 = vmax.f32 %v4403_v4, 0.0  ;;  %v21974_v1 = vld [vmem:[%s27885_s22 + $0x7c0] sm:$0xff]   ;;  %v22001_v4 = vld [vmem:[%s27885_s22 + $0x778] sm:$0xff]  }
0x11de   :  { %v24456_v51 = vpop.f32.mrb[60].mxu0  ;;  %v4484_v20 = vpop.f32.mrb[64].mxu1  ;;  %20480 = vmatprep.subr.bf16.mxu1 %v21950_v18 }
0x11df   :  { %v24461_v58 = vadd.f32 %v4484_v20, %v3819_v49  ;;  %v4445_v13 = vpop.f32.mrb[61].mxu0  ;;  %v4486_v55 = vpop.f32.mrb[65].mxu1  ;;  %v4517_v20 = vpack.c.bf16 %v4501_v17, %v4501_v17  ;;  %v17707_v17 = vld [vmem:[%s27886_s23 + $0x1] ss:$0 sm:$0xff] }
0x11e0   :  { %v4447_v23 = vpop.f32.mrb[62].mxu0  ;;  %v4488_v24 = vpop.f32.mrb[66].mxu1  ;;  %20459 = vmatpush3.bf16.msra.mxu0 %v21951_v19  ;;  %v4446_v9 = vadd.f32 %v4445_v13, %v3815_v57  ;;  %v4487_v10 = vadd.f32 %v4486_v55, %v3823_v60  ;;  %v21975_v19 = vld [vmem:[%s27885_s22 + $0x700] sm:$0xff]   ;;  %v21978_v55 = vld [vmem:[%s27885_s22 + $0x7c8] sm:$0xff]   ;;  %v3811_v57 = vrot.slane %v24381_v21, %v23573_v25  ;;  %v21999_v21 = vld [vmem:[%s27885_s22 + $0x730] sm:$0xff]  }
0x11e1   :  { %20481 = vmatpush3.bf16.msra.mxu1 %v21952_v15  ;;  %v4448_v29 = vpop.f32.mrb[63].mxu0  ;;  %v4489_v30 = vpop.f32.mrb[67].mxu1  ;;  %20460 = vmatprep.subr.bf16.mxu0 %v21953_v53  ;;  %v4515_v15 = vpack.c.bf16 %v4499_v16, %v4499_v16  ;;  %v21976_v53 = vld [vmem:[%s27885_s22 + $0x780] sm:$0xff]   ;;  %v21979_v24 = vld [vmem:[%s27885_s22 + $0x708] sm:$0xff]  }
0x11e2   :  { %20482 = vmatprep.subr.bf16.mxu1 %v21954_v22  ;;  %v4504_v18 = vmax.f32 %v4446_v9, 0.0  ;;  %v4506_v49 = vmax.f32 %v4487_v10, 0.0  ;;  %v21977_v22 = vld [vmem:[%s27885_s22 + $0x748] sm:$0xff]   ;;  %v21981_v29 = vld [vmem:[%s27885_s22 + $0x750] sm:$0xff]   ;;  %v22004_v10 = vld [vmem:[%s27885_s22 + $0x7b8] sm:$0xff]  }
0x11e3   :  { %v21982_v30 = vld [vmem:[%s27885_s22 + $0x7d0] sm:$0xff]   ;;  %v21996_v60 = vld [vmem:[%s27885_s22 + $0x7a8] sm:$0xff]  }
0x11e4   :  { %20461 = vmatpush3.bf16.msra.mxu0 %v21955_v27  ;;  %v4520_v13 = vpack.c.bf16 %v4504_v18, %v4504_v18  ;;  %v4522_v23 = vpack.c.bf16 %v4506_v49, %v4506_v49  ;;  %v21980_v27 = vld [vmem:[%s27885_s22 + $0x788] sm:$0xff]  }
0x11e5   :  { %20483 = vmatpush3.bf16.msra.mxu1 %v21956_v35  ;;  %20462 = vmatprep.subr.bf16.mxu0 %v21957_v36  ;;  %v21983_v35 = vld [vmem:[%s27885_s22 + $0x710] sm:$0xff]  }
0x11e6   :  { %20484 = vmatprep.subr.bf16.mxu1 %v21958_v5  ;;  %v21984_v36 = vld [vmem:[%s27885_s22 + $0x790] sm:$0xff]   ;;  %v21985_v5 = vld [vmem:[%s27885_s22 + $0x758] sm:$0xff]  }
0x11e8   :  { %20463 = vmatpush3.bf16.msra.mxu0 %v21959_v38  ;;  %v21986_v38 = vld [vmem:[%s27885_s22 + $0x7d8] sm:$0xff]  }
0x11e9   :  { %20485 = vmatpush3.bf16.msra.mxu1 %v21960_v52  ;;  %20464 = vmatprep.subr.bf16.mxu0 %v21961_v11  ;;  %v21987_v52 = vld [vmem:[%s27885_s22 + $0x718] sm:$0xff]  }
0x11ea   :  { %20486 = vmatprep.subr.bf16.mxu1 %v21962_v31  ;;  %v21988_v11 = vld [vmem:[%s27885_s22 + $0x798] sm:$0xff]   ;;  %v21989_v31 = vld [vmem:[%s27885_s22 + $0x760] sm:$0xff]  }
0x11ec   :  { %20465 = vmatpush3.bf16.msra.mxu0 %v21963_v40  ;;  %v21990_v40 = vld [vmem:[%s27885_s22 + $0x7e0] sm:$0xff]  }
0x11ed   :  { %20487 = vmatpush3.bf16.msra.mxu1 %v21964_v43  ;;  %20466 = vmatprep.subr.bf16.mxu0 %v21965_v45  ;;  %v21992_v43 = vld [vmem:[%s27885_s22 + $0x7a0] sm:$0xff]   ;;  %v21993_v45 = vld [vmem:[%s27885_s22 + $0x768] sm:$0xff]  }
0x11ee   :  { %20488 = vmatprep.subr.bf16.mxu1 %v21966_v56  ;;  %v21995_v56 = vld [vmem:[%s27885_s22 + $0x728] sm:$0xff]  }
0x11f0   :  { %20467 = vmatpush3.bf16.msra.mxu0 %v21967_v61  ;;  %v21997_v61 = vld [vmem:[%s27885_s22 + $0x770] sm:$0xff]  }
0x11f1   :  { %20489 = vmatpush3.bf16.msra.mxu1 %v21968_v63  ;;  %20468 = vmatprep.subr.bf16.mxu0 %v21969_v2  ;;  %v4444_v63 = vadd.f32 %v24456_v51, %v3811_v57  ;;  %v22000_v2 = vld [vmem:[%s27885_s22 + $0x7b0] sm:$0xff]   ;;  %v22003_v51 = vld [vmem:[%s27885_s22 + $0x738] sm:$0xff]  }
0x11f2   :  { %20490 = vmatprep.subr.bf16.mxu1 %v21970_v7  ;;  %v22002_v7 = vld [vmem:[%s27885_s22 + $0x7f8] sm:$0xff]  }
0x11f3   :  { %v4503_v9 = vmax.f32 %v4444_v63, 0.0 }
0x11f4   :  { %20469 = vmatpush3.bf16.msra.mxu0 %v21971_v44  ;;  %v4505_v44 = vmax.f32 %v24461_v58, 0.0 }
0x11f5   :  { %20491 = vmatpush3.bf16.msra.mxu1 %v21972_v34  ;;  %20498 = vmatprep.subr.bf16.mxu0 %v21973_v32  ;;  %v4519_v16 = vpack.c.bf16 %v4503_v9, %v4503_v9 }
0x11f6   :  { %20520 = vmatprep.subr.bf16.mxu1 %v21974_v1  ;;  %v4521_v34 = vpack.c.bf16 %v4505_v44, %v4505_v44 }
0x11f7   :  { %5749 = vmatmul.mubr.bf16.vlgmr.msra.gmra.mrb[72].mxu0 %v4515_v15 }
0x11f8   :  { %5789 = vmatmul.mubr.bf16.vlgmr.msra.gmra.mrb[76].mxu1 %v4517_v20  ;;  %20499 = vmatpush3.bf16.msra.mxu0 %v21975_v19 }
0x11f9   :  { %5828 = vmatprep.mubr.bf16.mxu0 %v4520_v13  ;;  %20521 = vmatpush3.bf16.msra.mxu1 %v21976_v53 }
0x11fa   :  { %5868 = vmatprep.mubr.bf16.mxu1 %v4522_v23  ;;  %20500 = vmatprep.subr.bf16.mxu0 %v21977_v22 }
0x11fb   :  { %20522 = vmatprep.subr.bf16.mxu1 %v21978_v55 }
0x11fc   :  { %20501 = vmatpush3.bf16.msra.mxu0 %v21979_v24 }
0x11fd   :  { %20523 = vmatpush3.bf16.msra.mxu1 %v21980_v27  ;;  %20502 = vmatprep.subr.bf16.mxu0 %v21981_v29 }
0x11fe   :  { %20524 = vmatprep.subr.bf16.mxu1 %v21982_v30 }
0x1200   :  { %20503 = vmatpush3.bf16.msra.mxu0 %v21983_v35 }
0x1201   :  { %20525 = vmatpush3.bf16.msra.mxu1 %v21984_v36  ;;  %20504 = vmatprep.subr.bf16.mxu0 %v21985_v5 }
0x1202   :  { %20526 = vmatprep.subr.bf16.mxu1 %v21986_v38 }
0x1204   :  { %20505 = vmatpush3.bf16.msra.mxu0 %v21987_v52 }
0x1205   :  { %20527 = vmatpush3.bf16.msra.mxu1 %v21988_v11  ;;  %20506 = vmatprep.subr.bf16.mxu0 %v21989_v31 }
0x1206   :  { %20528 = vmatprep.subr.bf16.mxu1 %v21990_v40 }
0x1208   :  { %20507 = vmatpush3.bf16.msra.mxu0 %v21991_v41 }
0x1209   :  { %20529 = vmatpush3.bf16.msra.mxu1 %v21992_v43  ;;  %20508 = vmatprep.subr.bf16.mxu0 %v21993_v45 }
0x120a   :  { %20530 = vmatprep.subr.bf16.mxu1 %v21994_v50 }
0x120c   :  { %20509 = vmatpush3.bf16.msra.mxu0 %v21995_v56 }
0x120d   :  { %20531 = vmatpush3.bf16.msra.mxu1 %v21996_v60  ;;  %20510 = vmatprep.subr.bf16.mxu0 %v21997_v61 }
0x120e   :  { %20532 = vmatprep.subr.bf16.mxu1 %v21998_v62 }
0x1210   :  { %20511 = vmatpush3.bf16.msra.mxu0 %v21999_v21 }
0x1211   :  { %20533 = vmatpush3.bf16.msra.mxu1 %v22000_v2  ;;  %20512 = vmatprep.subr.bf16.mxu0 %v22001_v4 }
0x1212   :  { %20534 = vmatprep.subr.bf16.mxu1 %v22002_v7 }
0x1214   :  { %20513 = vmatpush3.bf16.msra.mxu0 %v22003_v51 }
0x1215   :  { %20535 = vmatpush3.bf16.msra.mxu1 %v22004_v10 }
0x1216   :  { %21660 = vmatprep.subr.bf16.mxu1 %v22720_v3 }
0x1217   :  { %5829 = vmatmul.mubr.bf16.vlgmr.msra.gmra.mrb[76].mxu0 %v4519_v16 }
0x1218   :  { %5869 = vmatmul.mubr.bf16.vlgmr.msra.gmra.mrb[80].mxu1 %v4521_v34  ;;  %6006 = vmatprep.mubr.bf16.mxu0 %v22723_v28 }
0x1219   :  { %21662 = vmatpush3.bf16.msra.mxu1 %v23050_v37  ;;  %21466 = vmatprep.mubr.msk.f32.mxu1 %vm22721_vm0, %v22722_v6 }
0x121a   :  { %21663 = vmatprep.subr.bf16.mxu1 %v22720_v3 }
0x121d   :  { %21665 = vmatpush3.bf16.msra.mxu1 %v23056_v39 }
0x121e   :  { %21666 = vmatprep.subr.bf16.mxu1 %v22720_v3 }
0x1221   :  { %21668 = vmatpush3.bf16.msra.mxu1 %v23066_v42 }
0x1222   :  { %21669 = vmatprep.subr.bf16.mxu1 %v22720_v3 }
0x1225   :  { %21671 = vmatpush3.bf16.msra.mxu1 %v23079_v47 }
0x128a   :  { %v20382_v58 = vpop.f32.mrb[64].mxu0  ;;  %v20404_v32 = vpop.f32.mrb[68].mxu1 }
0x128b   :  { %v20383_v1 = vpop.f32.mrb[65].mxu0  ;;  %v20405_v18 = vpop.f32.mrb[69].mxu1 }
0x128c   :  { %v20384_v49 = vadd.f32 %v20383_v1, %v20382_v58  ;;  %v20406_v19 = vadd.f32 %v20405_v18, %v20404_v32  ;;  %v20385_v15 = vpop.f32.mrb[66].mxu0  ;;  %v20407_v53 = vpop.f32.mrb[70].mxu1 }
0x128d   :  { %v20386_v20 = vpop.f32.mrb[67].mxu0  ;;  %v20408_v22 = vpop.f32.mrb[71].mxu1 }
0x128e   :  { %v5591_v13 = vadd.f32 %v20384_v49, %v17707_v17  ;;  %v22007_v22 = vld [vmem:[%s27919_s4 + $0x84] ss:$8 sps:$4 sm:$0xff]  }
0x128f   :  { %5974 = vmatprep.subr.bf16.mxu0 %v22007_v22 }
0x1290   :  { %v5631_v55 = vadd.f32 %v20406_v19, %v5591_v13  ;;  %v22005_v13 = vld [vmem:[%s27919_s4 + $0x80] ss:$8 sps:$4 sm:$0xff]  }
0x1291   :  { %5975 = vmatpush1.bf16.msra.mxu0 %v22005_v13 }
0x12aa   :  { %v20426_v23 = vpop.f32.mrb[68].mxu0  ;;  %v20448_v24 = vpop.f32.mrb[72].mxu1 }
0x12ab   :  { %v20427_v27 = vpop.f32.mrb[69].mxu0  ;;  %v20449_v29 = vpop.f32.mrb[73].mxu1 }
0x12ac   :  { %v20428_v30 = vadd.f32 %v20427_v27, %v20426_v23  ;;  %v20450_v35 = vadd.f32 %v20449_v29, %v20448_v24  ;;  %v20429_v36 = vpop.f32.mrb[70].mxu0  ;;  %v20451_v5 = vpop.f32.mrb[74].mxu1  ;;  %v22013_v23 = vld [vmem:[%s27919_s4 + $0xa4] ss:$8 sps:$4 sm:$0xff]   ;;  %v22011_v24 = vld [vmem:[%s27919_s4 + $0xa0] ss:$8 sps:$4 sm:$0xff]  }
0x12ad   :  { %v20430_v38 = vpop.f32.mrb[71].mxu0  ;;  %v20452_v52 = vpop.f32.mrb[75].mxu1  ;;  %v22016_v27 = vld [vmem:[%s27919_s4 + $0xb4] ss:$8 sps:$4 sm:$0xff]   ;;  %v22014_v29 = vld [vmem:[%s27919_s4 + $0xb0] ss:$8 sps:$4 sm:$0xff]  }
0x12ae   :  { %v5671_v11 = vadd.f32 %v20428_v30, %v5631_v55  ;;  %v22008_v55 = vld [vmem:[%s27919_s4 + $0x90] ss:$8 sps:$4 sm:$0xff]   ;;  %v17838_v38 = vld [vmem:[%s27881_s18 + $0x1] ss:$0 sm:$0xff] }
0x12b0   :  { %v5711_v31 = vadd.f32 %v20450_v35, %v5671_v11  ;;  %v17839_v11 = vld [vmem:[%s27882_s19 + $0x1] ss:$0 sm:$0xff] }
0x12ca   :  { %v20470_v40 = vpop.f32.mrb[72].mxu0 }
0x12cb   :  { %v20492_v41 = vpop.f32.mrb[76].mxu1  ;;  %v20471_v43 = vpop.f32.mrb[73].mxu0 }
0x12cc   :  { %v20472_v45 = vadd.f32 %v20471_v43, %v20470_v40  ;;  %v20493_v50 = vpop.f32.mrb[77].mxu1  ;;  %v20473_v56 = vpop.f32.mrb[74].mxu0  ;;  %v22668_v43 = vld [vmem:[%s27925_s6] sm:$0xff] }
0x12cd   :  { %v20494_v57 = vadd.f32 %v20493_v50, %v20492_v41  ;;  %v20495_v60 = vpop.f32.mrb[78].mxu1  ;;  %v20474_v61 = vpop.f32.mrb[75].mxu0 }
0x12ce   :  { %v5751_v62 = vadd.f32 %v20472_v45, %v5711_v31  ;;  %v20496_v21 = vpop.f32.mrb[79].mxu1  ;;  %v24689_v45 = vld [vmem:[%s27876_s13 + $0x4] sm:$0x3] }
0x12cf   :  { %v5924_v50 = vrot.slane %v24689_v45, %v23082_v48 }
0x12d0   :  { %v5791_v63 = vadd.f32 %v20494_v57, %v5751_v62 }
0x12ea   :  { %v20514_v2 = vpop.f32.mrb[76].mxu0 }
0x12eb   :  { %v20536_v4 = vpop.f32.mrb[80].mxu1  ;;  %v20515_v7 = vpop.f32.mrb[77].mxu0 }
0x12ec   :  { %v20516_v51 = vadd.f32 %v20515_v7, %v20514_v2  ;;  %v20537_v9 = vpop.f32.mrb[81].mxu1  ;;  %v20517_v10 = vpop.f32.mrb[78].mxu0 }
0x12ed   :  { %v20538_v44 = vadd.f32 %v20537_v9, %v20536_v4  ;;  %v20539_v16 = vpop.f32.mrb[82].mxu1  ;;  %v20518_v34 = vpop.f32.mrb[79].mxu0 }
0x12ee   :  { %v5831_v58 = vadd.f32 %v20516_v51, %v5791_v63  ;;  %v20540_v32 = vpop.f32.mrb[83].mxu1 }
0x12f0   :  { %v5871_v17 = vadd.f32 %v20538_v44, %v5831_v58 }
0x12f2   :  { %v5876_v1 = vadd.f32 %v5871_v17, %v24041_v33  ;;  %v22010_v33 = vld [vmem:[%s27919_s4 + $0x94] ss:$8 sps:$4 sm:$0xff]  }
0x12f3   :  { %5976 = vmatprep.subr.bf16.mxu0 %v22010_v33 }
0x12f4   :  { %v5881_v18 = vsel %vm840_vm8, %v5876_v1, 0.0  ;;  %5977 = vmatpush1.bf16.msra.mxu0 %v22008_v55 }
0x12f5   :  { %5882 = vadd.xlane.f32.xlu0 %v5881_v18  ;;  %5978 = vmatprep.subr.bf16.mxu0 %v22013_v23 }
0x12f8   :  { %5979 = vmatpush1.bf16.msra.mxu0 %v22011_v24 }
0x12f9   :  { %5980 = vmatprep.subr.bf16.mxu0 %v22016_v27 }
0x12fc   :  { %5981 = vmatpush1.bf16.msra.mxu0 %v22014_v29 }
0x12fd   :  { %21469 = vmatprep.subr.mxu0 %v22722_v6 }
0x1382   :  { %v5883_v49 = vpop.xlane.xlu0 %5882 }
0x1383   :  { %v5884_v19 = vmul.f32 0.015625, %v5883_v49 }
0x1385   :  { %v5885_v15 = vsub.f32 %v5876_v1, %v5884_v19 }
0x1387   :  { %v5886_v53 = vmul.f32 %v5885_v15, %v5885_v15 }
0x1389   :  { %v5887_v20 = vsel %vm840_vm8, %v5886_v53, 0.0 }
0x138a   :  { %5888 = vadd.xlane.f32.xlu0 %v5887_v20 }
0x1417   :  { %v5889_v30 = vpop.xlane.xlu0 %5888 }
0x1418   :  { %v5890_v35 = vmul.f32 0.015625, %v5889_v30 }
0x141a   :  { %v5891_v36 = vadd.f32 1e-05, %v5890_v35 }
0x141c   :  { %22625 = vrsqrt.f32 %v5891_v36 }
0x1426   :  { %v22626_v5 = vpop.eup %22625 }
0x1427   :  { %v5893_v52 = vmul.f32 %v22626_v5, %v5885_v15 }
0x1429   :  { %v5900_v31 = vmul.f32 %v17838_v38, %v5893_v52 }
0x142b   :  { %v24675_v40 = vadd.f32 %v17839_v11, %v5900_v31 }
0x142d   :  { %v5908_v41 = vpack.c.bf16 %v24675_v40, %v24675_v40 }
0x142f   :  { %17857 = vmatmul.mubr.msk.bf16.vlgmr.msra.gmra.mrb[80].mxu0 %vm91_vm1, %v5908_v41 }
0x1430   :  { %21470 = vmatpush3.msra.mxu0 %v22668_v43  ;;  %21471 = vmatprep.mubr.msk.f32.mxu0 %vm22721_vm0, %v22722_v6 }
0x1431   :  { %21474 = vmatprep.subr.bf16.mxu0 %v22722_v6 }
0x1502   :  { %v6008_v56 = vpop.f32.mrb[80].mxu0 }
0x1503   :  { %v6009_v57 = vadd.f32 %v6008_v56, %v5924_v50  ;;  %v24693_v60 = vpop.f32.mrb[81].mxu0 }
0x1504   :  { %v6012_v61 = vpop.f32.mrb[82].mxu0 }
0x1505   :  { %v6013_v62 = vpop.f32.mrb[83].mxu0  ;;  %6048 = vrot.lane.b32.xlu0 %v6009_v57, %s22724_s8  ;;  %v6022_v21 = vrot.slane %v6009_v57, %v23097_v59 }
0x1507   :  { %v6023_v63 = vcombine.high %v6022_v21, %v6022_v21  ;;  %v6030_v2 = vrot.slane %v6022_v21, %v23097_v59 }
0x1509   :  { %v6037_v4 = vrot.slane %v6023_v63, %v23097_v59  ;;  %v6041_v7 = vrot.slane %v6030_v2, %v23082_v48  ;;  %v22017_v2 = vld [vmem:[%s27877_s14 + $0x40] sm:$0xff]  }
0x150b   :  { %v6045_v51 = vrot.slane %v6037_v4, %v23082_v48  ;;  %v22018_v4 = vld [vmem:[%s27877_s14 + $0x48] sm:$0xff]  }
0x1577   :  { %v6049_v9 = vpop.permute.xlu0 %6048 }
0x1578   :  { %v6051_v10 = vmul.f32 %v6049_v9, %v6041_v7  ;;  %v6052_v44 = vmul.f32 %v6049_v9, %v6045_v51  ;;  %v22019_v7 = vld [vmem:[%s27877_s14 + $0x50] sm:$0xff]   ;;  %v22020_v51 = vld [vmem:[%s27877_s14 + $0x58] sm:$0xff]   ;;  %v5928_v9 = vrot.slane %v24689_v45, %v23139_v0 }
0x157a   :  { %v6055_v16 = vcombine.low %v6051_v10, %v6052_v44  ;;  %v6011_v44 = vadd.f32 %v24693_v60, %v5928_v9 }
0x157c   :  { %v6062_v34 = vrot.slane %v6055_v16, %v23105_v8 }
0x157e   :  { %21467 = vmatmul.mubr.msk.f32.vlgmr.msra.gmra.mrb[46].mxu1 %vm91_vm1, %v6062_v34 }
0x157f   :  { %6914 = vmatprep.mubr.bf16.mxu1 %v22723_v28 }
0x1651   :  { %v6131_v58 = vpop.f32.mrb[46].mxu1 }
0x1652   :  { %v6135_v32 = vmul.f32 0.35355338, %v6131_v58  ;;  %v21468_v17 = vpop.f32.mrb[47].mxu1 }
0x1654   :  { %v6136_v1 = vsel %vm703_vm5, %v6135_v32, -inf }
0x1655   :  { %v6137_v18 = vrot.slane %v6136_v1, 4 }
0x1657   :  { %v6138_v49 = vmax.f32 %v6136_v1, %v6137_v18 }
0x1659   :  { %v6139_v19 = vrot.slane %v6138_v49, 2 }
0x165b   :  { %v6140_v15 = vmax.f32 %v6138_v49, %v6139_v19 }
0x165d   :  { %v6141_v53 = vrot.slane %v6140_v15, 1 }
0x165f   :  { %v6142_v20 = vmax.f32 %v6140_v15, %v6141_v53 }
0x1661   :  { %v6143_v22 = vsub.f32 %v6135_v32, %v6142_v20 }
0x1663   :  { %v6144_v13 = vmul.f32 1.442695, %v6143_v22 }
0x1665   :  { %22627 = vpow2.f32 %v6144_v13 }
0x166f   :  { %v22628_v33 = vpop.eup %22627 }
0x1670   :  { %v6153_v55 = vrot.slane %v22628_v33, %v23105_v8 }
0x1672   :  { %v6157_v23 = vsel %vm725_vm6, %v6153_v55, 0.0  ;;  %v6154_v24 = vcombine.high %v6153_v55, %v6153_v55 }
0x1673   :  { %v6158_v27 = vrot.slane %v6157_v23, 4 }
0x1674   :  { %v6164_v29 = vsel %vm725_vm6, %v6154_v24, 0.0 }
0x1675   :  { %v6159_v30 = vadd.f32 %v6158_v27, %v6157_v23  ;;  %v6165_v35 = vrot.slane %v6164_v29, 4 }
0x1677   :  { %v6160_v36 = vrot.slane %v6159_v30, 2  ;;  %v6166_v5 = vadd.f32 %v6165_v35, %v6164_v29 }
0x1679   :  { %v6161_v38 = vadd.f32 %v6160_v36, %v6159_v30  ;;  %v6167_v52 = vrot.slane %v6166_v5, 2 }
0x167b   :  { %v6162_v11 = vrot.slane %v6161_v38, 1  ;;  %v6168_v31 = vadd.f32 %v6167_v52, %v6166_v5  ;;  %v17869_v5 = vld [vmem:[%s27878_s15 + $0x2] ss:$0 sm:$0xff] }
0x167d   :  { %v6163_v41 = vadd.f32 %v6162_v11, %v6161_v38  ;;  %v6169_v43 = vrot.slane %v6168_v31, 1 }
0x167f   :  { %22629 = vrcp.f32 %v6163_v41  ;;  %v6170_v50 = vadd.f32 %v6169_v43, %v6168_v31 }
0x1681   :  { %22631 = vrcp.f32 %v6170_v50 }
0x1689   :  { %v22630_v56 = vpop.eup %22629 }
0x168a   :  { %v6172_v61 = vmul.f32 %v22630_v56, %v6153_v55 }
0x168b   :  { %v22632_v57 = vpop.eup %22631 }
0x168c   :  { %v6174_v62 = vmul.f32 %v22632_v57, %v6154_v24 }
0x168e   :  { %v6177_v21 = vcombine.low %v6172_v61, %v6174_v62 }
0x1690   :  { %v6184_v63 = vrot.slane %v6177_v21, %v23105_v8 }
0x1692   :  { %21472 = vmatmul.mubr.msk.f32.vlgmr.msra.gmra.mrb[46].mxu0 %vm754_vm7, %v6184_v63  ;;  %v17879_v63 = vld [vmem:[%s27883_s20 + $0x400] sm:$0xff] }
0x1693   :  { %21482 = vmatprep.mubr.msk.bf16.mxu0 %vm22721_vm0, %v22722_v6  ;;  %21475 = vmatpush3.bf16.msra.mxu0 %v22017_v2  ;;  %v17880_v2 = vld [vmem:[%s27883_s20 + $0x408] sm:$0xff] }
0x1694   :  { %21476 = vmatprep.subr.bf16.mxu0 %v22722_v6 }
0x1697   :  { %21477 = vmatpush3.bf16.msra.mxu0 %v22018_v4 }
0x1698   :  { %21478 = vmatprep.subr.bf16.mxu0 %v22722_v6 }
0x169b   :  { %21479 = vmatpush3.bf16.msra.mxu0 %v22019_v7  ;;  %v17888_v7 = vld [vmem:[%s27883_s20 + $0x448] sm:$0xff] }
0x169c   :  { %21480 = vmatprep.subr.bf16.mxu0 %v22722_v6  ;;  %v17947_v9 = vcombine.low %v17880_v2, %v17888_v7 }
0x169f   :  { %21481 = vmatpush3.bf16.msra.mxu0 %v22020_v51 }
0x1765   :  { %v6253_v10 = vpop.f32.mrb[46].mxu0 }
0x1766   :  { %v6264_v16 = vrot.slane %v6253_v10, %v23105_v8  ;;  %v21473_v34 = vpop.f32.mrb[47].mxu0  ;;  %v17948_v10 = vcombine.high %v17880_v2, %v17888_v7  ;;  %v17897_v2 = vld [vmem:[%s27883_s20 + $0x490] sm:$0xff]  ;;  %v17898_v7 = vld [vmem:[%s27883_s20 + $0x498] sm:$0xff] }
0x1767   :  { %v17896_v34 = vld [vmem:[%s27883_s20 + $0x488] sm:$0xff] }
0x1768   :  { %v6265_v58 = vcombine.high %v6264_v16, %v6264_v16  ;;  %v6268_v32 = vmul.f32 %v6264_v16, %v6011_v44  ;;  %6923 = vmatprep.subr.bf16.mxu0 %v17948_v10  ;;  %v17903_v16 = vld [vmem:[%s27883_s20 + $0x4c0] sm:$0xff] }
0x176a   :  { %v6269_v17 = vmul.f32 %v6265_v58, %v6011_v44  ;;  %v6270_v1 = vsel %vm840_vm8, %v6268_v32, 0.0  ;;  %v17895_v44 = vld [vmem:[%s27883_s20 + $0x480] sm:$0xff]  ;;  %v17904_v32 = vld [vmem:[%s27883_s20 + $0x4c8] sm:$0xff] }
0x176b   :  { %v6271_v18 = vrot.slane %v6270_v1, 4  ;;  %v17962_v58 = vcombine.high %v17895_v44, %v17903_v16 }
0x176c   :  { %v6277_v49 = vsel %vm840_vm8, %v6269_v17, 0.0  ;;  %v17961_v17 = vcombine.low %v17895_v44, %v17903_v16  ;;  %v17913_v16 = vld [vmem:[%s27883_s20 + $0x510] sm:$0xff] }
0x176d   :  { %v6272_v19 = vadd.f32 %v6271_v18, %v6270_v1  ;;  %v6278_v15 = vrot.slane %v6277_v49, 4  ;;  %v17963_v1 = vcombine.low %v17896_v34, %v17904_v32  ;;  %v17964_v18 = vcombine.high %v17896_v34, %v17904_v32  ;;  %v17921_v34 = vld [vmem:[%s27883_s20 + $0x550] sm:$0xff]  ;;  %v17922_v32 = vld [vmem:[%s27883_s20 + $0x558] sm:$0xff] }
0x176f   :  { %v6273_v53 = vrot.slane %v6272_v19, 2  ;;  %v6279_v20 = vadd.f32 %v6278_v15, %v6277_v49  ;;  %v17911_v49 = vld [vmem:[%s27883_s20 + $0x500] sm:$0xff]  ;;  %v17912_v15 = vld [vmem:[%s27883_s20 + $0x508] sm:$0xff] }
0x1771   :  { %v6274_v22 = vadd.f32 %v6273_v53, %v6272_v19  ;;  %v6280_v45 = vrot.slane %v6279_v20, 2  ;;  %v17919_v19 = vld [vmem:[%s27883_s20 + $0x540] sm:$0xff] }
0x1772   :  { %v17978_v53 = vcombine.high %v17911_v49, %v17919_v19 }
0x1773   :  { %v6275_v13 = vrot.slane %v6274_v22, 1  ;;  %v6281_v33 = vadd.f32 %v6280_v45, %v6279_v20  ;;  %v17920_v20 = vld [vmem:[%s27883_s20 + $0x548] sm:$0xff] }
0x1774   :  { %v17979_v45 = vcombine.low %v17912_v15, %v17920_v20 }
0x1775   :  { %v6276_v60 = vadd.f32 %v6275_v13, %v6274_v22  ;;  %v6282_v55 = vrot.slane %v6281_v33, 1  ;;  %v17977_v22 = vcombine.low %v17911_v49, %v17919_v19  ;;  %v17980_v13 = vcombine.high %v17912_v15, %v17920_v20  ;;  %v17929_v19 = vld [vmem:[%s27883_s20 + $0x590] sm:$0xff]  ;;  %v17938_v20 = vld [vmem:[%s27883_s20 + $0x5d8] sm:$0xff] }
0x1776   :  { %v17937_v15 = vld [vmem:[%s27883_s20 + $0x5d0] sm:$0xff] }
0x1777   :  { %v6283_v23 = vadd.f32 %v6282_v55, %v6281_v33  ;;  %v6284_v24 = vpack.c.bf16 %v6276_v60, %v6276_v60  ;;  %v17927_v33 = vld [vmem:[%s27883_s20 + $0x580] sm:$0xff]  ;;  %v17928_v55 = vld [vmem:[%s27883_s20 + $0x588] sm:$0xff] }
0x1778   :  { %v17935_v60 = vld [vmem:[%s27883_s20 + $0x5c0] sm:$0xff] }
0x1779   :  { %v6285_v27 = vpack.c.bf16 %v6283_v23, %v6283_v23  ;;  %v6305_v29 = vunpack.c.l.b16 %v6284_v24  ;;  %v17994_v23 = vcombine.high %v17927_v33, %v17935_v60  ;;  %v17936_v24 = vld [vmem:[%s27883_s20 + $0x5c8] sm:$0xff] }
0x177b   :  { %v6306_v30 = vunpack.c.l.b16 %v6285_v27  ;;  %v17993_v27 = vcombine.low %v17927_v33, %v17935_v60  ;;  %v17883_v60 = vld [vmem:[%s27883_s20 + $0x420] sm:$0xff] }
0x177d   :  { %v6307_v35 = vsel %vm126_vm2, %v6306_v30, %v6305_v29  ;;  %v17995_v29 = vcombine.low %v17928_v55, %v17936_v24  ;;  %v17996_v30 = vcombine.high %v17928_v55, %v17936_v24  ;;  %v17891_v55 = vld [vmem:[%s27883_s20 + $0x460] sm:$0xff]  ;;  %v17892_v24 = vld [vmem:[%s27883_s20 + $0x468] sm:$0xff] }
0x177e   :  { %v6308_v36 = vpack.c.b16 %v6307_v35, %v6307_v35  ;;  %v17881_v35 = vld [vmem:[%s27883_s20 + $0x410] sm:$0xff] }
0x1780   :  { %21483 = vmatmul.mubr.msk.bf16.vlgmr.msra.gmra.mrb[84].mxu0 %vm91_vm1, %v6308_v36  ;;  %v17889_v36 = vld [vmem:[%s27883_s20 + $0x450] sm:$0xff] }
0x1781   :  { %6955 = vmatprep.mubr.bf16.mxu0 %v22723_v28  ;;  %6924 = vmatpush1.bf16.msra.mxu0 %v17947_v9 }
0x1782   :  { %6925 = vmatprep.subr.bf16.mxu0 %v17964_v18  ;;  %v17982_v18 = vcombine.high %v17913_v16, %v17921_v34 }
0x1785   :  { %6926 = vmatpush1.bf16.msra.mxu0 %v17963_v1 }
0x1786   :  { %6927 = vmatprep.subr.bf16.mxu0 %v17980_v13  ;;  %v17998_v13 = vcombine.high %v17929_v19, %v17937_v15 }
0x1789   :  { %6928 = vmatpush1.bf16.msra.mxu0 %v17979_v45 }
0x178a   :  { %6929 = vmatprep.subr.bf16.mxu0 %v17996_v30  ;;  %v17954_v30 = vcombine.high %v17883_v60, %v17891_v55 }
0x178d   :  { %6930 = vmatpush1.bf16.msra.mxu0 %v17995_v29 }
0x1853   :  { %v6370_v38 = vpop.f32.mrb[84].mxu0 }
0x1854   :  { %v6371_v52 = vadd.f32 %v17869_v5, %v6370_v38  ;;  %v21484_v11 = vpop.f32.mrb[85].mxu0  ;;  %v17882_v5 = vld [vmem:[%s27883_s20 + $0x418] sm:$0xff]  ;;  %v17949_v38 = vcombine.low %v17881_v35, %v17889_v36 }
0x1855   :  { %v6373_v31 = vpop.f32.mrb[86].mxu0  ;;  %v17890_v11 = vld [vmem:[%s27883_s20 + $0x458] sm:$0xff] }
0x1856   :  { %v21485_v41 = vpop.f32.mrb[87].mxu0  ;;  %v6376_v43 = vadd.f32 %v6371_v52, %v24675_v40  ;;  %v17887_v40 = vld [vmem:[%s27883_s20 + $0x440] sm:$0xff]  ;;  %v17950_v52 = vcombine.high %v17881_v35, %v17889_v36  ;;  %v17951_v31 = vcombine.low %v17882_v5, %v17890_v11 }
0x1857   :  { %v17946_v4 = vcombine.high %v17879_v63, %v17887_v40  ;;  %v17945_v51 = vcombine.low %v17879_v63, %v17887_v40  ;;  %v17952_v41 = vcombine.high %v17882_v5, %v17890_v11  ;;  %v17878_v63 = vld [vmem:[%s27880_s17 + $0x2] ss:$0 sm:$0xff]  ;;  %v17953_v11 = vcombine.low %v17883_v60, %v17891_v55 }
0x1858   :  { %v6381_v50 = vsel %vm840_vm8, %v6376_v43, 0.0  ;;  %v17899_v36 = vld [vmem:[%s27883_s20 + $0x4a0] sm:$0xff] }
0x1859   :  { %6382 = vadd.xlane.f32.xlu1 %v6381_v50  ;;  %6882 = vmatprep.subr.bf16.mxu1 %v17946_v4  ;;  %v17905_v4 = vld [vmem:[%s27883_s20 + $0x4d0] sm:$0xff]  ;;  %v17907_v5 = vld [vmem:[%s27883_s20 + $0x4e0] sm:$0xff] }
0x185a   :  { %6883 = vmatpush1.bf16.msra.mxu1 %v17945_v51  ;;  %7005 = vmatprep.subr.bf16.mxu0 %v17952_v41  ;;  %v17966_v10 = vcombine.high %v17897_v2, %v17905_v4  ;;  %v17970_v41 = vcombine.high %v17899_v36, %v17907_v5 }
0x185b   :  { %6884 = vmatprep.subr.bf16.mxu1 %v17962_v58  ;;  %v17914_v58 = vld [vmem:[%s27883_s20 + $0x518] sm:$0xff] }
0x185c   :  { %v17984_v49 = vcombine.high %v17914_v58, %v17922_v32  ;;  %v17983_v45 = vcombine.low %v17914_v58, %v17922_v32  ;;  %v17885_v32 = vld [vmem:[%s27883_s20 + $0x430] sm:$0xff] }
0x185e   :  { %6885 = vmatpush1.bf16.msra.mxu1 %v17961_v17  ;;  %v17965_v17 = vcombine.low %v17897_v2, %v17905_v4  ;;  %v17931_v4 = vld [vmem:[%s27883_s20 + $0x5a0] sm:$0xff] }
0x185f   :  { %6886 = vmatprep.subr.bf16.mxu1 %v17978_v53  ;;  %v17930_v53 = vld [vmem:[%s27883_s20 + $0x598] sm:$0xff] }
0x1860   :  { %v18000_v33 = vcombine.high %v17930_v53, %v17938_v20  ;;  %v17999_v29 = vcombine.low %v17930_v53, %v17938_v20  ;;  %v17901_v20 = vld [vmem:[%s27883_s20 + $0x4b0] sm:$0xff] }
0x1862   :  { %6887 = vmatpush1.bf16.msra.mxu1 %v17977_v22  ;;  %v17981_v22 = vcombine.low %v17913_v16, %v17921_v34 }
0x1863   :  { %6888 = vmatprep.subr.bf16.mxu1 %v17994_v23  ;;  %v17884_v23 = vld [vmem:[%s27883_s20 + $0x428] sm:$0xff] }
0x1864   :  { %v17956_v35 = vcombine.high %v17884_v23, %v17892_v24 }
0x1866   :  { %6889 = vmatpush1.bf16.msra.mxu1 %v17993_v27  ;;  %v17997_v27 = vcombine.low %v17929_v19, %v17937_v15 }
0x1867   :  { %6964 = vmatprep.subr.bf16.mxu1 %v17950_v52  ;;  %v17908_v52 = vld [vmem:[%s27883_s20 + $0x4e8] sm:$0xff] }
0x18e6   :  { %v6383_v56 = vpop.xlane.xlu1 %6382 }
0x18e7   :  { %v6384_v57 = vmul.f32 0.015625, %v6383_v56 }
0x18e9   :  { %v24741_v61 = vsub.f32 %v6376_v43, %v6384_v57 }
0x18eb   :  { %v6386_v62 = vmul.f32 %v24741_v61, %v24741_v61 }
0x18ed   :  { %v6387_v21 = vsel %vm840_vm8, %v6386_v62, 0.0  ;;  %v17877_v62 = vld [vmem:[%s27879_s16 + $0x2] ss:$0 sm:$0xff] }
0x18ee   :  { %6388 = vadd.xlane.f32.xlu0 %v6387_v21 }
0x197b   :  { %v6389_v43 = vpop.xlane.xlu0 %6388 }
0x197c   :  { %v6390_v50 = vmul.f32 0.015625, %v6389_v43 }
0x197e   :  { %v6391_v56 = vadd.f32 1e-05, %v6390_v50  ;;  %v17915_v50 = vld [vmem:[%s27883_s20 + $0x520] sm:$0xff] }
0x1980   :  { %22633 = vrsqrt.f32 %v6391_v56  ;;  %v17923_v56 = vld [vmem:[%s27883_s20 + $0x560] sm:$0xff] }
0x198a   :  { %v22634_v57 = vpop.eup %22633 }
0x198b   :  { %v6393_v21 = vmul.f32 %v22634_v57, %v24741_v61  ;;  %v17906_v61 = vld [vmem:[%s27883_s20 + $0x4d8] sm:$0xff]  ;;  %v17916_v57 = vld [vmem:[%s27883_s20 + $0x528] sm:$0xff] }
0x198c   :  { %v17968_v44 = vcombine.high %v17898_v7, %v17906_v61  ;;  %v17967_v1 = vcombine.low %v17898_v7, %v17906_v61  ;;  %v17939_v7 = vld [vmem:[%s27883_s20 + $0x5e0] sm:$0xff]  ;;  %v17932_v61 = vld [vmem:[%s27883_s20 + $0x5a8] sm:$0xff] }
0x198d   :  { %v6400_v40 = vmul.f32 %v17877_v62, %v6393_v21  ;;  %v17924_v62 = vld [vmem:[%s27883_s20 + $0x568] sm:$0xff]  ;;  %v17969_v21 = vcombine.low %v17899_v36, %v17907_v5  ;;  %v18002_v34 = vcombine.high %v17931_v4, %v17939_v7 }
0x198e   :  { %v17988_v2 = vcombine.high %v17916_v57, %v17924_v62  ;;  %v17987_v16 = vcombine.low %v17916_v57, %v17924_v62 }
0x198f   :  { %v24825_v51 = vadd.f32 %v17878_v63, %v6400_v40  ;;  %v17986_v40 = vcombine.high %v17915_v50, %v17923_v56 }
0x1991   :  { %v24829_v9 = vpack.c.bf16 %v24825_v51, %v24825_v51 }
0x1993   :  { %18009 = vmatmul.mubr.msk.bf16.vlgmr.msra.gmra.mrb[84].mxu1 %vm91_vm1, %v24829_v9  ;;  %18010 = vmatmul.mubr.msk.bf16.vlgmr.msra.gmra.mrb[88].mxu0 %vm91_vm1, %v24829_v9 }
0x1994   :  { %6965 = vmatpush1.bf16.msra.mxu1 %v17949_v38  ;;  %7006 = vmatpush1.bf16.msra.mxu0 %v17951_v31  ;;  %v17900_v38 = vld [vmem:[%s27883_s20 + $0x4a8] sm:$0xff]  ;;  %v17955_v31 = vcombine.low %v17884_v23, %v17892_v24  ;;  %v17917_v24 = vld [vmem:[%s27883_s20 + $0x530] sm:$0xff] }
0x1995   :  { %6966 = vmatprep.subr.bf16.mxu1 %v17966_v10  ;;  %7007 = vmatprep.subr.bf16.mxu0 %v17968_v44  ;;  %v17972_v43 = vcombine.high %v17900_v38, %v17908_v52  ;;  %v17971_v63 = vcombine.low %v17900_v38, %v17908_v52  ;;  %v17940_v10 = vld [vmem:[%s27883_s20 + $0x5e8] sm:$0xff]  ;;  %v17985_v44 = vcombine.low %v17915_v50, %v17923_v56  ;;  %v17933_v52 = vld [vmem:[%s27883_s20 + $0x5b0] sm:$0xff] }
0x1996   :  { %6996 = vmatprep.mubr.bf16.mxu1 %v22723_v28  ;;  %7037 = vmatprep.mubr.bf16.mxu0 %v22723_v28  ;;  %v18004_v58 = vcombine.high %v17932_v61, %v17940_v10  ;;  %v18003_v19 = vcombine.low %v17932_v61, %v17940_v10  ;;  %v22026_v61 = vld [vmem:[%s27885_s22 + $0x8c8] sm:$0xff]  }
0x1997   :  { %v22027_v10 = vld [vmem:[%s27885_s22 + $0x808] sm:$0xff]  }
0x1998   :  { %6967 = vmatpush1.bf16.msra.mxu1 %v17965_v17  ;;  %7008 = vmatpush1.bf16.msra.mxu0 %v17967_v1  ;;  %v17893_v17 = vld [vmem:[%s27883_s20 + $0x470] sm:$0xff]  ;;  %v17886_v1 = vld [vmem:[%s27883_s20 + $0x438] sm:$0xff] }
0x1999   :  { %6968 = vmatprep.subr.bf16.mxu1 %v17982_v18  ;;  %7009 = vmatprep.subr.bf16.mxu0 %v17984_v49  ;;  %v17894_v18 = vld [vmem:[%s27883_s20 + $0x478] sm:$0xff]  ;;  %v18001_v49 = vcombine.low %v17931_v4, %v17939_v7  ;;  %v17958_v15 = vcombine.high %v17885_v32, %v17893_v17  ;;  %v22024_v4 = vld [vmem:[%s27885_s22 + $0x880] sm:$0xff]   ;;  %v22025_v7 = vld [vmem:[%s27885_s22 + $0x848] sm:$0xff]  }
0x199a   :  { %v17960_v53 = vcombine.high %v17886_v1, %v17894_v18  ;;  %v17959_v60 = vcombine.low %v17886_v1, %v17894_v18  ;;  %v22035_v1 = vld [vmem:[%s27885_s22 + $0x818] sm:$0xff]  }
0x199b   :  { %v22036_v18 = vld [vmem:[%s27885_s22 + $0x898] sm:$0xff]  }
0x199c   :  { %6969 = vmatpush1.bf16.msra.mxu1 %v17981_v22  ;;  %7010 = vmatpush1.bf16.msra.mxu0 %v17983_v45  ;;  %v17909_v22 = vld [vmem:[%s27883_s20 + $0x4f0] sm:$0xff]  ;;  %v17902_v45 = vld [vmem:[%s27883_s20 + $0x4b8] sm:$0xff] }
0x199d   :  { %6970 = vmatprep.subr.bf16.mxu1 %v17998_v13  ;;  %7011 = vmatprep.subr.bf16.mxu0 %v18000_v33  ;;  %v17910_v13 = vld [vmem:[%s27883_s20 + $0x4f8] sm:$0xff]  ;;  %v17957_v33 = vcombine.low %v17885_v32, %v17893_v17  ;;  %v17974_v55 = vcombine.high %v17901_v20, %v17909_v22 }
0x199e   :  { %v17976_v23 = vcombine.high %v17902_v45, %v17910_v13  ;;  %v17975_v36 = vcombine.low %v17902_v45, %v17910_v13  ;;  %v22033_v32 = vld [vmem:[%s27885_s22 + $0x858] sm:$0xff]   ;;  %v22043_v45 = vld [vmem:[%s27885_s22 + $0x828] sm:$0xff]  }
0x199f   :  { %v22034_v17 = vld [vmem:[%s27885_s22 + $0x8d8] sm:$0xff]   ;;  %v22044_v13 = vld [vmem:[%s27885_s22 + $0x8a8] sm:$0xff]  }
0x19a0   :  { %6971 = vmatpush1.bf16.msra.mxu1 %v17997_v27  ;;  %7012 = vmatpush1.bf16.msra.mxu0 %v17999_v29  ;;  %v17925_v27 = vld [vmem:[%s27883_s20 + $0x570] sm:$0xff]  ;;  %v17918_v29 = vld [vmem:[%s27883_s20 + $0x538] sm:$0xff] }
0x19a1   :  { %7046 = vmatprep.subr.bf16.mxu1 %v17954_v30  ;;  %7087 = vmatprep.subr.bf16.mxu0 %v17956_v35  ;;  %v17926_v30 = vld [vmem:[%s27883_s20 + $0x578] sm:$0xff]  ;;  %v17973_v35 = vcombine.low %v17901_v20, %v17909_v22  ;;  %v17990_v5 = vcombine.high %v17917_v24, %v17925_v27  ;;  %v22041_v20 = vld [vmem:[%s27885_s22 + $0x868] sm:$0xff]  }
0x19a2   :  { %v17992_v38 = vcombine.high %v17918_v29, %v17926_v30  ;;  %v17991_v50 = vcombine.low %v17918_v29, %v17926_v30  ;;  %v22042_v22 = vld [vmem:[%s27885_s22 + $0x8e8] sm:$0xff]   ;;  %v22051_v29 = vld [vmem:[%s27885_s22 + $0x838] sm:$0xff]  }
0x19a3   :  { %18011 = vmatmul.mubr.msk.bf16.vlgmr.msra.gmra.mrb[88].mxu1 %vm91_vm1, %v24829_v9  ;;  %18012 = vmatmul.mubr.msk.bf16.vlgmr.msra.gmra.mrb[92].mxu0 %vm91_vm1, %v24829_v9  ;;  %v22052_v30 = vld [vmem:[%s27885_s22 + $0x8b8] sm:$0xff]  }
0x19a4   :  { %7047 = vmatpush1.bf16.msra.mxu1 %v17953_v11  ;;  %7088 = vmatpush1.bf16.msra.mxu0 %v17955_v31  ;;  %v17941_v11 = vld [vmem:[%s27883_s20 + $0x5f0] sm:$0xff]  ;;  %v17934_v31 = vld [vmem:[%s27883_s20 + $0x5b8] sm:$0xff] }
0x19a5   :  { %7048 = vmatprep.subr.bf16.mxu1 %v17970_v41  ;;  %7089 = vmatprep.subr.bf16.mxu0 %v17972_v43  ;;  %v17942_v41 = vld [vmem:[%s27883_s20 + $0x5f8] sm:$0xff]  ;;  %v17989_v43 = vcombine.low %v17917_v24, %v17925_v27  ;;  %v18006_v56 = vcombine.high %v17933_v52, %v17941_v11  ;;  %v18005_v62 = vcombine.low %v17933_v52, %v17941_v11 }
0x19a6   :  { %7078 = vmatprep.mubr.bf16.mxu1 %v22723_v28  ;;  %7119 = vmatprep.mubr.bf16.mxu0 %v22723_v28  ;;  %v18008_v57 = vcombine.high %v17934_v31, %v17942_v41  ;;  %v22049_v24 = vld [vmem:[%s27885_s22 + $0x878] sm:$0xff]  }
0x19a7   :  { %v22050_v27 = vld [vmem:[%s27885_s22 + $0x8f8] sm:$0xff]  }
0x19a8   :  { %7049 = vmatpush1.bf16.msra.mxu1 %v17969_v21  ;;  %7090 = vmatpush1.bf16.msra.mxu0 %v17971_v63  ;;  %v18007_v21 = vcombine.low %v17934_v31, %v17942_v41  ;;  %v22021_v63 = vld [vmem:[%s27885_s22 + $0x840] sm:$0xff]  }
0x19a9   :  { %7050 = vmatprep.subr.bf16.mxu1 %v17986_v40  ;;  %7091 = vmatprep.subr.bf16.mxu0 %v17988_v2  ;;  %v22022_v40 = vld [vmem:[%s27885_s22 + $0x8c0] sm:$0xff]  }
0x19aa   :  { %v22023_v2 = vld [vmem:[%s27885_s22 + $0x800] sm:$0xff]  }
0x19ac   :  { %7051 = vmatpush1.bf16.msra.mxu1 %v17985_v44  ;;  %7092 = vmatpush1.bf16.msra.mxu0 %v17987_v16  ;;  %v22028_v44 = vld [vmem:[%s27885_s22 + $0x888] sm:$0xff]   ;;  %v22029_v16 = vld [vmem:[%s27885_s22 + $0x850] sm:$0xff]  }
0x19ad   :  { %7052 = vmatprep.subr.bf16.mxu1 %v18002_v34  ;;  %7093 = vmatprep.subr.bf16.mxu0 %v18004_v58  ;;  %v22031_v34 = vld [vmem:[%s27885_s22 + $0x810] sm:$0xff]  }
0x19ae   :  { %v22032_v58 = vld [vmem:[%s27885_s22 + $0x890] sm:$0xff]  }
0x19b0   :  { %7053 = vmatpush1.bf16.msra.mxu1 %v18001_v49  ;;  %7094 = vmatpush1.bf16.msra.mxu0 %v18003_v19  ;;  %v22037_v49 = vld [vmem:[%s27885_s22 + $0x860] sm:$0xff]  }
0x19b1   :  { %7128 = vmatprep.subr.bf16.mxu1 %v17958_v15  ;;  %7169 = vmatprep.subr.bf16.mxu0 %v17960_v53  ;;  %v22038_v19 = vld [vmem:[%s27885_s22 + $0x8e0] sm:$0xff]  }
0x19b2   :  { %v22039_v15 = vld [vmem:[%s27885_s22 + $0x820] sm:$0xff]  }
0x19b3   :  { %18013 = vmatmul.mubr.msk.bf16.vlgmr.msra.gmra.mrb[92].mxu1 %vm91_vm1, %v24829_v9  ;;  %18014 = vmatmul.mubr.msk.bf16.vlgmr.msra.gmra.mrb[96].mxu0 %vm91_vm1, %v24829_v9  ;;  %v22040_v53 = vld [vmem:[%s27885_s22 + $0x8a0] sm:$0xff]  }
0x19b4   :  { %7129 = vmatpush1.bf16.msra.mxu1 %v17957_v33  ;;  %7170 = vmatpush1.bf16.msra.mxu0 %v17959_v60  ;;  %v22045_v33 = vld [vmem:[%s27885_s22 + $0x870] sm:$0xff]  }
0x19b5   :  { %7130 = vmatprep.subr.bf16.mxu1 %v17974_v55  ;;  %7171 = vmatprep.subr.bf16.mxu0 %v17976_v23  ;;  %v22046_v60 = vld [vmem:[%s27885_s22 + $0x8f0] sm:$0xff]  }
0x19b6   :  { %7160 = vmatprep.mubr.bf16.mxu1 %v22723_v28  ;;  %7201 = vmatprep.mubr.bf16.mxu0 %v22723_v28  ;;  %v22047_v55 = vld [vmem:[%s27885_s22 + $0x830] sm:$0xff]  }
0x19b7   :  { %v22048_v23 = vld [vmem:[%s27885_s22 + $0x8b0] sm:$0xff]  }
0x19b8   :  { %7131 = vmatpush1.bf16.msra.mxu1 %v17973_v35  ;;  %7172 = vmatpush1.bf16.msra.mxu0 %v17975_v36  ;;  %v22053_v35 = vld [vmem:[%s27885_s22 + $0x940] sm:$0xff]  }
0x19b9   :  { %7132 = vmatprep.subr.bf16.mxu1 %v17990_v5  ;;  %7173 = vmatprep.subr.bf16.mxu0 %v17992_v38  ;;  %v22054_v36 = vld [vmem:[%s27885_s22 + $0x9c0] sm:$0xff]  }
0x19ba   :  { %v25078_v5 = vld [vmem:[%s27884_s21 + $0x20] sm:$0xff] }
0x19bb   :  { %v6482_v38 = vrot.slane %v25078_v5, %v23082_v48  ;;  %v6490_v52 = vrot.slane %v25078_v5, %v23490_v12  ;;  %v6486_v11 = vrot.slane %v25078_v5, %v23139_v0  ;;  %v6494_v31 = vrot.slane %v25078_v5, %v23498_v14 }
0x19bc   :  { %7133 = vmatpush1.bf16.msra.mxu1 %v17989_v43  ;;  %7174 = vmatpush1.bf16.msra.mxu0 %v17991_v50 }
0x19bd   :  { %7134 = vmatprep.subr.bf16.mxu1 %v18006_v56  ;;  %7175 = vmatprep.subr.bf16.mxu0 %v18008_v57 }
0x19c0   :  { %7135 = vmatpush1.bf16.msra.mxu1 %v18005_v62  ;;  %7176 = vmatpush1.bf16.msra.mxu0 %v18007_v21 }
0x19c1   :  { %20558 = vmatprep.subr.bf16.mxu1 %v22021_v63  ;;  %20580 = vmatprep.subr.bf16.mxu0 %v22022_v40 }
0x19c3   :  { %18015 = vmatmul.mubr.msk.bf16.vlgmr.msra.gmra.mrb[96].mxu1 %vm91_vm1, %v24829_v9  ;;  %18016 = vmatmul.mubr.msk.bf16.vlgmr.msra.gmra.mrb[100].mxu0 %vm91_vm1, %v24829_v9  ;;  %v22030_v9 = vld [vmem:[%s27885_s22 + $0x8d0] sm:$0xff]  }
0x19c4   :  { %20559 = vmatpush3.bf16.msra.mxu1 %v22023_v2  ;;  %20581 = vmatpush3.bf16.msra.mxu0 %v22024_v4 }
0x19c5   :  { %20560 = vmatprep.subr.bf16.mxu1 %v22025_v7  ;;  %20582 = vmatprep.subr.bf16.mxu0 %v22026_v61 }
0x19c8   :  { %20561 = vmatpush3.bf16.msra.mxu1 %v22027_v10  ;;  %20583 = vmatpush3.bf16.msra.mxu0 %v22028_v44 }
0x19c9   :  { %20562 = vmatprep.subr.bf16.mxu1 %v22029_v16  ;;  %20584 = vmatprep.subr.bf16.mxu0 %v22030_v9 }
0x19cc   :  { %20563 = vmatpush3.bf16.msra.mxu1 %v22031_v34  ;;  %20585 = vmatpush3.bf16.msra.mxu0 %v22032_v58  ;;  %v22055_v58 = vld [vmem:[%s27885_s22 + $0x900] sm:$0xff]  }
0x19cd   :  { %20564 = vmatprep.subr.bf16.mxu1 %v22033_v32  ;;  %20586 = vmatprep.subr.bf16.mxu0 %v22034_v17  ;;  %v22056_v32 = vld [vmem:[%s27885_s22 + $0x980] sm:$0xff]  }
0x19d0   :  { %20565 = vmatpush3.bf16.msra.mxu1 %v22035_v1  ;;  %20587 = vmatpush3.bf16.msra.mxu0 %v22036_v18  ;;  %v22057_v18 = vld [vmem:[%s27885_s22 + $0x948] sm:$0xff]  }
0x19d1   :  { %20566 = vmatprep.subr.bf16.mxu1 %v22037_v49  ;;  %20588 = vmatprep.subr.bf16.mxu0 %v22038_v19  ;;  %v22058_v49 = vld [vmem:[%s27885_s22 + $0x9c8] sm:$0xff]  }
0x19d2   :  { %v22059_v19 = vld [vmem:[%s27885_s22 + $0x908] sm:$0xff]  }
0x19d4   :  { %20567 = vmatpush3.bf16.msra.mxu1 %v22039_v15  ;;  %20589 = vmatpush3.bf16.msra.mxu0 %v22040_v53  ;;  %v22060_v15 = vld [vmem:[%s27885_s22 + $0x988] sm:$0xff]   ;;  %v22061_v53 = vld [vmem:[%s27885_s22 + $0x950] sm:$0xff]  }
0x19d5   :  { %20568 = vmatprep.subr.bf16.mxu1 %v22041_v20  ;;  %20590 = vmatprep.subr.bf16.mxu0 %v22042_v22  ;;  %v22062_v20 = vld [vmem:[%s27885_s22 + $0x9d0] sm:$0xff]   ;;  %v6502_v22 = vrot.slane %v25078_v5, %v23527_v46 }
0x19d8   :  { %20569 = vmatpush3.bf16.msra.mxu1 %v22043_v45  ;;  %20591 = vmatpush3.bf16.msra.mxu0 %v22044_v13  ;;  %v6510_v45 = vrot.slane %v25078_v5, %v23530_v54  ;;  %v22063_v13 = vld [vmem:[%s27885_s22 + $0x910] sm:$0xff]  }
0x19d9   :  { %20570 = vmatprep.subr.bf16.mxu1 %v22045_v33  ;;  %20592 = vmatprep.subr.bf16.mxu0 %v22046_v60  ;;  %v22064_v33 = vld [vmem:[%s27885_s22 + $0x990] sm:$0xff]   ;;  %v22065_v60 = vld [vmem:[%s27885_s22 + $0x958] sm:$0xff]  }
0x19dc   :  { %20571 = vmatpush3.bf16.msra.mxu1 %v22047_v55  ;;  %20593 = vmatpush3.bf16.msra.mxu0 %v22048_v23  ;;  %v22066_v55 = vld [vmem:[%s27885_s22 + $0x9d8] sm:$0xff]  }
0x19dd   :  { %20572 = vmatprep.subr.bf16.mxu1 %v22049_v24  ;;  %20594 = vmatprep.subr.bf16.mxu0 %v22050_v27 }
0x19e0   :  { %20573 = vmatpush3.bf16.msra.mxu1 %v22051_v29  ;;  %20595 = vmatpush3.bf16.msra.mxu0 %v22052_v30 }
0x19e1   :  { %20602 = vmatprep.subr.bf16.mxu1 %v22053_v35  ;;  %20624 = vmatprep.subr.bf16.mxu0 %v22054_v36 }
0x1a66   :  { %v6916_v41 = vpop.f32.mrb[84].mxu1  ;;  %v6957_v43 = vpop.f32.mrb[88].mxu0 }
0x1a67   :  { %v6917_v50 = vadd.f32 %v6916_v41, %v6482_v38  ;;  %v6958_v56 = vadd.f32 %v6957_v43, %v6490_v52  ;;  %v6918_v57 = vpop.f32.mrb[85].mxu1  ;;  %v6959_v62 = vpop.f32.mrb[89].mxu0  ;;  %v22067_v52 = vld [vmem:[%s27885_s22 + $0x918] sm:$0xff]   ;;  %v22069_v43 = vld [vmem:[%s27885_s22 + $0x960] sm:$0xff]  }
0x1a68   :  { %v6919_v21 = vadd.f32 %v6918_v57, %v6486_v11  ;;  %v6960_v63 = vadd.f32 %v6959_v62, %v6494_v31  ;;  %v6920_v40 = vpop.f32.mrb[86].mxu1  ;;  %v6961_v2 = vpop.f32.mrb[90].mxu0  ;;  %v22068_v11 = vld [vmem:[%s27885_s22 + $0x998] sm:$0xff]  }
0x1a69   :  { %v7210_v4 = vmax.f32 %v6917_v50, 0.0  ;;  %v7212_v7 = vmax.f32 %v6958_v56, 0.0  ;;  %v6921_v61 = vpop.f32.mrb[87].mxu1  ;;  %v6962_v10 = vpop.f32.mrb[91].mxu0  ;;  %v22070_v50 = vld [vmem:[%s27885_s22 + $0x9e0] sm:$0xff]   ;;  %v22073_v2 = vld [vmem:[%s27885_s22 + $0x968] sm:$0xff]  }
0x1a6a   :  { %v7211_v44 = vmax.f32 %v6919_v21, 0.0  ;;  %v7213_v16 = vmax.f32 %v6960_v63, 0.0  ;;  %v22071_v63 = vld [vmem:[%s27885_s22 + $0x920] sm:$0xff]   ;;  %v22076_v61 = vld [vmem:[%s27885_s22 + $0x9a8] sm:$0xff]   ;;  %v6498_v10 = vrot.slane %v25078_v5, %v23573_v25 }
0x1a6b   :  { %v7226_v17 = vpack.c.bf16 %v7210_v4, %v7210_v4  ;;  %v7228_v1 = vpack.c.bf16 %v7212_v7, %v7212_v7  ;;  %v22072_v40 = vld [vmem:[%s27885_s22 + $0x9a0] sm:$0xff]   ;;  %v22074_v4 = vld [vmem:[%s27885_s22 + $0x9e8] sm:$0xff]  }
0x1a6c   :  { %v7227_v9 = vpack.c.bf16 %v7211_v44, %v7211_v44  ;;  %v7229_v34 = vpack.c.bf16 %v7213_v16, %v7213_v16  ;;  %v22075_v7 = vld [vmem:[%s27885_s22 + $0x928] sm:$0xff]   ;;  %v6506_v44 = vrot.slane %v25078_v5, %v23576_v26 }
0x1a6d   :  { %v25165_v16 = vld [vmem:[%s27884_s21 + $0x28] sm:$0xff] }
0x1a6e   :  { %8307 = vmatprep.mubr.bf16.mxu1 %v7227_v9  ;;  %8347 = vmatprep.mubr.bf16.mxu0 %v7229_v34  ;;  %v22077_v9 = vld [vmem:[%s27885_s22 + $0x970] sm:$0xff]   ;;  %v6518_v5 = vrot.slane %v25165_v16, %v23139_v0 }
0x1a6f   :  { %8308 = vmatmul.mubr.bf16.vlgmr.msra.gmra.mrb[100].mxu1 %v7226_v17  ;;  %8348 = vmatmul.mubr.bf16.vlgmr.msra.gmra.mrb[104].mxu0 %v7228_v1  ;;  %v22078_v34 = vld [vmem:[%s27885_s22 + $0x9f0] sm:$0xff]  }
0x1a70   :  { %20603 = vmatpush3.bf16.msra.mxu1 %v22055_v58  ;;  %20625 = vmatpush3.bf16.msra.mxu0 %v22056_v32  ;;  %v6526_v58 = vrot.slane %v25165_v16, %v23498_v14  ;;  %v22079_v32 = vld [vmem:[%s27885_s22 + $0x930] sm:$0xff]  }
0x1a71   :  { %20604 = vmatprep.subr.bf16.mxu1 %v22057_v18  ;;  %20626 = vmatprep.subr.bf16.mxu0 %v22058_v49  ;;  %v22080_v17 = vld [vmem:[%s27885_s22 + $0x9b0] sm:$0xff]   ;;  %v22081_v49 = vld [vmem:[%s27885_s22 + $0x978] sm:$0xff]  }
0x1a74   :  { %20605 = vmatpush3.bf16.msra.mxu1 %v22059_v19  ;;  %20627 = vmatpush3.bf16.msra.mxu0 %v22060_v15  ;;  %v22082_v19 = vld [vmem:[%s27885_s22 + $0x9f8] sm:$0xff]  }
0x1a75   :  { %20606 = vmatprep.subr.bf16.mxu1 %v22061_v53  ;;  %20628 = vmatprep.subr.bf16.mxu0 %v22062_v20 }
0x1a76   :  { %v6998_v23 = vpop.f32.mrb[88].mxu1  ;;  %v7039_v24 = vpop.f32.mrb[92].mxu0 }
0x1a77   :  { %v7000_v27 = vpop.f32.mrb[89].mxu1  ;;  %v7041_v29 = vpop.f32.mrb[93].mxu0  ;;  %v6999_v1 = vadd.f32 %v6998_v23, %v6498_v10  ;;  %v7040_v18 = vadd.f32 %v7039_v24, %v6506_v44  ;;  %v22084_v23 = vld [vmem:[%s27885_s22 + $0x9b8] sm:$0xff]  }
0x1a78   :  { %v7001_v30 = vadd.f32 %v7000_v27, %v6502_v22  ;;  %v7042_v35 = vadd.f32 %v7041_v29, %v6510_v45  ;;  %v7002_v36 = vpop.f32.mrb[90].mxu1  ;;  %v7043_v38 = vpop.f32.mrb[94].mxu0  ;;  %20607 = vmatpush3.bf16.msra.mxu1 %v22063_v13  ;;  %20629 = vmatpush3.bf16.msra.mxu0 %v22064_v33  ;;  %v22097_v10 = vld [vmem:[%s27885_s22 + $0xa58] sm:$0xff]  }
0x1a79   :  { %v7003_v31 = vpop.f32.mrb[91].mxu1  ;;  %v7044_v41 = vpop.f32.mrb[95].mxu0  ;;  %20608 = vmatprep.subr.bf16.mxu1 %v22065_v60  ;;  %20630 = vmatprep.subr.bf16.mxu0 %v22066_v55  ;;  %v22083_v55 = vld [vmem:[%s27885_s22 + $0x938] sm:$0xff]   ;;  %v7214_v24 = vmax.f32 %v6999_v1, 0.0  ;;  %v7216_v27 = vmax.f32 %v7040_v18, 0.0  ;;  %v22086_v36 = vld [vmem:[%s27885_s22 + $0xac0] sm:$0xff]  }
0x1a7a   :  { %v7215_v56 = vmax.f32 %v7001_v30, 0.0  ;;  %v7217_v57 = vmax.f32 %v7042_v35, 0.0  ;;  %v22085_v35 = vld [vmem:[%s27885_s22 + $0xa40] sm:$0xff]   ;;  %v22099_v18 = vld [vmem:[%s27885_s22 + $0xa18] sm:$0xff]  }
0x1a7b   :  { %v7230_v31 = vpack.c.bf16 %v7214_v24, %v7214_v24  ;;  %v7232_v41 = vpack.c.bf16 %v7216_v27, %v7216_v27  ;;  %v6514_v24 = vrot.slane %v25165_v16, %v23082_v48  ;;  %v22108_v27 = vld [vmem:[%s27885_s22 + $0xaa8] sm:$0xff]  }
0x1a7c   :  { %v7231_v62 = vpack.c.bf16 %v7215_v56, %v7215_v56  ;;  %v7233_v21 = vpack.c.bf16 %v7217_v57, %v7217_v57  ;;  %20609 = vmatpush3.bf16.msra.mxu1 %v22067_v52  ;;  %20631 = vmatpush3.bf16.msra.mxu0 %v22068_v11  ;;  %v22087_v11 = vld [vmem:[%s27885_s22 + $0xa00] sm:$0xff]   ;;  %v22089_v56 = vld [vmem:[%s27885_s22 + $0xa48] sm:$0xff]  }
0x1a7d   :  { %20610 = vmatprep.subr.bf16.mxu1 %v22069_v43  ;;  %20632 = vmatprep.subr.bf16.mxu0 %v22070_v50  ;;  %v22088_v43 = vld [vmem:[%s27885_s22 + $0xa80] sm:$0xff]   ;;  %v22090_v57 = vld [vmem:[%s27885_s22 + $0xac8] sm:$0xff]  }
0x1a7e   :  { %8387 = vmatprep.mubr.bf16.mxu1 %v7231_v62  ;;  %8427 = vmatprep.mubr.bf16.mxu0 %v7233_v21  ;;  %v22091_v21 = vld [vmem:[%s27885_s22 + $0xa08] sm:$0xff]  }
0x1a80   :  { %20611 = vmatpush3.bf16.msra.mxu1 %v22071_v63  ;;  %20633 = vmatpush3.bf16.msra.mxu0 %v22072_v40  ;;  %v22092_v63 = vld [vmem:[%s27885_s22 + $0xa88] sm:$0xff]   ;;  %v22093_v40 = vld [vmem:[%s27885_s22 + $0xa50] sm:$0xff]  }
0x1a81   :  { %20612 = vmatprep.subr.bf16.mxu1 %v22073_v2  ;;  %20634 = vmatprep.subr.bf16.mxu0 %v22074_v4  ;;  %v22094_v2 = vld [vmem:[%s27885_s22 + $0xad0] sm:$0xff]   ;;  %v6538_v4 = vrot.slane %v25165_v16, %v23576_v26 }
0x1a84   :  { %20613 = vmatpush3.bf16.msra.mxu1 %v22075_v7  ;;  %20635 = vmatpush3.bf16.msra.mxu0 %v22076_v61  ;;  %v22095_v7 = vld [vmem:[%s27885_s22 + $0xa10] sm:$0xff]  }
0x1a85   :  { %20614 = vmatprep.subr.bf16.mxu1 %v22077_v9  ;;  %20636 = vmatprep.subr.bf16.mxu0 %v22078_v34  ;;  %v22096_v61 = vld [vmem:[%s27885_s22 + $0xa90] sm:$0xff]   ;;  %v22098_v34 = vld [vmem:[%s27885_s22 + $0xad8] sm:$0xff]  }
0x1a86   :  { %v25189_v15 = vpop.f32.mrb[92].mxu1  ;;  %v25191_v53 = vpop.f32.mrb[96].mxu0 }
0x1a87   :  { %v7082_v20 = vpop.f32.mrb[93].mxu1  ;;  %v7123_v22 = vpop.f32.mrb[97].mxu0 }
0x1a88   :  { %v7083_v45 = vadd.f32 %v7082_v20, %v6518_v5  ;;  %v7124_v13 = vadd.f32 %v7123_v22, %v6526_v58  ;;  %v7084_v33 = vpop.f32.mrb[94].mxu1  ;;  %v7125_v60 = vpop.f32.mrb[98].mxu0  ;;  %20615 = vmatpush3.bf16.msra.mxu1 %v22079_v32  ;;  %20637 = vmatpush3.bf16.msra.mxu0 %v22080_v17  ;;  %v22100_v20 = vld [vmem:[%s27885_s22 + $0xa98] sm:$0xff]   ;;  %v22101_v22 = vld [vmem:[%s27885_s22 + $0xa60] sm:$0xff]  }
0x1a89   :  { %v7085_v29 = vpop.f32.mrb[95].mxu1  ;;  %v7126_v30 = vpop.f32.mrb[99].mxu0  ;;  %20616 = vmatprep.subr.bf16.mxu1 %v22081_v49  ;;  %20638 = vmatprep.subr.bf16.mxu0 %v22082_v19  ;;  %v22104_v33 = vld [vmem:[%s27885_s22 + $0xaa0] sm:$0xff]   ;;  %v22105_v60 = vld [vmem:[%s27885_s22 + $0xa68] sm:$0xff]  }
0x1a8a   :  { %v7219_v38 = vmax.f32 %v7083_v45, 0.0  ;;  %v7221_v52 = vmax.f32 %v7124_v13, 0.0  ;;  %v22102_v45 = vld [vmem:[%s27885_s22 + $0xae0] sm:$0xff]   ;;  %v22109_v29 = vld [vmem:[%s27885_s22 + $0xa70] sm:$0xff]   ;;  %v6522_v30 = vrot.slane %v25165_v16, %v23490_v12 }
0x1a8b   :  { %v22103_v13 = vld [vmem:[%s27885_s22 + $0xa20] sm:$0xff]  }
0x1a8c   :  { %20617 = vmatpush3.bf16.msra.mxu1 %v22083_v55  ;;  %20639 = vmatpush3.bf16.msra.mxu0 %v22084_v23  ;;  %v7235_v50 = vpack.c.bf16 %v7219_v38, %v7219_v38  ;;  %v7237_v62 = vpack.c.bf16 %v7221_v52, %v7221_v52  ;;  %v22106_v55 = vld [vmem:[%s27885_s22 + $0xae8] sm:$0xff]   ;;  %v6542_v38 = vrot.slane %v25165_v16, %v23530_v54  ;;  %v22111_v52 = vld [vmem:[%s27885_s22 + $0xa30] sm:$0xff]  }
0x1a8d   :  { %20646 = vmatprep.subr.bf16.mxu1 %v22085_v35  ;;  %20668 = vmatprep.subr.bf16.mxu0 %v22086_v36  ;;  %v22107_v23 = vld [vmem:[%s27885_s22 + $0xa28] sm:$0xff]   ;;  %v22110_v35 = vld [vmem:[%s27885_s22 + $0xaf0] sm:$0xff]   ;;  %v6534_v36 = vrot.slane %v25165_v16, %v23527_v46 }
0x1a8f   :  { %8388 = vmatmul.mubr.bf16.vlgmr.msra.gmra.mrb[104].mxu1 %v7230_v31  ;;  %8428 = vmatmul.mubr.bf16.vlgmr.msra.gmra.mrb[108].mxu0 %v7232_v41  ;;  %v22112_v31 = vld [vmem:[%s27885_s22 + $0xab0] sm:$0xff]   ;;  %v22113_v41 = vld [vmem:[%s27885_s22 + $0xa78] sm:$0xff]  }
0x1a90   :  { %20647 = vmatpush3.bf16.msra.mxu1 %v22087_v11  ;;  %8467 = vmatprep.mubr.bf16.mxu1 %v7235_v50  ;;  %v7081_v11 = vadd.f32 %v25189_v15, %v6514_v24  ;;  %v22114_v50 = vld [vmem:[%s27885_s22 + $0xaf8] sm:$0xff]   ;;  %v22135_v24 = vld [vmem:[%s27885_s22 + $0xb20] sm:$0xff]  }
0x1a91   :  { %20669 = vmatpush3.bf16.msra.mxu0 %v22088_v43  ;;  %8507 = vmatprep.mubr.bf16.mxu0 %v7237_v62  ;;  %v7122_v43 = vadd.f32 %v25191_v53, %v6522_v30  ;;  %v22115_v15 = vld [vmem:[%s27885_s22 + $0xa38] sm:$0xff]   ;;  %v22117_v53 = vld [vmem:[%s27885_s22 + $0xb40] sm:$0xff]   ;;  %v22138_v30 = vld [vmem:[%s27885_s22 + $0xbe8] sm:$0xff]  }
0x1a92   :  { %20648 = vmatprep.subr.bf16.mxu1 %v22089_v56  ;;  %20670 = vmatprep.subr.bf16.mxu0 %v22090_v57  ;;  %v7218_v62 = vmax.f32 %v7081_v11, 0.0  ;;  %v22142_v11 = vld [vmem:[%s27885_s22 + $0xbf0] sm:$0xff]  }
0x1a94   :  { %20649 = vmatpush3.bf16.msra.mxu1 %v22091_v21  ;;  %v22116_v21 = vld [vmem:[%s27885_s22 + $0xab8] sm:$0xff]  }
0x1a95   :  { %20671 = vmatpush3.bf16.msra.mxu0 %v22092_v63  ;;  %20650 = vmatprep.subr.bf16.mxu1 %v22093_v40  ;;  %v7220_v63 = vmax.f32 %v7122_v43, 0.0  ;;  %v22118_v40 = vld [vmem:[%s27885_s22 + $0xbc0] sm:$0xff]   ;;  %v22145_v43 = vld [vmem:[%s27885_s22 + $0xb78] sm:$0xff]  }
0x1a96   :  { %v25240_v44 = vpop.f32.mrb[96].mxu1  ;;  %v7203_v9 = vpop.f32.mrb[100].mxu0  ;;  %20672 = vmatprep.subr.bf16.mxu0 %v22094_v2 }
0x1a97   :  { %v25245_v5 = vadd.f32 %v7203_v9, %v6538_v4  ;;  %v7164_v58 = vpop.f32.mrb[97].mxu1  ;;  %v7205_v32 = vpop.f32.mrb[101].mxu0  ;;  %v7236_v9 = vpack.c.bf16 %v7220_v63, %v7220_v63  ;;  %v18274_v63 = vld [vmem:[%s27886_s23 + $0x2] ss:$0 sm:$0xff] }
0x1a98   :  { %v7166_v17 = vpop.f32.mrb[98].mxu1  ;;  %v7207_v1 = vpop.f32.mrb[102].mxu0  ;;  %20651 = vmatpush3.bf16.msra.mxu1 %v22095_v7  ;;  %v7165_v56 = vadd.f32 %v7164_v58, %v6534_v36  ;;  %v7206_v57 = vadd.f32 %v7205_v32, %v6542_v38  ;;  %v22119_v7 = vld [vmem:[%s27885_s22 + $0xb00] sm:$0xff]   ;;  %v22122_v32 = vld [vmem:[%s27885_s22 + $0xbc8] sm:$0xff]   ;;  %v6530_v36 = vrot.slane %v25165_v16, %v23573_v25  ;;  %v22143_v16 = vld [vmem:[%s27885_s22 + $0xb30] sm:$0xff]  }
0x1a99   :  { %20673 = vmatpush3.bf16.msra.mxu0 %v22096_v61  ;;  %v7167_v49 = vpop.f32.mrb[99].mxu1  ;;  %v7208_v19 = vpop.f32.mrb[103].mxu0  ;;  %20652 = vmatprep.subr.bf16.mxu1 %v22097_v10  ;;  %v7234_v61 = vpack.c.bf16 %v7218_v62, %v7218_v62  ;;  %v22120_v10 = vld [vmem:[%s27885_s22 + $0xb80] sm:$0xff]   ;;  %v22123_v1 = vld [vmem:[%s27885_s22 + $0xb08] sm:$0xff]  }
0x1a9a   :  { %20674 = vmatprep.subr.bf16.mxu0 %v22098_v34  ;;  %v7223_v2 = vmax.f32 %v7165_v56, 0.0  ;;  %v7225_v4 = vmax.f32 %v7206_v57, 0.0  ;;  %v22121_v34 = vld [vmem:[%s27885_s22 + $0xb48] sm:$0xff]   ;;  %v22125_v49 = vld [vmem:[%s27885_s22 + $0xb50] sm:$0xff]   ;;  %v22148_v57 = vld [vmem:[%s27885_s22 + $0xbb8] sm:$0xff]  }
0x1a9b   :  { %v22126_v19 = vld [vmem:[%s27885_s22 + $0xbd0] sm:$0xff]   ;;  %v22140_v38 = vld [vmem:[%s27885_s22 + $0xba8] sm:$0xff]  }
0x1a9c   :  { %20653 = vmatpush3.bf16.msra.mxu1 %v22099_v18  ;;  %v7239_v58 = vpack.c.bf16 %v7223_v2, %v7223_v2  ;;  %v7241_v17 = vpack.c.bf16 %v7225_v4, %v7225_v4  ;;  %v22124_v18 = vld [vmem:[%s27885_s22 + $0xb88] sm:$0xff]  }
0x1a9d   :  { %20675 = vmatpush3.bf16.msra.mxu0 %v22100_v20  ;;  %20654 = vmatprep.subr.bf16.mxu1 %v22101_v22  ;;  %v22127_v20 = vld [vmem:[%s27885_s22 + $0xb10] sm:$0xff]  }
0x1a9e   :  { %20676 = vmatprep.subr.bf16.mxu0 %v22102_v45  ;;  %v22128_v22 = vld [vmem:[%s27885_s22 + $0xb90] sm:$0xff]   ;;  %v22129_v45 = vld [vmem:[%s27885_s22 + $0xb58] sm:$0xff]  }
0x1aa0   :  { %20655 = vmatpush3.bf16.msra.mxu1 %v22103_v13  ;;  %v22130_v13 = vld [vmem:[%s27885_s22 + $0xbd8] sm:$0xff]  }
0x1aa1   :  { %20677 = vmatpush3.bf16.msra.mxu0 %v22104_v33  ;;  %20656 = vmatprep.subr.bf16.mxu1 %v22105_v60  ;;  %v22131_v33 = vld [vmem:[%s27885_s22 + $0xb18] sm:$0xff]  }
0x1aa2   :  { %20678 = vmatprep.subr.bf16.mxu0 %v22106_v55  ;;  %v22132_v60 = vld [vmem:[%s27885_s22 + $0xb98] sm:$0xff]   ;;  %v22133_v55 = vld [vmem:[%s27885_s22 + $0xb60] sm:$0xff]  }
0x1aa4   :  { %20657 = vmatpush3.bf16.msra.mxu1 %v22107_v23  ;;  %v22134_v23 = vld [vmem:[%s27885_s22 + $0xbe0] sm:$0xff]  }
0x1aa5   :  { %20679 = vmatpush3.bf16.msra.mxu0 %v22108_v27  ;;  %20658 = vmatprep.subr.bf16.mxu1 %v22109_v29  ;;  %v22136_v27 = vld [vmem:[%s27885_s22 + $0xba0] sm:$0xff]   ;;  %v22137_v29 = vld [vmem:[%s27885_s22 + $0xb68] sm:$0xff]  }
0x1aa6   :  { %20680 = vmatprep.subr.bf16.mxu0 %v22110_v35  ;;  %v22139_v35 = vld [vmem:[%s27885_s22 + $0xb28] sm:$0xff]  }
0x1aa8   :  { %20659 = vmatpush3.bf16.msra.mxu1 %v22111_v52  ;;  %v22141_v52 = vld [vmem:[%s27885_s22 + $0xb70] sm:$0xff]  }
0x1aa9   :  { %20681 = vmatpush3.bf16.msra.mxu0 %v22112_v31  ;;  %20660 = vmatprep.subr.bf16.mxu1 %v22113_v41  ;;  %v7163_v31 = vadd.f32 %v25240_v44, %v6530_v36  ;;  %v22144_v41 = vld [vmem:[%s27885_s22 + $0xbb0] sm:$0xff]   ;;  %v22147_v44 = vld [vmem:[%s27885_s22 + $0xb38] sm:$0xff]  }
0x1aaa   :  { %20682 = vmatprep.subr.bf16.mxu0 %v22114_v50  ;;  %v22146_v50 = vld [vmem:[%s27885_s22 + $0xbf8] sm:$0xff]  }
0x1aab   :  { %v7222_v56 = vmax.f32 %v7163_v31, 0.0 }
0x1aac   :  { %20661 = vmatpush3.bf16.msra.mxu1 %v22115_v15  ;;  %v7224_v15 = vmax.f32 %v25245_v5, 0.0 }
0x1aad   :  { %20683 = vmatpush3.bf16.msra.mxu0 %v22116_v21  ;;  %20690 = vmatprep.subr.bf16.mxu1 %v22117_v53  ;;  %v7238_v62 = vpack.c.bf16 %v7222_v56, %v7222_v56 }
0x1aae   :  { %20712 = vmatprep.subr.bf16.mxu0 %v22118_v40  ;;  %v7240_v21 = vpack.c.bf16 %v7224_v15, %v7224_v15 }
0x1aaf   :  { %8468 = vmatmul.mubr.bf16.vlgmr.msra.gmra.mrb[108].mxu1 %v7234_v61 }
0x1ab0   :  { %8508 = vmatmul.mubr.bf16.vlgmr.msra.gmra.mrb[112].mxu0 %v7236_v9  ;;  %20691 = vmatpush3.bf16.msra.mxu1 %v22119_v7 }
0x1ab1   :  { %8547 = vmatprep.mubr.bf16.mxu1 %v7239_v58  ;;  %20713 = vmatpush3.bf16.msra.mxu0 %v22120_v10 }
0x1ab2   :  { %8587 = vmatprep.mubr.bf16.mxu0 %v7241_v17  ;;  %20692 = vmatprep.subr.bf16.mxu1 %v22121_v34 }
0x1ab3   :  { %20714 = vmatprep.subr.bf16.mxu0 %v22122_v32 }
0x1ab4   :  { %20693 = vmatpush3.bf16.msra.mxu1 %v22123_v1 }
0x1ab5   :  { %20715 = vmatpush3.bf16.msra.mxu0 %v22124_v18  ;;  %20694 = vmatprep.subr.bf16.mxu1 %v22125_v49 }
0x1ab6   :  { %20716 = vmatprep.subr.bf16.mxu0 %v22126_v19 }
0x1ab8   :  { %20695 = vmatpush3.bf16.msra.mxu1 %v22127_v20 }
0x1ab9   :  { %20717 = vmatpush3.bf16.msra.mxu0 %v22128_v22  ;;  %20696 = vmatprep.subr.bf16.mxu1 %v22129_v45 }
0x1aba   :  { %20718 = vmatprep.subr.bf16.mxu0 %v22130_v13 }
0x1abc   :  { %20697 = vmatpush3.bf16.msra.mxu1 %v22131_v33 }
0x1abd   :  { %20719 = vmatpush3.bf16.msra.mxu0 %v22132_v60  ;;  %20698 = vmatprep.subr.bf16.mxu1 %v22133_v55 }
0x1abe   :  { %20720 = vmatprep.subr.bf16.mxu0 %v22134_v23 }
0x1ac0   :  { %20699 = vmatpush3.bf16.msra.mxu1 %v22135_v24 }
0x1ac1   :  { %20721 = vmatpush3.bf16.msra.mxu0 %v22136_v27  ;;  %20700 = vmatprep.subr.bf16.mxu1 %v22137_v29 }
0x1ac2   :  { %20722 = vmatprep.subr.bf16.mxu0 %v22138_v30 }
0x1ac4   :  { %20701 = vmatpush3.bf16.msra.mxu1 %v22139_v35 }
0x1ac5   :  { %20723 = vmatpush3.bf16.msra.mxu0 %v22140_v38  ;;  %20702 = vmatprep.subr.bf16.mxu1 %v22141_v52 }
0x1ac6   :  { %20724 = vmatprep.subr.bf16.mxu0 %v22142_v11 }
0x1ac8   :  { %20703 = vmatpush3.bf16.msra.mxu1 %v22143_v16 }
0x1ac9   :  { %20725 = vmatpush3.bf16.msra.mxu0 %v22144_v41  ;;  %20704 = vmatprep.subr.bf16.mxu1 %v22145_v43 }
0x1aca   :  { %20726 = vmatprep.subr.bf16.mxu0 %v22146_v50 }
0x1acc   :  { %20705 = vmatpush3.bf16.msra.mxu1 %v22147_v44 }
0x1acd   :  { %20727 = vmatpush3.bf16.msra.mxu0 %v22148_v57 }
0x1ace   :  { %21672 = vmatprep.subr.bf16.mxu0 %v22720_v3 }
0x1acf   :  { %8548 = vmatmul.mubr.bf16.vlgmr.msra.gmra.mrb[112].mxu1 %v7238_v62 }
0x1ad0   :  { %8588 = vmatmul.mubr.bf16.vlgmr.msra.gmra.mrb[116].mxu0 %v7240_v21  ;;  %8725 = vmatprep.mubr.bf16.mxu1 %v22723_v28 }
0x1ad1   :  { %21674 = vmatpush3.bf16.msra.mxu0 %v23050_v37  ;;  %21502 = vmatprep.mubr.msk.f32.mxu0 %vm22721_vm0, %v22722_v6 }
0x1ad2   :  { %21675 = vmatprep.subr.bf16.mxu0 %v22720_v3 }
0x1ad5   :  { %21677 = vmatpush3.bf16.msra.mxu0 %v23056_v39 }
0x1ad6   :  { %21678 = vmatprep.subr.bf16.mxu0 %v22720_v3 }
0x1ad9   :  { %21680 = vmatpush3.bf16.msra.mxu0 %v23066_v42 }
0x1ada   :  { %21681 = vmatprep.subr.bf16.mxu0 %v22720_v3 }
0x1add   :  { %21683 = vmatpush3.bf16.msra.mxu0 %v23079_v47 }
0x1b42   :  { %v20574_v5 = vpop.f32.mrb[100].mxu1  ;;  %v20596_v53 = vpop.f32.mrb[104].mxu0 }
0x1b43   :  { %v20575_v40 = vpop.f32.mrb[101].mxu1  ;;  %v20597_v2 = vpop.f32.mrb[105].mxu0 }
0x1b44   :  { %v20576_v4 = vadd.f32 %v20575_v40, %v20574_v5  ;;  %v20598_v7 = vadd.f32 %v20597_v2, %v20596_v53  ;;  %v20577_v61 = vpop.f32.mrb[102].mxu1  ;;  %v20599_v10 = vpop.f32.mrb[106].mxu0 }
0x1b45   :  { %v20578_v9 = vpop.f32.mrb[103].mxu1  ;;  %v20600_v34 = vpop.f32.mrb[107].mxu0 }
0x1b46   :  { %v8310_v58 = vadd.f32 %v20576_v4, %v18274_v63  ;;  %v22151_v34 = vld [vmem:[%s27919_s4 + $0xc4] ss:$8 sps:$4 sm:$0xff]  }
0x1b47   :  { %8693 = vmatprep.subr.bf16.mxu1 %v22151_v34 }
0x1b48   :  { %v8350_v32 = vadd.f32 %v20598_v7, %v8310_v58  ;;  %v22149_v58 = vld [vmem:[%s27919_s4 + $0xc0] ss:$8 sps:$4 sm:$0xff]  }
0x1b49   :  { %8694 = vmatpush1.bf16.msra.mxu1 %v22149_v58 }
0x1b62   :  { %v20618_v17 = vpop.f32.mrb[104].mxu1  ;;  %v20640_v1 = vpop.f32.mrb[108].mxu0 }
0x1b63   :  { %v20619_v18 = vpop.f32.mrb[105].mxu1  ;;  %v20641_v49 = vpop.f32.mrb[109].mxu0 }
0x1b64   :  { %v20620_v19 = vadd.f32 %v20619_v18, %v20618_v17  ;;  %v20642_v20 = vadd.f32 %v20641_v49, %v20640_v1  ;;  %v20621_v22 = vpop.f32.mrb[106].mxu1  ;;  %v20643_v45 = vpop.f32.mrb[110].mxu0  ;;  %v22157_v17 = vld [vmem:[%s27919_s4 + $0xe4] ss:$8 sps:$4 sm:$0xff]   ;;  %v22155_v1 = vld [vmem:[%s27919_s4 + $0xe0] ss:$8 sps:$4 sm:$0xff]  }
0x1b65   :  { %v20622_v13 = vpop.f32.mrb[107].mxu1  ;;  %v20644_v33 = vpop.f32.mrb[111].mxu0  ;;  %v22160_v18 = vld [vmem:[%s27919_s4 + $0xf4] ss:$8 sps:$4 sm:$0xff]   ;;  %v22158_v49 = vld [vmem:[%s27919_s4 + $0xf0] ss:$8 sps:$4 sm:$0xff]  }
0x1b66   :  { %v8390_v60 = vadd.f32 %v20620_v19, %v8350_v32  ;;  %v22152_v32 = vld [vmem:[%s27919_s4 + $0xd0] ss:$8 sps:$4 sm:$0xff]   ;;  %v18405_v13 = vld [vmem:[%s27881_s18 + $0x2] ss:$0 sm:$0xff] }
0x1b68   :  { %v8430_v55 = vadd.f32 %v20642_v20, %v8390_v60  ;;  %v18406_v60 = vld [vmem:[%s27882_s19 + $0x2] ss:$0 sm:$0xff] }
0x1b82   :  { %v20662_v23 = vpop.f32.mrb[108].mxu1 }
0x1b83   :  { %v20684_v24 = vpop.f32.mrb[112].mxu0  ;;  %v20663_v27 = vpop.f32.mrb[109].mxu1 }
0x1b84   :  { %v20664_v29 = vadd.f32 %v20663_v27, %v20662_v23  ;;  %v20685_v30 = vpop.f32.mrb[113].mxu0  ;;  %v20665_v35 = vpop.f32.mrb[110].mxu1  ;;  %v22669_v27 = vld [vmem:[%s27925_s6] sm:$0xff] }
0x1b85   :  { %v20686_v36 = vadd.f32 %v20685_v30, %v20684_v24  ;;  %v20687_v38 = vpop.f32.mrb[114].mxu0  ;;  %v20666_v52 = vpop.f32.mrb[111].mxu1 }
0x1b86   :  { %v8470_v11 = vadd.f32 %v20664_v29, %v8430_v55  ;;  %v20688_v16 = vpop.f32.mrb[115].mxu0  ;;  %v25473_v29 = vld [vmem:[%s27876_s13 + $0x6] sm:$0x3] }
0x1b87   :  { %v8643_v30 = vrot.slane %v25473_v29, %v23082_v48 }
0x1b88   :  { %v8510_v31 = vadd.f32 %v20686_v36, %v8470_v11 }
0x1ba2   :  { %v20706_v41 = vpop.f32.mrb[112].mxu1 }
0x1ba3   :  { %v20728_v43 = vpop.f32.mrb[116].mxu0  ;;  %v20707_v50 = vpop.f32.mrb[113].mxu1 }
0x1ba4   :  { %v20708_v44 = vadd.f32 %v20707_v50, %v20706_v41  ;;  %v20729_v56 = vpop.f32.mrb[117].mxu0  ;;  %v20709_v57 = vpop.f32.mrb[114].mxu1 }
0x1ba5   :  { %v20730_v15 = vadd.f32 %v20729_v56, %v20728_v43  ;;  %v20731_v62 = vpop.f32.mrb[118].mxu0  ;;  %v20710_v21 = vpop.f32.mrb[115].mxu1 }
0x1ba6   :  { %v8550_v5 = vadd.f32 %v20708_v44, %v8510_v31  ;;  %v20732_v53 = vpop.f32.mrb[119].mxu0 }
0x1ba8   :  { %v8590_v63 = vadd.f32 %v20730_v15, %v8550_v5 }
0x1baa   :  { %v8595_v40 = vadd.f32 %v8590_v63, %v24825_v51  ;;  %v22154_v51 = vld [vmem:[%s27919_s4 + $0xd4] ss:$8 sps:$4 sm:$0xff]  }
0x1bab   :  { %8695 = vmatprep.subr.bf16.mxu1 %v22154_v51 }
0x1bac   :  { %v8600_v2 = vsel %vm840_vm8, %v8595_v40, 0.0  ;;  %8696 = vmatpush1.bf16.msra.mxu1 %v22152_v32 }
0x1bad   :  { %8601 = vadd.xlane.f32.xlu1 %v8600_v2  ;;  %8697 = vmatprep.subr.bf16.mxu1 %v22157_v17 }
0x1bb0   :  { %8698 = vmatpush1.bf16.msra.mxu1 %v22155_v1 }
0x1bb1   :  { %8699 = vmatprep.subr.bf16.mxu1 %v22160_v18 }
0x1bb4   :  { %8700 = vmatpush1.bf16.msra.mxu1 %v22158_v49 }
0x1bb5   :  { %21505 = vmatprep.subr.mxu1 %v22722_v6 }
0x1c3a   :  { %v8602_v4 = vpop.xlane.xlu1 %8601 }
0x1c3b   :  { %v8603_v7 = vmul.f32 0.015625, %v8602_v4 }
0x1c3d   :  { %v8604_v61 = vsub.f32 %v8595_v40, %v8603_v7 }
0x1c3f   :  { %v8605_v10 = vmul.f32 %v8604_v61, %v8604_v61 }
0x1c41   :  { %v8606_v9 = vsel %vm840_vm8, %v8605_v10, 0.0 }
0x1c42   :  { %8607 = vadd.xlane.f32.xlu1 %v8606_v9 }
0x1ccf   :  { %v8608_v19 = vpop.xlane.xlu1 %8607 }
0x1cd0   :  { %v8609_v20 = vmul.f32 0.015625, %v8608_v19 }
0x1cd2   :  { %v8610_v22 = vadd.f32 1e-05, %v8609_v20 }
0x1cd4   :  { %22635 = vrsqrt.f32 %v8610_v22 }
0x1cde   :  { %v22636_v45 = vpop.eup %22635 }
0x1cdf   :  { %v8612_v33 = vmul.f32 %v22636_v45, %v8604_v61 }
0x1ce1   :  { %v8619_v55 = vmul.f32 %v18405_v13, %v8612_v33 }
0x1ce3   :  { %v25459_v23 = vadd.f32 %v18406_v60, %v8619_v55 }
0x1ce5   :  { %v8627_v24 = vpack.c.bf16 %v25459_v23, %v25459_v23 }
0x1ce7   :  { %18424 = vmatmul.mubr.msk.bf16.vlgmr.msra.gmra.mrb[116].mxu1 %vm91_vm1, %v8627_v24 }
0x1ce8   :  { %21506 = vmatpush3.msra.mxu1 %v22669_v27  ;;  %21507 = vmatprep.mubr.msk.f32.mxu1 %vm22721_vm0, %v22722_v6 }
0x1ce9   :  { %21510 = vmatprep.subr.bf16.mxu1 %v22722_v6 }
0x1dba   :  { %v8727_v35 = vpop.f32.mrb[116].mxu1 }
0x1dbb   :  { %v8728_v36 = vadd.f32 %v8727_v35, %v8643_v30  ;;  %v25477_v38 = vpop.f32.mrb[117].mxu1 }
0x1dbc   :  { %v8731_v52 = vpop.f32.mrb[118].mxu1 }
0x1dbd   :  { %v8732_v11 = vpop.f32.mrb[119].mxu1  ;;  %8767 = vrot.lane.b32.xlu1 %v8728_v36, %s22724_s8  ;;  %v8741_v16 = vrot.slane %v8728_v36, %v23097_v59 }
0x1dbf   :  { %v8742_v31 = vcombine.high %v8741_v16, %v8741_v16  ;;  %v8749_v41 = vrot.slane %v8741_v16, %v23097_v59 }
0x1dc1   :  { %v8756_v43 = vrot.slane %v8742_v31, %v23097_v59  ;;  %v8760_v50 = vrot.slane %v8749_v41, %v23082_v48  ;;  %v22161_v41 = vld [vmem:[%s27877_s14 + $0x60] sm:$0xff]  }
0x1dc3   :  { %v8764_v44 = vrot.slane %v8756_v43, %v23082_v48  ;;  %v22162_v43 = vld [vmem:[%s27877_s14 + $0x68] sm:$0xff]  }
0x1e2f   :  { %v8768_v56 = vpop.permute.xlu1 %8767 }
0x1e30   :  { %v8770_v57 = vmul.f32 %v8768_v56, %v8760_v50  ;;  %v8771_v15 = vmul.f32 %v8768_v56, %v8764_v44  ;;  %v22163_v50 = vld [vmem:[%s27877_s14 + $0x70] sm:$0xff]   ;;  %v22164_v44 = vld [vmem:[%s27877_s14 + $0x78] sm:$0xff]   ;;  %v8647_v56 = vrot.slane %v25473_v29, %v23139_v0 }
0x1e32   :  { %v8774_v62 = vcombine.low %v8770_v57, %v8771_v15  ;;  %v8730_v15 = vadd.f32 %v25477_v38, %v8647_v56 }
0x1e34   :  { %v8781_v21 = vrot.slane %v8774_v62, %v23105_v8 }
0x1e36   :  { %21503 = vmatmul.mubr.msk.f32.vlgmr.msra.gmra.mrb[120].mxu0 %vm91_vm1, %v8781_v21 }
0x1e37   :  { %9633 = vmatprep.mubr.bf16.mxu0 %v22723_v28 }
0x1f09   :  { %v8850_v5 = vpop.f32.mrb[120].mxu0 }
0x1f0a   :  { %v8854_v53 = vmul.f32 0.35355338, %v8850_v5  ;;  %v21504_v63 = vpop.f32.mrb[121].mxu0 }
0x1f0c   :  { %v8855_v40 = vsel %vm703_vm5, %v8854_v53, -inf }
0x1f0d   :  { %v8856_v2 = vrot.slane %v8855_v40, 4 }
0x1f0f   :  { %v8857_v4 = vmax.f32 %v8855_v40, %v8856_v2 }
0x1f11   :  { %v8858_v7 = vrot.slane %v8857_v4, 2 }
0x1f13   :  { %v8859_v61 = vmax.f32 %v8857_v4, %v8858_v7 }
0x1f15   :  { %v8860_v10 = vrot.slane %v8859_v61, 1 }
0x1f17   :  { %v8861_v9 = vmax.f32 %v8859_v61, %v8860_v10 }
0x1f19   :  { %v8862_v34 = vsub.f32 %v8854_v53, %v8861_v9 }
0x1f1b   :  { %v8863_v58 = vmul.f32 1.442695, %v8862_v34 }
0x1f1d   :  { %22637 = vpow2.f32 %v8863_v58 }
0x1f27   :  { %v22638_v51 = vpop.eup %22637 }
0x1f28   :  { %v8872_v32 = vrot.slane %v22638_v51, %v23105_v8 }
0x1f2a   :  { %v8876_v17 = vsel %vm725_vm6, %v8872_v32, 0.0  ;;  %v8873_v1 = vcombine.high %v8872_v32, %v8872_v32 }
0x1f2b   :  { %v8877_v18 = vrot.slane %v8876_v17, 4 }
0x1f2c   :  { %v8883_v49 = vsel %vm725_vm6, %v8873_v1, 0.0 }
0x1f2d   :  { %v8878_v19 = vadd.f32 %v8877_v18, %v8876_v17  ;;  %v8884_v20 = vrot.slane %v8883_v49, 4 }
0x1f2f   :  { %v8879_v22 = vrot.slane %v8878_v19, 2  ;;  %v8885_v45 = vadd.f32 %v8884_v20, %v8883_v49 }
0x1f31   :  { %v8880_v13 = vadd.f32 %v8879_v22, %v8878_v19  ;;  %v8886_v33 = vrot.slane %v8885_v45, 2 }
0x1f33   :  { %v8881_v60 = vrot.slane %v8880_v13, 1  ;;  %v8887_v55 = vadd.f32 %v8886_v33, %v8885_v45  ;;  %v18436_v45 = vld [vmem:[%s27878_s15 + $0x3] ss:$0 sm:$0xff] }
0x1f35   :  { %v8882_v24 = vadd.f32 %v8881_v60, %v8880_v13  ;;  %v8888_v27 = vrot.slane %v8887_v55, 1 }
0x1f37   :  { %22639 = vrcp.f32 %v8882_v24  ;;  %v8889_v30 = vadd.f32 %v8888_v27, %v8887_v55 }
0x1f39   :  { %22641 = vrcp.f32 %v8889_v30 }
0x1f41   :  { %v22640_v35 = vpop.eup %22639 }
0x1f42   :  { %v8891_v52 = vmul.f32 %v22640_v35, %v8872_v32 }
0x1f43   :  { %v22642_v36 = vpop.eup %22641 }
0x1f44   :  { %v8893_v11 = vmul.f32 %v22642_v36, %v8873_v1 }
0x1f46   :  { %v8896_v16 = vcombine.low %v8891_v52, %v8893_v11 }
0x1f48   :  { %v8903_v31 = vrot.slane %v8896_v16, %v23105_v8 }
0x1f4a   :  { %21508 = vmatmul.mubr.msk.f32.vlgmr.msra.gmra.mrb[120].mxu1 %vm754_vm7, %v8903_v31  ;;  %v18446_v31 = vld [vmem:[%s27883_s20 + $0x600] sm:$0xff] }
0x1f4b   :  { %21518 = vmatprep.mubr.msk.bf16.mxu1 %vm22721_vm0, %v22722_v6  ;;  %21511 = vmatpush3.bf16.msra.mxu1 %v22161_v41  ;;  %v18447_v41 = vld [vmem:[%s27883_s20 + $0x608] sm:$0xff] }
0x1f4c   :  { %21512 = vmatprep.subr.bf16.mxu1 %v22722_v6 }
0x1f4f   :  { %21513 = vmatpush3.bf16.msra.mxu1 %v22162_v43 }
0x1f50   :  { %21514 = vmatprep.subr.bf16.mxu1 %v22722_v6 }
0x1f53   :  { %21515 = vmatpush3.bf16.msra.mxu1 %v22163_v50  ;;  %v18455_v50 = vld [vmem:[%s27883_s20 + $0x648] sm:$0xff] }
0x1f54   :  { %21516 = vmatprep.subr.bf16.mxu1 %v22722_v6  ;;  %v18514_v56 = vcombine.low %v18447_v41, %v18455_v50 }
0x1f57   :  { %21517 = vmatpush3.bf16.msra.mxu1 %v22164_v44 }
0x201d   :  { %v8972_v57 = vpop.f32.mrb[120].mxu1 }
0x201e   :  { %v8983_v62 = vrot.slane %v8972_v57, %v23105_v8  ;;  %v21509_v21 = vpop.f32.mrb[121].mxu1  ;;  %v18515_v57 = vcombine.high %v18447_v41, %v18455_v50  ;;  %v18464_v41 = vld [vmem:[%s27883_s20 + $0x690] sm:$0xff]  ;;  %v18465_v50 = vld [vmem:[%s27883_s20 + $0x698] sm:$0xff] }
0x201f   :  { %v18463_v21 = vld [vmem:[%s27883_s20 + $0x688] sm:$0xff] }
0x2020   :  { %v8984_v5 = vcombine.high %v8983_v62, %v8983_v62  ;;  %v8987_v53 = vmul.f32 %v8983_v62, %v8730_v15  ;;  %9642 = vmatprep.subr.bf16.mxu1 %v18515_v57  ;;  %v18470_v62 = vld [vmem:[%s27883_s20 + $0x6c0] sm:$0xff] }
0x2022   :  { %v8988_v63 = vmul.f32 %v8984_v5, %v8730_v15  ;;  %v8989_v40 = vsel %vm840_vm8, %v8987_v53, 0.0  ;;  %v18462_v15 = vld [vmem:[%s27883_s20 + $0x680] sm:$0xff]  ;;  %v18471_v53 = vld [vmem:[%s27883_s20 + $0x6c8] sm:$0xff] }
0x2023   :  { %v8990_v2 = vrot.slane %v8989_v40, 4  ;;  %v18529_v5 = vcombine.high %v18462_v15, %v18470_v62 }
0x2024   :  { %v8996_v4 = vsel %vm840_vm8, %v8988_v63, 0.0  ;;  %v18528_v63 = vcombine.low %v18462_v15, %v18470_v62  ;;  %v18480_v62 = vld [vmem:[%s27883_s20 + $0x710] sm:$0xff] }
0x2025   :  { %v8991_v7 = vadd.f32 %v8990_v2, %v8989_v40  ;;  %v8997_v61 = vrot.slane %v8996_v4, 4  ;;  %v18530_v40 = vcombine.low %v18463_v21, %v18471_v53  ;;  %v18531_v2 = vcombine.high %v18463_v21, %v18471_v53  ;;  %v18488_v21 = vld [vmem:[%s27883_s20 + $0x750] sm:$0xff]  ;;  %v18489_v53 = vld [vmem:[%s27883_s20 + $0x758] sm:$0xff] }
0x2027   :  { %v8992_v10 = vrot.slane %v8991_v7, 2  ;;  %v8998_v9 = vadd.f32 %v8997_v61, %v8996_v4  ;;  %v18478_v4 = vld [vmem:[%s27883_s20 + $0x700] sm:$0xff]  ;;  %v18479_v61 = vld [vmem:[%s27883_s20 + $0x708] sm:$0xff] }
0x2029   :  { %v8993_v34 = vadd.f32 %v8992_v10, %v8991_v7  ;;  %v8999_v29 = vrot.slane %v8998_v9, 2  ;;  %v18486_v7 = vld [vmem:[%s27883_s20 + $0x740] sm:$0xff] }
0x202a   :  { %v18545_v10 = vcombine.high %v18478_v4, %v18486_v7 }
0x202b   :  { %v8994_v58 = vrot.slane %v8993_v34, 1  ;;  %v9000_v51 = vadd.f32 %v8999_v29, %v8998_v9  ;;  %v18487_v9 = vld [vmem:[%s27883_s20 + $0x748] sm:$0xff] }
0x202c   :  { %v18546_v29 = vcombine.low %v18479_v61, %v18487_v9 }
0x202d   :  { %v8995_v38 = vadd.f32 %v8994_v58, %v8993_v34  ;;  %v9001_v32 = vrot.slane %v9000_v51, 1  ;;  %v18544_v34 = vcombine.low %v18478_v4, %v18486_v7  ;;  %v18547_v58 = vcombine.high %v18479_v61, %v18487_v9  ;;  %v18496_v7 = vld [vmem:[%s27883_s20 + $0x790] sm:$0xff]  ;;  %v18505_v9 = vld [vmem:[%s27883_s20 + $0x7d8] sm:$0xff] }
0x202e   :  { %v18504_v61 = vld [vmem:[%s27883_s20 + $0x7d0] sm:$0xff] }
0x202f   :  { %v9002_v17 = vadd.f32 %v9001_v32, %v9000_v51  ;;  %v9003_v1 = vpack.c.bf16 %v8995_v38, %v8995_v38  ;;  %v18494_v51 = vld [vmem:[%s27883_s20 + $0x780] sm:$0xff]  ;;  %v18495_v32 = vld [vmem:[%s27883_s20 + $0x788] sm:$0xff] }
0x2030   :  { %v18502_v38 = vld [vmem:[%s27883_s20 + $0x7c0] sm:$0xff] }
0x2031   :  { %v9004_v18 = vpack.c.bf16 %v9002_v17, %v9002_v17  ;;  %v9024_v49 = vunpack.c.l.b16 %v9003_v1  ;;  %v18561_v17 = vcombine.high %v18494_v51, %v18502_v38  ;;  %v18503_v1 = vld [vmem:[%s27883_s20 + $0x7c8] sm:$0xff] }
0x2033   :  { %v9025_v19 = vunpack.c.l.b16 %v9004_v18  ;;  %v18560_v18 = vcombine.low %v18494_v51, %v18502_v38  ;;  %v18450_v38 = vld [vmem:[%s27883_s20 + $0x620] sm:$0xff] }
0x2035   :  { %v9026_v20 = vsel %vm126_vm2, %v9025_v19, %v9024_v49  ;;  %v18562_v49 = vcombine.low %v18495_v32, %v18503_v1  ;;  %v18563_v19 = vcombine.high %v18495_v32, %v18503_v1  ;;  %v18458_v32 = vld [vmem:[%s27883_s20 + $0x660] sm:$0xff]  ;;  %v18459_v1 = vld [vmem:[%s27883_s20 + $0x668] sm:$0xff] }
0x2036   :  { %v9027_v22 = vpack.c.b16 %v9026_v20, %v9026_v20  ;;  %v18448_v20 = vld [vmem:[%s27883_s20 + $0x610] sm:$0xff] }
0x2038   :  { %21519 = vmatmul.mubr.msk.bf16.vlgmr.msra.gmra.mrb[124].mxu1 %vm91_vm1, %v9027_v22  ;;  %v18456_v22 = vld [vmem:[%s27883_s20 + $0x650] sm:$0xff] }
0x2039   :  { %9674 = vmatprep.mubr.bf16.mxu1 %v22723_v28  ;;  %9643 = vmatpush1.bf16.msra.mxu1 %v18514_v56 }
0x203a   :  { %9644 = vmatprep.subr.bf16.mxu1 %v18531_v2  ;;  %v18549_v2 = vcombine.high %v18480_v62, %v18488_v21 }
0x203d   :  { %9645 = vmatpush1.bf16.msra.mxu1 %v18530_v40 }
0x203e   :  { %9646 = vmatprep.subr.bf16.mxu1 %v18547_v58  ;;  %v18565_v58 = vcombine.high %v18496_v7, %v18504_v61 }
0x2041   :  { %9647 = vmatpush1.bf16.msra.mxu1 %v18546_v29 }
0x2042   :  { %9648 = vmatprep.subr.bf16.mxu1 %v18563_v19  ;;  %v18521_v19 = vcombine.high %v18450_v38, %v18458_v32 }
0x2045   :  { %9649 = vmatpush1.bf16.msra.mxu1 %v18562_v49 }
0x210b   :  { %v9089_v13 = vpop.f32.mrb[124].mxu1 }
0x210c   :  { %v9090_v33 = vadd.f32 %v18436_v45, %v9089_v13  ;;  %v21520_v60 = vpop.f32.mrb[125].mxu1  ;;  %v18449_v45 = vld [vmem:[%s27883_s20 + $0x618] sm:$0xff]  ;;  %v18516_v13 = vcombine.low %v18448_v20, %v18456_v22 }
0x210d   :  { %v9092_v55 = vpop.f32.mrb[126].mxu1  ;;  %v18457_v60 = vld [vmem:[%s27883_s20 + $0x658] sm:$0xff] }
0x210e   :  { %v21521_v24 = vpop.f32.mrb[127].mxu1  ;;  %v9095_v27 = vadd.f32 %v9090_v33, %v25459_v23  ;;  %v18454_v23 = vld [vmem:[%s27883_s20 + $0x640] sm:$0xff]  ;;  %v18517_v33 = vcombine.high %v18448_v20, %v18456_v22  ;;  %v18518_v55 = vcombine.low %v18449_v45, %v18457_v60 }
0x210f   :  { %v18513_v43 = vcombine.high %v18446_v31, %v18454_v23  ;;  %v18512_v44 = vcombine.low %v18446_v31, %v18454_v23  ;;  %v18519_v24 = vcombine.high %v18449_v45, %v18457_v60  ;;  %v18445_v31 = vld [vmem:[%s27880_s17 + $0x3] ss:$0 sm:$0xff]  ;;  %v18520_v60 = vcombine.low %v18450_v38, %v18458_v32 }
0x2110   :  { %v9100_v30 = vsel %vm840_vm8, %v9095_v27, 0.0  ;;  %v18466_v22 = vld [vmem:[%s27883_s20 + $0x6a0] sm:$0xff] }
0x2111   :  { %9101 = vadd.xlane.f32.xlu1 %v9100_v30  ;;  %9601 = vmatprep.subr.bf16.mxu0 %v18513_v43  ;;  %v18472_v43 = vld [vmem:[%s27883_s20 + $0x6d0] sm:$0xff]  ;;  %v18474_v45 = vld [vmem:[%s27883_s20 + $0x6e0] sm:$0xff] }
0x2112   :  { %9602 = vmatpush1.bf16.msra.mxu0 %v18512_v44  ;;  %9724 = vmatprep.subr.bf16.mxu1 %v18519_v24  ;;  %v18533_v57 = vcombine.high %v18464_v41, %v18472_v43  ;;  %v18537_v24 = vcombine.high %v18466_v22, %v18474_v45 }
0x2113   :  { %9603 = vmatprep.subr.bf16.mxu0 %v18529_v5  ;;  %v18481_v5 = vld [vmem:[%s27883_s20 + $0x718] sm:$0xff] }
0x2114   :  { %v18551_v4 = vcombine.high %v18481_v5, %v18489_v53  ;;  %v18550_v29 = vcombine.low %v18481_v5, %v18489_v53  ;;  %v18452_v53 = vld [vmem:[%s27883_s20 + $0x630] sm:$0xff] }
0x2116   :  { %9604 = vmatpush1.bf16.msra.mxu0 %v18528_v63  ;;  %v18532_v63 = vcombine.low %v18464_v41, %v18472_v43  ;;  %v18498_v43 = vld [vmem:[%s27883_s20 + $0x7a0] sm:$0xff] }
0x2117   :  { %9605 = vmatprep.subr.bf16.mxu0 %v18545_v10  ;;  %v18497_v10 = vld [vmem:[%s27883_s20 + $0x798] sm:$0xff] }
0x2118   :  { %v18567_v51 = vcombine.high %v18497_v10, %v18505_v9  ;;  %v18566_v49 = vcombine.low %v18497_v10, %v18505_v9  ;;  %v18468_v9 = vld [vmem:[%s27883_s20 + $0x6b0] sm:$0xff] }
0x211a   :  { %9606 = vmatpush1.bf16.msra.mxu0 %v18544_v34  ;;  %v18548_v34 = vcombine.low %v18480_v62, %v18488_v21 }
0x211b   :  { %9607 = vmatprep.subr.bf16.mxu0 %v18561_v17  ;;  %v18451_v17 = vld [vmem:[%s27883_s20 + $0x628] sm:$0xff] }
0x211c   :  { %v18523_v20 = vcombine.high %v18451_v17, %v18459_v1 }
0x211e   :  { %9608 = vmatpush1.bf16.msra.mxu0 %v18560_v18  ;;  %v18564_v18 = vcombine.low %v18496_v7, %v18504_v61 }
0x211f   :  { %9683 = vmatprep.subr.bf16.mxu0 %v18517_v33  ;;  %v18475_v33 = vld [vmem:[%s27883_s20 + $0x6e8] sm:$0xff] }
0x219e   :  { %v9102_v35 = vpop.xlane.xlu1 %9101 }
0x219f   :  { %v9103_v36 = vmul.f32 0.015625, %v9102_v35 }
0x21a1   :  { %v25525_v52 = vsub.f32 %v9095_v27, %v9103_v36 }
0x21a3   :  { %v9105_v11 = vmul.f32 %v25525_v52, %v25525_v52 }
0x21a5   :  { %v9106_v16 = vsel %vm840_vm8, %v9105_v11, 0.0  ;;  %v18444_v11 = vld [vmem:[%s27879_s16 + $0x3] ss:$0 sm:$0xff] }
0x21a6   :  { %9107 = vadd.xlane.f32.xlu0 %v9106_v16 }
0x2233   :  { %v9108_v27 = vpop.xlane.xlu0 %9107 }
0x2234   :  { %v9109_v30 = vmul.f32 0.015625, %v9108_v27 }
0x2236   :  { %v9110_v35 = vadd.f32 1e-05, %v9109_v30  ;;  %v18482_v30 = vld [vmem:[%s27883_s20 + $0x720] sm:$0xff] }
0x2238   :  { %22643 = vrsqrt.f32 %v9110_v35  ;;  %v18490_v35 = vld [vmem:[%s27883_s20 + $0x760] sm:$0xff] }
0x2242   :  { %v22644_v36 = vpop.eup %22643 }
0x2243   :  { %v9112_v16 = vmul.f32 %v22644_v36, %v25525_v52  ;;  %v18473_v52 = vld [vmem:[%s27883_s20 + $0x6d8] sm:$0xff]  ;;  %v18483_v36 = vld [vmem:[%s27883_s20 + $0x728] sm:$0xff] }
0x2244   :  { %v18535_v15 = vcombine.high %v18465_v50, %v18473_v52  ;;  %v18534_v40 = vcombine.low %v18465_v50, %v18473_v52  ;;  %v18506_v50 = vld [vmem:[%s27883_s20 + $0x7e0] sm:$0xff]  ;;  %v18499_v52 = vld [vmem:[%s27883_s20 + $0x7a8] sm:$0xff] }
0x2245   :  { %v9119_v23 = vmul.f32 %v18444_v11, %v9112_v16  ;;  %v18491_v11 = vld [vmem:[%s27883_s20 + $0x768] sm:$0xff]  ;;  %v18536_v16 = vcombine.low %v18466_v22, %v18474_v45  ;;  %v18569_v21 = vcombine.high %v18498_v43, %v18506_v50 }
0x2246   :  { %v18555_v41 = vcombine.high %v18483_v36, %v18491_v11  ;;  %v18554_v62 = vcombine.low %v18483_v36, %v18491_v11 }
0x2247   :  { %v25609_v44 = vadd.f32 %v18445_v31, %v9119_v23  ;;  %v18553_v23 = vcombine.high %v18482_v30, %v18490_v35 }
0x2249   :  { %v25613_v56 = vpack.c.bf16 %v25609_v44, %v25609_v44 }
0x224b   :  { %18576 = vmatmul.mubr.msk.bf16.vlgmr.msra.gmra.mrb[124].mxu0 %vm91_vm1, %v25613_v56  ;;  %18577 = vmatmul.mubr.msk.bf16.vlgmr.msra.gmra.mrb[128].mxu1 %vm91_vm1, %v25613_v56 }
0x224c   :  { %9684 = vmatpush1.bf16.msra.mxu0 %v18516_v13  ;;  %9725 = vmatpush1.bf16.msra.mxu1 %v18518_v55  ;;  %v18467_v13 = vld [vmem:[%s27883_s20 + $0x6a8] sm:$0xff]  ;;  %v18522_v55 = vcombine.low %v18451_v17, %v18459_v1  ;;  %v18484_v1 = vld [vmem:[%s27883_s20 + $0x730] sm:$0xff] }
0x224d   :  { %9685 = vmatprep.subr.bf16.mxu0 %v18533_v57  ;;  %9726 = vmatprep.subr.bf16.mxu1 %v18535_v15  ;;  %v18539_v27 = vcombine.high %v18467_v13, %v18475_v33  ;;  %v18538_v31 = vcombine.low %v18467_v13, %v18475_v33  ;;  %v18507_v57 = vld [vmem:[%s27883_s20 + $0x7e8] sm:$0xff]  ;;  %v18552_v15 = vcombine.low %v18482_v30, %v18490_v35  ;;  %v18500_v33 = vld [vmem:[%s27883_s20 + $0x7b0] sm:$0xff] }
0x224e   :  { %9715 = vmatprep.mubr.bf16.mxu0 %v22723_v28  ;;  %9756 = vmatprep.mubr.bf16.mxu1 %v22723_v28  ;;  %v18571_v5 = vcombine.high %v18499_v52, %v18507_v57  ;;  %v18570_v7 = vcombine.low %v18499_v52, %v18507_v57  ;;  %v22170_v52 = vld [vmem:[%s27885_s22 + $0xcc8] sm:$0xff]  }
0x224f   :  { %v22171_v57 = vld [vmem:[%s27885_s22 + $0xc08] sm:$0xff]  }
0x2250   :  { %9686 = vmatpush1.bf16.msra.mxu0 %v18532_v63  ;;  %9727 = vmatpush1.bf16.msra.mxu1 %v18534_v40  ;;  %v18460_v63 = vld [vmem:[%s27883_s20 + $0x670] sm:$0xff]  ;;  %v18453_v40 = vld [vmem:[%s27883_s20 + $0x638] sm:$0xff] }
0x2251   :  { %9687 = vmatprep.subr.bf16.mxu0 %v18549_v2  ;;  %9728 = vmatprep.subr.bf16.mxu1 %v18551_v4  ;;  %v18461_v2 = vld [vmem:[%s27883_s20 + $0x678] sm:$0xff]  ;;  %v18568_v4 = vcombine.low %v18498_v43, %v18506_v50  ;;  %v18525_v61 = vcombine.high %v18452_v53, %v18460_v63  ;;  %v22168_v43 = vld [vmem:[%s27885_s22 + $0xc80] sm:$0xff]   ;;  %v22169_v50 = vld [vmem:[%s27885_s22 + $0xc48] sm:$0xff]  }
0x2252   :  { %v18527_v10 = vcombine.high %v18453_v40, %v18461_v2  ;;  %v18526_v38 = vcombine.low %v18453_v40, %v18461_v2  ;;  %v22179_v40 = vld [vmem:[%s27885_s22 + $0xc18] sm:$0xff]  }
0x2253   :  { %v22180_v2 = vld [vmem:[%s27885_s22 + $0xc98] sm:$0xff]  }
0x2254   :  { %9688 = vmatpush1.bf16.msra.mxu0 %v18548_v34  ;;  %9729 = vmatpush1.bf16.msra.mxu1 %v18550_v29  ;;  %v18476_v34 = vld [vmem:[%s27883_s20 + $0x6f0] sm:$0xff]  ;;  %v18469_v29 = vld [vmem:[%s27883_s20 + $0x6b8] sm:$0xff] }
0x2255   :  { %9689 = vmatprep.subr.bf16.mxu0 %v18565_v58  ;;  %9730 = vmatprep.subr.bf16.mxu1 %v18567_v51  ;;  %v18477_v58 = vld [vmem:[%s27883_s20 + $0x6f8] sm:$0xff]  ;;  %v18524_v51 = vcombine.low %v18452_v53, %v18460_v63  ;;  %v18541_v32 = vcombine.high %v18468_v9, %v18476_v34 }
0x2256   :  { %v18543_v17 = vcombine.high %v18469_v29, %v18477_v58  ;;  %v18542_v22 = vcombine.low %v18469_v29, %v18477_v58  ;;  %v22177_v53 = vld [vmem:[%s27885_s22 + $0xc58] sm:$0xff]   ;;  %v22187_v29 = vld [vmem:[%s27885_s22 + $0xc28] sm:$0xff]  }
0x2257   :  { %v22178_v63 = vld [vmem:[%s27885_s22 + $0xcd8] sm:$0xff]   ;;  %v22188_v58 = vld [vmem:[%s27885_s22 + $0xca8] sm:$0xff]  }
0x2258   :  { %9690 = vmatpush1.bf16.msra.mxu0 %v18564_v18  ;;  %9731 = vmatpush1.bf16.msra.mxu1 %v18566_v49  ;;  %v18492_v18 = vld [vmem:[%s27883_s20 + $0x770] sm:$0xff]  ;;  %v18485_v49 = vld [vmem:[%s27883_s20 + $0x738] sm:$0xff] }
0x2259   :  { %9765 = vmatprep.subr.bf16.mxu0 %v18521_v19  ;;  %9806 = vmatprep.subr.bf16.mxu1 %v18523_v20  ;;  %v18493_v19 = vld [vmem:[%s27883_s20 + $0x778] sm:$0xff]  ;;  %v18540_v20 = vcombine.low %v18468_v9, %v18476_v34  ;;  %v18557_v45 = vcombine.high %v18484_v1, %v18492_v18  ;;  %v22185_v9 = vld [vmem:[%s27885_s22 + $0xc68] sm:$0xff]  }
0x225a   :  { %v18559_v13 = vcombine.high %v18485_v49, %v18493_v19  ;;  %v18558_v30 = vcombine.low %v18485_v49, %v18493_v19  ;;  %v22186_v34 = vld [vmem:[%s27885_s22 + $0xce8] sm:$0xff]   ;;  %v22195_v49 = vld [vmem:[%s27885_s22 + $0xc38] sm:$0xff]  }
0x225b   :  { %18578 = vmatmul.mubr.msk.bf16.vlgmr.msra.gmra.mrb[128].mxu0 %vm91_vm1, %v25613_v56  ;;  %18579 = vmatmul.mubr.msk.bf16.vlgmr.msra.gmra.mrb[132].mxu1 %vm91_vm1, %v25613_v56  ;;  %v22196_v19 = vld [vmem:[%s27885_s22 + $0xcb8] sm:$0xff]  }
0x225c   :  { %9766 = vmatpush1.bf16.msra.mxu0 %v18520_v60  ;;  %9807 = vmatpush1.bf16.msra.mxu1 %v18522_v55  ;;  %v18508_v60 = vld [vmem:[%s27883_s20 + $0x7f0] sm:$0xff]  ;;  %v18501_v55 = vld [vmem:[%s27883_s20 + $0x7b8] sm:$0xff] }
0x225d   :  { %9767 = vmatprep.subr.bf16.mxu0 %v18537_v24  ;;  %9808 = vmatprep.subr.bf16.mxu1 %v18539_v27  ;;  %v18509_v24 = vld [vmem:[%s27883_s20 + $0x7f8] sm:$0xff]  ;;  %v18556_v27 = vcombine.low %v18484_v1, %v18492_v18  ;;  %v18573_v35 = vcombine.high %v18500_v33, %v18508_v60  ;;  %v18572_v11 = vcombine.low %v18500_v33, %v18508_v60 }
0x225e   :  { %9797 = vmatprep.mubr.bf16.mxu0 %v22723_v28  ;;  %9838 = vmatprep.mubr.bf16.mxu1 %v22723_v28  ;;  %v18575_v36 = vcombine.high %v18501_v55, %v18509_v24  ;;  %v22193_v1 = vld [vmem:[%s27885_s22 + $0xc78] sm:$0xff]  }
0x225f   :  { %v22194_v18 = vld [vmem:[%s27885_s22 + $0xcf8] sm:$0xff]  }
0x2260   :  { %9768 = vmatpush1.bf16.msra.mxu0 %v18536_v16  ;;  %9809 = vmatpush1.bf16.msra.mxu1 %v18538_v31  ;;  %v18574_v16 = vcombine.low %v18501_v55, %v18509_v24  ;;  %v22165_v31 = vld [vmem:[%s27885_s22 + $0xc40] sm:$0xff]  }
0x2261   :  { %9769 = vmatprep.subr.bf16.mxu0 %v18553_v23  ;;  %9810 = vmatprep.subr.bf16.mxu1 %v18555_v41  ;;  %v22166_v23 = vld [vmem:[%s27885_s22 + $0xcc0] sm:$0xff]  }
0x2262   :  { %v22167_v41 = vld [vmem:[%s27885_s22 + $0xc00] sm:$0xff]  }
0x2264   :  { %9770 = vmatpush1.bf16.msra.mxu0 %v18552_v15  ;;  %9811 = vmatpush1.bf16.msra.mxu1 %v18554_v62  ;;  %v22172_v15 = vld [vmem:[%s27885_s22 + $0xc88] sm:$0xff]   ;;  %v22173_v62 = vld [vmem:[%s27885_s22 + $0xc50] sm:$0xff]  }
0x2265   :  { %9771 = vmatprep.subr.bf16.mxu0 %v18569_v21  ;;  %9812 = vmatprep.subr.bf16.mxu1 %v18571_v5  ;;  %v22175_v21 = vld [vmem:[%s27885_s22 + $0xc10] sm:$0xff]  }
0x2266   :  { %v22176_v5 = vld [vmem:[%s27885_s22 + $0xc90] sm:$0xff]  }
0x2268   :  { %9772 = vmatpush1.bf16.msra.mxu0 %v18568_v4  ;;  %9813 = vmatpush1.bf16.msra.mxu1 %v18570_v7  ;;  %v22181_v4 = vld [vmem:[%s27885_s22 + $0xc60] sm:$0xff]  }
0x2269   :  { %9847 = vmatprep.subr.bf16.mxu0 %v18525_v61  ;;  %9888 = vmatprep.subr.bf16.mxu1 %v18527_v10  ;;  %v22182_v7 = vld [vmem:[%s27885_s22 + $0xce0] sm:$0xff]  }
0x226a   :  { %v22183_v61 = vld [vmem:[%s27885_s22 + $0xc20] sm:$0xff]  }
0x226b   :  { %18580 = vmatmul.mubr.msk.bf16.vlgmr.msra.gmra.mrb[132].mxu0 %vm91_vm1, %v25613_v56  ;;  %18581 = vmatmul.mubr.msk.bf16.vlgmr.msra.gmra.mrb[136].mxu1 %vm91_vm1, %v25613_v56  ;;  %v22184_v10 = vld [vmem:[%s27885_s22 + $0xca0] sm:$0xff]  }
0x226c   :  { %9848 = vmatpush1.bf16.msra.mxu0 %v18524_v51  ;;  %9889 = vmatpush1.bf16.msra.mxu1 %v18526_v38  ;;  %v22189_v51 = vld [vmem:[%s27885_s22 + $0xc70] sm:$0xff]  }
0x226d   :  { %9849 = vmatprep.subr.bf16.mxu0 %v18541_v32  ;;  %9890 = vmatprep.subr.bf16.mxu1 %v18543_v17  ;;  %v22190_v38 = vld [vmem:[%s27885_s22 + $0xcf0] sm:$0xff]  }
0x226e   :  { %9879 = vmatprep.mubr.bf16.mxu0 %v22723_v28  ;;  %9920 = vmatprep.mubr.bf16.mxu1 %v22723_v28  ;;  %v22191_v32 = vld [vmem:[%s27885_s22 + $0xc30] sm:$0xff]  }
0x226f   :  { %v22192_v17 = vld [vmem:[%s27885_s22 + $0xcb0] sm:$0xff]  }
0x2270   :  { %9850 = vmatpush1.bf16.msra.mxu0 %v18540_v20  ;;  %9891 = vmatpush1.bf16.msra.mxu1 %v18542_v22  ;;  %v22197_v20 = vld [vmem:[%s27885_s22 + $0xd40] sm:$0xff]  }
0x2271   :  { %9851 = vmatprep.subr.bf16.mxu0 %v18557_v45  ;;  %9892 = vmatprep.subr.bf16.mxu1 %v18559_v13  ;;  %v22198_v22 = vld [vmem:[%s27885_s22 + $0xdc0] sm:$0xff]   ;;  %v25862_v45 = vld [vmem:[%s27884_s21 + $0x30] sm:$0xff] }
0x2272   :  { %v9201_v13 = vrot.slane %v25862_v45, %v23082_v48  ;;  %v9209_v33 = vrot.slane %v25862_v45, %v23490_v12  ;;  %v9205_v60 = vrot.slane %v25862_v45, %v23139_v0  ;;  %v9213_v55 = vrot.slane %v25862_v45, %v23498_v14 }
0x2274   :  { %9852 = vmatpush1.bf16.msra.mxu0 %v18556_v27  ;;  %9893 = vmatpush1.bf16.msra.mxu1 %v18558_v30 }
0x2275   :  { %9853 = vmatprep.subr.bf16.mxu0 %v18573_v35  ;;  %9894 = vmatprep.subr.bf16.mxu1 %v18575_v36 }
0x2278   :  { %9854 = vmatpush1.bf16.msra.mxu0 %v18572_v11  ;;  %9895 = vmatpush1.bf16.msra.mxu1 %v18574_v16 }
0x2279   :  { %20750 = vmatprep.subr.bf16.mxu0 %v22165_v31  ;;  %20772 = vmatprep.subr.bf16.mxu1 %v22166_v23 }
0x227b   :  { %18582 = vmatmul.mubr.msk.bf16.vlgmr.msra.gmra.mrb[136].mxu0 %vm91_vm1, %v25613_v56  ;;  %18583 = vmatmul.mubr.msk.bf16.vlgmr.msra.gmra.mrb[140].mxu1 %vm91_vm1, %v25613_v56  ;;  %v22174_v56 = vld [vmem:[%s27885_s22 + $0xcd0] sm:$0xff]  }
0x227c   :  { %20751 = vmatpush3.bf16.msra.mxu0 %v22167_v41  ;;  %20773 = vmatpush3.bf16.msra.mxu1 %v22168_v43 }
0x227d   :  { %20752 = vmatprep.subr.bf16.mxu0 %v22169_v50  ;;  %20774 = vmatprep.subr.bf16.mxu1 %v22170_v52 }
0x2280   :  { %20753 = vmatpush3.bf16.msra.mxu0 %v22171_v57  ;;  %20775 = vmatpush3.bf16.msra.mxu1 %v22172_v15 }
0x2281   :  { %20754 = vmatprep.subr.bf16.mxu0 %v22173_v62  ;;  %20776 = vmatprep.subr.bf16.mxu1 %v22174_v56 }
0x2284   :  { %20755 = vmatpush3.bf16.msra.mxu0 %v22175_v21  ;;  %20777 = vmatpush3.bf16.msra.mxu1 %v22176_v5  ;;  %v22199_v5 = vld [vmem:[%s27885_s22 + $0xd00] sm:$0xff]  }
0x2285   :  { %20756 = vmatprep.subr.bf16.mxu0 %v22177_v53  ;;  %20778 = vmatprep.subr.bf16.mxu1 %v22178_v63  ;;  %v22200_v53 = vld [vmem:[%s27885_s22 + $0xd80] sm:$0xff]  }
0x2288   :  { %20757 = vmatpush3.bf16.msra.mxu0 %v22179_v40  ;;  %20779 = vmatpush3.bf16.msra.mxu1 %v22180_v2  ;;  %v22201_v2 = vld [vmem:[%s27885_s22 + $0xd48] sm:$0xff]  }
0x2289   :  { %20758 = vmatprep.subr.bf16.mxu0 %v22181_v4  ;;  %20780 = vmatprep.subr.bf16.mxu1 %v22182_v7  ;;  %v22202_v4 = vld [vmem:[%s27885_s22 + $0xdc8] sm:$0xff]  }
0x228a   :  { %v22203_v7 = vld [vmem:[%s27885_s22 + $0xd08] sm:$0xff]  }
0x228c   :  { %20759 = vmatpush3.bf16.msra.mxu0 %v22183_v61  ;;  %20781 = vmatpush3.bf16.msra.mxu1 %v22184_v10  ;;  %v22204_v61 = vld [vmem:[%s27885_s22 + $0xd88] sm:$0xff]   ;;  %v22205_v10 = vld [vmem:[%s27885_s22 + $0xd50] sm:$0xff]  }
0x228d   :  { %20760 = vmatprep.subr.bf16.mxu0 %v22185_v9  ;;  %20782 = vmatprep.subr.bf16.mxu1 %v22186_v34  ;;  %v22206_v9 = vld [vmem:[%s27885_s22 + $0xdd0] sm:$0xff]   ;;  %v9221_v34 = vrot.slane %v25862_v45, %v23527_v46 }
0x2290   :  { %20761 = vmatpush3.bf16.msra.mxu0 %v22187_v29  ;;  %20783 = vmatpush3.bf16.msra.mxu1 %v22188_v58  ;;  %v9229_v29 = vrot.slane %v25862_v45, %v23530_v54  ;;  %v22207_v58 = vld [vmem:[%s27885_s22 + $0xd10] sm:$0xff]  }
0x2291   :  { %20762 = vmatprep.subr.bf16.mxu0 %v22189_v51  ;;  %20784 = vmatprep.subr.bf16.mxu1 %v22190_v38  ;;  %v22208_v51 = vld [vmem:[%s27885_s22 + $0xd90] sm:$0xff]   ;;  %v22209_v38 = vld [vmem:[%s27885_s22 + $0xd58] sm:$0xff]  }
0x2294   :  { %20763 = vmatpush3.bf16.msra.mxu0 %v22191_v32  ;;  %20785 = vmatpush3.bf16.msra.mxu1 %v22192_v17  ;;  %v22210_v32 = vld [vmem:[%s27885_s22 + $0xdd8] sm:$0xff]  }
0x2295   :  { %20764 = vmatprep.subr.bf16.mxu0 %v22193_v1  ;;  %20786 = vmatprep.subr.bf16.mxu1 %v22194_v18 }
0x2298   :  { %20765 = vmatpush3.bf16.msra.mxu0 %v22195_v49  ;;  %20787 = vmatpush3.bf16.msra.mxu1 %v22196_v19 }
0x2299   :  { %20794 = vmatprep.subr.bf16.mxu0 %v22197_v20  ;;  %20816 = vmatprep.subr.bf16.mxu1 %v22198_v22 }
0x231e   :  { %v9635_v24 = vpop.f32.mrb[124].mxu0  ;;  %v9676_v27 = vpop.f32.mrb[128].mxu1 }
0x231f   :  { %v9636_v30 = vadd.f32 %v9635_v24, %v9201_v13  ;;  %v9677_v35 = vadd.f32 %v9676_v27, %v9209_v33  ;;  %v9637_v36 = vpop.f32.mrb[125].mxu0  ;;  %v9678_v11 = vpop.f32.mrb[129].mxu1  ;;  %v22211_v33 = vld [vmem:[%s27885_s22 + $0xd18] sm:$0xff]   ;;  %v22213_v27 = vld [vmem:[%s27885_s22 + $0xd60] sm:$0xff]  }
0x2320   :  { %v9638_v16 = vadd.f32 %v9637_v36, %v9205_v60  ;;  %v9679_v31 = vadd.f32 %v9678_v11, %v9213_v55  ;;  %v9639_v23 = vpop.f32.mrb[126].mxu0  ;;  %v9680_v41 = vpop.f32.mrb[130].mxu1  ;;  %v22212_v60 = vld [vmem:[%s27885_s22 + $0xd98] sm:$0xff]  }
0x2321   :  { %v9929_v43 = vmax.f32 %v9636_v30, 0.0  ;;  %v9931_v50 = vmax.f32 %v9677_v35, 0.0  ;;  %v9640_v52 = vpop.f32.mrb[127].mxu0  ;;  %v9681_v57 = vpop.f32.mrb[131].mxu1  ;;  %v22214_v30 = vld [vmem:[%s27885_s22 + $0xde0] sm:$0xff]   ;;  %v22217_v41 = vld [vmem:[%s27885_s22 + $0xd68] sm:$0xff]  }
0x2322   :  { %v9930_v15 = vmax.f32 %v9638_v16, 0.0  ;;  %v9932_v62 = vmax.f32 %v9679_v31, 0.0  ;;  %v22215_v31 = vld [vmem:[%s27885_s22 + $0xd20] sm:$0xff]   ;;  %v22220_v52 = vld [vmem:[%s27885_s22 + $0xda8] sm:$0xff]   ;;  %v9217_v57 = vrot.slane %v25862_v45, %v23573_v25 }
0x2323   :  { %v9945_v63 = vpack.c.bf16 %v9929_v43, %v9929_v43  ;;  %v9947_v40 = vpack.c.bf16 %v9931_v50, %v9931_v50  ;;  %v22216_v23 = vld [vmem:[%s27885_s22 + $0xda0] sm:$0xff]   ;;  %v22218_v43 = vld [vmem:[%s27885_s22 + $0xde8] sm:$0xff]  }
0x2324   :  { %v9946_v56 = vpack.c.bf16 %v9930_v15, %v9930_v15  ;;  %v9948_v21 = vpack.c.bf16 %v9932_v62, %v9932_v62  ;;  %v22219_v50 = vld [vmem:[%s27885_s22 + $0xd28] sm:$0xff]   ;;  %v9225_v15 = vrot.slane %v25862_v45, %v23576_v26  ;;  %v25949_v62 = vld [vmem:[%s27884_s21 + $0x38] sm:$0xff] }
0x2325   :  { %v9237_v45 = vrot.slane %v25949_v62, %v23139_v0 }
0x2326   :  { %11026 = vmatprep.mubr.bf16.mxu0 %v9946_v56  ;;  %11066 = vmatprep.mubr.bf16.mxu1 %v9948_v21  ;;  %v22221_v56 = vld [vmem:[%s27885_s22 + $0xd70] sm:$0xff]  }
0x2327   :  { %11027 = vmatmul.mubr.bf16.vlgmr.msra.gmra.mrb[140].mxu0 %v9945_v63  ;;  %11067 = vmatmul.mubr.bf16.vlgmr.msra.gmra.mrb[144].mxu1 %v9947_v40  ;;  %v22222_v21 = vld [vmem:[%s27885_s22 + $0xdf0] sm:$0xff]  }
0x2328   :  { %20795 = vmatpush3.bf16.msra.mxu0 %v22199_v5  ;;  %20817 = vmatpush3.bf16.msra.mxu1 %v22200_v53  ;;  %v9245_v5 = vrot.slane %v25949_v62, %v23498_v14  ;;  %v22223_v53 = vld [vmem:[%s27885_s22 + $0xd30] sm:$0xff]  }
0x2329   :  { %20796 = vmatprep.subr.bf16.mxu0 %v22201_v2  ;;  %20818 = vmatprep.subr.bf16.mxu1 %v22202_v4  ;;  %v22224_v63 = vld [vmem:[%s27885_s22 + $0xdb0] sm:$0xff]   ;;  %v22225_v4 = vld [vmem:[%s27885_s22 + $0xd78] sm:$0xff]  }
0x232c   :  { %20797 = vmatpush3.bf16.msra.mxu0 %v22203_v7  ;;  %20819 = vmatpush3.bf16.msra.mxu1 %v22204_v61  ;;  %v22226_v7 = vld [vmem:[%s27885_s22 + $0xdf8] sm:$0xff]  }
0x232d   :  { %20798 = vmatprep.subr.bf16.mxu0 %v22205_v10  ;;  %20820 = vmatprep.subr.bf16.mxu1 %v22206_v9 }
0x232e   :  { %v9717_v17 = vpop.f32.mrb[128].mxu0  ;;  %v9758_v1 = vpop.f32.mrb[132].mxu1 }
0x232f   :  { %v9719_v18 = vpop.f32.mrb[129].mxu0  ;;  %v9760_v49 = vpop.f32.mrb[133].mxu1  ;;  %v9718_v40 = vadd.f32 %v9717_v17, %v9217_v57  ;;  %v9759_v2 = vadd.f32 %v9758_v1, %v9225_v15  ;;  %v22228_v17 = vld [vmem:[%s27885_s22 + $0xdb8] sm:$0xff]  }
0x2330   :  { %v9720_v19 = vadd.f32 %v9719_v18, %v9221_v34  ;;  %v9761_v20 = vadd.f32 %v9760_v49, %v9229_v29  ;;  %v9721_v22 = vpop.f32.mrb[130].mxu0  ;;  %v9762_v13 = vpop.f32.mrb[134].mxu1  ;;  %20799 = vmatpush3.bf16.msra.mxu0 %v22207_v58  ;;  %20821 = vmatpush3.bf16.msra.mxu1 %v22208_v51  ;;  %v22241_v57 = vld [vmem:[%s27885_s22 + $0xe58] sm:$0xff]  }
0x2331   :  { %v9722_v55 = vpop.f32.mrb[131].mxu0  ;;  %v9763_v24 = vpop.f32.mrb[135].mxu1  ;;  %20800 = vmatprep.subr.bf16.mxu0 %v22209_v38  ;;  %20822 = vmatprep.subr.bf16.mxu1 %v22210_v32  ;;  %v22227_v32 = vld [vmem:[%s27885_s22 + $0xd38] sm:$0xff]   ;;  %v9933_v1 = vmax.f32 %v9718_v40, 0.0  ;;  %v9935_v18 = vmax.f32 %v9759_v2, 0.0  ;;  %v22230_v22 = vld [vmem:[%s27885_s22 + $0xec0] sm:$0xff]  }
0x2332   :  { %v9934_v35 = vmax.f32 %v9720_v19, 0.0  ;;  %v9936_v36 = vmax.f32 %v9761_v20, 0.0  ;;  %v22229_v20 = vld [vmem:[%s27885_s22 + $0xe40] sm:$0xff]   ;;  %v22243_v2 = vld [vmem:[%s27885_s22 + $0xe18] sm:$0xff]  }
0x2333   :  { %v9949_v55 = vpack.c.bf16 %v9933_v1, %v9933_v1  ;;  %v9951_v24 = vpack.c.bf16 %v9935_v18, %v9935_v18  ;;  %v9233_v1 = vrot.slane %v25949_v62, %v23082_v48  ;;  %v22252_v18 = vld [vmem:[%s27885_s22 + $0xea8] sm:$0xff]  }
0x2334   :  { %v9950_v11 = vpack.c.bf16 %v9934_v35, %v9934_v35  ;;  %v9952_v16 = vpack.c.bf16 %v9936_v36, %v9936_v36  ;;  %20801 = vmatpush3.bf16.msra.mxu0 %v22211_v33  ;;  %20823 = vmatpush3.bf16.msra.mxu1 %v22212_v60  ;;  %v22231_v60 = vld [vmem:[%s27885_s22 + $0xe00] sm:$0xff]   ;;  %v22233_v35 = vld [vmem:[%s27885_s22 + $0xe48] sm:$0xff]  }
0x2335   :  { %20802 = vmatprep.subr.bf16.mxu0 %v22213_v27  ;;  %20824 = vmatprep.subr.bf16.mxu1 %v22214_v30  ;;  %v22232_v27 = vld [vmem:[%s27885_s22 + $0xe80] sm:$0xff]   ;;  %v22234_v36 = vld [vmem:[%s27885_s22 + $0xec8] sm:$0xff]  }
0x2336   :  { %11106 = vmatprep.mubr.bf16.mxu0 %v9950_v11  ;;  %11146 = vmatprep.mubr.bf16.mxu1 %v9952_v16  ;;  %v22235_v16 = vld [vmem:[%s27885_s22 + $0xe08] sm:$0xff]  }
0x2338   :  { %20803 = vmatpush3.bf16.msra.mxu0 %v22215_v31  ;;  %20825 = vmatpush3.bf16.msra.mxu1 %v22216_v23  ;;  %v22236_v31 = vld [vmem:[%s27885_s22 + $0xe88] sm:$0xff]   ;;  %v22237_v23 = vld [vmem:[%s27885_s22 + $0xe50] sm:$0xff]  }
0x2339   :  { %20804 = vmatprep.subr.bf16.mxu0 %v22217_v41  ;;  %20826 = vmatprep.subr.bf16.mxu1 %v22218_v43  ;;  %v22238_v41 = vld [vmem:[%s27885_s22 + $0xed0] sm:$0xff]   ;;  %v9257_v43 = vrot.slane %v25949_v62, %v23576_v26 }
0x233c   :  { %20805 = vmatpush3.bf16.msra.mxu0 %v22219_v50  ;;  %20827 = vmatpush3.bf16.msra.mxu1 %v22220_v52  ;;  %v22239_v50 = vld [vmem:[%s27885_s22 + $0xe10] sm:$0xff]  }
0x233d   :  { %20806 = vmatprep.subr.bf16.mxu0 %v22221_v56  ;;  %20828 = vmatprep.subr.bf16.mxu1 %v22222_v21  ;;  %v22240_v52 = vld [vmem:[%s27885_s22 + $0xe90] sm:$0xff]   ;;  %v22242_v21 = vld [vmem:[%s27885_s22 + $0xed8] sm:$0xff]  }
0x233e   :  { %v25973_v61 = vpop.f32.mrb[132].mxu0  ;;  %v25975_v10 = vpop.f32.mrb[136].mxu1 }
0x233f   :  { %v9801_v9 = vpop.f32.mrb[133].mxu0  ;;  %v9842_v34 = vpop.f32.mrb[137].mxu1 }
0x2340   :  { %v9802_v29 = vadd.f32 %v9801_v9, %v9237_v45  ;;  %v9843_v58 = vadd.f32 %v9842_v34, %v9245_v5  ;;  %v9803_v51 = vpop.f32.mrb[134].mxu0  ;;  %v9844_v38 = vpop.f32.mrb[138].mxu1  ;;  %20807 = vmatpush3.bf16.msra.mxu0 %v22223_v53  ;;  %20829 = vmatpush3.bf16.msra.mxu1 %v22224_v63  ;;  %v22244_v9 = vld [vmem:[%s27885_s22 + $0xe98] sm:$0xff]   ;;  %v22245_v34 = vld [vmem:[%s27885_s22 + $0xe60] sm:$0xff]  }
0x2341   :  { %v9804_v49 = vpop.f32.mrb[135].mxu0  ;;  %v9845_v19 = vpop.f32.mrb[139].mxu1  ;;  %20808 = vmatprep.subr.bf16.mxu0 %v22225_v4  ;;  %20830 = vmatprep.subr.bf16.mxu1 %v22226_v7  ;;  %v22248_v51 = vld [vmem:[%s27885_s22 + $0xea0] sm:$0xff]   ;;  %v22249_v38 = vld [vmem:[%s27885_s22 + $0xe68] sm:$0xff]  }
0x2342   :  { %v9938_v13 = vmax.f32 %v9802_v29, 0.0  ;;  %v9940_v33 = vmax.f32 %v9843_v58, 0.0  ;;  %v22246_v29 = vld [vmem:[%s27885_s22 + $0xee0] sm:$0xff]   ;;  %v22253_v49 = vld [vmem:[%s27885_s22 + $0xe70] sm:$0xff]   ;;  %v9241_v19 = vrot.slane %v25949_v62, %v23490_v12 }
0x2343   :  { %v22247_v58 = vld [vmem:[%s27885_s22 + $0xe20] sm:$0xff]  }
0x2344   :  { %20809 = vmatpush3.bf16.msra.mxu0 %v22227_v32  ;;  %20831 = vmatpush3.bf16.msra.mxu1 %v22228_v17  ;;  %v9954_v30 = vpack.c.bf16 %v9938_v13, %v9938_v13  ;;  %v9956_v11 = vpack.c.bf16 %v9940_v33, %v9940_v33  ;;  %v22250_v32 = vld [vmem:[%s27885_s22 + $0xee8] sm:$0xff]   ;;  %v9261_v13 = vrot.slane %v25949_v62, %v23530_v54  ;;  %v22255_v33 = vld [vmem:[%s27885_s22 + $0xe30] sm:$0xff]  }
0x2345   :  { %20838 = vmatprep.subr.bf16.mxu0 %v22229_v20  ;;  %20860 = vmatprep.subr.bf16.mxu1 %v22230_v22  ;;  %v22251_v17 = vld [vmem:[%s27885_s22 + $0xe28] sm:$0xff]   ;;  %v22254_v20 = vld [vmem:[%s27885_s22 + $0xef0] sm:$0xff]   ;;  %v9253_v22 = vrot.slane %v25949_v62, %v23527_v46 }
0x2347   :  { %11107 = vmatmul.mubr.bf16.vlgmr.msra.gmra.mrb[144].mxu0 %v9949_v55  ;;  %11147 = vmatmul.mubr.bf16.vlgmr.msra.gmra.mrb[148].mxu1 %v9951_v24  ;;  %v22256_v55 = vld [vmem:[%s27885_s22 + $0xeb0] sm:$0xff]   ;;  %v22257_v24 = vld [vmem:[%s27885_s22 + $0xe78] sm:$0xff]  }
0x2348   :  { %20839 = vmatpush3.bf16.msra.mxu0 %v22231_v60  ;;  %11186 = vmatprep.mubr.bf16.mxu0 %v9954_v30  ;;  %v9800_v60 = vadd.f32 %v25973_v61, %v9233_v1  ;;  %v22258_v30 = vld [vmem:[%s27885_s22 + $0xef8] sm:$0xff]   ;;  %v22279_v1 = vld [vmem:[%s27885_s22 + $0xf20] sm:$0xff]  }
0x2349   :  { %20861 = vmatpush3.bf16.msra.mxu1 %v22232_v27  ;;  %11226 = vmatprep.mubr.bf16.mxu1 %v9956_v11  ;;  %v9841_v27 = vadd.f32 %v25975_v10, %v9241_v19  ;;  %v22259_v61 = vld [vmem:[%s27885_s22 + $0xe38] sm:$0xff]   ;;  %v22261_v10 = vld [vmem:[%s27885_s22 + $0xf40] sm:$0xff]   ;;  %v22282_v19 = vld [vmem:[%s27885_s22 + $0xfe8] sm:$0xff]  }
0x234a   :  { %20840 = vmatprep.subr.bf16.mxu0 %v22233_v35  ;;  %20862 = vmatprep.subr.bf16.mxu1 %v22234_v36  ;;  %v9937_v11 = vmax.f32 %v9800_v60, 0.0  ;;  %v22286_v60 = vld [vmem:[%s27885_s22 + $0xff0] sm:$0xff]  }
0x234c   :  { %20841 = vmatpush3.bf16.msra.mxu0 %v22235_v16  ;;  %v22260_v16 = vld [vmem:[%s27885_s22 + $0xeb8] sm:$0xff]  }
0x234d   :  { %20863 = vmatpush3.bf16.msra.mxu1 %v22236_v31  ;;  %20842 = vmatprep.subr.bf16.mxu0 %v22237_v23  ;;  %v9939_v31 = vmax.f32 %v9841_v27, 0.0  ;;  %v22262_v23 = vld [vmem:[%s27885_s22 + $0xfc0] sm:$0xff]   ;;  %v22289_v27 = vld [vmem:[%s27885_s22 + $0xf78] sm:$0xff]  }
0x234e   :  { %v26024_v15 = vpop.f32.mrb[136].mxu0  ;;  %v9922_v56 = vpop.f32.mrb[140].mxu1  ;;  %20864 = vmatprep.subr.bf16.mxu1 %v22238_v41 }
0x234f   :  { %v26029_v45 = vadd.f32 %v9922_v56, %v9257_v43  ;;  %v9883_v5 = vpop.f32.mrb[137].mxu0  ;;  %v9924_v53 = vpop.f32.mrb[141].mxu1  ;;  %v9955_v56 = vpack.c.bf16 %v9939_v31, %v9939_v31  ;;  %v18841_v31 = vld [vmem:[%s27886_s23 + $0x3] ss:$0 sm:$0xff] }
0x2350   :  { %v9885_v63 = vpop.f32.mrb[138].mxu0  ;;  %v9926_v40 = vpop.f32.mrb[142].mxu1  ;;  %20843 = vmatpush3.bf16.msra.mxu0 %v22239_v50  ;;  %v9884_v35 = vadd.f32 %v9883_v5, %v9253_v22  ;;  %v9925_v36 = vadd.f32 %v9924_v53, %v9261_v13  ;;  %v22263_v50 = vld [vmem:[%s27885_s22 + $0xf00] sm:$0xff]   ;;  %v22266_v53 = vld [vmem:[%s27885_s22 + $0xfc8] sm:$0xff]   ;;  %v9249_v22 = vrot.slane %v25949_v62, %v23573_v25  ;;  %v22287_v62 = vld [vmem:[%s27885_s22 + $0xf30] sm:$0xff]  }
0x2351   :  { %20865 = vmatpush3.bf16.msra.mxu1 %v22240_v52  ;;  %v9886_v4 = vpop.f32.mrb[139].mxu0  ;;  %v9927_v7 = vpop.f32.mrb[143].mxu1  ;;  %20844 = vmatprep.subr.bf16.mxu0 %v22241_v57  ;;  %v9953_v52 = vpack.c.bf16 %v9937_v11, %v9937_v11  ;;  %v22264_v57 = vld [vmem:[%s27885_s22 + $0xf80] sm:$0xff]   ;;  %v22267_v40 = vld [vmem:[%s27885_s22 + $0xf08] sm:$0xff]  }
0x2352   :  { %20866 = vmatprep.subr.bf16.mxu1 %v22242_v21  ;;  %v9942_v41 = vmax.f32 %v9884_v35, 0.0  ;;  %v9944_v43 = vmax.f32 %v9925_v36, 0.0  ;;  %v22265_v21 = vld [vmem:[%s27885_s22 + $0xf48] sm:$0xff]   ;;  %v22269_v4 = vld [vmem:[%s27885_s22 + $0xf50] sm:$0xff]   ;;  %v22292_v36 = vld [vmem:[%s27885_s22 + $0xfb8] sm:$0xff]  }
0x2353   :  { %v22270_v7 = vld [vmem:[%s27885_s22 + $0xfd0] sm:$0xff]   ;;  %v22284_v13 = vld [vmem:[%s27885_s22 + $0xfa8] sm:$0xff]  }
0x2354   :  { %20845 = vmatpush3.bf16.msra.mxu0 %v22243_v2  ;;  %v9958_v5 = vpack.c.bf16 %v9942_v41, %v9942_v41  ;;  %v9960_v63 = vpack.c.bf16 %v9944_v43, %v9944_v43  ;;  %v22268_v2 = vld [vmem:[%s27885_s22 + $0xf88] sm:$0xff]  }
0x2355   :  { %20867 = vmatpush3.bf16.msra.mxu1 %v22244_v9  ;;  %20846 = vmatprep.subr.bf16.mxu0 %v22245_v34  ;;  %v22271_v9 = vld [vmem:[%s27885_s22 + $0xf10] sm:$0xff]  }
0x2356   :  { %20868 = vmatprep.subr.bf16.mxu1 %v22246_v29  ;;  %v22272_v34 = vld [vmem:[%s27885_s22 + $0xf90] sm:$0xff]   ;;  %v22273_v29 = vld [vmem:[%s27885_s22 + $0xf58] sm:$0xff]  }
0x2358   :  { %20847 = vmatpush3.bf16.msra.mxu0 %v22247_v58  ;;  %v22274_v58 = vld [vmem:[%s27885_s22 + $0xfd8] sm:$0xff]  }
0x2359   :  { %20869 = vmatpush3.bf16.msra.mxu1 %v22248_v51  ;;  %20848 = vmatprep.subr.bf16.mxu0 %v22249_v38  ;;  %v22275_v51 = vld [vmem:[%s27885_s22 + $0xf18] sm:$0xff]  }
0x235a   :  { %20870 = vmatprep.subr.bf16.mxu1 %v22250_v32  ;;  %v22276_v38 = vld [vmem:[%s27885_s22 + $0xf98] sm:$0xff]   ;;  %v22277_v32 = vld [vmem:[%s27885_s22 + $0xf60] sm:$0xff]  }
0x235c   :  { %20849 = vmatpush3.bf16.msra.mxu0 %v22251_v17  ;;  %v22278_v17 = vld [vmem:[%s27885_s22 + $0xfe0] sm:$0xff]  }
0x235d   :  { %20871 = vmatpush3.bf16.msra.mxu1 %v22252_v18  ;;  %20850 = vmatprep.subr.bf16.mxu0 %v22253_v49  ;;  %v22280_v18 = vld [vmem:[%s27885_s22 + $0xfa0] sm:$0xff]   ;;  %v22281_v49 = vld [vmem:[%s27885_s22 + $0xf68] sm:$0xff]  }
0x235e   :  { %20872 = vmatprep.subr.bf16.mxu1 %v22254_v20  ;;  %v22283_v20 = vld [vmem:[%s27885_s22 + $0xf28] sm:$0xff]  }
0x2360   :  { %20851 = vmatpush3.bf16.msra.mxu0 %v22255_v33  ;;  %v22285_v33 = vld [vmem:[%s27885_s22 + $0xf70] sm:$0xff]  }
0x2361   :  { %20873 = vmatpush3.bf16.msra.mxu1 %v22256_v55  ;;  %20852 = vmatprep.subr.bf16.mxu0 %v22257_v24  ;;  %v9882_v55 = vadd.f32 %v26024_v15, %v9249_v22  ;;  %v22288_v24 = vld [vmem:[%s27885_s22 + $0xfb0] sm:$0xff]   ;;  %v22291_v15 = vld [vmem:[%s27885_s22 + $0xf38] sm:$0xff]  }
0x2362   :  { %20874 = vmatprep.subr.bf16.mxu1 %v22258_v30  ;;  %v22290_v30 = vld [vmem:[%s27885_s22 + $0xff8] sm:$0xff]  }
0x2363   :  { %v9941_v35 = vmax.f32 %v9882_v55, 0.0 }
0x2364   :  { %20853 = vmatpush3.bf16.msra.mxu0 %v22259_v61  ;;  %v9943_v61 = vmax.f32 %v26029_v45, 0.0 }
0x2365   :  { %20875 = vmatpush3.bf16.msra.mxu1 %v22260_v16  ;;  %20882 = vmatprep.subr.bf16.mxu0 %v22261_v10  ;;  %v9957_v11 = vpack.c.bf16 %v9941_v35, %v9941_v35 }
0x2366   :  { %20904 = vmatprep.subr.bf16.mxu1 %v22262_v23  ;;  %v9959_v16 = vpack.c.bf16 %v9943_v61, %v9943_v61 }
0x2367   :  { %11187 = vmatmul.mubr.bf16.vlgmr.msra.gmra.mrb[148].mxu0 %v9953_v52 }
0x2368   :  { %11227 = vmatmul.mubr.bf16.vlgmr.msra.gmra.mrb[152].mxu1 %v9955_v56  ;;  %20883 = vmatpush3.bf16.msra.mxu0 %v22263_v50 }
0x2369   :  { %11266 = vmatprep.mubr.bf16.mxu0 %v9958_v5  ;;  %20905 = vmatpush3.bf16.msra.mxu1 %v22264_v57 }
0x236a   :  { %11306 = vmatprep.mubr.bf16.mxu1 %v9960_v63  ;;  %20884 = vmatprep.subr.bf16.mxu0 %v22265_v21 }
0x236b   :  { %20906 = vmatprep.subr.bf16.mxu1 %v22266_v53 }
0x236c   :  { %20885 = vmatpush3.bf16.msra.mxu0 %v22267_v40 }
0x236d   :  { %20907 = vmatpush3.bf16.msra.mxu1 %v22268_v2  ;;  %20886 = vmatprep.subr.bf16.mxu0 %v22269_v4 }
0x236e   :  { %20908 = vmatprep.subr.bf16.mxu1 %v22270_v7 }
0x2370   :  { %20887 = vmatpush3.bf16.msra.mxu0 %v22271_v9 }
0x2371   :  { %20909 = vmatpush3.bf16.msra.mxu1 %v22272_v34  ;;  %20888 = vmatprep.subr.bf16.mxu0 %v22273_v29 }
0x2372   :  { %20910 = vmatprep.subr.bf16.mxu1 %v22274_v58 }
0x2374   :  { %20889 = vmatpush3.bf16.msra.mxu0 %v22275_v51 }
0x2375   :  { %20911 = vmatpush3.bf16.msra.mxu1 %v22276_v38  ;;  %20890 = vmatprep.subr.bf16.mxu0 %v22277_v32 }
0x2376   :  { %20912 = vmatprep.subr.bf16.mxu1 %v22278_v17 }
0x2378   :  { %20891 = vmatpush3.bf16.msra.mxu0 %v22279_v1 }
0x2379   :  { %20913 = vmatpush3.bf16.msra.mxu1 %v22280_v18  ;;  %20892 = vmatprep.subr.bf16.mxu0 %v22281_v49 }
0x237a   :  { %20914 = vmatprep.subr.bf16.mxu1 %v22282_v19 }
0x237c   :  { %20893 = vmatpush3.bf16.msra.mxu0 %v22283_v20 }
0x237d   :  { %20915 = vmatpush3.bf16.msra.mxu1 %v22284_v13  ;;  %20894 = vmatprep.subr.bf16.mxu0 %v22285_v33 }
0x237e   :  { %20916 = vmatprep.subr.bf16.mxu1 %v22286_v60 }
0x2380   :  { %20895 = vmatpush3.bf16.msra.mxu0 %v22287_v62 }
0x2381   :  { %20917 = vmatpush3.bf16.msra.mxu1 %v22288_v24  ;;  %20896 = vmatprep.subr.bf16.mxu0 %v22289_v27 }
0x2382   :  { %20918 = vmatprep.subr.bf16.mxu1 %v22290_v30 }
0x2384   :  { %20897 = vmatpush3.bf16.msra.mxu0 %v22291_v15 }
0x2385   :  { %20919 = vmatpush3.bf16.msra.mxu1 %v22292_v36 }
0x2386   :  { %21684 = vmatprep.subr.bf16.mxu1 %v22720_v3 }
0x2387   :  { %11267 = vmatmul.mubr.bf16.vlgmr.msra.gmra.mrb[152].mxu0 %v9957_v11 }
0x2388   :  { %11307 = vmatmul.mubr.bf16.vlgmr.msra.gmra.mrb[156].mxu1 %v9959_v16  ;;  %11444 = vmatprep.mubr.bf16.mxu0 %v22723_v28 }
0x2389   :  { %21686 = vmatpush3.bf16.msra.mxu1 %v23050_v37  ;;  %21538 = vmatprep.mubr.msk.f32.mxu1 %vm22721_vm0, %v22722_v6 }
0x238a   :  { %21687 = vmatprep.subr.bf16.mxu1 %v22720_v3 }
0x238d   :  { %21689 = vmatpush3.bf16.msra.mxu1 %v23056_v39 }
0x238e   :  { %21690 = vmatprep.subr.bf16.mxu1 %v22720_v3 }
0x2391   :  { %21692 = vmatpush3.bf16.msra.mxu1 %v23066_v42 }
0x2392   :  { %21693 = vmatprep.subr.bf16.mxu1 %v22720_v3 }
0x2395   :  { %21695 = vmatpush3.bf16.msra.mxu1 %v23079_v47 }
0x23fa   :  { %v20766_v45 = vpop.f32.mrb[140].mxu0  ;;  %v20788_v10 = vpop.f32.mrb[144].mxu1 }
0x23fb   :  { %v20767_v23 = vpop.f32.mrb[141].mxu0  ;;  %v20789_v41 = vpop.f32.mrb[145].mxu1 }
0x23fc   :  { %v20768_v43 = vadd.f32 %v20767_v23, %v20766_v45  ;;  %v20790_v50 = vadd.f32 %v20789_v41, %v20788_v10  ;;  %v20769_v52 = vpop.f32.mrb[142].mxu0  ;;  %v20791_v57 = vpop.f32.mrb[146].mxu1 }
0x23fd   :  { %v20770_v56 = vpop.f32.mrb[143].mxu0  ;;  %v20792_v21 = vpop.f32.mrb[147].mxu1 }
0x23fe   :  { %v11029_v5 = vadd.f32 %v20768_v43, %v18841_v31  ;;  %v22295_v21 = vld [vmem:[%s27919_s4 + $0x104] ss:$8 sps:$4 sm:$0xff]  }
0x23ff   :  { %11412 = vmatprep.subr.bf16.mxu0 %v22295_v21 }
0x2400   :  { %v11069_v53 = vadd.f32 %v20790_v50, %v11029_v5  ;;  %v22293_v5 = vld [vmem:[%s27919_s4 + $0x100] ss:$8 sps:$4 sm:$0xff]  }
0x2401   :  { %11413 = vmatpush1.bf16.msra.mxu0 %v22293_v5 }
0x241a   :  { %v20810_v63 = vpop.f32.mrb[144].mxu0  ;;  %v20832_v40 = vpop.f32.mrb[148].mxu1 }
0x241b   :  { %v20811_v2 = vpop.f32.mrb[145].mxu0  ;;  %v20833_v4 = vpop.f32.mrb[149].mxu1 }
0x241c   :  { %v20812_v7 = vadd.f32 %v20811_v2, %v20810_v63  ;;  %v20834_v9 = vadd.f32 %v20833_v4, %v20832_v40  ;;  %v20813_v34 = vpop.f32.mrb[146].mxu0  ;;  %v20835_v29 = vpop.f32.mrb[150].mxu1  ;;  %v22301_v63 = vld [vmem:[%s27919_s4 + $0x124] ss:$8 sps:$4 sm:$0xff]   ;;  %v22299_v40 = vld [vmem:[%s27919_s4 + $0x120] ss:$8 sps:$4 sm:$0xff]  }
0x241d   :  { %v20814_v58 = vpop.f32.mrb[147].mxu0  ;;  %v20836_v51 = vpop.f32.mrb[151].mxu1  ;;  %v22304_v2 = vld [vmem:[%s27919_s4 + $0x134] ss:$8 sps:$4 sm:$0xff]   ;;  %v22302_v4 = vld [vmem:[%s27919_s4 + $0x130] ss:$8 sps:$4 sm:$0xff]  }
0x241e   :  { %v11109_v38 = vadd.f32 %v20812_v7, %v11069_v53  ;;  %v22296_v53 = vld [vmem:[%s27919_s4 + $0x110] ss:$8 sps:$4 sm:$0xff]   ;;  %v18972_v58 = vld [vmem:[%s27881_s18 + $0x3] ss:$0 sm:$0xff] }
0x2420   :  { %v11149_v32 = vadd.f32 %v20834_v9, %v11109_v38  ;;  %v18973_v38 = vld [vmem:[%s27882_s19 + $0x3] ss:$0 sm:$0xff] }
0x243a   :  { %v20854_v17 = vpop.f32.mrb[148].mxu0 }
0x243b   :  { %v20876_v1 = vpop.f32.mrb[152].mxu1  ;;  %v20855_v18 = vpop.f32.mrb[149].mxu0 }
0x243c   :  { %v20856_v49 = vadd.f32 %v20855_v18, %v20854_v17  ;;  %v20877_v19 = vpop.f32.mrb[153].mxu1  ;;  %v20857_v20 = vpop.f32.mrb[150].mxu0  ;;  %v22670_v18 = vld [vmem:[%s27925_s6] sm:$0xff] }
0x243d   :  { %v20878_v22 = vadd.f32 %v20877_v19, %v20876_v1  ;;  %v20879_v13 = vpop.f32.mrb[154].mxu1  ;;  %v20858_v33 = vpop.f32.mrb[151].mxu0 }
0x243e   :  { %v11189_v60 = vadd.f32 %v20856_v49, %v11149_v32  ;;  %v20880_v62 = vpop.f32.mrb[155].mxu1  ;;  %v26257_v49 = vld [vmem:[%s27876_s13 + $0x8] sm:$0x3] }
0x243f   :  { %v11362_v19 = vrot.slane %v26257_v49, %v23082_v48 }
0x2440   :  { %v11229_v55 = vadd.f32 %v20878_v22, %v11189_v60 }
0x245a   :  { %v20898_v24 = vpop.f32.mrb[152].mxu0 }
0x245b   :  { %v20920_v27 = vpop.f32.mrb[156].mxu1  ;;  %v20899_v30 = vpop.f32.mrb[153].mxu0 }
0x245c   :  { %v20900_v15 = vadd.f32 %v20899_v30, %v20898_v24  ;;  %v20921_v35 = vpop.f32.mrb[157].mxu1  ;;  %v20901_v36 = vpop.f32.mrb[154].mxu0 }
0x245d   :  { %v20922_v61 = vadd.f32 %v20921_v35, %v20920_v27  ;;  %v20923_v11 = vpop.f32.mrb[158].mxu1  ;;  %v20902_v16 = vpop.f32.mrb[155].mxu0 }
0x245e   :  { %v11269_v45 = vadd.f32 %v20900_v15, %v11229_v55  ;;  %v20924_v10 = vpop.f32.mrb[159].mxu1 }
0x2460   :  { %v11309_v31 = vadd.f32 %v20922_v61, %v11269_v45 }
0x2462   :  { %v11314_v23 = vadd.f32 %v11309_v31, %v25609_v44  ;;  %v22298_v44 = vld [vmem:[%s27919_s4 + $0x114] ss:$8 sps:$4 sm:$0xff]  }
0x2463   :  { %11414 = vmatprep.subr.bf16.mxu0 %v22298_v44 }
0x2464   :  { %v11319_v41 = vsel %vm840_vm8, %v11314_v23, 0.0  ;;  %11415 = vmatpush1.bf16.msra.mxu0 %v22296_v53 }
0x2465   :  { %11320 = vadd.xlane.f32.xlu0 %v11319_v41  ;;  %11416 = vmatprep.subr.bf16.mxu0 %v22301_v63 }
0x2468   :  { %11417 = vmatpush1.bf16.msra.mxu0 %v22299_v40 }
0x2469   :  { %11418 = vmatprep.subr.bf16.mxu0 %v22304_v2 }
0x246c   :  { %11419 = vmatpush1.bf16.msra.mxu0 %v22302_v4 }
0x246d   :  { %21541 = vmatprep.subr.mxu0 %v22722_v6 }
0x24f2   :  { %v11321_v43 = vpop.xlane.xlu0 %11320 }
0x24f3   :  { %v11322_v50 = vmul.f32 0.015625, %v11321_v43 }
0x24f5   :  { %v11323_v52 = vsub.f32 %v11314_v23, %v11322_v50 }
0x24f7   :  { %v11324_v57 = vmul.f32 %v11323_v52, %v11323_v52 }
0x24f9   :  { %v11325_v56 = vsel %vm840_vm8, %v11324_v57, 0.0 }
0x24fa   :  { %11326 = vadd.xlane.f32.xlu0 %v11325_v56 }
0x2587   :  { %v11327_v7 = vpop.xlane.xlu0 %11326 }
0x2588   :  { %v11328_v9 = vmul.f32 0.015625, %v11327_v7 }
0x258a   :  { %v11329_v34 = vadd.f32 1e-05, %v11328_v9 }
0x258c   :  { %22645 = vrsqrt.f32 %v11329_v34 }
0x2596   :  { %v22646_v29 = vpop.eup %22645 }
0x2597   :  { %v11331_v51 = vmul.f32 %v22646_v29, %v11323_v52 }
0x2599   :  { %v11338_v32 = vmul.f32 %v18972_v58, %v11331_v51 }
0x259b   :  { %v26243_v17 = vadd.f32 %v18973_v38, %v11338_v32 }
0x259d   :  { %v11346_v1 = vpack.c.bf16 %v26243_v17, %v26243_v17 }
0x259f   :  { %18991 = vmatmul.mubr.msk.bf16.vlgmr.msra.gmra.mrb[156].mxu0 %vm91_vm1, %v11346_v1 }
0x25a0   :  { %21542 = vmatpush3.msra.mxu0 %v22670_v18  ;;  %21543 = vmatprep.mubr.msk.f32.mxu0 %vm22721_vm0, %v22722_v6 }
0x25a1   :  { %21546 = vmatprep.subr.bf16.mxu0 %v22722_v6 }
0x2672   :  { %v11446_v20 = vpop.f32.mrb[156].mxu0 }
0x2673   :  { %v11447_v22 = vadd.f32 %v11446_v20, %v11362_v19  ;;  %v26261_v13 = vpop.f32.mrb[157].mxu0 }
0x2674   :  { %v11450_v33 = vpop.f32.mrb[158].mxu0 }
0x2675   :  { %v11451_v60 = vpop.f32.mrb[159].mxu0  ;;  %11486 = vrot.lane.b32.xlu0 %v11447_v22, %s22724_s8  ;;  %v11460_v62 = vrot.slane %v11447_v22, %v23097_v59 }
0x2677   :  { %v11461_v55 = vcombine.high %v11460_v62, %v11460_v62  ;;  %v11468_v24 = vrot.slane %v11460_v62, %v23097_v59 }
0x2679   :  { %v11475_v27 = vrot.slane %v11461_v55, %v23097_v59  ;;  %v11479_v30 = vrot.slane %v11468_v24, %v23082_v48  ;;  %v22305_v24 = vld [vmem:[%s27877_s14 + $0x80] sm:$0xff]  }
0x267b   :  { %v11483_v15 = vrot.slane %v11475_v27, %v23082_v48  ;;  %v22306_v27 = vld [vmem:[%s27877_s14 + $0x88] sm:$0xff]  }
0x26e7   :  { %v11487_v35 = vpop.permute.xlu0 %11486 }
0x26e8   :  { %v11489_v36 = vmul.f32 %v11487_v35, %v11479_v30  ;;  %v11490_v61 = vmul.f32 %v11487_v35, %v11483_v15  ;;  %v22307_v30 = vld [vmem:[%s27877_s14 + $0x90] sm:$0xff]   ;;  %v22308_v15 = vld [vmem:[%s27877_s14 + $0x98] sm:$0xff]   ;;  %v11366_v35 = vrot.slane %v26257_v49, %v23139_v0 }
0x26ea   :  { %v11493_v11 = vcombine.low %v11489_v36, %v11490_v61  ;;  %v11449_v61 = vadd.f32 %v26261_v13, %v11366_v35 }
0x26ec   :  { %v11500_v16 = vrot.slane %v11493_v11, %v23105_v8 }
0x26ee   :  { %21539 = vmatmul.mubr.msk.f32.vlgmr.msra.gmra.mrb[122].mxu1 %vm91_vm1, %v11500_v16 }
0x26ef   :  { %12352 = vmatprep.mubr.bf16.mxu1 %v22723_v28 }
0x27c1   :  { %v11569_v45 = vpop.f32.mrb[122].mxu1 }
0x27c2   :  { %v11573_v10 = vmul.f32 0.35355338, %v11569_v45  ;;  %v21540_v31 = vpop.f32.mrb[123].mxu1 }
0x27c4   :  { %v11574_v23 = vsel %vm703_vm5, %v11573_v10, -inf }
0x27c5   :  { %v11575_v41 = vrot.slane %v11574_v23, 4 }
0x27c7   :  { %v11576_v43 = vmax.f32 %v11574_v23, %v11575_v41 }
0x27c9   :  { %v11577_v50 = vrot.slane %v11576_v43, 2 }
0x27cb   :  { %v11578_v52 = vmax.f32 %v11576_v43, %v11577_v50 }
0x27cd   :  { %v11579_v57 = vrot.slane %v11578_v52, 1 }
0x27cf   :  { %v11580_v56 = vmax.f32 %v11578_v52, %v11579_v57 }
0x27d1   :  { %v11581_v21 = vsub.f32 %v11573_v10, %v11580_v56 }
0x27d3   :  { %v11582_v5 = vmul.f32 1.442695, %v11581_v21 }
0x27d5   :  { %22647 = vpow2.f32 %v11582_v5 }
0x27df   :  { %v22648_v44 = vpop.eup %22647 }
0x27e0   :  { %v11591_v53 = vrot.slane %v22648_v44, %v23105_v8 }
0x27e2   :  { %v11595_v63 = vsel %vm725_vm6, %v11591_v53, 0.0  ;;  %v11592_v40 = vcombine.high %v11591_v53, %v11591_v53 }
0x27e3   :  { %v11596_v2 = vrot.slane %v11595_v63, 4 }
0x27e4   :  { %v11602_v4 = vsel %vm725_vm6, %v11592_v40, 0.0 }
0x27e5   :  { %v11597_v7 = vadd.f32 %v11596_v2, %v11595_v63  ;;  %v11603_v9 = vrot.slane %v11602_v4, 4 }
0x27e7   :  { %v11598_v34 = vrot.slane %v11597_v7, 2  ;;  %v11604_v29 = vadd.f32 %v11603_v9, %v11602_v4 }
0x27e9   :  { %v11599_v58 = vadd.f32 %v11598_v34, %v11597_v7  ;;  %v11605_v51 = vrot.slane %v11604_v29, 2 }
0x27eb   :  { %v11600_v38 = vrot.slane %v11599_v58, 1  ;;  %v11606_v32 = vadd.f32 %v11605_v51, %v11604_v29  ;;  %v19003_v29 = vld [vmem:[%s27878_s15 + $0x4] ss:$0 sm:$0xff] }
0x27ed   :  { %v11601_v1 = vadd.f32 %v11600_v38, %v11599_v58  ;;  %v11607_v18 = vrot.slane %v11606_v32, 1 }
0x27ef   :  { %22649 = vrcp.f32 %v11601_v1  ;;  %v11608_v19 = vadd.f32 %v11607_v18, %v11606_v32 }
0x27f1   :  { %22651 = vrcp.f32 %v11608_v19 }
0x27f9   :  { %v22650_v20 = vpop.eup %22649 }
0x27fa   :  { %v11610_v33 = vmul.f32 %v22650_v20, %v11591_v53 }
0x27fb   :  { %v22652_v22 = vpop.eup %22651 }
0x27fc   :  { %v11612_v60 = vmul.f32 %v22652_v22, %v11592_v40 }
0x27fe   :  { %v11615_v62 = vcombine.low %v11610_v33, %v11612_v60 }
0x2800   :  { %v11622_v55 = vrot.slane %v11615_v62, %v23105_v8 }
0x2802   :  { %21544 = vmatmul.mubr.msk.f32.vlgmr.msra.gmra.mrb[122].mxu0 %vm754_vm7, %v11622_v55  ;;  %v19013_v55 = vld [vmem:[%s27883_s20 + $0x800] sm:$0xff] }
0x2803   :  { %21554 = vmatprep.mubr.msk.bf16.mxu0 %vm22721_vm0, %v22722_v6  ;;  %21547 = vmatpush3.bf16.msra.mxu0 %v22305_v24  ;;  %v19014_v24 = vld [vmem:[%s27883_s20 + $0x808] sm:$0xff] }
0x2804   :  { %21548 = vmatprep.subr.bf16.mxu0 %v22722_v6 }
0x2807   :  { %21549 = vmatpush3.bf16.msra.mxu0 %v22306_v27 }
0x2808   :  { %21550 = vmatprep.subr.bf16.mxu0 %v22722_v6 }
0x280b   :  { %21551 = vmatpush3.bf16.msra.mxu0 %v22307_v30  ;;  %v19022_v30 = vld [vmem:[%s27883_s20 + $0x848] sm:$0xff] }
0x280c   :  { %21552 = vmatprep.subr.bf16.mxu0 %v22722_v6  ;;  %v19081_v35 = vcombine.low %v19014_v24, %v19022_v30 }
0x280f   :  { %21553 = vmatpush3.bf16.msra.mxu0 %v22308_v15 }
0x28d5   :  { %v11691_v36 = vpop.f32.mrb[122].mxu0 }
0x28d6   :  { %v11702_v11 = vrot.slane %v11691_v36, %v23105_v8  ;;  %v21545_v16 = vpop.f32.mrb[123].mxu0  ;;  %v19082_v36 = vcombine.high %v19014_v24, %v19022_v30  ;;  %v19031_v24 = vld [vmem:[%s27883_s20 + $0x890] sm:$0xff]  ;;  %v19032_v30 = vld [vmem:[%s27883_s20 + $0x898] sm:$0xff] }
0x28d7   :  { %v19030_v16 = vld [vmem:[%s27883_s20 + $0x888] sm:$0xff] }
0x28d8   :  { %v11703_v45 = vcombine.high %v11702_v11, %v11702_v11  ;;  %v11706_v10 = vmul.f32 %v11702_v11, %v11449_v61  ;;  %12361 = vmatprep.subr.bf16.mxu0 %v19082_v36  ;;  %v19037_v11 = vld [vmem:[%s27883_s20 + $0x8c0] sm:$0xff] }
0x28da   :  { %v11707_v31 = vmul.f32 %v11703_v45, %v11449_v61  ;;  %v11708_v23 = vsel %vm840_vm8, %v11706_v10, 0.0  ;;  %v19029_v61 = vld [vmem:[%s27883_s20 + $0x880] sm:$0xff]  ;;  %v19038_v10 = vld [vmem:[%s27883_s20 + $0x8c8] sm:$0xff] }
0x28db   :  { %v11709_v41 = vrot.slane %v11708_v23, 4  ;;  %v19096_v45 = vcombine.high %v19029_v61, %v19037_v11 }
0x28dc   :  { %v11715_v43 = vsel %vm840_vm8, %v11707_v31, 0.0  ;;  %v19095_v31 = vcombine.low %v19029_v61, %v19037_v11  ;;  %v19047_v11 = vld [vmem:[%s27883_s20 + $0x910] sm:$0xff] }
0x28dd   :  { %v11710_v50 = vadd.f32 %v11709_v41, %v11708_v23  ;;  %v11716_v52 = vrot.slane %v11715_v43, 4  ;;  %v19097_v23 = vcombine.low %v19030_v16, %v19038_v10  ;;  %v19098_v41 = vcombine.high %v19030_v16, %v19038_v10  ;;  %v19055_v16 = vld [vmem:[%s27883_s20 + $0x950] sm:$0xff]  ;;  %v19056_v10 = vld [vmem:[%s27883_s20 + $0x958] sm:$0xff] }
0x28df   :  { %v11711_v57 = vrot.slane %v11710_v50, 2  ;;  %v11717_v56 = vadd.f32 %v11716_v52, %v11715_v43  ;;  %v19045_v43 = vld [vmem:[%s27883_s20 + $0x900] sm:$0xff]  ;;  %v19046_v52 = vld [vmem:[%s27883_s20 + $0x908] sm:$0xff] }
0x28e1   :  { %v11712_v21 = vadd.f32 %v11711_v57, %v11710_v50  ;;  %v11718_v49 = vrot.slane %v11717_v56, 2  ;;  %v19053_v50 = vld [vmem:[%s27883_s20 + $0x940] sm:$0xff] }
0x28e2   :  { %v19112_v57 = vcombine.high %v19045_v43, %v19053_v50 }
0x28e3   :  { %v11713_v5 = vrot.slane %v11712_v21, 1  ;;  %v11719_v44 = vadd.f32 %v11718_v49, %v11717_v56  ;;  %v19054_v56 = vld [vmem:[%s27883_s20 + $0x948] sm:$0xff] }
0x28e4   :  { %v19113_v49 = vcombine.low %v19046_v52, %v19054_v56 }
0x28e5   :  { %v11714_v13 = vadd.f32 %v11713_v5, %v11712_v21  ;;  %v11720_v53 = vrot.slane %v11719_v44, 1  ;;  %v19111_v21 = vcombine.low %v19045_v43, %v19053_v50  ;;  %v19114_v5 = vcombine.high %v19046_v52, %v19054_v56  ;;  %v19063_v50 = vld [vmem:[%s27883_s20 + $0x990] sm:$0xff]  ;;  %v19072_v56 = vld [vmem:[%s27883_s20 + $0x9d8] sm:$0xff] }
0x28e6   :  { %v19071_v52 = vld [vmem:[%s27883_s20 + $0x9d0] sm:$0xff] }
0x28e7   :  { %v11721_v63 = vadd.f32 %v11720_v53, %v11719_v44  ;;  %v11722_v40 = vpack.c.bf16 %v11714_v13, %v11714_v13  ;;  %v19061_v44 = vld [vmem:[%s27883_s20 + $0x980] sm:$0xff]  ;;  %v19062_v53 = vld [vmem:[%s27883_s20 + $0x988] sm:$0xff] }
0x28e8   :  { %v19069_v13 = vld [vmem:[%s27883_s20 + $0x9c0] sm:$0xff] }
0x28e9   :  { %v11723_v2 = vpack.c.bf16 %v11721_v63, %v11721_v63  ;;  %v11743_v4 = vunpack.c.l.b16 %v11722_v40  ;;  %v19128_v63 = vcombine.high %v19061_v44, %v19069_v13  ;;  %v19070_v40 = vld [vmem:[%s27883_s20 + $0x9c8] sm:$0xff] }
0x28eb   :  { %v11744_v7 = vunpack.c.l.b16 %v11723_v2  ;;  %v19127_v2 = vcombine.low %v19061_v44, %v19069_v13  ;;  %v19017_v13 = vld [vmem:[%s27883_s20 + $0x820] sm:$0xff] }
0x28ed   :  { %v11745_v9 = vsel %vm126_vm2, %v11744_v7, %v11743_v4  ;;  %v19129_v4 = vcombine.low %v19062_v53, %v19070_v40  ;;  %v19130_v7 = vcombine.high %v19062_v53, %v19070_v40  ;;  %v19025_v53 = vld [vmem:[%s27883_s20 + $0x860] sm:$0xff]  ;;  %v19026_v40 = vld [vmem:[%s27883_s20 + $0x868] sm:$0xff] }
0x28ee   :  { %v11746_v34 = vpack.c.b16 %v11745_v9, %v11745_v9  ;;  %v19015_v9 = vld [vmem:[%s27883_s20 + $0x810] sm:$0xff] }
0x28f0   :  { %21555 = vmatmul.mubr.msk.bf16.vlgmr.msra.gmra.mrb[160].mxu0 %vm91_vm1, %v11746_v34  ;;  %v19023_v34 = vld [vmem:[%s27883_s20 + $0x850] sm:$0xff] }
0x28f1   :  { %12393 = vmatprep.mubr.bf16.mxu0 %v22723_v28  ;;  %12362 = vmatpush1.bf16.msra.mxu0 %v19081_v35 }
0x28f2   :  { %12363 = vmatprep.subr.bf16.mxu0 %v19098_v41  ;;  %v19116_v41 = vcombine.high %v19047_v11, %v19055_v16 }
0x28f5   :  { %12364 = vmatpush1.bf16.msra.mxu0 %v19097_v23 }
0x28f6   :  { %12365 = vmatprep.subr.bf16.mxu0 %v19114_v5  ;;  %v19132_v5 = vcombine.high %v19063_v50, %v19071_v52 }
0x28f9   :  { %12366 = vmatpush1.bf16.msra.mxu0 %v19113_v49 }
0x28fa   :  { %12367 = vmatprep.subr.bf16.mxu0 %v19130_v7  ;;  %v19088_v7 = vcombine.high %v19017_v13, %v19025_v53 }
0x28fd   :  { %12368 = vmatpush1.bf16.msra.mxu0 %v19129_v4 }
0x29c3   :  { %v11808_v58 = vpop.f32.mrb[160].mxu0 }
0x29c4   :  { %v11809_v51 = vadd.f32 %v19003_v29, %v11808_v58  ;;  %v21556_v38 = vpop.f32.mrb[161].mxu0  ;;  %v19016_v29 = vld [vmem:[%s27883_s20 + $0x818] sm:$0xff]  ;;  %v19083_v58 = vcombine.low %v19015_v9, %v19023_v34 }
0x29c5   :  { %v11811_v32 = vpop.f32.mrb[162].mxu0  ;;  %v19024_v38 = vld [vmem:[%s27883_s20 + $0x858] sm:$0xff] }
0x29c6   :  { %v21557_v1 = vpop.f32.mrb[163].mxu0  ;;  %v11814_v18 = vadd.f32 %v11809_v51, %v26243_v17  ;;  %v19021_v17 = vld [vmem:[%s27883_s20 + $0x840] sm:$0xff]  ;;  %v19084_v51 = vcombine.high %v19015_v9, %v19023_v34  ;;  %v19085_v32 = vcombine.low %v19016_v29, %v19024_v38 }
0x29c7   :  { %v19080_v27 = vcombine.high %v19013_v55, %v19021_v17  ;;  %v19079_v15 = vcombine.low %v19013_v55, %v19021_v17  ;;  %v19086_v1 = vcombine.high %v19016_v29, %v19024_v38  ;;  %v19012_v55 = vld [vmem:[%s27880_s17 + $0x4] ss:$0 sm:$0xff]  ;;  %v19087_v38 = vcombine.low %v19017_v13, %v19025_v53 }
0x29c8   :  { %v11819_v19 = vsel %vm840_vm8, %v11814_v18, 0.0  ;;  %v19033_v34 = vld [vmem:[%s27883_s20 + $0x8a0] sm:$0xff] }
0x29c9   :  { %11820 = vadd.xlane.f32.xlu1 %v11819_v19  ;;  %12320 = vmatprep.subr.bf16.mxu1 %v19080_v27  ;;  %v19039_v27 = vld [vmem:[%s27883_s20 + $0x8d0] sm:$0xff]  ;;  %v19041_v29 = vld [vmem:[%s27883_s20 + $0x8e0] sm:$0xff] }
0x29ca   :  { %12321 = vmatpush1.bf16.msra.mxu1 %v19079_v15  ;;  %12443 = vmatprep.subr.bf16.mxu0 %v19086_v1  ;;  %v19100_v36 = vcombine.high %v19031_v24, %v19039_v27  ;;  %v19104_v1 = vcombine.high %v19033_v34, %v19041_v29 }
0x29cb   :  { %12322 = vmatprep.subr.bf16.mxu1 %v19096_v45  ;;  %v19048_v45 = vld [vmem:[%s27883_s20 + $0x918] sm:$0xff] }
0x29cc   :  { %v19118_v43 = vcombine.high %v19048_v45, %v19056_v10  ;;  %v19117_v49 = vcombine.low %v19048_v45, %v19056_v10  ;;  %v19019_v10 = vld [vmem:[%s27883_s20 + $0x830] sm:$0xff] }
0x29ce   :  { %12323 = vmatpush1.bf16.msra.mxu1 %v19095_v31  ;;  %v19099_v31 = vcombine.low %v19031_v24, %v19039_v27  ;;  %v19065_v27 = vld [vmem:[%s27883_s20 + $0x9a0] sm:$0xff] }
0x29cf   :  { %12324 = vmatprep.subr.bf16.mxu1 %v19112_v57  ;;  %v19064_v57 = vld [vmem:[%s27883_s20 + $0x998] sm:$0xff] }
0x29d0   :  { %v19134_v44 = vcombine.high %v19064_v57, %v19072_v56  ;;  %v19133_v4 = vcombine.low %v19064_v57, %v19072_v56  ;;  %v19035_v56 = vld [vmem:[%s27883_s20 + $0x8b0] sm:$0xff] }
0x29d2   :  { %12325 = vmatpush1.bf16.msra.mxu1 %v19111_v21  ;;  %v19115_v21 = vcombine.low %v19047_v11, %v19055_v16 }
0x29d3   :  { %12326 = vmatprep.subr.bf16.mxu1 %v19128_v63  ;;  %v19018_v63 = vld [vmem:[%s27883_s20 + $0x828] sm:$0xff] }
0x29d4   :  { %v19090_v9 = vcombine.high %v19018_v63, %v19026_v40 }
0x29d6   :  { %12327 = vmatpush1.bf16.msra.mxu1 %v19127_v2  ;;  %v19131_v2 = vcombine.low %v19063_v50, %v19071_v52 }
0x29d7   :  { %12402 = vmatprep.subr.bf16.mxu1 %v19084_v51  ;;  %v19042_v51 = vld [vmem:[%s27883_s20 + $0x8e8] sm:$0xff] }
0x2a56   :  { %v11821_v20 = vpop.xlane.xlu1 %11820 }
0x2a57   :  { %v11822_v22 = vmul.f32 0.015625, %v11821_v20 }
0x2a59   :  { %v26309_v33 = vsub.f32 %v11814_v18, %v11822_v22 }
0x2a5b   :  { %v11824_v60 = vmul.f32 %v26309_v33, %v26309_v33 }
0x2a5d   :  { %v11825_v62 = vsel %vm840_vm8, %v11824_v60, 0.0  ;;  %v19011_v60 = vld [vmem:[%s27879_s16 + $0x4] ss:$0 sm:$0xff] }
0x2a5e   :  { %11826 = vadd.xlane.f32.xlu0 %v11825_v62 }
0x2aeb   :  { %v11827_v18 = vpop.xlane.xlu0 %11826 }
0x2aec   :  { %v11828_v19 = vmul.f32 0.015625, %v11827_v18 }
0x2aee   :  { %v11829_v20 = vadd.f32 1e-05, %v11828_v19  ;;  %v19049_v19 = vld [vmem:[%s27883_s20 + $0x920] sm:$0xff] }
0x2af0   :  { %22653 = vrsqrt.f32 %v11829_v20  ;;  %v19057_v20 = vld [vmem:[%s27883_s20 + $0x960] sm:$0xff] }
0x2afa   :  { %v22654_v22 = vpop.eup %22653 }
0x2afb   :  { %v11831_v62 = vmul.f32 %v22654_v22, %v26309_v33  ;;  %v19040_v33 = vld [vmem:[%s27883_s20 + $0x8d8] sm:$0xff]  ;;  %v19050_v22 = vld [vmem:[%s27883_s20 + $0x928] sm:$0xff] }
0x2afc   :  { %v19102_v61 = vcombine.high %v19032_v30, %v19040_v33  ;;  %v19101_v23 = vcombine.low %v19032_v30, %v19040_v33  ;;  %v19073_v30 = vld [vmem:[%s27883_s20 + $0x9e0] sm:$0xff]  ;;  %v19066_v33 = vld [vmem:[%s27883_s20 + $0x9a8] sm:$0xff] }
0x2afd   :  { %v11838_v17 = vmul.f32 %v19011_v60, %v11831_v62  ;;  %v19058_v60 = vld [vmem:[%s27883_s20 + $0x968] sm:$0xff]  ;;  %v19103_v62 = vcombine.low %v19033_v34, %v19041_v29  ;;  %v19136_v16 = vcombine.high %v19065_v27, %v19073_v30 }
0x2afe   :  { %v19122_v24 = vcombine.high %v19050_v22, %v19058_v60  ;;  %v19121_v11 = vcombine.low %v19050_v22, %v19058_v60 }
0x2aff   :  { %v26393_v15 = vadd.f32 %v19012_v55, %v11838_v17  ;;  %v19120_v17 = vcombine.high %v19049_v19, %v19057_v20 }
0x2b01   :  { %v26397_v35 = vpack.c.bf16 %v26393_v15, %v26393_v15 }
0x2b03   :  { %19143 = vmatmul.mubr.msk.bf16.vlgmr.msra.gmra.mrb[160].mxu1 %vm91_vm1, %v26397_v35  ;;  %19144 = vmatmul.mubr.msk.bf16.vlgmr.msra.gmra.mrb[164].mxu0 %vm91_vm1, %v26397_v35 }
0x2b04   :  { %12403 = vmatpush1.bf16.msra.mxu1 %v19083_v58  ;;  %12444 = vmatpush1.bf16.msra.mxu0 %v19085_v32  ;;  %v19034_v58 = vld [vmem:[%s27883_s20 + $0x8a8] sm:$0xff]  ;;  %v19089_v32 = vcombine.low %v19018_v63, %v19026_v40  ;;  %v19051_v40 = vld [vmem:[%s27883_s20 + $0x930] sm:$0xff] }
0x2b05   :  { %12404 = vmatprep.subr.bf16.mxu1 %v19100_v36  ;;  %12445 = vmatprep.subr.bf16.mxu0 %v19102_v61  ;;  %v19106_v18 = vcombine.high %v19034_v58, %v19042_v51  ;;  %v19105_v55 = vcombine.low %v19034_v58, %v19042_v51  ;;  %v19074_v36 = vld [vmem:[%s27883_s20 + $0x9e8] sm:$0xff]  ;;  %v19119_v61 = vcombine.low %v19049_v19, %v19057_v20  ;;  %v19067_v51 = vld [vmem:[%s27883_s20 + $0x9b0] sm:$0xff] }
0x2b06   :  { %12434 = vmatprep.mubr.bf16.mxu1 %v22723_v28  ;;  %12475 = vmatprep.mubr.bf16.mxu0 %v22723_v28  ;;  %v19138_v45 = vcombine.high %v19066_v33, %v19074_v36  ;;  %v19137_v50 = vcombine.low %v19066_v33, %v19074_v36  ;;  %v22314_v33 = vld [vmem:[%s27885_s22 + $0x10c8] sm:$0xff]  }
0x2b07   :  { %v22315_v36 = vld [vmem:[%s27885_s22 + $0x1008] sm:$0xff]  }
0x2b08   :  { %12405 = vmatpush1.bf16.msra.mxu1 %v19099_v31  ;;  %12446 = vmatpush1.bf16.msra.mxu0 %v19101_v23  ;;  %v19027_v31 = vld [vmem:[%s27883_s20 + $0x870] sm:$0xff]  ;;  %v19020_v23 = vld [vmem:[%s27883_s20 + $0x838] sm:$0xff] }
0x2b09   :  { %12406 = vmatprep.subr.bf16.mxu1 %v19116_v41  ;;  %12447 = vmatprep.subr.bf16.mxu0 %v19118_v43  ;;  %v19028_v41 = vld [vmem:[%s27883_s20 + $0x878] sm:$0xff]  ;;  %v19135_v43 = vcombine.low %v19065_v27, %v19073_v30  ;;  %v19092_v52 = vcombine.high %v19019_v10, %v19027_v31  ;;  %v22312_v27 = vld [vmem:[%s27885_s22 + $0x1080] sm:$0xff]   ;;  %v22313_v30 = vld [vmem:[%s27885_s22 + $0x1048] sm:$0xff]  }
0x2b0a   :  { %v19094_v57 = vcombine.high %v19020_v23, %v19028_v41  ;;  %v19093_v13 = vcombine.low %v19020_v23, %v19028_v41  ;;  %v22323_v23 = vld [vmem:[%s27885_s22 + $0x1018] sm:$0xff]  }
0x2b0b   :  { %v22324_v41 = vld [vmem:[%s27885_s22 + $0x1098] sm:$0xff]  }
0x2b0c   :  { %12407 = vmatpush1.bf16.msra.mxu1 %v19115_v21  ;;  %12448 = vmatpush1.bf16.msra.mxu0 %v19117_v49  ;;  %v19043_v21 = vld [vmem:[%s27883_s20 + $0x8f0] sm:$0xff]  ;;  %v19036_v49 = vld [vmem:[%s27883_s20 + $0x8b8] sm:$0xff] }
0x2b0d   :  { %12408 = vmatprep.subr.bf16.mxu1 %v19132_v5  ;;  %12449 = vmatprep.subr.bf16.mxu0 %v19134_v44  ;;  %v19044_v5 = vld [vmem:[%s27883_s20 + $0x8f8] sm:$0xff]  ;;  %v19091_v44 = vcombine.low %v19019_v10, %v19027_v31  ;;  %v19108_v53 = vcombine.high %v19035_v56, %v19043_v21 }
0x2b0e   :  { %v19110_v63 = vcombine.high %v19036_v49, %v19044_v5  ;;  %v19109_v34 = vcombine.low %v19036_v49, %v19044_v5  ;;  %v22321_v10 = vld [vmem:[%s27885_s22 + $0x1058] sm:$0xff]   ;;  %v22331_v49 = vld [vmem:[%s27885_s22 + $0x1028] sm:$0xff]  }
0x2b0f   :  { %v22322_v31 = vld [vmem:[%s27885_s22 + $0x10d8] sm:$0xff]   ;;  %v22332_v5 = vld [vmem:[%s27885_s22 + $0x10a8] sm:$0xff]  }
0x2b10   :  { %12409 = vmatpush1.bf16.msra.mxu1 %v19131_v2  ;;  %12450 = vmatpush1.bf16.msra.mxu0 %v19133_v4  ;;  %v19059_v2 = vld [vmem:[%s27883_s20 + $0x970] sm:$0xff]  ;;  %v19052_v4 = vld [vmem:[%s27883_s20 + $0x938] sm:$0xff] }
0x2b11   :  { %12484 = vmatprep.subr.bf16.mxu1 %v19088_v7  ;;  %12525 = vmatprep.subr.bf16.mxu0 %v19090_v9  ;;  %v19060_v7 = vld [vmem:[%s27883_s20 + $0x978] sm:$0xff]  ;;  %v19107_v9 = vcombine.low %v19035_v56, %v19043_v21  ;;  %v19124_v29 = vcombine.high %v19051_v40, %v19059_v2  ;;  %v22329_v56 = vld [vmem:[%s27885_s22 + $0x1068] sm:$0xff]  }
0x2b12   :  { %v19126_v58 = vcombine.high %v19052_v4, %v19060_v7  ;;  %v19125_v19 = vcombine.low %v19052_v4, %v19060_v7  ;;  %v22330_v21 = vld [vmem:[%s27885_s22 + $0x10e8] sm:$0xff]   ;;  %v22339_v4 = vld [vmem:[%s27885_s22 + $0x1038] sm:$0xff]  }
0x2b13   :  { %19145 = vmatmul.mubr.msk.bf16.vlgmr.msra.gmra.mrb[164].mxu1 %vm91_vm1, %v26397_v35  ;;  %19146 = vmatmul.mubr.msk.bf16.vlgmr.msra.gmra.mrb[168].mxu0 %vm91_vm1, %v26397_v35  ;;  %v22340_v7 = vld [vmem:[%s27885_s22 + $0x10b8] sm:$0xff]  }
0x2b14   :  { %12485 = vmatpush1.bf16.msra.mxu1 %v19087_v38  ;;  %12526 = vmatpush1.bf16.msra.mxu0 %v19089_v32  ;;  %v19075_v38 = vld [vmem:[%s27883_s20 + $0x9f0] sm:$0xff]  ;;  %v19068_v32 = vld [vmem:[%s27883_s20 + $0x9b8] sm:$0xff] }
0x2b15   :  { %12486 = vmatprep.subr.bf16.mxu1 %v19104_v1  ;;  %12527 = vmatprep.subr.bf16.mxu0 %v19106_v18  ;;  %v19076_v1 = vld [vmem:[%s27883_s20 + $0x9f8] sm:$0xff]  ;;  %v19123_v18 = vcombine.low %v19051_v40, %v19059_v2  ;;  %v19140_v20 = vcombine.high %v19067_v51, %v19075_v38  ;;  %v19139_v60 = vcombine.low %v19067_v51, %v19075_v38 }
0x2b16   :  { %12516 = vmatprep.mubr.bf16.mxu1 %v22723_v28  ;;  %12557 = vmatprep.mubr.bf16.mxu0 %v22723_v28  ;;  %v19142_v22 = vcombine.high %v19068_v32, %v19076_v1  ;;  %v22337_v40 = vld [vmem:[%s27885_s22 + $0x1078] sm:$0xff]  }
0x2b17   :  { %v22338_v2 = vld [vmem:[%s27885_s22 + $0x10f8] sm:$0xff]  }
0x2b18   :  { %12487 = vmatpush1.bf16.msra.mxu1 %v19103_v62  ;;  %12528 = vmatpush1.bf16.msra.mxu0 %v19105_v55  ;;  %v19141_v62 = vcombine.low %v19068_v32, %v19076_v1  ;;  %v22309_v55 = vld [vmem:[%s27885_s22 + $0x1040] sm:$0xff]  }
0x2b19   :  { %12488 = vmatprep.subr.bf16.mxu1 %v19120_v17  ;;  %12529 = vmatprep.subr.bf16.mxu0 %v19122_v24  ;;  %v22310_v17 = vld [vmem:[%s27885_s22 + $0x10c0] sm:$0xff]  }
0x2b1a   :  { %v22311_v24 = vld [vmem:[%s27885_s22 + $0x1000] sm:$0xff]  }
0x2b1c   :  { %12489 = vmatpush1.bf16.msra.mxu1 %v19119_v61  ;;  %12530 = vmatpush1.bf16.msra.mxu0 %v19121_v11  ;;  %v22316_v61 = vld [vmem:[%s27885_s22 + $0x1088] sm:$0xff]   ;;  %v22317_v11 = vld [vmem:[%s27885_s22 + $0x1050] sm:$0xff]  }
0x2b1d   :  { %12490 = vmatprep.subr.bf16.mxu1 %v19136_v16  ;;  %12531 = vmatprep.subr.bf16.mxu0 %v19138_v45  ;;  %v22319_v16 = vld [vmem:[%s27885_s22 + $0x1010] sm:$0xff]  }
0x2b1e   :  { %v22320_v45 = vld [vmem:[%s27885_s22 + $0x1090] sm:$0xff]  }
0x2b20   :  { %12491 = vmatpush1.bf16.msra.mxu1 %v19135_v43  ;;  %12532 = vmatpush1.bf16.msra.mxu0 %v19137_v50  ;;  %v22325_v43 = vld [vmem:[%s27885_s22 + $0x1060] sm:$0xff]  }
0x2b21   :  { %12566 = vmatprep.subr.bf16.mxu1 %v19092_v52  ;;  %12607 = vmatprep.subr.bf16.mxu0 %v19094_v57  ;;  %v22326_v50 = vld [vmem:[%s27885_s22 + $0x10e0] sm:$0xff]  }
0x2b22   :  { %v22327_v52 = vld [vmem:[%s27885_s22 + $0x1020] sm:$0xff]  }
0x2b23   :  { %19147 = vmatmul.mubr.msk.bf16.vlgmr.msra.gmra.mrb[168].mxu1 %vm91_vm1, %v26397_v35  ;;  %19148 = vmatmul.mubr.msk.bf16.vlgmr.msra.gmra.mrb[172].mxu0 %vm91_vm1, %v26397_v35  ;;  %v22328_v57 = vld [vmem:[%s27885_s22 + $0x10a0] sm:$0xff]  }
0x2b24   :  { %12567 = vmatpush1.bf16.msra.mxu1 %v19091_v44  ;;  %12608 = vmatpush1.bf16.msra.mxu0 %v19093_v13  ;;  %v22333_v44 = vld [vmem:[%s27885_s22 + $0x1070] sm:$0xff]  }
0x2b25   :  { %12568 = vmatprep.subr.bf16.mxu1 %v19108_v53  ;;  %12609 = vmatprep.subr.bf16.mxu0 %v19110_v63  ;;  %v22334_v13 = vld [vmem:[%s27885_s22 + $0x10f0] sm:$0xff]  }
0x2b26   :  { %12598 = vmatprep.mubr.bf16.mxu1 %v22723_v28  ;;  %12639 = vmatprep.mubr.bf16.mxu0 %v22723_v28  ;;  %v22335_v53 = vld [vmem:[%s27885_s22 + $0x1030] sm:$0xff]  }
0x2b27   :  { %v22336_v63 = vld [vmem:[%s27885_s22 + $0x10b0] sm:$0xff]  }
0x2b28   :  { %12569 = vmatpush1.bf16.msra.mxu1 %v19107_v9  ;;  %12610 = vmatpush1.bf16.msra.mxu0 %v19109_v34  ;;  %v22341_v9 = vld [vmem:[%s27885_s22 + $0x1140] sm:$0xff]  }
0x2b29   :  { %12570 = vmatprep.subr.bf16.mxu1 %v19124_v29  ;;  %12611 = vmatprep.subr.bf16.mxu0 %v19126_v58  ;;  %v22342_v34 = vld [vmem:[%s27885_s22 + $0x11c0] sm:$0xff]  }
0x2b2a   :  { %v26646_v29 = vld [vmem:[%s27884_s21 + $0x40] sm:$0xff] }
0x2b2b   :  { %v11920_v58 = vrot.slane %v26646_v29, %v23082_v48  ;;  %v11928_v51 = vrot.slane %v26646_v29, %v23490_v12  ;;  %v11924_v38 = vrot.slane %v26646_v29, %v23139_v0  ;;  %v11932_v32 = vrot.slane %v26646_v29, %v23498_v14 }
0x2b2c   :  { %12571 = vmatpush1.bf16.msra.mxu1 %v19123_v18  ;;  %12612 = vmatpush1.bf16.msra.mxu0 %v19125_v19 }
0x2b2d   :  { %12572 = vmatprep.subr.bf16.mxu1 %v19140_v20  ;;  %12613 = vmatprep.subr.bf16.mxu0 %v19142_v22 }
0x2b30   :  { %12573 = vmatpush1.bf16.msra.mxu1 %v19139_v60  ;;  %12614 = vmatpush1.bf16.msra.mxu0 %v19141_v62 }
0x2b31   :  { %20942 = vmatprep.subr.bf16.mxu1 %v22309_v55  ;;  %20964 = vmatprep.subr.bf16.mxu0 %v22310_v17 }
0x2b33   :  { %19149 = vmatmul.mubr.msk.bf16.vlgmr.msra.gmra.mrb[172].mxu1 %vm91_vm1, %v26397_v35  ;;  %19150 = vmatmul.mubr.msk.bf16.vlgmr.msra.gmra.mrb[176].mxu0 %vm91_vm1, %v26397_v35  ;;  %v22318_v35 = vld [vmem:[%s27885_s22 + $0x10d0] sm:$0xff]  }
0x2b34   :  { %20943 = vmatpush3.bf16.msra.mxu1 %v22311_v24  ;;  %20965 = vmatpush3.bf16.msra.mxu0 %v22312_v27 }
0x2b35   :  { %20944 = vmatprep.subr.bf16.mxu1 %v22313_v30  ;;  %20966 = vmatprep.subr.bf16.mxu0 %v22314_v33 }
0x2b38   :  { %20945 = vmatpush3.bf16.msra.mxu1 %v22315_v36  ;;  %20967 = vmatpush3.bf16.msra.mxu0 %v22316_v61 }
0x2b39   :  { %20946 = vmatprep.subr.bf16.mxu1 %v22317_v11  ;;  %20968 = vmatprep.subr.bf16.mxu0 %v22318_v35 }
0x2b3c   :  { %20947 = vmatpush3.bf16.msra.mxu1 %v22319_v16  ;;  %20969 = vmatpush3.bf16.msra.mxu0 %v22320_v45  ;;  %v22343_v45 = vld [vmem:[%s27885_s22 + $0x1100] sm:$0xff]  }
0x2b3d   :  { %20948 = vmatprep.subr.bf16.mxu1 %v22321_v10  ;;  %20970 = vmatprep.subr.bf16.mxu0 %v22322_v31  ;;  %v22344_v10 = vld [vmem:[%s27885_s22 + $0x1180] sm:$0xff]  }
0x2b40   :  { %20949 = vmatpush3.bf16.msra.mxu1 %v22323_v23  ;;  %20971 = vmatpush3.bf16.msra.mxu0 %v22324_v41  ;;  %v22345_v41 = vld [vmem:[%s27885_s22 + $0x1148] sm:$0xff]  }
0x2b41   :  { %20950 = vmatprep.subr.bf16.mxu1 %v22325_v43  ;;  %20972 = vmatprep.subr.bf16.mxu0 %v22326_v50  ;;  %v22346_v43 = vld [vmem:[%s27885_s22 + $0x11c8] sm:$0xff]  }
0x2b42   :  { %v22347_v50 = vld [vmem:[%s27885_s22 + $0x1108] sm:$0xff]  }
0x2b44   :  { %20951 = vmatpush3.bf16.msra.mxu1 %v22327_v52  ;;  %20973 = vmatpush3.bf16.msra.mxu0 %v22328_v57  ;;  %v22348_v52 = vld [vmem:[%s27885_s22 + $0x1188] sm:$0xff]   ;;  %v22349_v57 = vld [vmem:[%s27885_s22 + $0x1150] sm:$0xff]  }
0x2b45   :  { %20952 = vmatprep.subr.bf16.mxu1 %v22329_v56  ;;  %20974 = vmatprep.subr.bf16.mxu0 %v22330_v21  ;;  %v22350_v56 = vld [vmem:[%s27885_s22 + $0x11d0] sm:$0xff]   ;;  %v11940_v21 = vrot.slane %v26646_v29, %v23527_v46 }
0x2b48   :  { %20953 = vmatpush3.bf16.msra.mxu1 %v22331_v49  ;;  %20975 = vmatpush3.bf16.msra.mxu0 %v22332_v5  ;;  %v11948_v49 = vrot.slane %v26646_v29, %v23530_v54  ;;  %v22351_v5 = vld [vmem:[%s27885_s22 + $0x1110] sm:$0xff]  }
0x2b49   :  { %20954 = vmatprep.subr.bf16.mxu1 %v22333_v44  ;;  %20976 = vmatprep.subr.bf16.mxu0 %v22334_v13  ;;  %v22352_v44 = vld [vmem:[%s27885_s22 + $0x1190] sm:$0xff]   ;;  %v22353_v13 = vld [vmem:[%s27885_s22 + $0x1158] sm:$0xff]  }
0x2b4c   :  { %20955 = vmatpush3.bf16.msra.mxu1 %v22335_v53  ;;  %20977 = vmatpush3.bf16.msra.mxu0 %v22336_v63  ;;  %v22354_v53 = vld [vmem:[%s27885_s22 + $0x11d8] sm:$0xff]  }
0x2b4d   :  { %20956 = vmatprep.subr.bf16.mxu1 %v22337_v40  ;;  %20978 = vmatprep.subr.bf16.mxu0 %v22338_v2 }
0x2b50   :  { %20957 = vmatpush3.bf16.msra.mxu1 %v22339_v4  ;;  %20979 = vmatpush3.bf16.msra.mxu0 %v22340_v7 }
0x2b51   :  { %20986 = vmatprep.subr.bf16.mxu1 %v22341_v9  ;;  %21008 = vmatprep.subr.bf16.mxu0 %v22342_v34 }
0x2bd6   :  { %v12354_v1 = vpop.f32.mrb[160].mxu1  ;;  %v12395_v18 = vpop.f32.mrb[164].mxu0 }
0x2bd7   :  { %v12355_v19 = vadd.f32 %v12354_v1, %v11920_v58  ;;  %v12396_v20 = vadd.f32 %v12395_v18, %v11928_v51  ;;  %v12356_v22 = vpop.f32.mrb[161].mxu1  ;;  %v12397_v60 = vpop.f32.mrb[165].mxu0  ;;  %v22355_v51 = vld [vmem:[%s27885_s22 + $0x1118] sm:$0xff]   ;;  %v22357_v18 = vld [vmem:[%s27885_s22 + $0x1160] sm:$0xff]  }
0x2bd8   :  { %v12357_v62 = vadd.f32 %v12356_v22, %v11924_v38  ;;  %v12398_v55 = vadd.f32 %v12397_v60, %v11932_v32  ;;  %v12358_v17 = vpop.f32.mrb[162].mxu1  ;;  %v12399_v24 = vpop.f32.mrb[166].mxu0  ;;  %v22356_v38 = vld [vmem:[%s27885_s22 + $0x1198] sm:$0xff]  }
0x2bd9   :  { %v12648_v27 = vmax.f32 %v12355_v19, 0.0  ;;  %v12650_v30 = vmax.f32 %v12396_v20, 0.0  ;;  %v12359_v33 = vpop.f32.mrb[163].mxu1  ;;  %v12400_v36 = vpop.f32.mrb[167].mxu0  ;;  %v22358_v19 = vld [vmem:[%s27885_s22 + $0x11e0] sm:$0xff]   ;;  %v22361_v24 = vld [vmem:[%s27885_s22 + $0x1168] sm:$0xff]  }
0x2bda   :  { %v12649_v61 = vmax.f32 %v12357_v62, 0.0  ;;  %v12651_v11 = vmax.f32 %v12398_v55, 0.0  ;;  %v22359_v55 = vld [vmem:[%s27885_s22 + $0x1120] sm:$0xff]   ;;  %v22364_v33 = vld [vmem:[%s27885_s22 + $0x11a8] sm:$0xff]   ;;  %v11936_v36 = vrot.slane %v26646_v29, %v23573_v25 }
0x2bdb   :  { %v12664_v31 = vpack.c.bf16 %v12648_v27, %v12648_v27  ;;  %v12666_v23 = vpack.c.bf16 %v12650_v30, %v12650_v30  ;;  %v22360_v17 = vld [vmem:[%s27885_s22 + $0x11a0] sm:$0xff]   ;;  %v22362_v27 = vld [vmem:[%s27885_s22 + $0x11e8] sm:$0xff]  }
0x2bdc   :  { %v12665_v35 = vpack.c.bf16 %v12649_v61, %v12649_v61  ;;  %v12667_v16 = vpack.c.bf16 %v12651_v11, %v12651_v11  ;;  %v22363_v30 = vld [vmem:[%s27885_s22 + $0x1128] sm:$0xff]   ;;  %v11944_v61 = vrot.slane %v26646_v29, %v23576_v26 }
0x2bdd   :  { %v26733_v11 = vld [vmem:[%s27884_s21 + $0x48] sm:$0xff] }
0x2bde   :  { %13745 = vmatprep.mubr.bf16.mxu1 %v12665_v35  ;;  %13785 = vmatprep.mubr.bf16.mxu0 %v12667_v16  ;;  %v22365_v35 = vld [vmem:[%s27885_s22 + $0x1170] sm:$0xff]   ;;  %v11956_v29 = vrot.slane %v26733_v11, %v23139_v0 }
0x2bdf   :  { %13746 = vmatmul.mubr.bf16.vlgmr.msra.gmra.mrb[176].mxu1 %v12664_v31  ;;  %13786 = vmatmul.mubr.bf16.vlgmr.msra.gmra.mrb[180].mxu0 %v12666_v23  ;;  %v22366_v16 = vld [vmem:[%s27885_s22 + $0x11f0] sm:$0xff]  }
0x2be0   :  { %20987 = vmatpush3.bf16.msra.mxu1 %v22343_v45  ;;  %21009 = vmatpush3.bf16.msra.mxu0 %v22344_v10  ;;  %v11964_v45 = vrot.slane %v26733_v11, %v23498_v14  ;;  %v22367_v10 = vld [vmem:[%s27885_s22 + $0x1130] sm:$0xff]  }
0x2be1   :  { %20988 = vmatprep.subr.bf16.mxu1 %v22345_v41  ;;  %21010 = vmatprep.subr.bf16.mxu0 %v22346_v43  ;;  %v22368_v31 = vld [vmem:[%s27885_s22 + $0x11b0] sm:$0xff]   ;;  %v22369_v43 = vld [vmem:[%s27885_s22 + $0x1178] sm:$0xff]  }
0x2be4   :  { %20989 = vmatpush3.bf16.msra.mxu1 %v22347_v50  ;;  %21011 = vmatpush3.bf16.msra.mxu0 %v22348_v52  ;;  %v22370_v50 = vld [vmem:[%s27885_s22 + $0x11f8] sm:$0xff]  }
0x2be5   :  { %20990 = vmatprep.subr.bf16.mxu1 %v22349_v57  ;;  %21012 = vmatprep.subr.bf16.mxu0 %v22350_v56 }
0x2be6   :  { %v12436_v63 = vpop.f32.mrb[164].mxu1  ;;  %v12477_v40 = vpop.f32.mrb[168].mxu0 }
0x2be7   :  { %v12438_v2 = vpop.f32.mrb[165].mxu1  ;;  %v12479_v4 = vpop.f32.mrb[169].mxu0  ;;  %v12437_v23 = vadd.f32 %v12436_v63, %v11936_v36  ;;  %v12478_v41 = vadd.f32 %v12477_v40, %v11944_v61  ;;  %v22372_v63 = vld [vmem:[%s27885_s22 + $0x11b8] sm:$0xff]  }
0x2be8   :  { %v12439_v7 = vadd.f32 %v12438_v2, %v11940_v21  ;;  %v12480_v9 = vadd.f32 %v12479_v4, %v11948_v49  ;;  %v12440_v34 = vpop.f32.mrb[166].mxu1  ;;  %v12481_v58 = vpop.f32.mrb[170].mxu0  ;;  %20991 = vmatpush3.bf16.msra.mxu1 %v22351_v5  ;;  %21013 = vmatpush3.bf16.msra.mxu0 %v22352_v44  ;;  %v22385_v36 = vld [vmem:[%s27885_s22 + $0x1258] sm:$0xff]  }
0x2be9   :  { %v12441_v32 = vpop.f32.mrb[167].mxu1  ;;  %v12482_v1 = vpop.f32.mrb[171].mxu0  ;;  %20992 = vmatprep.subr.bf16.mxu1 %v22353_v13  ;;  %21014 = vmatprep.subr.bf16.mxu0 %v22354_v53  ;;  %v22371_v53 = vld [vmem:[%s27885_s22 + $0x1138] sm:$0xff]   ;;  %v12652_v40 = vmax.f32 %v12437_v23, 0.0  ;;  %v12654_v2 = vmax.f32 %v12478_v41, 0.0  ;;  %v22374_v34 = vld [vmem:[%s27885_s22 + $0x12c0] sm:$0xff]  }
0x2bea   :  { %v12653_v20 = vmax.f32 %v12439_v7, 0.0  ;;  %v12655_v22 = vmax.f32 %v12480_v9, 0.0  ;;  %v22373_v9 = vld [vmem:[%s27885_s22 + $0x1240] sm:$0xff]   ;;  %v22387_v41 = vld [vmem:[%s27885_s22 + $0x1218] sm:$0xff]  }
0x2beb   :  { %v12668_v32 = vpack.c.bf16 %v12652_v40, %v12652_v40  ;;  %v12670_v1 = vpack.c.bf16 %v12654_v2, %v12654_v2  ;;  %v11952_v40 = vrot.slane %v26733_v11, %v23082_v48  ;;  %v22396_v2 = vld [vmem:[%s27885_s22 + $0x12a8] sm:$0xff]  }
0x2bec   :  { %v12669_v60 = vpack.c.bf16 %v12653_v20, %v12653_v20  ;;  %v12671_v62 = vpack.c.bf16 %v12655_v22, %v12655_v22  ;;  %20993 = vmatpush3.bf16.msra.mxu1 %v22355_v51  ;;  %21015 = vmatpush3.bf16.msra.mxu0 %v22356_v38  ;;  %v22375_v38 = vld [vmem:[%s27885_s22 + $0x1200] sm:$0xff]   ;;  %v22377_v20 = vld [vmem:[%s27885_s22 + $0x1248] sm:$0xff]  }
0x2bed   :  { %20994 = vmatprep.subr.bf16.mxu1 %v22357_v18  ;;  %21016 = vmatprep.subr.bf16.mxu0 %v22358_v19  ;;  %v22376_v18 = vld [vmem:[%s27885_s22 + $0x1280] sm:$0xff]   ;;  %v22378_v22 = vld [vmem:[%s27885_s22 + $0x12c8] sm:$0xff]  }
0x2bee   :  { %13825 = vmatprep.mubr.bf16.mxu1 %v12669_v60  ;;  %13865 = vmatprep.mubr.bf16.mxu0 %v12671_v62  ;;  %v22379_v62 = vld [vmem:[%s27885_s22 + $0x1208] sm:$0xff]  }
0x2bf0   :  { %20995 = vmatpush3.bf16.msra.mxu1 %v22359_v55  ;;  %21017 = vmatpush3.bf16.msra.mxu0 %v22360_v17  ;;  %v22380_v55 = vld [vmem:[%s27885_s22 + $0x1288] sm:$0xff]   ;;  %v22381_v17 = vld [vmem:[%s27885_s22 + $0x1250] sm:$0xff]  }
0x2bf1   :  { %20996 = vmatprep.subr.bf16.mxu1 %v22361_v24  ;;  %21018 = vmatprep.subr.bf16.mxu0 %v22362_v27  ;;  %v22382_v24 = vld [vmem:[%s27885_s22 + $0x12d0] sm:$0xff]   ;;  %v11976_v27 = vrot.slane %v26733_v11, %v23576_v26 }
0x2bf4   :  { %20997 = vmatpush3.bf16.msra.mxu1 %v22363_v30  ;;  %21019 = vmatpush3.bf16.msra.mxu0 %v22364_v33  ;;  %v22383_v30 = vld [vmem:[%s27885_s22 + $0x1210] sm:$0xff]  }
0x2bf5   :  { %20998 = vmatprep.subr.bf16.mxu1 %v22365_v35  ;;  %21020 = vmatprep.subr.bf16.mxu0 %v22366_v16  ;;  %v22384_v33 = vld [vmem:[%s27885_s22 + $0x1290] sm:$0xff]   ;;  %v22386_v16 = vld [vmem:[%s27885_s22 + $0x12d8] sm:$0xff]  }
0x2bf6   :  { %v26757_v52 = vpop.f32.mrb[168].mxu1  ;;  %v26759_v57 = vpop.f32.mrb[172].mxu0 }
0x2bf7   :  { %v12520_v56 = vpop.f32.mrb[169].mxu1  ;;  %v12561_v21 = vpop.f32.mrb[173].mxu0 }
0x2bf8   :  { %v12521_v49 = vadd.f32 %v12520_v56, %v11956_v29  ;;  %v12562_v5 = vadd.f32 %v12561_v21, %v11964_v45  ;;  %v12522_v44 = vpop.f32.mrb[170].mxu1  ;;  %v12563_v13 = vpop.f32.mrb[174].mxu0  ;;  %20999 = vmatpush3.bf16.msra.mxu1 %v22367_v10  ;;  %21021 = vmatpush3.bf16.msra.mxu0 %v22368_v31  ;;  %v22388_v56 = vld [vmem:[%s27885_s22 + $0x1298] sm:$0xff]   ;;  %v22389_v21 = vld [vmem:[%s27885_s22 + $0x1260] sm:$0xff]  }
0x2bf9   :  { %v12523_v4 = vpop.f32.mrb[171].mxu1  ;;  %v12564_v7 = vpop.f32.mrb[175].mxu0  ;;  %21000 = vmatprep.subr.bf16.mxu1 %v22369_v43  ;;  %21022 = vmatprep.subr.bf16.mxu0 %v22370_v50  ;;  %v22392_v44 = vld [vmem:[%s27885_s22 + $0x12a0] sm:$0xff]   ;;  %v22393_v13 = vld [vmem:[%s27885_s22 + $0x1268] sm:$0xff]  }
0x2bfa   :  { %v12657_v58 = vmax.f32 %v12521_v49, 0.0  ;;  %v12659_v51 = vmax.f32 %v12562_v5, 0.0  ;;  %v22390_v49 = vld [vmem:[%s27885_s22 + $0x12e0] sm:$0xff]   ;;  %v22397_v4 = vld [vmem:[%s27885_s22 + $0x1270] sm:$0xff]   ;;  %v11960_v7 = vrot.slane %v26733_v11, %v23490_v12 }
0x2bfb   :  { %v22391_v5 = vld [vmem:[%s27885_s22 + $0x1220] sm:$0xff]  }
0x2bfc   :  { %21001 = vmatpush3.bf16.msra.mxu1 %v22371_v53  ;;  %21023 = vmatpush3.bf16.msra.mxu0 %v22372_v63  ;;  %v12673_v19 = vpack.c.bf16 %v12657_v58, %v12657_v58  ;;  %v12675_v60 = vpack.c.bf16 %v12659_v51, %v12659_v51  ;;  %v22394_v53 = vld [vmem:[%s27885_s22 + $0x12e8] sm:$0xff]   ;;  %v11980_v58 = vrot.slane %v26733_v11, %v23530_v54  ;;  %v22399_v51 = vld [vmem:[%s27885_s22 + $0x1230] sm:$0xff]  }
0x2bfd   :  { %21030 = vmatprep.subr.bf16.mxu1 %v22373_v9  ;;  %21052 = vmatprep.subr.bf16.mxu0 %v22374_v34  ;;  %v22395_v63 = vld [vmem:[%s27885_s22 + $0x1228] sm:$0xff]   ;;  %v22398_v9 = vld [vmem:[%s27885_s22 + $0x12f0] sm:$0xff]   ;;  %v11972_v34 = vrot.slane %v26733_v11, %v23527_v46 }
0x2bff   :  { %13826 = vmatmul.mubr.bf16.vlgmr.msra.gmra.mrb[180].mxu1 %v12668_v32  ;;  %13866 = vmatmul.mubr.bf16.vlgmr.msra.gmra.mrb[184].mxu0 %v12670_v1  ;;  %v22400_v32 = vld [vmem:[%s27885_s22 + $0x12b0] sm:$0xff]   ;;  %v22401_v1 = vld [vmem:[%s27885_s22 + $0x1278] sm:$0xff]  }
0x2c00   :  { %21031 = vmatpush3.bf16.msra.mxu1 %v22375_v38  ;;  %13905 = vmatprep.mubr.bf16.mxu1 %v12673_v19  ;;  %v12519_v38 = vadd.f32 %v26757_v52, %v11952_v40  ;;  %v22402_v19 = vld [vmem:[%s27885_s22 + $0x12f8] sm:$0xff]   ;;  %v22423_v40 = vld [vmem:[%s27885_s22 + $0x1320] sm:$0xff]  }
0x2c01   :  { %21053 = vmatpush3.bf16.msra.mxu0 %v22376_v18  ;;  %13945 = vmatprep.mubr.bf16.mxu0 %v12675_v60  ;;  %v12560_v18 = vadd.f32 %v26759_v57, %v11960_v7  ;;  %v22403_v52 = vld [vmem:[%s27885_s22 + $0x1238] sm:$0xff]   ;;  %v22405_v57 = vld [vmem:[%s27885_s22 + $0x1340] sm:$0xff]   ;;  %v22426_v7 = vld [vmem:[%s27885_s22 + $0x13e8] sm:$0xff]  }
0x2c02   :  { %21032 = vmatprep.subr.bf16.mxu1 %v22377_v20  ;;  %21054 = vmatprep.subr.bf16.mxu0 %v22378_v22  ;;  %v12656_v60 = vmax.f32 %v12519_v38, 0.0  ;;  %v22430_v38 = vld [vmem:[%s27885_s22 + $0x13f0] sm:$0xff]  }
0x2c04   :  { %21033 = vmatpush3.bf16.msra.mxu1 %v22379_v62  ;;  %v22404_v62 = vld [vmem:[%s27885_s22 + $0x12b8] sm:$0xff]  }
0x2c05   :  { %21055 = vmatpush3.bf16.msra.mxu0 %v22380_v55  ;;  %21034 = vmatprep.subr.bf16.mxu1 %v22381_v17  ;;  %v12658_v55 = vmax.f32 %v12560_v18, 0.0  ;;  %v22406_v17 = vld [vmem:[%s27885_s22 + $0x13c0] sm:$0xff]   ;;  %v22433_v18 = vld [vmem:[%s27885_s22 + $0x1378] sm:$0xff]  }
0x2c06   :  { %v26808_v61 = vpop.f32.mrb[172].mxu1  ;;  %v12641_v35 = vpop.f32.mrb[176].mxu0  ;;  %21056 = vmatprep.subr.bf16.mxu0 %v22382_v24 }
0x2c07   :  { %v26813_v29 = vadd.f32 %v12641_v35, %v11976_v27  ;;  %v12602_v45 = vpop.f32.mrb[173].mxu1  ;;  %v12643_v10 = vpop.f32.mrb[177].mxu0  ;;  %v12674_v35 = vpack.c.bf16 %v12658_v55, %v12658_v55 }
0x2c08   :  { %v12604_v31 = vpop.f32.mrb[174].mxu1  ;;  %v12645_v23 = vpop.f32.mrb[178].mxu0  ;;  %21035 = vmatpush3.bf16.msra.mxu1 %v22383_v30  ;;  %v12603_v20 = vadd.f32 %v12602_v45, %v11972_v34  ;;  %v12644_v22 = vadd.f32 %v12643_v10, %v11980_v58  ;;  %v22407_v30 = vld [vmem:[%s27885_s22 + $0x1300] sm:$0xff]   ;;  %v22410_v10 = vld [vmem:[%s27885_s22 + $0x13c8] sm:$0xff]   ;;  %v11968_v34 = vrot.slane %v26733_v11, %v23573_v25  ;;  %v22431_v11 = vld [vmem:[%s27885_s22 + $0x1330] sm:$0xff]  }
0x2c09   :  { %21057 = vmatpush3.bf16.msra.mxu0 %v22384_v33  ;;  %v12605_v43 = vpop.f32.mrb[175].mxu1  ;;  %v12646_v50 = vpop.f32.mrb[179].mxu0  ;;  %21036 = vmatprep.subr.bf16.mxu1 %v22385_v36  ;;  %v12672_v33 = vpack.c.bf16 %v12656_v60, %v12656_v60  ;;  %v22408_v36 = vld [vmem:[%s27885_s22 + $0x1380] sm:$0xff]   ;;  %v22411_v23 = vld [vmem:[%s27885_s22 + $0x1308] sm:$0xff]  }
0x2c0a   :  { %21058 = vmatprep.subr.bf16.mxu0 %v22386_v16  ;;  %v12661_v24 = vmax.f32 %v12603_v20, 0.0  ;;  %v12663_v27 = vmax.f32 %v12644_v22, 0.0  ;;  %v22409_v16 = vld [vmem:[%s27885_s22 + $0x1348] sm:$0xff]   ;;  %v22413_v43 = vld [vmem:[%s27885_s22 + $0x1350] sm:$0xff]   ;;  %v22436_v22 = vld [vmem:[%s27885_s22 + $0x13b8] sm:$0xff]  }
0x2c0b   :  { %v22414_v50 = vld [vmem:[%s27885_s22 + $0x13d0] sm:$0xff]   ;;  %v22428_v58 = vld [vmem:[%s27885_s22 + $0x13a8] sm:$0xff]  }
0x2c0c   :  { %21037 = vmatpush3.bf16.msra.mxu1 %v22387_v41  ;;  %v12677_v45 = vpack.c.bf16 %v12661_v24, %v12661_v24  ;;  %v12679_v31 = vpack.c.bf16 %v12663_v27, %v12663_v27  ;;  %v22412_v41 = vld [vmem:[%s27885_s22 + $0x1388] sm:$0xff]  }
0x2c0d   :  { %21059 = vmatpush3.bf16.msra.mxu0 %v22388_v56  ;;  %21038 = vmatprep.subr.bf16.mxu1 %v22389_v21  ;;  %v22415_v56 = vld [vmem:[%s27885_s22 + $0x1310] sm:$0xff]  }
0x2c0e   :  { %21060 = vmatprep.subr.bf16.mxu0 %v22390_v49  ;;  %v22416_v21 = vld [vmem:[%s27885_s22 + $0x1390] sm:$0xff]   ;;  %v22417_v49 = vld [vmem:[%s27885_s22 + $0x1358] sm:$0xff]  }
0x2c10   :  { %21039 = vmatpush3.bf16.msra.mxu1 %v22391_v5  ;;  %v22418_v5 = vld [vmem:[%s27885_s22 + $0x13d8] sm:$0xff]  }
0x2c11   :  { %21061 = vmatpush3.bf16.msra.mxu0 %v22392_v44  ;;  %21040 = vmatprep.subr.bf16.mxu1 %v22393_v13  ;;  %v22419_v44 = vld [vmem:[%s27885_s22 + $0x1318] sm:$0xff]  }
0x2c12   :  { %21062 = vmatprep.subr.bf16.mxu0 %v22394_v53  ;;  %v22420_v13 = vld [vmem:[%s27885_s22 + $0x1398] sm:$0xff]   ;;  %v22421_v53 = vld [vmem:[%s27885_s22 + $0x1360] sm:$0xff]  }
0x2c14   :  { %21041 = vmatpush3.bf16.msra.mxu1 %v22395_v63  ;;  %v22422_v63 = vld [vmem:[%s27885_s22 + $0x13e0] sm:$0xff]  }
0x2c15   :  { %21063 = vmatpush3.bf16.msra.mxu0 %v22396_v2  ;;  %21042 = vmatprep.subr.bf16.mxu1 %v22397_v4  ;;  %v22424_v2 = vld [vmem:[%s27885_s22 + $0x13a0] sm:$0xff]   ;;  %v22425_v4 = vld [vmem:[%s27885_s22 + $0x1368] sm:$0xff]  }
0x2c16   :  { %21064 = vmatprep.subr.bf16.mxu0 %v22398_v9  ;;  %v22427_v9 = vld [vmem:[%s27885_s22 + $0x1328] sm:$0xff]  }
0x2c18   :  { %21043 = vmatpush3.bf16.msra.mxu1 %v22399_v51  ;;  %v22429_v51 = vld [vmem:[%s27885_s22 + $0x1370] sm:$0xff]  }
0x2c19   :  { %21065 = vmatpush3.bf16.msra.mxu0 %v22400_v32  ;;  %21044 = vmatprep.subr.bf16.mxu1 %v22401_v1  ;;  %v12601_v32 = vadd.f32 %v26808_v61, %v11968_v34  ;;  %v22432_v1 = vld [vmem:[%s27885_s22 + $0x13b0] sm:$0xff]   ;;  %v22435_v61 = vld [vmem:[%s27885_s22 + $0x1338] sm:$0xff]  }
0x2c1a   :  { %21066 = vmatprep.subr.bf16.mxu0 %v22402_v19  ;;  %v22434_v19 = vld [vmem:[%s27885_s22 + $0x13f8] sm:$0xff]  }
0x2c1b   :  { %v12660_v20 = vmax.f32 %v12601_v32, 0.0 }
0x2c1c   :  { %21045 = vmatpush3.bf16.msra.mxu1 %v22403_v52  ;;  %v12662_v52 = vmax.f32 %v26813_v29, 0.0 }
0x2c1d   :  { %21067 = vmatpush3.bf16.msra.mxu0 %v22404_v62  ;;  %21074 = vmatprep.subr.bf16.mxu1 %v22405_v57  ;;  %v12676_v60 = vpack.c.bf16 %v12660_v20, %v12660_v20 }
0x2c1e   :  { %21096 = vmatprep.subr.bf16.mxu0 %v22406_v17  ;;  %v12678_v62 = vpack.c.bf16 %v12662_v52, %v12662_v52 }
0x2c1f   :  { %13906 = vmatmul.mubr.bf16.vlgmr.msra.gmra.mrb[184].mxu1 %v12672_v33 }
0x2c20   :  { %13946 = vmatmul.mubr.bf16.vlgmr.msra.gmra.mrb[188].mxu0 %v12674_v35  ;;  %21075 = vmatpush3.bf16.msra.mxu1 %v22407_v30 }
0x2c21   :  { %13985 = vmatprep.mubr.bf16.mxu1 %v12677_v45  ;;  %21097 = vmatpush3.bf16.msra.mxu0 %v22408_v36 }
0x2c22   :  { %14025 = vmatprep.mubr.bf16.mxu0 %v12679_v31  ;;  %21076 = vmatprep.subr.bf16.mxu1 %v22409_v16 }
0x2c23   :  { %21098 = vmatprep.subr.bf16.mxu0 %v22410_v10 }
0x2c24   :  { %21077 = vmatpush3.bf16.msra.mxu1 %v22411_v23 }
0x2c25   :  { %21099 = vmatpush3.bf16.msra.mxu0 %v22412_v41  ;;  %21078 = vmatprep.subr.bf16.mxu1 %v22413_v43 }
0x2c26   :  { %21100 = vmatprep.subr.bf16.mxu0 %v22414_v50 }
0x2c28   :  { %21079 = vmatpush3.bf16.msra.mxu1 %v22415_v56 }
0x2c29   :  { %21101 = vmatpush3.bf16.msra.mxu0 %v22416_v21  ;;  %21080 = vmatprep.subr.bf16.mxu1 %v22417_v49 }
0x2c2a   :  { %21102 = vmatprep.subr.bf16.mxu0 %v22418_v5 }
0x2c2c   :  { %21081 = vmatpush3.bf16.msra.mxu1 %v22419_v44 }
0x2c2d   :  { %21103 = vmatpush3.bf16.msra.mxu0 %v22420_v13  ;;  %21082 = vmatprep.subr.bf16.mxu1 %v22421_v53 }
0x2c2e   :  { %21104 = vmatprep.subr.bf16.mxu0 %v22422_v63 }
0x2c30   :  { %21083 = vmatpush3.bf16.msra.mxu1 %v22423_v40 }
0x2c31   :  { %21105 = vmatpush3.bf16.msra.mxu0 %v22424_v2  ;;  %21084 = vmatprep.subr.bf16.mxu1 %v22425_v4 }
0x2c32   :  { %21106 = vmatprep.subr.bf16.mxu0 %v22426_v7 }
0x2c34   :  { %21085 = vmatpush3.bf16.msra.mxu1 %v22427_v9 }
0x2c35   :  { %21107 = vmatpush3.bf16.msra.mxu0 %v22428_v58  ;;  %21086 = vmatprep.subr.bf16.mxu1 %v22429_v51 }
0x2c36   :  { %21108 = vmatprep.subr.bf16.mxu0 %v22430_v38 }
0x2c38   :  { %21087 = vmatpush3.bf16.msra.mxu1 %v22431_v11 }
0x2c39   :  { %21109 = vmatpush3.bf16.msra.mxu0 %v22432_v1  ;;  %21088 = vmatprep.subr.bf16.mxu1 %v22433_v18 }
0x2c3a   :  { %21110 = vmatprep.subr.bf16.mxu0 %v22434_v19 }
0x2c3c   :  { %21089 = vmatpush3.bf16.msra.mxu1 %v22435_v61 }
0x2c3d   :  { %21111 = vmatpush3.bf16.msra.mxu0 %v22436_v22 }
0x2c3e   :  { %21696 = vmatprep.subr.bf16.mxu0 %v22720_v3 }
0x2c3f   :  { %13986 = vmatmul.mubr.bf16.vlgmr.msra.gmra.mrb[188].mxu1 %v12676_v60 }
0x2c40   :  { %14026 = vmatmul.mubr.bf16.vlgmr.msra.gmra.mrb[192].mxu0 %v12678_v62  ;;  %14163 = vmatprep.mubr.bf16.mxu1 %v22723_v28 }
0x2c41   :  { %21698 = vmatpush3.bf16.msra.mxu0 %v23050_v37  ;;  %21574 = vmatprep.mubr.msk.f32.mxu0 %vm22721_vm0, %v22722_v6  ;;  %v19408_v37 = vld [vmem:[%s27886_s23 + $0x4] ss:$0 sm:$0xff] }
0x2c42   :  { %21699 = vmatprep.subr.bf16.mxu0 %v22720_v3 }
0x2c45   :  { %21701 = vmatpush3.bf16.msra.mxu0 %v23056_v39 }
0x2c46   :  { %21702 = vmatprep.subr.bf16.mxu0 %v22720_v3 }
0x2c49   :  { %21704 = vmatpush3.bf16.msra.mxu0 %v23066_v42 }
0x2c4a   :  { %21705 = vmatprep.subr.bf16.mxu0 %v22720_v3 }
0x2c4d   :  { %21707 = vmatpush3.bf16.msra.mxu0 %v23079_v47 }
0x2cb2   :  { %v20958_v29 = vpop.f32.mrb[176].mxu1  ;;  %v20980_v57 = vpop.f32.mrb[180].mxu0 }
0x2cb3   :  { %v20959_v55 = vpop.f32.mrb[177].mxu1  ;;  %v20981_v17 = vpop.f32.mrb[181].mxu0 }
0x2cb4   :  { %v20960_v24 = vadd.f32 %v20959_v55, %v20958_v29  ;;  %v20982_v27 = vadd.f32 %v20981_v17, %v20980_v57  ;;  %v20961_v30 = vpop.f32.mrb[178].mxu1  ;;  %v20983_v39 = vpop.f32.mrb[182].mxu0 }
0x2cb5   :  { %v20962_v33 = vpop.f32.mrb[179].mxu1  ;;  %v20984_v36 = vpop.f32.mrb[183].mxu0  ;;  %v22440_v30 = vld [vmem:[%s27919_s4 + $0x150] ss:$8 sps:$4 sm:$0xff]   ;;  %v22445_v39 = vld [vmem:[%s27919_s4 + $0x164] ss:$8 sps:$4 sm:$0xff]  }
0x2cb6   :  { %v13748_v35 = vadd.f32 %v20960_v24, %v19408_v37  ;;  %v22439_v24 = vld [vmem:[%s27919_s4 + $0x144] ss:$8 sps:$4 sm:$0xff]   ;;  %v22443_v33 = vld [vmem:[%s27919_s4 + $0x160] ss:$8 sps:$4 sm:$0xff]   ;;  %v22448_v36 = vld [vmem:[%s27919_s4 + $0x174] ss:$8 sps:$4 sm:$0xff]  }
0x2cb7   :  { %14131 = vmatprep.subr.bf16.mxu1 %v22439_v24 }
0x2cb8   :  { %v13788_v42 = vadd.f32 %v20982_v27, %v13748_v35  ;;  %v22437_v27 = vld [vmem:[%s27919_s4 + $0x140] ss:$8 sps:$4 sm:$0xff]   ;;  %v22446_v35 = vld [vmem:[%s27919_s4 + $0x170] ss:$8 sps:$4 sm:$0xff]  }
0x2cb9   :  { %14132 = vmatpush1.bf16.msra.mxu1 %v22437_v27 }
0x2cd2   :  { %v21002_v16 = vpop.f32.mrb[180].mxu1  ;;  %v21024_v3 = vpop.f32.mrb[184].mxu0 }
0x2cd3   :  { %v21003_v45 = vpop.f32.mrb[181].mxu1  ;;  %v21025_v47 = vpop.f32.mrb[185].mxu0 }
0x2cd4   :  { %v21004_v10 = vadd.f32 %v21003_v45, %v21002_v16  ;;  %v21026_v31 = vadd.f32 %v21025_v47, %v21024_v3  ;;  %v21005_v23 = vpop.f32.mrb[182].mxu1  ;;  %v21027_v41 = vpop.f32.mrb[186].mxu0  ;;  %v19539_v47 = vld [vmem:[%s27881_s18 + $0x4] ss:$0 sm:$0xff] }
0x2cd5   :  { %v21006_v43 = vpop.f32.mrb[183].mxu1  ;;  %v21028_v50 = vpop.f32.mrb[187].mxu0 }
0x2cd6   :  { %v13828_v56 = vadd.f32 %v21004_v10, %v13788_v42  ;;  %v22671_v50 = vld [vmem:[%s27925_s6] sm:$0xff] }
0x2cd8   :  { %v13868_v21 = vadd.f32 %v21026_v31, %v13828_v56  ;;  %v19540_v31 = vld [vmem:[%s27882_s19 + $0x4] ss:$0 sm:$0xff]  ;;  %v27041_v56 = vld [vmem:[%s27876_s13 + $0xa] sm:$0x3] }
0x2cf2   :  { %v21046_v49 = vpop.f32.mrb[184].mxu1 }
0x2cf3   :  { %v21068_v5 = vpop.f32.mrb[188].mxu0  ;;  %v21047_v44 = vpop.f32.mrb[185].mxu1 }
0x2cf4   :  { %v21048_v13 = vadd.f32 %v21047_v44, %v21046_v49  ;;  %v21069_v53 = vpop.f32.mrb[189].mxu0  ;;  %v21049_v63 = vpop.f32.mrb[186].mxu1 }
0x2cf5   :  { %v21070_v40 = vadd.f32 %v21069_v53, %v21068_v5  ;;  %v21071_v2 = vpop.f32.mrb[190].mxu0  ;;  %v21050_v4 = vpop.f32.mrb[187].mxu1 }
0x2cf6   :  { %v13908_v7 = vadd.f32 %v21048_v13, %v13868_v21  ;;  %v21072_v9 = vpop.f32.mrb[191].mxu0  ;;  %v14081_v21 = vrot.slane %v27041_v56, %v23082_v48 }
0x2cf8   :  { %v13948_v34 = vadd.f32 %v21070_v40, %v13908_v7 }
0x2d12   :  { %v21090_v58 = vpop.f32.mrb[188].mxu1 }
0x2d13   :  { %v21112_v51 = vpop.f32.mrb[192].mxu0  ;;  %v21091_v38 = vpop.f32.mrb[189].mxu1 }
0x2d14   :  { %v21092_v11 = vadd.f32 %v21091_v38, %v21090_v58  ;;  %v21113_v32 = vpop.f32.mrb[193].mxu0  ;;  %v21093_v1 = vpop.f32.mrb[190].mxu1 }
0x2d15   :  { %v21114_v18 = vadd.f32 %v21113_v32, %v21112_v51  ;;  %v21115_v19 = vpop.f32.mrb[194].mxu0  ;;  %v21094_v61 = vpop.f32.mrb[191].mxu1 }
0x2d16   :  { %v13988_v20 = vadd.f32 %v21092_v11, %v13948_v34  ;;  %v21116_v22 = vpop.f32.mrb[195].mxu0 }
0x2d18   :  { %v14028_v52 = vadd.f32 %v21114_v18, %v13988_v20 }
0x2d1a   :  { %v14033_v60 = vadd.f32 %v14028_v52, %v26393_v15  ;;  %v22442_v15 = vld [vmem:[%s27919_s4 + $0x154] ss:$8 sps:$4 sm:$0xff]  }
0x2d1b   :  { %14133 = vmatprep.subr.bf16.mxu1 %v22442_v15 }
0x2d1c   :  { %v14038_v62 = vsel %vm840_vm8, %v14033_v60, 0.0  ;;  %14134 = vmatpush1.bf16.msra.mxu1 %v22440_v30 }
0x2d1d   :  { %14039 = vadd.xlane.f32.xlu1 %v14038_v62  ;;  %14135 = vmatprep.subr.bf16.mxu1 %v22445_v39 }
0x2d20   :  { %14136 = vmatpush1.bf16.msra.mxu1 %v22443_v33 }
0x2d21   :  { %14137 = vmatprep.subr.bf16.mxu1 %v22448_v36 }
0x2d24   :  { %14138 = vmatpush1.bf16.msra.mxu1 %v22446_v35 }
0x2d25   :  { %21577 = vmatprep.subr.mxu1 %v22722_v6 }
0x2daa   :  { %v14040_v29 = vpop.xlane.xlu1 %14039 }
0x2dab   :  { %v14041_v57 = vmul.f32 0.015625, %v14040_v29 }
0x2dad   :  { %v14042_v37 = vsub.f32 %v14033_v60, %v14041_v57 }
0x2daf   :  { %v14043_v55 = vmul.f32 %v14042_v37, %v14042_v37 }
0x2db1   :  { %v14044_v17 = vsel %vm840_vm8, %v14043_v55, 0.0 }
0x2db2   :  { %14045 = vadd.xlane.f32.xlu1 %v14044_v17 }
0x2e3f   :  { %v14046_v42 = vpop.xlane.xlu1 %14045 }
0x2e40   :  { %v14047_v16 = vmul.f32 0.015625, %v14046_v42 }
0x2e42   :  { %v14048_v3 = vadd.f32 1e-05, %v14047_v16 }
0x2e44   :  { %22655 = vrsqrt.f32 %v14048_v3 }
0x2e4e   :  { %v22656_v45 = vpop.eup %22655 }
0x2e4f   :  { %v14050_v10 = vmul.f32 %v22656_v45, %v14042_v37 }
0x2e51   :  { %v14057_v23 = vmul.f32 %v19539_v47, %v14050_v10 }
0x2e53   :  { %v27027_v41 = vadd.f32 %v19540_v31, %v14057_v23 }
0x2e55   :  { %v14065_v43 = vpack.c.bf16 %v27027_v41, %v27027_v41 }
0x2e57   :  { %19558 = vmatmul.mubr.msk.bf16.vlgmr.msra.gmra.mrb[192].mxu1 %vm91_vm1, %v14065_v43 }
0x2e58   :  { %21578 = vmatpush3.msra.mxu1 %v22671_v50  ;;  %21579 = vmatprep.mubr.msk.f32.mxu1 %vm22721_vm0, %v22722_v6 }
0x2e59   :  { %21582 = vmatprep.subr.bf16.mxu1 %v22722_v6 }
0x2f2a   :  { %v14165_v49 = vpop.f32.mrb[192].mxu1 }
0x2f2b   :  { %v14166_v5 = vadd.f32 %v14165_v49, %v14081_v21  ;;  %v27045_v44 = vpop.f32.mrb[193].mxu1  ;;  %v22449_v49 = vld [vmem:[%s27877_s14 + $0xa0] sm:$0xff]  }
0x2f2c   :  { %v14169_v13 = vpop.f32.mrb[194].mxu1 }
0x2f2d   :  { %v14170_v53 = vpop.f32.mrb[195].mxu1  ;;  %14205 = vrot.lane.b32.xlu1 %v14166_v5, %s22724_s8  ;;  %v14179_v63 = vrot.slane %v14166_v5, %v23097_v59  ;;  %v22450_v5 = vld [vmem:[%s27877_s14 + $0xa8] sm:$0xff]   ;;  %v22451_v13 = vld [vmem:[%s27877_s14 + $0xb0] sm:$0xff]   ;;  %s22728_s8 = smov [#allocation4]  }
0x2f2e   :  { %v22452_v53 = vld [vmem:[%s27877_s14 + $0xb8] sm:$0xff]   ;;  %s17027_s6 = sshll.u32 %s22728_s8, 4  ;;  %s17028_s6 = int_to_ptr.vmem [resolvable:$true] %s17027_s6 }
0x2f2f   :  { %v14180_v40 = vcombine.high %v14179_v63, %v14179_v63  ;;  %v14187_v2 = vrot.slane %v14179_v63, %v23097_v59  ;;  %v14085_v63 = vrot.slane %v27041_v56, %v23139_v0 }
0x2f31   :  { %v14194_v4 = vrot.slane %v14180_v40, %v23097_v59  ;;  %v14198_v7 = vrot.slane %v14187_v2, %v23082_v48  ;;  %v14168_v2 = vadd.f32 %v27045_v44, %v14085_v63 }
0x2f33   :  { %v14202_v9 = vrot.slane %v14194_v4, %v23082_v48 }
0x2f9f   :  { %v14206_v34 = vpop.permute.xlu1 %14205 }
0x2fa0   :  { %v14208_v58 = vmul.f32 %v14206_v34, %v14198_v7  ;;  %v14209_v51 = vmul.f32 %v14206_v34, %v14202_v9 }
0x2fa2   :  { %v14212_v38 = vcombine.low %v14208_v58, %v14209_v51 }
0x2fa4   :  { %v14219_v11 = vrot.slane %v14212_v38, %v23105_v8 }
0x2fa6   :  { %21575 = vmatmul.mubr.msk.f32.vlgmr.msra.gmra.mrb[196].mxu0 %vm91_vm1, %v14219_v11 }
0x2fa7   :  { %15071 = vmatprep.mubr.bf16.mxu0 %v22723_v28 }
0x3079   :  { %v14288_v32 = vpop.f32.mrb[196].mxu0 }
0x307a   :  { %v14292_v1 = vmul.f32 0.35355338, %v14288_v32  ;;  %v21576_v18 = vpop.f32.mrb[197].mxu0 }
0x307c   :  { %v14293_v19 = vsel %vm703_vm5, %v14292_v1, -inf }
0x307d   :  { %v14294_v59 = vrot.slane %v14293_v19, 4 }
0x307f   :  { %v14295_v61 = vmax.f32 %v14293_v19, %v14294_v59 }
0x3081   :  { %v14296_v20 = vrot.slane %v14295_v61, 2 }
0x3083   :  { %v14297_v22 = vmax.f32 %v14295_v61, %v14296_v20 }
0x3085   :  { %v14298_v52 = vrot.slane %v14297_v22, 1 }
0x3087   :  { %v14299_v60 = vmax.f32 %v14297_v22, %v14298_v52 }
0x3089   :  { %v14300_v62 = vsub.f32 %v14292_v1, %v14299_v60 }
0x308b   :  { %v14301_v29 = vmul.f32 1.442695, %v14300_v62 }
0x308d   :  { %22657 = vpow2.f32 %v14301_v29 }
0x3097   :  { %v22658_v57 = vpop.eup %22657 }
0x3098   :  { %v14310_v37 = vrot.slane %v22658_v57, %v23105_v8 }
0x309a   :  { %v14314_v55 = vsel %vm725_vm6, %v14310_v37, 0.0  ;;  %v14311_v17 = vcombine.high %v14310_v37, %v14310_v37 }
0x309b   :  { %v14315_v24 = vrot.slane %v14314_v55, 4 }
0x309c   :  { %v14321_v27 = vsel %vm725_vm6, %v14311_v17, 0.0 }
0x309d   :  { %v14316_v15 = vadd.f32 %v14315_v24, %v14314_v55  ;;  %v14322_v30 = vrot.slane %v14321_v27, 4  ;;  %v19570_v55 = vld [vmem:[%s27878_s15 + $0x5] ss:$0 sm:$0xff] }
0x309f   :  { %v14317_v39 = vrot.slane %v14316_v15, 2  ;;  %v14323_v33 = vadd.f32 %v14322_v30, %v14321_v27 }
0x30a1   :  { %v14318_v36 = vadd.f32 %v14317_v39, %v14316_v15  ;;  %v14324_v35 = vrot.slane %v14323_v33, 2 }
0x30a3   :  { %v14319_v42 = vrot.slane %v14318_v36, 1  ;;  %v14325_v16 = vadd.f32 %v14324_v35, %v14323_v33 }
0x30a5   :  { %v14320_v3 = vadd.f32 %v14319_v42, %v14318_v36  ;;  %v14326_v45 = vrot.slane %v14325_v16, 1 }
0x30a7   :  { %22659 = vrcp.f32 %v14320_v3  ;;  %v14327_v47 = vadd.f32 %v14326_v45, %v14325_v16  ;;  %v19580_v45 = vld [vmem:[%s27883_s20 + $0xa00] sm:$0xff] }
0x30a9   :  { %22661 = vrcp.f32 %v14327_v47  ;;  %v19581_v47 = vld [vmem:[%s27883_s20 + $0xa08] sm:$0xff] }
0x30b1   :  { %v22660_v10 = vpop.eup %22659 }
0x30b2   :  { %v14329_v23 = vmul.f32 %v22660_v10, %v14310_v37 }
0x30b3   :  { %v22662_v31 = vpop.eup %22661 }
0x30b4   :  { %v14331_v43 = vmul.f32 %v22662_v31, %v14311_v17  ;;  %v19589_v31 = vld [vmem:[%s27883_s20 + $0xa48] sm:$0xff] }
0x30b6   :  { %v14334_v50 = vcombine.low %v14329_v23, %v14331_v43  ;;  %v19648_v43 = vcombine.low %v19581_v47, %v19589_v31 }
0x30b8   :  { %v14341_v21 = vrot.slane %v14334_v50, %v23105_v8  ;;  %v19649_v50 = vcombine.high %v19581_v47, %v19589_v31  ;;  %v19614_v47 = vld [vmem:[%s27883_s20 + $0xb10] sm:$0xff]  ;;  %v19615_v31 = vld [vmem:[%s27883_s20 + $0xb18] sm:$0xff] }
0x30ba   :  { %21580 = vmatmul.mubr.msk.f32.vlgmr.msra.gmra.mrb[196].mxu1 %vm754_vm7, %v14341_v21  ;;  %v19596_v21 = vld [vmem:[%s27883_s20 + $0xa80] sm:$0xff] }
0x30bb   :  { %21590 = vmatprep.mubr.msk.bf16.mxu1 %vm22721_vm0, %v22722_v6  ;;  %21583 = vmatpush3.bf16.msra.mxu1 %v22449_v49  ;;  %v19604_v49 = vld [vmem:[%s27883_s20 + $0xac0] sm:$0xff] }
0x30bc   :  { %21584 = vmatprep.subr.bf16.mxu1 %v22722_v6  ;;  %v19662_v63 = vcombine.low %v19596_v21, %v19604_v49 }
0x30bf   :  { %21585 = vmatpush3.bf16.msra.mxu1 %v22450_v5  ;;  %v19597_v5 = vld [vmem:[%s27883_s20 + $0xa88] sm:$0xff] }
0x30c0   :  { %21586 = vmatprep.subr.bf16.mxu1 %v22722_v6 }
0x30c3   :  { %21587 = vmatpush3.bf16.msra.mxu1 %v22451_v13  ;;  %v19663_v13 = vcombine.high %v19596_v21, %v19604_v49 }
0x30c4   :  { %21588 = vmatprep.subr.bf16.mxu1 %v22722_v6 }
0x30c7   :  { %21589 = vmatpush3.bf16.msra.mxu1 %v22452_v53  ;;  %v19605_v53 = vld [vmem:[%s27883_s20 + $0xac8] sm:$0xff] }
0x30c8   :  { %15080 = vmatprep.subr.bf16.mxu1 %v19649_v50 }
0x318d   :  { %v14410_v40 = vpop.f32.mrb[196].mxu1 }
0x318e   :  { %v14421_v4 = vrot.slane %v14410_v40, %v23105_v8  ;;  %v21581_v7 = vpop.f32.mrb[197].mxu1  ;;  %v19664_v40 = vcombine.low %v19597_v5, %v19605_v53 }
0x318f   :  { %v19620_v7 = vld [vmem:[%s27883_s20 + $0xb40] sm:$0xff] }
0x3190   :  { %v14422_v9 = vcombine.high %v14421_v4, %v14421_v4  ;;  %v14425_v34 = vmul.f32 %v14421_v4, %v14168_v2  ;;  %v19612_v4 = vld [vmem:[%s27883_s20 + $0xb00] sm:$0xff] }
0x3192   :  { %v14426_v58 = vmul.f32 %v14422_v9, %v14168_v2  ;;  %v14427_v51 = vsel %vm840_vm8, %v14425_v34, 0.0  ;;  %v19665_v2 = vcombine.high %v19597_v5, %v19605_v53  ;;  %v19613_v9 = vld [vmem:[%s27883_s20 + $0xb08] sm:$0xff]  ;;  %v19679_v34 = vcombine.high %v19612_v4, %v19620_v7  ;;  %v19630_v5 = vld [vmem:[%s27883_s20 + $0xb90] sm:$0xff]  ;;  %v19631_v53 = vld [vmem:[%s27883_s20 + $0xb98] sm:$0xff] }
0x3193   :  { %v14428_v38 = vrot.slane %v14427_v51, 4 }
0x3194   :  { %v14434_v11 = vsel %vm840_vm8, %v14426_v58, 0.0  ;;  %v19621_v58 = vld [vmem:[%s27883_s20 + $0xb48] sm:$0xff] }
0x3195   :  { %v14429_v32 = vadd.f32 %v14428_v38, %v14427_v51  ;;  %v14435_v6 = vrot.slane %v14434_v11, 4  ;;  %v19678_v51 = vcombine.low %v19612_v4, %v19620_v7  ;;  %v19680_v38 = vcombine.low %v19613_v9, %v19621_v58 }
0x3197   :  { %v14430_v1 = vrot.slane %v14429_v32, 2  ;;  %v14436_v18 = vadd.f32 %v14435_v6, %v14434_v11  ;;  %v19681_v11 = vcombine.high %v19613_v9, %v19621_v58  ;;  %v19636_v6 = vld [vmem:[%s27883_s20 + $0xbc0] sm:$0xff]  ;;  %v19585_v58 = vld [vmem:[%s27883_s20 + $0xa28] sm:$0xff] }
0x3198   :  { %v19584_v9 = vld [vmem:[%s27883_s20 + $0xa20] sm:$0xff] }
0x3199   :  { %v14431_v19 = vadd.f32 %v14430_v1, %v14429_v32  ;;  %v14437_v56 = vrot.slane %v14436_v18, 2  ;;  %v19628_v32 = vld [vmem:[%s27883_s20 + $0xb80] sm:$0xff]  ;;  %v19629_v1 = vld [vmem:[%s27883_s20 + $0xb88] sm:$0xff] }
0x319b   :  { %v14432_v59 = vrot.slane %v14431_v19, 1  ;;  %v14438_v61 = vadd.f32 %v14437_v56, %v14436_v18  ;;  %v19695_v18 = vcombine.high %v19628_v32, %v19636_v6  ;;  %v19694_v56 = vcombine.low %v19628_v32, %v19636_v6 }
0x319d   :  { %v14433_v44 = vadd.f32 %v14432_v59, %v14431_v19  ;;  %v14439_v20 = vrot.slane %v14438_v61, 1  ;;  %v19637_v19 = vld [vmem:[%s27883_s20 + $0xbc8] sm:$0xff] }
0x319e   :  { %v19696_v59 = vcombine.low %v19629_v1, %v19637_v19 }
0x319f   :  { %v14440_v22 = vadd.f32 %v14439_v20, %v14438_v61  ;;  %v14441_v52 = vpack.c.bf16 %v14433_v44, %v14433_v44  ;;  %v19697_v61 = vcombine.high %v19629_v1, %v19637_v19  ;;  %v19582_v44 = vld [vmem:[%s27883_s20 + $0xa10] sm:$0xff]  ;;  %v19600_v1 = vld [vmem:[%s27883_s20 + $0xaa0] sm:$0xff]  ;;  %v19601_v19 = vld [vmem:[%s27883_s20 + $0xaa8] sm:$0xff] }
0x31a0   :  { %v19590_v20 = vld [vmem:[%s27883_s20 + $0xa50] sm:$0xff] }
0x31a1   :  { %v14442_v60 = vpack.c.bf16 %v14440_v22, %v14440_v22  ;;  %v14462_v62 = vunpack.c.l.b16 %v14441_v52  ;;  %v19583_v22 = vld [vmem:[%s27883_s20 + $0xa18] sm:$0xff]  ;;  %v19650_v52 = vcombine.low %v19582_v44, %v19590_v20 }
0x31a3   :  { %v14463_v29 = vunpack.c.l.b16 %v14442_v60  ;;  %v19651_v60 = vcombine.high %v19582_v44, %v19590_v20 }
0x31a5   :  { %v14464_v57 = vsel %vm126_vm2, %v14463_v29, %v14462_v62  ;;  %v19591_v62 = vld [vmem:[%s27883_s20 + $0xa58] sm:$0xff] }
0x31a6   :  { %v14465_v37 = vpack.c.b16 %v14464_v57, %v14464_v57  ;;  %v19652_v29 = vcombine.low %v19583_v22, %v19591_v62  ;;  %v19653_v57 = vcombine.high %v19583_v22, %v19591_v62  ;;  %v19616_v22 = vld [vmem:[%s27883_s20 + $0xb20] sm:$0xff]  ;;  %v19625_v62 = vld [vmem:[%s27883_s20 + $0xb68] sm:$0xff] }
0x31a8   :  { %21591 = vmatmul.mubr.msk.bf16.vlgmr.msra.gmra.mrb[200].mxu1 %vm91_vm1, %v14465_v37 }
0x31a9   :  { %15112 = vmatprep.mubr.bf16.mxu1 %v22723_v28  ;;  %15081 = vmatpush1.bf16.msra.mxu1 %v19648_v43 }
0x31aa   :  { %15082 = vmatprep.subr.bf16.mxu1 %v19665_v2 }
0x31ad   :  { %15083 = vmatpush1.bf16.msra.mxu1 %v19664_v40 }
0x31ae   :  { %15084 = vmatprep.subr.bf16.mxu1 %v19681_v11 }
0x31b1   :  { %15085 = vmatpush1.bf16.msra.mxu1 %v19680_v38 }
0x31b2   :  { %15086 = vmatprep.subr.bf16.mxu1 %v19697_v61 }
0x31b5   :  { %15087 = vmatpush1.bf16.msra.mxu1 %v19696_v59 }
0x31b6   :  { %15162 = vmatprep.subr.bf16.mxu1 %v19653_v57 }
0x327b   :  { %v14527_v17 = vpop.f32.mrb[200].mxu1 }
0x327c   :  { %v14528_v24 = vadd.f32 %v19570_v55, %v14527_v17  ;;  %v21592_v27 = vpop.f32.mrb[201].mxu1 }
0x327d   :  { %v14530_v15 = vpop.f32.mrb[202].mxu1  ;;  %v19578_v27 = vld [vmem:[%s27879_s16 + $0x5] ss:$0 sm:$0xff] }
0x327e   :  { %v21593_v30 = vpop.f32.mrb[203].mxu1  ;;  %v14533_v39 = vadd.f32 %v14528_v24, %v27027_v41  ;;  %v19588_v41 = vld [vmem:[%s27883_s20 + $0xa40] sm:$0xff] }
0x327f   :  { %v19647_v10 = vcombine.high %v19580_v45, %v19588_v41  ;;  %v19646_v23 = vcombine.low %v19580_v45, %v19588_v41  ;;  %v19579_v30 = vld [vmem:[%s27880_s17 + $0x5] ss:$0 sm:$0xff] }
0x3280   :  { %v14538_v33 = vsel %vm840_vm8, %v14533_v39, 0.0 }
0x3281   :  { %14539 = vadd.xlane.f32.xlu1 %v14538_v33  ;;  %15039 = vmatprep.subr.bf16.mxu0 %v19647_v10  ;;  %v19598_v33 = vld [vmem:[%s27883_s20 + $0xa90] sm:$0xff] }
0x3282   :  { %15040 = vmatpush1.bf16.msra.mxu0 %v19646_v23  ;;  %v19622_v10 = vld [vmem:[%s27883_s20 + $0xb50] sm:$0xff]  ;;  %v19623_v23 = vld [vmem:[%s27883_s20 + $0xb58] sm:$0xff] }
0x3283   :  { %15041 = vmatprep.subr.bf16.mxu0 %v19663_v13  ;;  %v19683_v21 = vcombine.high %v19614_v47, %v19622_v10  ;;  %v19685_v49 = vcombine.high %v19615_v31, %v19623_v23  ;;  %v19638_v13 = vld [vmem:[%s27883_s20 + $0xbd0] sm:$0xff]  ;;  %v19682_v40 = vcombine.low %v19614_v47, %v19622_v10  ;;  %v19684_v2 = vcombine.low %v19615_v31, %v19623_v23 }
0x3284   :  { %v19699_v4 = vcombine.high %v19630_v5, %v19638_v13  ;;  %v19698_v38 = vcombine.low %v19630_v5, %v19638_v13 }
0x3286   :  { %15042 = vmatpush1.bf16.msra.mxu0 %v19662_v63  ;;  %v19639_v63 = vld [vmem:[%s27883_s20 + $0xbd8] sm:$0xff] }
0x3287   :  { %15043 = vmatprep.subr.bf16.mxu0 %v19679_v34  ;;  %v19701_v7 = vcombine.high %v19631_v53, %v19639_v63  ;;  %v19592_v34 = vld [vmem:[%s27883_s20 + $0xa60] sm:$0xff]  ;;  %v19700_v11 = vcombine.low %v19631_v53, %v19639_v63 }
0x3288   :  { %v19655_v32 = vcombine.high %v19584_v9, %v19592_v34  ;;  %v19654_v59 = vcombine.low %v19584_v9, %v19592_v34 }
0x328a   :  { %15044 = vmatpush1.bf16.msra.mxu0 %v19678_v51  ;;  %v19593_v51 = vld [vmem:[%s27883_s20 + $0xa68] sm:$0xff] }
0x328b   :  { %15045 = vmatprep.subr.bf16.mxu0 %v19695_v18  ;;  %v19657_v6 = vcombine.high %v19585_v58, %v19593_v51  ;;  %v19608_v18 = vld [vmem:[%s27883_s20 + $0xae0] sm:$0xff]  ;;  %v19656_v61 = vcombine.low %v19585_v58, %v19593_v51 }
0x328c   :  { %v19671_v44 = vcombine.high %v19600_v1, %v19608_v18 }
0x328e   :  { %15046 = vmatpush1.bf16.msra.mxu0 %v19694_v56  ;;  %v19609_v56 = vld [vmem:[%s27883_s20 + $0xae8] sm:$0xff] }
0x328f   :  { %15121 = vmatprep.subr.bf16.mxu0 %v19651_v60  ;;  %v19673_v20 = vcombine.high %v19601_v19, %v19609_v56  ;;  %v19617_v60 = vld [vmem:[%s27883_s20 + $0xb28] sm:$0xff]  ;;  %v19672_v57 = vcombine.low %v19601_v19, %v19609_v56 }
0x330e   :  { %v14540_v36 = vpop.xlane.xlu1 %14539 }
0x330f   :  { %v14541_v35 = vmul.f32 0.015625, %v14540_v36  ;;  %v19606_v36 = vld [vmem:[%s27883_s20 + $0xad0] sm:$0xff] }
0x3310   :  { %v19667_v45 = vcombine.high %v19598_v33, %v19606_v36  ;;  %v19666_v43 = vcombine.low %v19598_v33, %v19606_v36 }
0x3311   :  { %v27093_v42 = vsub.f32 %v14533_v39, %v14541_v35  ;;  %v19599_v35 = vld [vmem:[%s27883_s20 + $0xa98] sm:$0xff] }
0x3313   :  { %v14543_v16 = vmul.f32 %v27093_v42, %v27093_v42 }
0x3315   :  { %v14544_v3 = vsel %vm840_vm8, %v14543_v16, 0.0 }
0x3316   :  { %14545 = vadd.xlane.f32.xlu0 %v14544_v3 }
0x33a3   :  { %v14546_v37 = vpop.xlane.xlu0 %14545 }
0x33a4   :  { %v14547_v55 = vmul.f32 0.015625, %v14546_v37 }
0x33a6   :  { %v14548_v17 = vadd.f32 1e-05, %v14547_v55  ;;  %v19689_v55 = vcombine.high %v19617_v60, %v19625_v62 }
0x33a8   :  { %22663 = vrsqrt.f32 %v14548_v17  ;;  %v19632_v17 = vld [vmem:[%s27883_s20 + $0xba0] sm:$0xff] }
0x33b2   :  { %v22664_v24 = vpop.eup %22663 }
0x33b3   :  { %v14550_v15 = vmul.f32 %v22664_v24, %v27093_v42  ;;  %v19607_v42 = vld [vmem:[%s27883_s20 + $0xad8] sm:$0xff]  ;;  %v19640_v24 = vld [vmem:[%s27883_s20 + $0xbe0] sm:$0xff] }
0x33b4   :  { %v19669_v41 = vcombine.high %v19599_v35, %v19607_v42  ;;  %v19668_v50 = vcombine.low %v19599_v35, %v19607_v42  ;;  %v19703_v33 = vcombine.high %v19632_v17, %v19640_v24  ;;  %v19586_v35 = vld [vmem:[%s27883_s20 + $0xa30] sm:$0xff]  ;;  %v19702_v47 = vcombine.low %v19632_v17, %v19640_v24  ;;  %v22465_v24 = vld [vmem:[%s27885_s22 + $0x1458] sm:$0xff]  }
0x33b5   :  { %v14557_v39 = vmul.f32 %v19578_v27, %v14550_v15  ;;  %v19633_v27 = vld [vmem:[%s27883_s20 + $0xba8] sm:$0xff]  ;;  %v19594_v42 = vld [vmem:[%s27883_s20 + $0xa70] sm:$0xff] }
0x33b6   :  { %v19641_v15 = vld [vmem:[%s27883_s20 + $0xbe8] sm:$0xff]  ;;  %v19659_v31 = vcombine.high %v19586_v35, %v19594_v42  ;;  %v19658_v5 = vcombine.low %v19586_v35, %v19594_v42  ;;  %v22464_v17 = vld [vmem:[%s27885_s22 + $0x1490] sm:$0xff]   ;;  %v22472_v35 = vld [vmem:[%s27885_s22 + $0x14a0] sm:$0xff]  }
0x33b7   :  { %v27177_v16 = vadd.f32 %v19579_v30, %v14557_v39  ;;  %v19688_v39 = vcombine.low %v19617_v60, %v19625_v62  ;;  %v19705_v36 = vcombine.high %v19633_v27, %v19641_v15  ;;  %v19704_v10 = vcombine.low %v19633_v27, %v19641_v15  ;;  %v22457_v60 = vld [vmem:[%s27885_s22 + $0x1448] sm:$0xff]   ;;  %v22466_v27 = vld [vmem:[%s27885_s22 + $0x14d8] sm:$0xff]  }
0x33b8   :  { %v22458_v62 = vld [vmem:[%s27885_s22 + $0x14c8] sm:$0xff]   ;;  %v22467_v15 = vld [vmem:[%s27885_s22 + $0x1418] sm:$0xff]  }
0x33b9   :  { %v27181_v3 = vpack.c.bf16 %v27177_v16, %v27177_v16  ;;  %v22473_v42 = vld [vmem:[%s27885_s22 + $0x1468] sm:$0xff]  }
0x33bb   :  { %19710 = vmatmul.mubr.msk.bf16.vlgmr.msra.gmra.mrb[200].mxu0 %vm91_vm1, %v27181_v3  ;;  %19711 = vmatmul.mubr.msk.bf16.vlgmr.msra.gmra.mrb[204].mxu1 %vm91_vm1, %v27181_v3 }
0x33bc   :  { %15122 = vmatpush1.bf16.msra.mxu0 %v19650_v52  ;;  %15163 = vmatpush1.bf16.msra.mxu1 %v19652_v29  ;;  %v19624_v52 = vld [vmem:[%s27883_s20 + $0xb60] sm:$0xff]  ;;  %v19670_v29 = vcombine.low %v19600_v1, %v19608_v18 }
0x33bd   :  { %15123 = vmatprep.subr.bf16.mxu0 %v19667_v45  ;;  %15164 = vmatprep.subr.bf16.mxu1 %v19669_v41  ;;  %v19687_v37 = vcombine.high %v19616_v22, %v19624_v52  ;;  %v19686_v30 = vcombine.low %v19616_v22, %v19624_v52  ;;  %v19587_v45 = vld [vmem:[%s27883_s20 + $0xa38] sm:$0xff]  ;;  %v22455_v22 = vld [vmem:[%s27885_s22 + $0x1400] sm:$0xff]  }
0x33be   :  { %15153 = vmatprep.mubr.bf16.mxu0 %v22723_v28  ;;  %15194 = vmatprep.mubr.bf16.mxu1 %v22723_v28  ;;  %v19595_v41 = vld [vmem:[%s27883_s20 + $0xa78] sm:$0xff]  ;;  %v22456_v52 = vld [vmem:[%s27885_s22 + $0x1480] sm:$0xff]  }
0x33bf   :  { %v19661_v23 = vcombine.high %v19587_v45, %v19595_v41  ;;  %v19660_v13 = vcombine.low %v19587_v45, %v19595_v41  ;;  %v22474_v45 = vld [vmem:[%s27885_s22 + $0x14e8] sm:$0xff]  }
0x33c0   :  { %15124 = vmatpush1.bf16.msra.mxu0 %v19666_v43  ;;  %15165 = vmatpush1.bf16.msra.mxu1 %v19668_v50  ;;  %v19602_v43 = vld [vmem:[%s27883_s20 + $0xab0] sm:$0xff]  ;;  %v22475_v41 = vld [vmem:[%s27885_s22 + $0x1428] sm:$0xff]  }
0x33c1   :  { %15125 = vmatprep.subr.bf16.mxu0 %v19683_v21  ;;  %15166 = vmatprep.subr.bf16.mxu1 %v19685_v49  ;;  %v19610_v50 = vld [vmem:[%s27883_s20 + $0xaf0] sm:$0xff]  ;;  %v19603_v21 = vld [vmem:[%s27883_s20 + $0xab8] sm:$0xff] }
0x33c2   :  { %v19611_v49 = vld [vmem:[%s27883_s20 + $0xaf8] sm:$0xff]  ;;  %v19675_v53 = vcombine.high %v19602_v43, %v19610_v50  ;;  %v19674_v9 = vcombine.low %v19602_v43, %v19610_v50  ;;  %v22480_v43 = vld [vmem:[%s27885_s22 + $0x14b0] sm:$0xff]  }
0x33c3   :  { %v19677_v63 = vcombine.high %v19603_v21, %v19611_v49  ;;  %v19676_v34 = vcombine.low %v19603_v21, %v19611_v49  ;;  %v22481_v50 = vld [vmem:[%s27885_s22 + $0x1478] sm:$0xff]  }
0x33c4   :  { %15126 = vmatpush1.bf16.msra.mxu0 %v19682_v40  ;;  %15167 = vmatpush1.bf16.msra.mxu1 %v19684_v2  ;;  %v19618_v40 = vld [vmem:[%s27883_s20 + $0xb30] sm:$0xff]  ;;  %v22482_v21 = vld [vmem:[%s27885_s22 + $0x14f8] sm:$0xff]  }
0x33c5   :  { %15127 = vmatprep.subr.bf16.mxu0 %v19699_v4  ;;  %15168 = vmatprep.subr.bf16.mxu1 %v19701_v7  ;;  %v19626_v2 = vld [vmem:[%s27883_s20 + $0xb70] sm:$0xff]  ;;  %v19619_v4 = vld [vmem:[%s27883_s20 + $0xb38] sm:$0xff] }
0x33c6   :  { %v19627_v7 = vld [vmem:[%s27883_s20 + $0xb78] sm:$0xff]  ;;  %v19691_v58 = vcombine.high %v19618_v40, %v19626_v2  ;;  %v19690_v1 = vcombine.low %v19618_v40, %v19626_v2 }
0x33c7   :  { %v19693_v51 = vcombine.high %v19619_v4, %v19627_v7  ;;  %v19692_v18 = vcombine.low %v19619_v4, %v19627_v7  ;;  %v22483_v49 = vld [vmem:[%s27885_s22 + $0x1438] sm:$0xff]  }
0x33c8   :  { %15128 = vmatpush1.bf16.msra.mxu0 %v19698_v38  ;;  %15169 = vmatpush1.bf16.msra.mxu1 %v19700_v11  ;;  %v19634_v38 = vld [vmem:[%s27883_s20 + $0xbb0] sm:$0xff] }
0x33c9   :  { %15203 = vmatprep.subr.bf16.mxu0 %v19655_v32  ;;  %15244 = vmatprep.subr.bf16.mxu1 %v19657_v6  ;;  %v19642_v11 = vld [vmem:[%s27883_s20 + $0xbf0] sm:$0xff]  ;;  %v19635_v32 = vld [vmem:[%s27883_s20 + $0xbb8] sm:$0xff] }
0x33ca   :  { %v19643_v6 = vld [vmem:[%s27883_s20 + $0xbf8] sm:$0xff]  ;;  %v19707_v19 = vcombine.high %v19634_v38, %v19642_v11 }
0x33cb   :  { %19712 = vmatmul.mubr.msk.bf16.vlgmr.msra.gmra.mrb[204].mxu0 %vm91_vm1, %v27181_v3  ;;  %19713 = vmatmul.mubr.msk.bf16.vlgmr.msra.gmra.mrb[208].mxu1 %vm91_vm1, %v27181_v3  ;;  %v19709_v56 = vcombine.high %v19635_v32, %v19643_v6 }
0x33cc   :  { %15204 = vmatpush1.bf16.msra.mxu0 %v19654_v59  ;;  %15245 = vmatpush1.bf16.msra.mxu1 %v19656_v61  ;;  %v19706_v59 = vcombine.low %v19634_v38, %v19642_v11  ;;  %v19708_v61 = vcombine.low %v19635_v32, %v19643_v6 }
0x33cd   :  { %15205 = vmatprep.subr.bf16.mxu0 %v19671_v44  ;;  %15246 = vmatprep.subr.bf16.mxu1 %v19673_v20  ;;  %v22453_v44 = vld [vmem:[%s27885_s22 + $0x1440] sm:$0xff]  }
0x33ce   :  { %15235 = vmatprep.mubr.bf16.mxu0 %v22723_v28  ;;  %15276 = vmatprep.mubr.bf16.mxu1 %v22723_v28  ;;  %v22454_v20 = vld [vmem:[%s27885_s22 + $0x14c0] sm:$0xff]  }
0x33d0   :  { %15206 = vmatpush1.bf16.msra.mxu0 %v19670_v29  ;;  %15247 = vmatpush1.bf16.msra.mxu1 %v19672_v57  ;;  %v22459_v29 = vld [vmem:[%s27885_s22 + $0x1408] sm:$0xff]  }
0x33d1   :  { %15207 = vmatprep.subr.bf16.mxu0 %v19687_v37  ;;  %15248 = vmatprep.subr.bf16.mxu1 %v19689_v55  ;;  %v22460_v57 = vld [vmem:[%s27885_s22 + $0x1488] sm:$0xff]   ;;  %v22461_v37 = vld [vmem:[%s27885_s22 + $0x1450] sm:$0xff]  }
0x33d2   :  { %v22463_v55 = vld [vmem:[%s27885_s22 + $0x1410] sm:$0xff]  }
0x33d4   :  { %15208 = vmatpush1.bf16.msra.mxu0 %v19686_v30  ;;  %15249 = vmatpush1.bf16.msra.mxu1 %v19688_v39  ;;  %v22468_v30 = vld [vmem:[%s27885_s22 + $0x1498] sm:$0xff]   ;;  %v22469_v39 = vld [vmem:[%s27885_s22 + $0x1460] sm:$0xff]  }
0x33d5   :  { %15209 = vmatprep.subr.bf16.mxu0 %v19703_v33  ;;  %15250 = vmatprep.subr.bf16.mxu1 %v19705_v36  ;;  %v22470_v33 = vld [vmem:[%s27885_s22 + $0x14e0] sm:$0xff]  }
0x33d6   :  { %v22471_v36 = vld [vmem:[%s27885_s22 + $0x1420] sm:$0xff]  }
0x33d8   :  { %15210 = vmatpush1.bf16.msra.mxu0 %v19702_v47  ;;  %15251 = vmatpush1.bf16.msra.mxu1 %v19704_v10  ;;  %v22476_v47 = vld [vmem:[%s27885_s22 + $0x14a8] sm:$0xff]   ;;  %v22477_v10 = vld [vmem:[%s27885_s22 + $0x1470] sm:$0xff]  }
0x33d9   :  { %15285 = vmatprep.subr.bf16.mxu0 %v19659_v31  ;;  %15326 = vmatprep.subr.bf16.mxu1 %v19661_v23  ;;  %v22478_v31 = vld [vmem:[%s27885_s22 + $0x14f0] sm:$0xff]  }
0x33da   :  { %v22479_v23 = vld [vmem:[%s27885_s22 + $0x1430] sm:$0xff]  }
0x33db   :  { %19714 = vmatmul.mubr.msk.bf16.vlgmr.msra.gmra.mrb[208].mxu0 %vm91_vm1, %v27181_v3  ;;  %19715 = vmatmul.mubr.msk.bf16.vlgmr.msra.gmra.mrb[212].mxu1 %vm91_vm1, %v27181_v3 }
0x33dc   :  { %15286 = vmatpush1.bf16.msra.mxu0 %v19658_v5  ;;  %15327 = vmatpush1.bf16.msra.mxu1 %v19660_v13  ;;  %v22484_v5 = vld [vmem:[%s27885_s22 + $0x14b8] sm:$0xff]   ;;  %v22485_v13 = vld [vmem:[%s27885_s22 + $0x1540] sm:$0xff]  }
0x33dd   :  { %15287 = vmatprep.subr.bf16.mxu0 %v19675_v53  ;;  %15328 = vmatprep.subr.bf16.mxu1 %v19677_v63  ;;  %v22486_v53 = vld [vmem:[%s27885_s22 + $0x15c0] sm:$0xff]   ;;  %v27430_v63 = vld [vmem:[%s27884_s21 + $0x50] sm:$0xff] }
0x33de   :  { %15317 = vmatprep.mubr.bf16.mxu0 %v22723_v28  ;;  %15358 = vmatprep.mubr.bf16.mxu1 %v22723_v28  ;;  %v14639_v40 = vrot.slane %v27430_v63, %v23082_v48  ;;  %v14647_v2 = vrot.slane %v27430_v63, %v23490_v12  ;;  %v14643_v4 = vrot.slane %v27430_v63, %v23139_v0 }
0x33df   :  { %v14651_v7 = vrot.slane %v27430_v63, %v23498_v14 }
0x33e0   :  { %15288 = vmatpush1.bf16.msra.mxu0 %v19674_v9  ;;  %15329 = vmatpush1.bf16.msra.mxu1 %v19676_v34 }
0x33e1   :  { %15289 = vmatprep.subr.bf16.mxu0 %v19691_v58  ;;  %15330 = vmatprep.subr.bf16.mxu1 %v19693_v51 }
0x33e4   :  { %15290 = vmatpush1.bf16.msra.mxu0 %v19690_v1  ;;  %15331 = vmatpush1.bf16.msra.mxu1 %v19692_v18 }
0x33e5   :  { %15291 = vmatprep.subr.bf16.mxu0 %v19707_v19  ;;  %15332 = vmatprep.subr.bf16.mxu1 %v19709_v56 }
0x33e8   :  { %15292 = vmatpush1.bf16.msra.mxu0 %v19706_v59  ;;  %15333 = vmatpush1.bf16.msra.mxu1 %v19708_v61 }
0x33e9   :  { %21134 = vmatprep.subr.bf16.mxu0 %v22453_v44  ;;  %21156 = vmatprep.subr.bf16.mxu1 %v22454_v20 }
0x33eb   :  { %19716 = vmatmul.mubr.msk.bf16.vlgmr.msra.gmra.mrb[212].mxu0 %vm91_vm1, %v27181_v3  ;;  %19717 = vmatmul.mubr.msk.bf16.vlgmr.msra.gmra.mrb[216].mxu1 %vm91_vm1, %v27181_v3  ;;  %v22462_v3 = vld [vmem:[%s27885_s22 + $0x14d0] sm:$0xff]  }
0x33ec   :  { %21135 = vmatpush3.bf16.msra.mxu0 %v22455_v22  ;;  %21157 = vmatpush3.bf16.msra.mxu1 %v22456_v52 }
0x33ed   :  { %21136 = vmatprep.subr.bf16.mxu0 %v22457_v60  ;;  %21158 = vmatprep.subr.bf16.mxu1 %v22458_v62  ;;  %v22487_v60 = vld [vmem:[%s27885_s22 + $0x1500] sm:$0xff]  }
0x33ee   :  { %v22488_v62 = vld [vmem:[%s27885_s22 + $0x1580] sm:$0xff]  }
0x33f0   :  { %21137 = vmatpush3.bf16.msra.mxu0 %v22459_v29  ;;  %21159 = vmatpush3.bf16.msra.mxu1 %v22460_v57 }
0x33f1   :  { %21138 = vmatprep.subr.bf16.mxu0 %v22461_v37  ;;  %21160 = vmatprep.subr.bf16.mxu1 %v22462_v3  ;;  %v22489_v37 = vld [vmem:[%s27885_s22 + $0x1548] sm:$0xff]  }
0x33f2   :  { %v22490_v3 = vld [vmem:[%s27885_s22 + $0x15c8] sm:$0xff]  }
0x33f4   :  { %21139 = vmatpush3.bf16.msra.mxu0 %v22463_v55  ;;  %21161 = vmatpush3.bf16.msra.mxu1 %v22464_v17  ;;  %v22491_v55 = vld [vmem:[%s27885_s22 + $0x1508] sm:$0xff]  }
0x33f5   :  { %21140 = vmatprep.subr.bf16.mxu0 %v22465_v24  ;;  %21162 = vmatprep.subr.bf16.mxu1 %v22466_v27  ;;  %v22492_v17 = vld [vmem:[%s27885_s22 + $0x1588] sm:$0xff]   ;;  %v22493_v24 = vld [vmem:[%s27885_s22 + $0x1550] sm:$0xff]  }
0x33f6   :  { %v22494_v27 = vld [vmem:[%s27885_s22 + $0x15d0] sm:$0xff]  }
0x33f8   :  { %21141 = vmatpush3.bf16.msra.mxu0 %v22467_v15  ;;  %21163 = vmatpush3.bf16.msra.mxu1 %v22468_v30  ;;  %v14659_v15 = vrot.slane %v27430_v63, %v23527_v46  ;;  %v14667_v30 = vrot.slane %v27430_v63, %v23530_v54 }
0x33f9   :  { %21142 = vmatprep.subr.bf16.mxu0 %v22469_v39  ;;  %21164 = vmatprep.subr.bf16.mxu1 %v22470_v33  ;;  %v22495_v39 = vld [vmem:[%s27885_s22 + $0x1510] sm:$0xff]  }
0x33fa   :  { %v22496_v33 = vld [vmem:[%s27885_s22 + $0x1590] sm:$0xff]  }
0x33fc   :  { %21143 = vmatpush3.bf16.msra.mxu0 %v22471_v36  ;;  %21165 = vmatpush3.bf16.msra.mxu1 %v22472_v35  ;;  %v22497_v36 = vld [vmem:[%s27885_s22 + $0x1558] sm:$0xff]  }
0x33fd   :  { %21144 = vmatprep.subr.bf16.mxu0 %v22473_v42  ;;  %21166 = vmatprep.subr.bf16.mxu1 %v22474_v45  ;;  %v22498_v35 = vld [vmem:[%s27885_s22 + $0x15d8] sm:$0xff]  }
0x3400   :  { %21145 = vmatpush3.bf16.msra.mxu0 %v22475_v41  ;;  %21167 = vmatpush3.bf16.msra.mxu1 %v22476_v47 }
0x3401   :  { %21146 = vmatprep.subr.bf16.mxu0 %v22477_v10  ;;  %21168 = vmatprep.subr.bf16.mxu1 %v22478_v31 }
0x3404   :  { %21147 = vmatpush3.bf16.msra.mxu0 %v22479_v23  ;;  %21169 = vmatpush3.bf16.msra.mxu1 %v22480_v43 }
0x3405   :  { %21148 = vmatprep.subr.bf16.mxu0 %v22481_v50  ;;  %21170 = vmatprep.subr.bf16.mxu1 %v22482_v21  ;;  %v22499_v50 = vld [vmem:[%s27885_s22 + $0x1518] sm:$0xff]  }
0x3406   :  { %v22500_v21 = vld [vmem:[%s27885_s22 + $0x1598] sm:$0xff]  }
0x3408   :  { %21149 = vmatpush3.bf16.msra.mxu0 %v22483_v49  ;;  %21171 = vmatpush3.bf16.msra.mxu1 %v22484_v5 }
0x3409   :  { %21178 = vmatprep.subr.bf16.mxu0 %v22485_v13  ;;  %21200 = vmatprep.subr.bf16.mxu1 %v22486_v53  ;;  %v22501_v13 = vld [vmem:[%s27885_s22 + $0x1560] sm:$0xff]  }
0x340a   :  { %v22502_v53 = vld [vmem:[%s27885_s22 + $0x15e0] sm:$0xff]  }
0x348e   :  { %v15073_v9 = vpop.f32.mrb[200].mxu0  ;;  %v15114_v34 = vpop.f32.mrb[204].mxu1 }
0x348f   :  { %v15074_v58 = vadd.f32 %v15073_v9, %v14639_v40  ;;  %v15115_v51 = vadd.f32 %v15114_v34, %v14647_v2  ;;  %v15075_v38 = vpop.f32.mrb[201].mxu0  ;;  %v15116_v11 = vpop.f32.mrb[205].mxu1  ;;  %v22503_v9 = vld [vmem:[%s27885_s22 + $0x1520] sm:$0xff]  }
0x3490   :  { %v15076_v32 = vadd.f32 %v15075_v38, %v14643_v4  ;;  %v15117_v6 = vadd.f32 %v15116_v11, %v14651_v7  ;;  %v15077_v1 = vpop.f32.mrb[202].mxu0  ;;  %v15118_v18 = vpop.f32.mrb[206].mxu1  ;;  %v22504_v34 = vld [vmem:[%s27885_s22 + $0x15a0] sm:$0xff]   ;;  %v22507_v38 = vld [vmem:[%s27885_s22 + $0x1528] sm:$0xff]  }
0x3491   :  { %v15367_v19 = vmax.f32 %v15074_v58, 0.0  ;;  %v15369_v56 = vmax.f32 %v15115_v51, 0.0  ;;  %v15078_v59 = vpop.f32.mrb[203].mxu0  ;;  %v15119_v61 = vpop.f32.mrb[207].mxu1  ;;  %v22505_v58 = vld [vmem:[%s27885_s22 + $0x1568] sm:$0xff]   ;;  %v27517_v1 = vld [vmem:[%s27884_s21 + $0x58] sm:$0xff] }
0x3492   :  { %v15368_v44 = vmax.f32 %v15076_v32, 0.0  ;;  %v15370_v20 = vmax.f32 %v15117_v6, 0.0  ;;  %v22506_v51 = vld [vmem:[%s27885_s22 + $0x15e8] sm:$0xff]   ;;  %v14655_v32 = vrot.slane %v27430_v63, %v23573_v25  ;;  %v14663_v6 = vrot.slane %v27430_v63, %v23576_v26  ;;  %v22509_v18 = vld [vmem:[%s27885_s22 + $0x1570] sm:$0xff]  }
0x3493   :  { %v15383_v29 = vpack.c.bf16 %v15367_v19, %v15367_v19  ;;  %v15385_v57 = vpack.c.bf16 %v15369_v56, %v15369_v56  ;;  %v22508_v11 = vld [vmem:[%s27885_s22 + $0x15a8] sm:$0xff]   ;;  %v22510_v19 = vld [vmem:[%s27885_s22 + $0x15f0] sm:$0xff]   ;;  %v14675_v63 = vrot.slane %v27517_v1, %v23139_v0  ;;  %v14683_v56 = vrot.slane %v27517_v1, %v23498_v14 }
0x3494   :  { %v15384_v22 = vpack.c.bf16 %v15368_v44, %v15368_v44  ;;  %v15386_v52 = vpack.c.bf16 %v15370_v20, %v15370_v20  ;;  %v22511_v59 = vld [vmem:[%s27885_s22 + $0x1530] sm:$0xff]  }
0x3495   :  { %v22512_v61 = vld [vmem:[%s27885_s22 + $0x15b0] sm:$0xff]  }
0x3496   :  { %16464 = vmatprep.mubr.bf16.mxu0 %v15384_v22  ;;  %16504 = vmatprep.mubr.bf16.mxu1 %v15386_v52  ;;  %v22513_v22 = vld [vmem:[%s27885_s22 + $0x1578] sm:$0xff]  }
0x3497   :  { %16465 = vmatmul.mubr.bf16.vlgmr.msra.gmra.mrb[216].mxu0 %v15383_v29  ;;  %16505 = vmatmul.mubr.bf16.vlgmr.msra.gmra.mrb[220].mxu1 %v15385_v57  ;;  %v22514_v52 = vld [vmem:[%s27885_s22 + $0x15f8] sm:$0xff]  }
0x3498   :  { %21179 = vmatpush3.bf16.msra.mxu0 %v22487_v60  ;;  %21201 = vmatpush3.bf16.msra.mxu1 %v22488_v62 }
0x3499   :  { %21180 = vmatprep.subr.bf16.mxu0 %v22489_v37  ;;  %21202 = vmatprep.subr.bf16.mxu1 %v22490_v3 }
0x349c   :  { %21181 = vmatpush3.bf16.msra.mxu0 %v22491_v55  ;;  %21203 = vmatpush3.bf16.msra.mxu1 %v22492_v17 }
0x349d   :  { %21182 = vmatprep.subr.bf16.mxu0 %v22493_v24  ;;  %21204 = vmatprep.subr.bf16.mxu1 %v22494_v27  ;;  %v22515_v24 = vld [vmem:[%s27885_s22 + $0x1538] sm:$0xff]  }
0x349e   :  { %v15155_v42 = vpop.f32.mrb[204].mxu0  ;;  %v15196_v45 = vpop.f32.mrb[208].mxu1  ;;  %v22516_v27 = vld [vmem:[%s27885_s22 + $0x15b8] sm:$0xff]  }
0x349f   :  { %v15157_v41 = vpop.f32.mrb[205].mxu0  ;;  %v15198_v47 = vpop.f32.mrb[209].mxu1  ;;  %v15156_v44 = vadd.f32 %v15155_v42, %v14655_v32  ;;  %v15197_v20 = vadd.f32 %v15196_v45, %v14663_v6  ;;  %v22531_v6 = vld [vmem:[%s27885_s22 + $0x1618] sm:$0xff]  }
0x34a0   :  { %v15158_v10 = vadd.f32 %v15157_v41, %v14659_v15  ;;  %v15199_v31 = vadd.f32 %v15198_v47, %v14667_v30  ;;  %v15159_v23 = vpop.f32.mrb[206].mxu0  ;;  %v15200_v43 = vpop.f32.mrb[210].mxu1  ;;  %21183 = vmatpush3.bf16.msra.mxu0 %v22495_v39  ;;  %21205 = vmatpush3.bf16.msra.mxu1 %v22496_v33  ;;  %v22519_v41 = vld [vmem:[%s27885_s22 + $0x1600] sm:$0xff]  }
0x34a1   :  { %v15160_v49 = vpop.f32.mrb[207].mxu0  ;;  %v15201_v5 = vpop.f32.mrb[211].mxu1  ;;  %21184 = vmatprep.subr.bf16.mxu0 %v22497_v36  ;;  %21206 = vmatprep.subr.bf16.mxu1 %v22498_v35  ;;  %v15371_v15 = vmax.f32 %v15156_v44, 0.0  ;;  %v15373_v30 = vmax.f32 %v15197_v20, 0.0  ;;  %v22517_v36 = vld [vmem:[%s27885_s22 + $0x1640] sm:$0xff]   ;;  %v22521_v43 = vld [vmem:[%s27885_s22 + $0x1648] sm:$0xff]  }
0x34a2   :  { %v15372_v40 = vmax.f32 %v15158_v10, 0.0  ;;  %v15374_v2 = vmax.f32 %v15199_v31, 0.0  ;;  %v22518_v35 = vld [vmem:[%s27885_s22 + $0x16c0] sm:$0xff]   ;;  %v22523_v49 = vld [vmem:[%s27885_s22 + $0x1608] sm:$0xff]  }
0x34a3   :  { %v15387_v47 = vpack.c.bf16 %v15371_v15, %v15371_v15  ;;  %v15389_v10 = vpack.c.bf16 %v15373_v30, %v15373_v30  ;;  %v22520_v31 = vld [vmem:[%s27885_s22 + $0x1680] sm:$0xff]   ;;  %v22524_v5 = vld [vmem:[%s27885_s22 + $0x1688] sm:$0xff]   ;;  %v22544_v30 = vld [vmem:[%s27885_s22 + $0x16b0] sm:$0xff]  }
0x34a4   :  { %v15388_v4 = vpack.c.bf16 %v15372_v40, %v15372_v40  ;;  %v15390_v7 = vpack.c.bf16 %v15374_v2, %v15374_v2  ;;  %21185 = vmatpush3.bf16.msra.mxu0 %v22499_v50  ;;  %21207 = vmatpush3.bf16.msra.mxu1 %v22500_v21  ;;  %v22522_v50 = vld [vmem:[%s27885_s22 + $0x16c8] sm:$0xff]   ;;  %v14695_v40 = vrot.slane %v27517_v1, %v23576_v26  ;;  %v22527_v2 = vld [vmem:[%s27885_s22 + $0x1610] sm:$0xff]   ;;  %v22530_v26 = vld [vmem:[%s27885_s22 + $0x16d8] sm:$0xff]  }
0x34a5   :  { %21186 = vmatprep.subr.bf16.mxu0 %v22501_v13  ;;  %21208 = vmatprep.subr.bf16.mxu1 %v22502_v53  ;;  %v22525_v13 = vld [vmem:[%s27885_s22 + $0x1650] sm:$0xff]   ;;  %v22536_v44 = vld [vmem:[%s27885_s22 + $0x16a0] sm:$0xff]   ;;  %v22537_v20 = vld [vmem:[%s27885_s22 + $0x1668] sm:$0xff]  }
0x34a6   :  { %16544 = vmatprep.mubr.bf16.mxu0 %v15388_v4  ;;  %16584 = vmatprep.mubr.bf16.mxu1 %v15390_v7  ;;  %v22526_v53 = vld [vmem:[%s27885_s22 + $0x16d0] sm:$0xff]   ;;  %v22529_v7 = vld [vmem:[%s27885_s22 + $0x1658] sm:$0xff]  }
0x34a7   :  { %v22528_v4 = vld [vmem:[%s27885_s22 + $0x1690] sm:$0xff]  }
0x34a8   :  { %21187 = vmatpush3.bf16.msra.mxu0 %v22503_v9  ;;  %21209 = vmatpush3.bf16.msra.mxu1 %v22504_v34 }
0x34a9   :  { %21188 = vmatprep.subr.bf16.mxu0 %v22505_v58  ;;  %21210 = vmatprep.subr.bf16.mxu1 %v22506_v51 }
0x34ac   :  { %21189 = vmatpush3.bf16.msra.mxu0 %v22507_v38  ;;  %21211 = vmatpush3.bf16.msra.mxu1 %v22508_v11 }
0x34ad   :  { %21190 = vmatprep.subr.bf16.mxu0 %v22509_v18  ;;  %21212 = vmatprep.subr.bf16.mxu1 %v22510_v19 }
0x34ae   :  { %v27541_v60 = vpop.f32.mrb[208].mxu0  ;;  %v27543_v62 = vpop.f32.mrb[212].mxu1 }
0x34af   :  { %v15239_v29 = vpop.f32.mrb[209].mxu0  ;;  %v15280_v57 = vpop.f32.mrb[213].mxu1 }
0x34b0   :  { %v15240_v37 = vadd.f32 %v15239_v29, %v14675_v63  ;;  %v15281_v3 = vadd.f32 %v15280_v57, %v14683_v56  ;;  %v15241_v55 = vpop.f32.mrb[210].mxu0  ;;  %v15282_v17 = vpop.f32.mrb[214].mxu1  ;;  %21191 = vmatpush3.bf16.msra.mxu0 %v22511_v59  ;;  %21213 = vmatpush3.bf16.msra.mxu1 %v22512_v61  ;;  %v22532_v63 = vld [vmem:[%s27885_s22 + $0x1698] sm:$0xff]   ;;  %v22533_v56 = vld [vmem:[%s27885_s22 + $0x1660] sm:$0xff]   ;;  %v14671_v29 = vrot.slane %v27517_v1, %v23082_v48  ;;  %v22540_v57 = vld [vmem:[%s27885_s22 + $0x16a8] sm:$0xff]  }
0x34b1   :  { %v15242_v39 = vpop.f32.mrb[211].mxu0  ;;  %v15283_v33 = vpop.f32.mrb[215].mxu1  ;;  %21192 = vmatprep.subr.bf16.mxu0 %v22513_v22  ;;  %21214 = vmatprep.subr.bf16.mxu1 %v22514_v52  ;;  %v22534_v59 = vld [vmem:[%s27885_s22 + $0x16e0] sm:$0xff]   ;;  %v22538_v22 = vld [vmem:[%s27885_s22 + $0x16e8] sm:$0xff]   ;;  %v22542_v55 = vld [vmem:[%s27885_s22 + $0x16f0] sm:$0xff]   ;;  %v14691_v17 = vrot.slane %v27517_v1, %v23527_v46 }
0x34b2   :  { %v15376_v42 = vmax.f32 %v15240_v37, 0.0  ;;  %v15378_v45 = vmax.f32 %v15281_v3, 0.0  ;;  %v22535_v61 = vld [vmem:[%s27885_s22 + $0x1620] sm:$0xff]   ;;  %v22539_v52 = vld [vmem:[%s27885_s22 + $0x1628] sm:$0xff]   ;;  %v22541_v37 = vld [vmem:[%s27885_s22 + $0x1670] sm:$0xff]   ;;  %v14679_v3 = vrot.slane %v27517_v1, %v23490_v12  ;;  %v15238_v15 = vadd.f32 %v27541_v60, %v14671_v29 }
0x34b3   :  { %v22545_v46 = vld [vmem:[%s27885_s22 + $0x1678] sm:$0xff]  }
0x34b4   :  { %21193 = vmatpush3.bf16.msra.mxu0 %v22515_v24  ;;  %21215 = vmatpush3.bf16.msra.mxu1 %v22516_v27  ;;  %v15392_v23 = vpack.c.bf16 %v15376_v42, %v15376_v42  ;;  %v15394_v21 = vpack.c.bf16 %v15378_v45, %v15378_v45  ;;  %v14699_v24 = vrot.slane %v27517_v1, %v23530_v54  ;;  %v22543_v27 = vld [vmem:[%s27885_s22 + $0x1630] sm:$0xff]   ;;  %v22546_v54 = vld [vmem:[%s27885_s22 + $0x16f8] sm:$0xff]  }
0x34b5   :  { %21222 = vmatprep.subr.bf16.mxu0 %v22517_v36  ;;  %21244 = vmatprep.subr.bf16.mxu1 %v22518_v35  ;;  %v15279_v39 = vadd.f32 %v27543_v62, %v14679_v3  ;;  %v22547_v60 = vld [vmem:[%s27885_s22 + $0x1638] sm:$0xff]   ;;  %v15375_v35 = vmax.f32 %v15238_v15, 0.0  ;;  %v22549_v62 = vld [vmem:[%s27885_s22 + $0x1740] sm:$0xff]  }
0x34b6   :  { %v22548_v42 = vld [vmem:[%s27885_s22 + $0x16b8] sm:$0xff]  }
0x34b7   :  { %16545 = vmatmul.mubr.bf16.vlgmr.msra.gmra.mrb[220].mxu0 %v15387_v47  ;;  %16585 = vmatmul.mubr.bf16.vlgmr.msra.gmra.mrb[224].mxu1 %v15389_v10  ;;  %v15377_v45 = vmax.f32 %v15279_v39, 0.0  ;;  %v22577_v29 = vld [vmem:[%s27885_s22 + $0x1778] sm:$0xff]  }
0x34b8   :  { %21223 = vmatpush3.bf16.msra.mxu0 %v22519_v41  ;;  %16624 = vmatprep.mubr.bf16.mxu0 %v15392_v23  ;;  %v22550_v41 = vld [vmem:[%s27885_s22 + $0x17c0] sm:$0xff]   ;;  %v15391_v23 = vpack.c.bf16 %v15375_v35, %v15375_v35  ;;  %v22580_v3 = vld [vmem:[%s27885_s22 + $0x17b8] sm:$0xff]  }
0x34b9   :  { %21245 = vmatpush3.bf16.msra.mxu1 %v22520_v31  ;;  %16664 = vmatprep.mubr.bf16.mxu1 %v15394_v21  ;;  %v22551_v31 = vld [vmem:[%s27885_s22 + $0x1700] sm:$0xff]   ;;  %v22553_v21 = vld [vmem:[%s27885_s22 + $0x1748] sm:$0xff]  }
0x34ba   :  { %21224 = vmatprep.subr.bf16.mxu0 %v22521_v43  ;;  %21246 = vmatprep.subr.bf16.mxu1 %v22522_v50  ;;  %v22552_v43 = vld [vmem:[%s27885_s22 + $0x1780] sm:$0xff]   ;;  %v15393_v50 = vpack.c.bf16 %v15377_v45, %v15377_v45 }
0x34bc   :  { %21225 = vmatpush3.bf16.msra.mxu0 %v22523_v49 }
0x34bd   :  { %21247 = vmatpush3.bf16.msra.mxu1 %v22524_v5  ;;  %21226 = vmatprep.subr.bf16.mxu0 %v22525_v13  ;;  %v22554_v5 = vld [vmem:[%s27885_s22 + $0x17c8] sm:$0xff]  }
0x34be   :  { %v27592_v9 = vpop.f32.mrb[212].mxu0  ;;  %v15360_v34 = vpop.f32.mrb[216].mxu1  ;;  %21248 = vmatprep.subr.bf16.mxu1 %v22526_v53  ;;  %v22555_v53 = vld [vmem:[%s27885_s22 + $0x1708] sm:$0xff]  }
0x34bf   :  { %v27597_v58 = vadd.f32 %v15360_v34, %v14695_v40  ;;  %v15321_v51 = vpop.f32.mrb[213].mxu0  ;;  %v15362_v38 = vpop.f32.mrb[217].mxu1  ;;  %v22556_v40 = vld [vmem:[%s27885_s22 + $0x1788] sm:$0xff]   ;;  %v22560_v34 = vld [vmem:[%s27885_s22 + $0x1790] sm:$0xff]  }
0x34c0   :  { %v15323_v11 = vpop.f32.mrb[214].mxu0  ;;  %v15364_v32 = vpop.f32.mrb[218].mxu1  ;;  %21227 = vmatpush3.bf16.msra.mxu0 %v22527_v2  ;;  %v15322_v33 = vadd.f32 %v15321_v51, %v14691_v17  ;;  %v15363_v36 = vadd.f32 %v15362_v38, %v14699_v24  ;;  %v22557_v2 = vld [vmem:[%s27885_s22 + $0x1750] sm:$0xff]   ;;  %v22562_v51 = vld [vmem:[%s27885_s22 + $0x17d8] sm:$0xff]  }
0x34c1   :  { %21249 = vmatpush3.bf16.msra.mxu1 %v22528_v4  ;;  %v15324_v18 = vpop.f32.mrb[215].mxu0  ;;  %v15365_v19 = vpop.f32.mrb[219].mxu1  ;;  %21228 = vmatprep.subr.bf16.mxu0 %v22529_v7  ;;  %v22558_v4 = vld [vmem:[%s27885_s22 + $0x17d0] sm:$0xff]   ;;  %v22563_v38 = vld [vmem:[%s27885_s22 + $0x1718] sm:$0xff]   ;;  %v22565_v32 = vld [vmem:[%s27885_s22 + $0x1760] sm:$0xff]  }
0x34c2   :  { %21250 = vmatprep.subr.bf16.mxu1 %v22530_v26  ;;  %v15380_v47 = vmax.f32 %v15322_v33, 0.0  ;;  %v15382_v10 = vmax.f32 %v15363_v36, 0.0  ;;  %v22559_v7 = vld [vmem:[%s27885_s22 + $0x1710] sm:$0xff]   ;;  %v22561_v26 = vld [vmem:[%s27885_s22 + $0x1758] sm:$0xff]   ;;  %v22567_v18 = vld [vmem:[%s27885_s22 + $0x1720] sm:$0xff]  }
0x34c3   :  { %v22564_v11 = vld [vmem:[%s27885_s22 + $0x1798] sm:$0xff]   ;;  %v22568_v19 = vld [vmem:[%s27885_s22 + $0x17a0] sm:$0xff]  }
0x34c4   :  { %21229 = vmatpush3.bf16.msra.mxu0 %v22531_v6  ;;  %v15396_v49 = vpack.c.bf16 %v15380_v47, %v15380_v47  ;;  %v15398_v13 = vpack.c.bf16 %v15382_v10, %v15382_v10  ;;  %v22566_v6 = vld [vmem:[%s27885_s22 + $0x17e0] sm:$0xff]  }
0x34c5   :  { %21251 = vmatpush3.bf16.msra.mxu1 %v22532_v63  ;;  %21230 = vmatprep.subr.bf16.mxu0 %v22533_v56  ;;  %v22569_v63 = vld [vmem:[%s27885_s22 + $0x1768] sm:$0xff]  }
0x34c6   :  { %21252 = vmatprep.subr.bf16.mxu1 %v22534_v59  ;;  %v22570_v56 = vld [vmem:[%s27885_s22 + $0x17e8] sm:$0xff]  }
0x34c7   :  { %v22571_v59 = vld [vmem:[%s27885_s22 + $0x1728] sm:$0xff]  }
0x34c8   :  { %21231 = vmatpush3.bf16.msra.mxu0 %v22535_v61  ;;  %v14687_v61 = vrot.slane %v27517_v1, %v23573_v25  ;;  %v22575_v25 = vld [vmem:[%s27885_s22 + $0x1730] sm:$0xff]  }
0x34c9   :  { %21253 = vmatpush3.bf16.msra.mxu1 %v22536_v44  ;;  %21232 = vmatprep.subr.bf16.mxu0 %v22537_v20  ;;  %v22572_v44 = vld [vmem:[%s27885_s22 + $0x17a8] sm:$0xff]   ;;  %v22573_v20 = vld [vmem:[%s27885_s22 + $0x1770] sm:$0xff]  }
0x34ca   :  { %21254 = vmatprep.subr.bf16.mxu1 %v22538_v22  ;;  %v22574_v22 = vld [vmem:[%s27885_s22 + $0x17f0] sm:$0xff]   ;;  %v15320_v1 = vadd.f32 %v27592_v9, %v14687_v61  ;;  %v22579_v9 = vld [vmem:[%s27885_s22 + $0x1738] sm:$0xff]  }
0x34cc   :  { %21233 = vmatpush3.bf16.msra.mxu0 %v22539_v52  ;;  %v22576_v52 = vld [vmem:[%s27885_s22 + $0x17b0] sm:$0xff]  }
0x34cd   :  { %21255 = vmatpush3.bf16.msra.mxu1 %v22540_v57  ;;  %21234 = vmatprep.subr.bf16.mxu0 %v22541_v37  ;;  %v22578_v57 = vld [vmem:[%s27885_s22 + $0x17f8] sm:$0xff]   ;;  %v15379_v37 = vmax.f32 %v15320_v1, 0.0 }
0x34ce   :  { %21256 = vmatprep.subr.bf16.mxu1 %v22542_v55  ;;  %v15381_v55 = vmax.f32 %v27597_v58, 0.0 }
0x34cf   :  { %v15395_v17 = vpack.c.bf16 %v15379_v37, %v15379_v37 }
0x34d0   :  { %21235 = vmatpush3.bf16.msra.mxu0 %v22543_v27  ;;  %v15397_v24 = vpack.c.bf16 %v15381_v55, %v15381_v55 }
0x34d1   :  { %21257 = vmatpush3.bf16.msra.mxu1 %v22544_v30  ;;  %21236 = vmatprep.subr.bf16.mxu0 %v22545_v46  ;;  %v19975_v30 = vld [vmem:[%s27886_s23 + $0x5] ss:$0 sm:$0xff] }
0x34d2   :  { %21258 = vmatprep.subr.bf16.mxu1 %v22546_v54 }
0x34d4   :  { %21237 = vmatpush3.bf16.msra.mxu0 %v22547_v60 }
0x34d5   :  { %21259 = vmatpush3.bf16.msra.mxu1 %v22548_v42  ;;  %21266 = vmatprep.subr.bf16.mxu0 %v22549_v62 }
0x34d6   :  { %21288 = vmatprep.subr.bf16.mxu1 %v22550_v41 }
0x34d7   :  { %16625 = vmatmul.mubr.bf16.vlgmr.msra.gmra.mrb[224].mxu0 %v15391_v23 }
0x34d8   :  { %16665 = vmatmul.mubr.bf16.vlgmr.msra.gmra.mrb[228].mxu1 %v15393_v50  ;;  %21267 = vmatpush3.bf16.msra.mxu0 %v22551_v31 }
0x34d9   :  { %16704 = vmatprep.mubr.bf16.mxu0 %v15396_v49  ;;  %21289 = vmatpush3.bf16.msra.mxu1 %v22552_v43 }
0x34da   :  { %16744 = vmatprep.mubr.bf16.mxu1 %v15398_v13  ;;  %21268 = vmatprep.subr.bf16.mxu0 %v22553_v21 }
0x34db   :  { %21290 = vmatprep.subr.bf16.mxu1 %v22554_v5 }
0x34dc   :  { %21269 = vmatpush3.bf16.msra.mxu0 %v22555_v53 }
0x34dd   :  { %21291 = vmatpush3.bf16.msra.mxu1 %v22556_v40  ;;  %21270 = vmatprep.subr.bf16.mxu0 %v22557_v2 }
0x34de   :  { %21292 = vmatprep.subr.bf16.mxu1 %v22558_v4 }
0x34e0   :  { %21271 = vmatpush3.bf16.msra.mxu0 %v22559_v7 }
0x34e1   :  { %21293 = vmatpush3.bf16.msra.mxu1 %v22560_v34  ;;  %21272 = vmatprep.subr.bf16.mxu0 %v22561_v26 }
0x34e2   :  { %21294 = vmatprep.subr.bf16.mxu1 %v22562_v51 }
0x34e4   :  { %21273 = vmatpush3.bf16.msra.mxu0 %v22563_v38 }
0x34e5   :  { %21295 = vmatpush3.bf16.msra.mxu1 %v22564_v11  ;;  %21274 = vmatprep.subr.bf16.mxu0 %v22565_v32 }
0x34e6   :  { %21296 = vmatprep.subr.bf16.mxu1 %v22566_v6 }
0x34e8   :  { %21275 = vmatpush3.bf16.msra.mxu0 %v22567_v18 }
0x34e9   :  { %21297 = vmatpush3.bf16.msra.mxu1 %v22568_v19  ;;  %21276 = vmatprep.subr.bf16.mxu0 %v22569_v63 }
0x34ea   :  { %21298 = vmatprep.subr.bf16.mxu1 %v22570_v56 }
0x34ec   :  { %21277 = vmatpush3.bf16.msra.mxu0 %v22571_v59 }
0x34ed   :  { %21299 = vmatpush3.bf16.msra.mxu1 %v22572_v44  ;;  %21278 = vmatprep.subr.bf16.mxu0 %v22573_v20 }
0x34ee   :  { %21300 = vmatprep.subr.bf16.mxu1 %v22574_v22 }
0x34f0   :  { %21279 = vmatpush3.bf16.msra.mxu0 %v22575_v25 }
0x34f1   :  { %21301 = vmatpush3.bf16.msra.mxu1 %v22576_v52  ;;  %21280 = vmatprep.subr.bf16.mxu0 %v22577_v29 }
0x34f2   :  { %21302 = vmatprep.subr.bf16.mxu1 %v22578_v57 }
0x34f4   :  { %21281 = vmatpush3.bf16.msra.mxu0 %v22579_v9 }
0x34f5   :  { %21303 = vmatpush3.bf16.msra.mxu1 %v22580_v3 }
0x34f7   :  { %16705 = vmatmul.mubr.bf16.vlgmr.msra.gmra.mrb[228].mxu0 %v15395_v17  ;;  %v22583_v17 = vld [vmem:[%s27887_s24 + $0x4] ss:$16 sps:$4 sm:$0xff]  }
0x34f8   :  { %16745 = vmatmul.mubr.bf16.vlgmr.msra.gmra.mrb[232].mxu1 %v15397_v24  ;;  %16938 = vmatprep.mubr.bf16.mxu0 %v22723_v28  ;;  %v22586_v24 = vld [vmem:[%s27887_s24 + $0xc] ss:$16 sps:$4 sm:$0xff]  }
0x34f9   :  { %16979 = vmatprep.mubr.bf16.mxu1 %v22723_v28  ;;  %16906 = vmatprep.subr.bf16.mxu0 %v22583_v17 }
0x34fa   :  { %16947 = vmatprep.subr.bf16.mxu1 %v22586_v24 }
0x356a   :  { %v21150_v27 = vpop.f32.mrb[216].mxu0  ;;  %v21172_v15 = vpop.f32.mrb[220].mxu1 }
0x356b   :  { %v21151_v46 = vpop.f32.mrb[217].mxu0  ;;  %v21173_v39 = vpop.f32.mrb[221].mxu1 }
0x356c   :  { %v21152_v58 = vadd.f32 %v21151_v46, %v21150_v27  ;;  %v21174_v54 = vadd.f32 %v21173_v39, %v21172_v15  ;;  %v21153_v33 = vpop.f32.mrb[218].mxu0  ;;  %v21175_v36 = vpop.f32.mrb[222].mxu1  ;;  %v22584_v27 = vld [vmem:[%s27887_s24 + $0x8] ss:$16 sps:$4 sm:$0xff]   ;;  %v22589_v15 = vld [vmem:[%s27887_s24 + $0x24] ss:$16 sps:$4 sm:$0xff]  }
0x356d   :  { %v21154_v60 = vpop.f32.mrb[219].mxu0  ;;  %v21176_v35 = vpop.f32.mrb[223].mxu1  ;;  %16948 = vmatpush1.bf16.msra.mxu1 %v22584_v27  ;;  %v22587_v46 = vld [vmem:[%s27887_s24 + $0x20] ss:$16 sps:$4 sm:$0xff]   ;;  %v22590_v39 = vld [vmem:[%s27887_s24 + $0x28] ss:$16 sps:$4 sm:$0xff]  }
0x356e   :  { %v16467_v42 = vadd.f32 %v21152_v58, %v19975_v30  ;;  %v22592_v30 = vld [vmem:[%s27887_s24 + $0x2c] ss:$16 sps:$4 sm:$0xff]   ;;  %v22595_v58 = vld [vmem:[%s27887_s24 + $0x44] ss:$16 sps:$4 sm:$0xff]   ;;  %v22593_v33 = vld [vmem:[%s27887_s24 + $0x40] ss:$16 sps:$4 sm:$0xff]  }
0x356f   :  { %16949 = vmatprep.subr.bf16.mxu1 %v22592_v30  ;;  %v22596_v36 = vld [vmem:[%s27887_s24 + $0x48] ss:$16 sps:$4 sm:$0xff]   ;;  %v22601_v60 = vld [vmem:[%s27887_s24 + $0x64] ss:$16 sps:$4 sm:$0xff]   ;;  %v22599_v35 = vld [vmem:[%s27887_s24 + $0x60] ss:$16 sps:$4 sm:$0xff]  }
0x3570   :  { %v16507_v62 = vadd.f32 %v21174_v54, %v16467_v42  ;;  %v22598_v54 = vld [vmem:[%s27887_s24 + $0x4c] ss:$16 sps:$4 sm:$0xff]   ;;  %v22602_v42 = vld [vmem:[%s27887_s24 + $0x68] ss:$16 sps:$4 sm:$0xff]  }
0x3571   :  { %16950 = vmatpush1.bf16.msra.mxu1 %v22590_v39 }
0x3572   :  { %16951 = vmatprep.subr.bf16.mxu1 %v22598_v54 }
0x3575   :  { %16952 = vmatpush1.bf16.msra.mxu1 %v22596_v36 }
0x358a   :  { %v21194_v45 = vpop.f32.mrb[220].mxu0  ;;  %v21216_v41 = vpop.f32.mrb[224].mxu1 }
0x358b   :  { %v21195_v47 = vpop.f32.mrb[221].mxu0  ;;  %v21217_v28 = vpop.f32.mrb[225].mxu1 }
0x358c   :  { %v21196_v10 = vadd.f32 %v21195_v47, %v21194_v45  ;;  %v21218_v31 = vadd.f32 %v21217_v28, %v21216_v41  ;;  %v21197_v23 = vpop.f32.mrb[222].mxu0  ;;  %v21219_v43 = vpop.f32.mrb[226].mxu1 }
0x358d   :  { %v21198_v50 = vpop.f32.mrb[223].mxu0  ;;  %v21220_v21 = vpop.f32.mrb[227].mxu1  ;;  %v20107_v23 = vld [vmem:[%s27882_s19 + $0x5] ss:$0 sm:$0xff] }
0x358e   :  { %v16547_v49 = vadd.f32 %v21196_v10, %v16507_v62  ;;  %v22604_v62 = vld [vmem:[%s27887_s24 + $0x6c] ss:$16 sps:$4 sm:$0xff]   ;;  %v20106_v10 = vld [vmem:[%s27881_s18 + $0x5] ss:$0 sm:$0xff] }
0x358f   :  { %16953 = vmatprep.subr.bf16.mxu1 %v22604_v62 }
0x3590   :  { %v16587_v5 = vadd.f32 %v21218_v31, %v16547_v49  ;;  %16954 = vmatpush1.bf16.msra.mxu1 %v22602_v42 }
0x35aa   :  { %v21238_v13 = vpop.f32.mrb[224].mxu0 }
0x35ab   :  { %v21260_v53 = vpop.f32.mrb[228].mxu1  ;;  %v21239_v40 = vpop.f32.mrb[225].mxu0 }
0x35ac   :  { %v21240_v2 = vadd.f32 %v21239_v40, %v21238_v13  ;;  %v21261_v4 = vpop.f32.mrb[229].mxu1  ;;  %v21241_v7 = vpop.f32.mrb[226].mxu0 }
0x35ad   :  { %v21262_v34 = vadd.f32 %v21261_v4, %v21260_v53  ;;  %v21263_v26 = vpop.f32.mrb[230].mxu1  ;;  %v21242_v51 = vpop.f32.mrb[227].mxu0 }
0x35ae   :  { %v16627_v38 = vadd.f32 %v21240_v2, %v16587_v5  ;;  %v21264_v11 = vpop.f32.mrb[231].mxu1 }
0x35b0   :  { %v16667_v32 = vadd.f32 %v21262_v34, %v16627_v38 }
0x35ca   :  { %v21282_v6 = vpop.f32.mrb[228].mxu0 }
0x35cb   :  { %v21304_v18 = vpop.f32.mrb[232].mxu1  ;;  %v21283_v19 = vpop.f32.mrb[229].mxu0 }
0x35cc   :  { %v21284_v63 = vadd.f32 %v21283_v19, %v21282_v6  ;;  %v21305_v56 = vpop.f32.mrb[233].mxu1  ;;  %v21285_v59 = vpop.f32.mrb[230].mxu0 }
0x35cd   :  { %v21306_v61 = vadd.f32 %v21305_v56, %v21304_v18  ;;  %v21307_v44 = vpop.f32.mrb[234].mxu1  ;;  %v21286_v20 = vpop.f32.mrb[231].mxu0 }
0x35ce   :  { %v16707_v22 = vadd.f32 %v21284_v63, %v16667_v32  ;;  %v21308_v25 = vpop.f32.mrb[235].mxu1 }
0x35d0   :  { %v16747_v1 = vadd.f32 %v21306_v61, %v16707_v22 }
0x35d2   :  { %v16752_v52 = vadd.f32 %v16747_v1, %v27177_v16  ;;  %v22581_v16 = vld [vmem:[%s27887_s24] ss:$16 sps:$4 sm:$0xff]   ;;  %s22727_s24 = smov [#allocation2]  }
0x35d3   :  { %16907 = vmatpush1.bf16.msra.mxu0 %v22581_v16  ;;  %s17017_s13 = sshll.u32 %s22727_s24, 4  ;;  %s17018_s13 = int_to_ptr.vmem [resolvable:$true] %s17017_s13 }
0x35d4   :  { %v16757_v29 = vsel %vm840_vm8, %v16752_v52, 0.0  ;;  %16908 = vmatprep.subr.bf16.mxu0 %v22589_v15  ;;  %s22672_s2 = scalar_lea.vmem %s17018_s13, 32  ;;  %p22677_p1 = scmp.lt.s32.totalorder %s17018_s13, %s17018_s13 }
0x35d5   :  { %16758 = vadd.xlane.f32.xlu0 %v16757_v29  ;;  %p22673_p0 = scmp.ne.s32.totalorder %s17018_s13, %s22672_s2  ;;  %p22678_p2 = scmp.lt.s32.totalorder %s22672_s2, %s22672_s2 }
0x35d7   :  { %16909 = vmatpush1.bf16.msra.mxu0 %v22587_v46  ;;  %p22679_p3 = por %p22678_p2, %p22677_p1 }
0x35d8   :  { %16910 = vmatprep.subr.bf16.mxu0 %v22595_v58 }
0x35d9   :  { %p22680_p4 = pnand %p22679_p3, %p22673_p0 }
0x35db   :  { %16911 = vmatpush1.bf16.msra.mxu0 %v22593_v33 }
0x35dc   :  { %16912 = vmatprep.subr.bf16.mxu0 %v22601_v60 }
0x35df   :  { %16913 = vmatpush1.bf16.msra.mxu0 %v22599_v35 }
0x3662   :  { %v16759_v57 = vpop.xlane.xlu0 %16758 }
0x3663   :  { %v16760_v9 = vmul.f32 0.015625, %v16759_v57 }
0x3665   :  { %v16761_v37 = vsub.f32 %v16752_v52, %v16760_v9 }
0x3667   :  { %v16762_v3 = vmul.f32 %v16761_v37, %v16761_v37 }
0x3669   :  { %v16763_v55 = vsel %vm840_vm8, %v16762_v3, 0.0 }
0x366a   :  { %16764 = vadd.xlane.f32.xlu0 %v16763_v55 }
0x36f7   :  { %v16765_v45 = vpop.xlane.xlu0 %16764 }
0x36f8   :  { %v16766_v41 = vmul.f32 0.015625, %v16765_v45 }
0x36fa   :  { %v16767_v47 = vadd.f32 1e-05, %v16766_v41 }
0x36fc   :  { %22665 = vrsqrt.f32 %v16767_v47 }
0x3706   :  { %v22666_v28 = vpop.eup %22665 }
0x3707   :  { %v16769_v31 = vmul.f32 %v22666_v28, %v16761_v37 }
0x3709   :  { %v16776_v43 = vmul.f32 %v20106_v10, %v16769_v31 }
0x370b   :  { %v16783_v50 = vadd.f32 %v20107_v23, %v16776_v43 }
0x370d   :  { %v16784_v21 = vpack.c.bf16 %v16783_v50, %v16783_v50 }
0x370f   :  { %20124 = vmatmul.mubr.msk.bf16.vlgmr.msra.gmra.mrb[232].mxu0 %vm91_vm1, %v16784_v21  ;;  %20125 = vmatmul.mubr.msk.bf16.vlgmr.msra.gmra.mrb[236].mxu1 %vm91_vm1, %v16784_v21 }
0x3710   :  { %22683 = shalt.err (!%p22680_p4)
}
0x3711   :  { %s22684_s21 = scalar_lea.hbm %s27889_s26, 32 }
0x3712   :  { %p22685_p5 = scmp.ne.s32.totalorder %s27889_s26, %s22684_s21  ;;  %p22688_p6 = scmp.lt.u32.totalorder %s22684_s21, %s27889_s26 }
0x3714   :  { %p22690_p7 = pnand %p22688_p6, %p22685_p5 }
0x3716   :  { %22693 = shalt.err (!%p22690_p7)
}
0x3717   :  { %17020 = dma.vmem_to_hbm [thread:$0]  %s17018_s13, 32, %s27889_s26, [#allocation3]  }
0x3718   :  { %s22694_s30 = scalar_lea.vmem %s17028_s6, 32  ;;  %p22699_p9 = scmp.lt.s32.totalorder %s17028_s6, %s17028_s6 }
0x3719   :  { %p22695_p8 = scmp.ne.s32.totalorder %s17028_s6, %s22694_s30  ;;  %p22700_p10 = scmp.lt.s32.totalorder %s22694_s30, %s22694_s30 }
0x371b   :  { %p22701_p11 = por %p22700_p10, %p22699_p9 }
0x371d   :  { %p22702_p12 = pnand %p22701_p11, %p22695_p8 }
0x371f   :  { %22705 = shalt.err (!%p22702_p12)
}
0x3720   :  { %s22706_s14 = scalar_lea.hbm %s27890_s27, 32 }
0x3721   :  { %p22707_p13 = scmp.ne.s32.totalorder %s27890_s27, %s22706_s14  ;;  %p22710_p0 = scmp.lt.u32.totalorder %s22706_s14, %s27890_s27 }
0x3723   :  { %p22712_p1 = pnand %p22710_p0, %p22707_p13 }
0x3725   :  { %22715 = shalt.err (!%p22712_p1)
}
0x3726   :  { %17030 = dma.vmem_to_hbm [thread:$0]  %s17028_s6, 32, %s27890_s27, [#allocation5]   ;;  %v16801_v49 = vld [vmem:[%s27888_s25] sm:$0xf] }
0x3727   :  { %v16806_v5 = vrot.slane %v16801_v49, %v23082_v48  ;;  %v16814_v13 = vrot.slane %v16801_v49, %v23490_v12  ;;  %v16810_v53 = vrot.slane %v16801_v49, %v23139_v0  ;;  %v16818_v40 = vrot.slane %v16801_v49, %v23498_v14 }
0x37e2   :  { %v16940_v2 = vpop.f32.mrb[232].mxu0  ;;  %v16981_v4 = vpop.f32.mrb[236].mxu1 }
0x37e3   :  { %v16941_v7 = vadd.f32 %v16940_v2, %v16806_v5  ;;  %v16982_v34 = vadd.f32 %v16981_v4, %v16814_v13  ;;  %v16942_v26 = vpop.f32.mrb[233].mxu0  ;;  %v16983_v51 = vpop.f32.mrb[237].mxu1 }
0x37e4   :  { %v16943_v38 = vadd.f32 %v16942_v26, %v16810_v53  ;;  %v16984_v11 = vadd.f32 %v16983_v51, %v16818_v40  ;;  %v16944_v32 = vpop.f32.mrb[234].mxu0  ;;  %v16985_v6 = vpop.f32.mrb[238].mxu1 }
0x37e5   :  { %v16945_v18 = vpop.f32.mrb[235].mxu0  ;;  %v16986_v19 = vpop.f32.mrb[239].mxu1 }
0x37e6   :  { %v16992_v63 = vcombine.low %v16941_v7, %v16943_v38  ;;  %v16993_v48 = vcombine.low %v16982_v34, %v16984_v11 }
0x37e8   :  { %v17000_v12 = vrot.slane %v16992_v63, %v23105_v8  ;;  %v17007_v0 = vrot.slane %v16993_v48, %v23105_v8 }
0x37ea   :  { %v17008_v56 = vcombine.low %v17000_v12, %v17007_v0 }
0x37ec   :  { %17010 = vst [vmem:[%s27891_s28] sm:$0xff] %v17008_v56 }
0x37ed   :  { %22716 = dma.done.wait [#allocation3], 32  }
0x37ee   :  { %22717 = vsyncadd [#allocation3], 4294967264 }
0x37ef   :  { %22718 = dma.done.wait [#allocation5], 32  }
0x37f0   :  { %22719 = vsyncadd [#allocation5], 4294967264 }
0x37f1   :  { %17041 = vsyncpa [#allocation3], 1 }
0x37f2   :  { %17042 = vsyncpa [#allocation5], 1 }

</bundles_post_ra>
